<compile_context>
chip_gen: v7x
topology: tpu7x:2x2x1
jax: 0.10.0
libtpu: 0.0.40
codegen_flags: <defaults>
</compile_context>

<pallas_src>
import jax
import jax.numpy as jnp
import numpy as np
from jax.experimental import pallas as pl
from jax.experimental.pallas import tpu as pltpu

BN_EPS = 1e-5
LANE = 128


def _round_up(c, m=LANE):
    return ((c + m - 1) // m) * m


# ----------------------------------------------------------------------------- kernel
def _make_hg_kernel(num_stacks, H, W, c_pad):
    """Fused kernel for `num_stacks` hourglass stacks (all shapes static)."""

    def kernel(x_ref, w_ref, aff_ref, o_ref, xpad_ref):
        # Persistent zero-bordered activation scratch (f32).  Re-zeroed every grid
        # step (not only at program_id==0) so megacore-sharded "parallel" grids stay
        # correct; cost is one interior-sized store vs. 54 tap loads per image.
        xpad_ref[...] = jnp.zeros_like(xpad_ref)
        xpad_ref[1:H + 1, 1:W + 1, :] = x_ref[0].astype(xpad_ref.dtype)

        def conv3x3(s, j):
            # 3x3 same-padding conv as 9 accumulated MXU dots (K = c_pad each),
            # reading shifted taps straight from the padded scratch (no im2col slab).
            acc = jnp.zeros((H * W, c_pad), jnp.float32)
            for t in range(9):
                dy, dx = divmod(t, 3)
                tap = xpad_ref[dy:dy + H, dx:dx + W, :].reshape(H * W, c_pad)
                acc = acc + jnp.dot(tap.astype(jnp.bfloat16),   # bf16 MXU operands
                                    w_ref[s, 9 * j + t],
                                    preferred_element_type=jnp.float32)
            return acc

        def write_act(y):
            # Only the interior is rewritten; the zero border persists.
            xpad_ref[1:H + 1, 1:W + 1, :] = y.reshape(H, W, c_pad)

        for s in range(num_stacks):
            a = aff_ref[s]                                              # (8, c_pad) f32
            y = conv3x3(s, 0)                                           # conv1
            write_act(jnp.maximum(y * a[0:1, :] + a[1:2, :], 0.0))      # BN1 + ReLU
            y = conv3x3(s, 1)                                           # conv2
            write_act(jnp.maximum(y * a[2:3, :] + a[3:4, :], 0.0))      # BN2 + ReLU
            y = conv3x3(s, 2) + a[4:5, :]                               # conv3 + bias
            if s + 1 < num_stacks:
                write_act(y)
            else:
                o_ref[0] = y.reshape(H, W, c_pad).astype(o_ref.dtype)

    return kernel


# ----------------------------------------------------------------------------- host-side prep
def _prep_weights(params, c_pad):
    """Per-stack HWIO (3,3,Ci,Co) weights -> (num_stacks, 27, c_pad, c_pad) bf16.

    Row index inside a stack is 9*conv_idx + (3*dy + dx), matching the kernel."""
    ws = []
    for p in params:
        for name in ("w1", "w2", "w3"):
            w = p[name]
            ci, co = w.shape[2], w.shape[3]
            wp = jnp.pad(w, ((0, 0), (0, 0), (0, c_pad - ci), (0, c_pad - co)))
            ws.append(wp.reshape(9, c_pad, c_pad))
    w_all = jnp.stack(ws).reshape(len(params), 27, c_pad, c_pad)
    return w_all.astype(jnp.bfloat16)


def _prep_affine(params, c_pad):
    """Folded BN scale/bias + conv3 bias -> (num_stacks, 8, c_pad) f32.

    Rows: [scale1, bias1, scale2, bias2, bias3, 0, 0, 0].  Scale padded with 1,
    biases with 0, so padded output channels stay exactly zero."""
    rows = []
    for p in params:
        co = p["b3"].shape[0]
        pad = c_pad - co
        scale1 = jnp.pad(p["sb1"][0], (0, pad), constant_values=1.0)
        bias1 = jnp.pad(p["sb1"][1], (0, pad))
        scale2 = jnp.pad(p["sb2"][0], (0, pad), constant_values=1.0)
        bias2 = jnp.pad(p["sb2"][1], (0, pad))
        bias3 = jnp.pad(p["b3"], (0, pad))
        z = jnp.zeros((c_pad,), jnp.float32)
        rows.append(jnp.stack([scale1, bias1, scale2, bias2, bias3, z, z, z]))
    return jnp.stack(rows).astype(jnp.float32)


# ----------------------------------------------------------------------------- forward
@jax.jit
def hourglass_neck_forward(x_nchw, params):
    """Forward pass of HourglassNeck. Input/output are PyTorch-style NCHW."""
    N, Ci, H, W = x_nchw.shape
    num_stacks = len(params)
    Co = params[0]["w1"].shape[-1]
    if num_stacks > 1:
        # The reference module builds every stack with Conv2d(in_channels, ...),
        # so chaining only works when in_channels == out_channels.
        assert Ci == Co, "HourglassNeck stacks only chain when in_channels == out_channels"

    c_pad = _round_up(max(Ci, Co))

    # NCHW -> NHWC, zero-pad channels to the lane width (inert through the convs).
    x = jnp.transpose(x_nchw, (0, 2, 3, 1))
    x = jnp.pad(x, ((0, 0), (0, 0), (0, 0), (0, c_pad - Ci)))

    w_all = _prep_weights(params, c_pad)      # (S, 27, c_pad, c_pad) bf16
    aff_all = _prep_affine(params, c_pad)     # (S, 8, c_pad)         f32

    # Grid-invariant operands: fetched once; single-buffer them (no wasted 2nd buffer).
    const_kw = {"pipeline_mode": pl.Buffered(1)} if hasattr(pl, "Buffered") else {}
    w_spec = pl.BlockSpec(w_all.shape, lambda n: (0, 0, 0, 0), **const_kw)
    aff_spec = pl.BlockSpec(aff_all.shape, lambda n: (0, 0, 0), **const_kw)

    # VMEM budget computed from actual buffers (not a blanket 48 MiB).
    act_f32 = H * W * c_pad * 4
    vmem_need = (
        (H + 2) * (W + 2) * c_pad * 4                    # padded f32 activation scratch
        + int(w_all.size) * 2 + int(aff_all.size) * 4    # single-buffered constants
        + 2 * 2 * act_f32                                # double-buffered x / out blocks
        + 8 * act_f32)                                   # acc / taps / relayout headroom
    vmem_limit = int(min(max(2 * vmem_need, 32 << 20), 100 << 20))

    flops = N * num_stacks * 3 * 2 * H * W * 9 * c_pad * c_pad
    bytes_accessed = (int(x.size) * 4 + N * H * W * c_pad * 4
                      + int(w_all.size) * 2 + int(aff_all.size) * 4)
    cost = pl.CostEstimate(flops=int(flops), transcendentals=0,
                           bytes_accessed=int(bytes_accessed))

    out = pl.pallas_call(
        _make_hg_kernel(num_stacks, H, W, c_pad),
        out_shape=jax.ShapeDtypeStruct((N, H, W, c_pad), x.dtype),
        grid_spec=pltpu.PrefetchScalarGridSpec(
            num_scalar_prefetch=0,
            grid=(N,),
            in_specs=[
                pl.BlockSpec((1, H, W, c_pad), lambda n: (n, 0, 0, 0)),
                w_spec,
                aff_spec,
            ],
            out_specs=pl.BlockSpec((1, H, W, c_pad), lambda n: (n, 0, 0, 0)),
            scratch_shapes=[pltpu.VMEM((H + 2, W + 2, c_pad), jnp.float32)],
        ),
        compiler_params=pltpu.CompilerParams(
            dimension_semantics=("parallel",),
            vmem_limit_bytes=vmem_limit,
        ),
        cost_estimate=cost,
    )(x, w_all, aff_all)

    out = out[..., :Co]                                   # drop channel padding
    return jnp.transpose(out, (0, 3, 1, 2))               # NHWC -> NCHW


# ----------------------------------------------------------------------------- params
def _fold_bn(gamma, beta, mean, var, eps=BN_EPS):
    scale = gamma / jnp.sqrt(var + eps)
    bias = beta - mean * scale
    return jnp.stack([scale, bias], axis=0).astype(jnp.float32)     # (2, C)


def init_hourglass_neck_params(key, num_stacks, in_channels, out_channels):
    """Deterministic synthetic parameters matching the nn.Module shapes.

    conv1/conv2: bias=False (folded BN scale/bias only); conv3: bias=True."""
    params = []
    for s in range(num_stacks):
        ci = in_channels                     # module always uses in_channels for conv1
        k = jax.random.fold_in(key, s)
        ks = jax.random.split(k, 12)
        w1 = 0.2 * jax.random.normal(ks[0], (3, 3, ci, out_channels), jnp.float32)
        w2 = 0.2 * jax.random.normal(ks[1], (3, 3, out_channels, out_channels), jnp.float32)
        w3 = 0.2 * jax.random.normal(ks[2], (3, 3, out_channels, out_channels), jnp.float32)
        g1 = 1.0 + 0.1 * jax.random.normal(ks[3], (out_channels,), jnp.float32)
        b1 = 0.1 * jax.random.normal(ks[4], (out_channels,), jnp.float32)
        m1 = 0.1 * jax.random.normal(ks[5], (out_channels,), jnp.float32)
        v1 = 1.0 + 0.1 * jax.random.uniform(ks[6], (out_channels,), jnp.float32)
        g2 = 1.0 + 0.1 * jax.random.normal(ks[7], (out_channels,), jnp.float32)
        b2 = 0.1 * jax.random.normal(ks[8], (out_channels,), jnp.float32)
        m2 = 0.1 * jax.random.normal(ks[9], (out_channels,), jnp.float32)
        v2 = 1.0 + 0.1 * jax.random.uniform(ks[10], (out_channels,), jnp.float32)
        b3 = 0.1 * jax.random.normal(ks[11], (out_channels,), jnp.float32)
        params.append(dict(w1=w1, sb1=_fold_bn(g1, b1, m1, v1),
                           w2=w2, sb2=_fold_bn(g2, b2, m2, v2),
                           w3=w3, b3=b3))
    return params


# ----------------------------------------------------------------------------- reference
def _conv3x3_ref(x, w):
    return jax.lax.conv_general_dilated(
        x, w, window_strides=(1, 1), padding="SAME",
        dimension_numbers=("NHWC", "HWIO", "NHWC"))


def hourglass_neck_ref(x_nchw, params):
    x = jnp.transpose(x_nchw, (0, 2, 3, 1))
    for p in params:
        y = _conv3x3_ref(x, p["w1"])
        y = jnp.maximum(y * p["sb1"][0] + p["sb1"][1], 0.0)
        y = _conv3x3_ref(y, p["w2"])
        y = jnp.maximum(y * p["sb2"][0] + p["sb2"][1], 0.0)
        x = _conv3x3_ref(y, p["w3"]) + p["b3"]
    return jnp.transpose(x, (0, 3, 1, 2))


# ----------------------------------------------------------------------------- main
if __name__ == "__main__":
    num_stacks, in_channels, out_channels = 2, 8, 8    # in == out so stacks chain
    N, H, W = 2, 16, 16

    key = jax.random.PRNGKey(0)
    kx, kp = jax.random.split(key)
    x = jax.random.normal(kx, (N, in_channels, H, W), jnp.float32)   # NCHW like PyTorch
    params = init_hourglass_neck_params(kp, num_stacks, in_channels, out_channels)

    out = jax.block_until_ready(hourglass_neck_forward(x, params))
    ref = jax.block_until_ready(hourglass_neck_ref(x, params))

    # The kernel uses bf16 MXU operands (f32 accumulation) through 6 chained convs;
    # tolerances are sized for bf16 rounding of weights/activations, not f32 exactness.
    np.testing.assert_allclose(np.asarray(out), np.asarray(ref), rtol=3e-2, atol=3e-1)

    print("KERNEL_OK")
</pallas_src>

<mosaic_0001>
module attributes {stable_mosaic.version = 11 : i64} {
  func.func @kernel(%arg0: i32, %arg1: memref<1x16x16x128xf32, #tpu.memory_space<vmem>>, %arg2: memref<2x27x128x128xbf16, #tpu.memory_space<vmem>>, %arg3: memref<2x8x128xf32, #tpu.memory_space<vmem>>, %arg4: memref<1x16x16x128xf32, #tpu.memory_space<vmem>>, %arg5: memref<18x18x128xf32, #tpu.memory_space<vmem>>) attributes {dimension_semantics = [#tpu.dimension_semantics<parallel>], iteration_bounds = array<i64: 2>, scalar_prefetch = 0 : i64, scratch_operands = 1 : i64, tpu.core_type = #tpu.core_type<tc>, window_params = [{transform_indices = @transform_0, window_bounds = array<i64: 1, 16, 16, 128>}, {pipeline_mode = #tpu.pipeline_mode<synchronous>, transform_indices = @transform_1, window_bounds = array<i64: 2, 27, 128, 128>}, {pipeline_mode = #tpu.pipeline_mode<synchronous>, transform_indices = @transform_2, window_bounds = array<i64: 2, 8, 128>}, {transform_indices = @transform_3, window_bounds = array<i64: 1, 16, 16, 128>}]} {
    %cst = arith.constant 0.000000e+00 : f32
    %0 = vector.broadcast %cst : f32 to vector<18x18x128xf32>
    %c0 = arith.constant 0 : index
    %c0_0 = arith.constant 0 : index
    %c0_1 = arith.constant 0 : index
    %1 = vector.load %arg5[%c0, %c0_0, %c0_1] : memref<18x18x128xf32, #tpu.memory_space<vmem>>, vector<18x18x128xf32>
    tpu.vector_store %arg5[%c0, %c0_0, %c0_1], %0 {strides = array<i32>} : memref<18x18x128xf32, #tpu.memory_space<vmem>>, vector<18x18x128xf32>,
    %c0_2 = arith.constant 0 : index
    %c0_3 = arith.constant 0 : index
    %c0_4 = arith.constant 0 : index
    %c0_5 = arith.constant 0 : index
    %2 = vector.load %arg1[%c0_2, %c0_3, %c0_4, %c0_5] : memref<1x16x16x128xf32, #tpu.memory_space<vmem>>, vector<1x16x16x128xf32>
    %3 = vector.shape_cast %2 : vector<1x16x16x128xf32> to vector<16x16x128xf32>
    %c1 = arith.constant 1 : index
    %c1_6 = arith.constant 1 : index
    %c0_7 = arith.constant 0 : index
    %4 = vector.load %arg5[%c1, %c1_6, %c0_7] : memref<18x18x128xf32, #tpu.memory_space<vmem>>, vector<16x16x128xf32>
    tpu.vector_store %arg5[%c1, %c1_6, %c0_7], %3 {strides = array<i32>} : memref<18x18x128xf32, #tpu.memory_space<vmem>>, vector<16x16x128xf32>,
    %c0_8 = arith.constant 0 : index
    %c0_9 = arith.constant 0 : index
    %c0_10 = arith.constant 0 : index
    %5 = vector.load %arg3[%c0_8, %c0_9, %c0_10] : memref<2x8x128xf32, #tpu.memory_space<vmem>>, vector<1x8x128xf32>
    %6 = vector.shape_cast %5 : vector<1x8x128xf32> to vector<8x128xf32>
    %cst_11 = arith.constant 0.000000e+00 : f32
    %7 = vector.broadcast %cst_11 : f32 to vector<256x128xf32>
    %c0_12 = arith.constant 0 : index
    %c0_13 = arith.constant 0 : index
    %c0_14 = arith.constant 0 : index
    %8 = vector.load %arg5[%c0_12, %c0_13, %c0_14] : memref<18x18x128xf32, #tpu.memory_space<vmem>>, vector<16x16x128xf32>
    %9 = vector.shape_cast %8 : vector<16x16x128xf32> to vector<256x128xf32>
    %10 = arith.truncf %9 : vector<256x128xf32> to vector<256x128xbf16>
    %c0_15 = arith.constant 0 : index
    %c0_16 = arith.constant 0 : index
    %c0_17 = arith.constant 0 : index
    %c0_18 = arith.constant 0 : index
    %11 = vector.load %arg2[%c0_15, %c0_16, %c0_17, %c0_18] : memref<2x27x128x128xbf16, #tpu.memory_space<vmem>>, vector<1x1x128x128xbf16>
    %12 = vector.shape_cast %11 : vector<1x1x128x128xbf16> to vector<128x128xbf16>
    %cst_19 = arith.constant dense<0.000000e+00> : vector<256x128xf32>
    %13 = tpu.matmul %10, %12, %cst_19 {dimension_numbers = #tpu.dot_dimension_numbers<[1], [0], [0], [1], [0, 0, 1, 1], [], []>} : vector<256x128xbf16>, vector<128x128xbf16>, vector<256x128xf32> -> vector<256x128xf32>
    %14 = arith.addf %7, %13 : vector<256x128xf32>
    %c0_20 = arith.constant 0 : index
    %c1_21 = arith.constant 1 : index
    %c0_22 = arith.constant 0 : index
    %15 = vector.load %arg5[%c0_20, %c1_21, %c0_22] : memref<18x18x128xf32, #tpu.memory_space<vmem>>, vector<16x16x128xf32>
    %16 = vector.shape_cast %15 : vector<16x16x128xf32> to vector<256x128xf32>
    %17 = arith.truncf %16 : vector<256x128xf32> to vector<256x128xbf16>
    %c0_23 = arith.constant 0 : index
    %c1_24 = arith.constant 1 : index
    %c0_25 = arith.constant 0 : index
    %c0_26 = arith.constant 0 : index
    %18 = vector.load %arg2[%c0_23, %c1_24, %c0_25, %c0_26] : memref<2x27x128x128xbf16, #tpu.memory_space<vmem>>, vector<1x1x128x128xbf16>
    %19 = vector.shape_cast %18 : vector<1x1x128x128xbf16> to vector<128x128xbf16>
    %cst_27 = arith.constant dense<0.000000e+00> : vector<256x128xf32>
    %20 = tpu.matmul %17, %19, %cst_27 {dimension_numbers = #tpu.dot_dimension_numbers<[1], [0], [0], [1], [0, 0, 1, 1], [], []>} : vector<256x128xbf16>, vector<128x128xbf16>, vector<256x128xf32> -> vector<256x128xf32>
    %21 = arith.addf %14, %20 : vector<256x128xf32>
    %c0_28 = arith.constant 0 : index
    %c2 = arith.constant 2 : index
    %c0_29 = arith.constant 0 : index
    %22 = vector.load %arg5[%c0_28, %c2, %c0_29] : memref<18x18x128xf32, #tpu.memory_space<vmem>>, vector<16x16x128xf32>
    %23 = vector.shape_cast %22 : vector<16x16x128xf32> to vector<256x128xf32>
    %24 = arith.truncf %23 : vector<256x128xf32> to vector<256x128xbf16>
    %c0_30 = arith.constant 0 : index
    %c2_31 = arith.constant 2 : index
    %c0_32 = arith.constant 0 : index
    %c0_33 = arith.constant 0 : index
    %25 = vector.load %arg2[%c0_30, %c2_31, %c0_32, %c0_33] : memref<2x27x128x128xbf16, #tpu.memory_space<vmem>>, vector<1x1x128x128xbf16>
    %26 = vector.shape_cast %25 : vector<1x1x128x128xbf16> to vector<128x128xbf16>
    %cst_34 = arith.constant dense<0.000000e+00> : vector<256x128xf32>
    %27 = tpu.matmul %24, %26, %cst_34 {dimension_numbers = #tpu.dot_dimension_numbers<[1], [0], [0], [1], [0, 0, 1, 1], [], []>} : vector<256x128xbf16>, vector<128x128xbf16>, vector<256x128xf32> -> vector<256x128xf32>
    %28 = arith.addf %21, %27 : vector<256x128xf32>
    %c1_35 = arith.constant 1 : index
    %c0_36 = arith.constant 0 : index
    %c0_37 = arith.constant 0 : index
    %29 = vector.load %arg5[%c1_35, %c0_36, %c0_37] : memref<18x18x128xf32, #tpu.memory_space<vmem>>, vector<16x16x128xf32>
    %30 = vector.shape_cast %29 : vector<16x16x128xf32> to vector<256x128xf32>
    %31 = arith.truncf %30 : vector<256x128xf32> to vector<256x128xbf16>
    %c0_38 = arith.constant 0 : index
    %c3 = arith.constant 3 : index
    %c0_39 = arith.constant 0 : index
    %c0_40 = arith.constant 0 : index
    %32 = vector.load %arg2[%c0_38, %c3, %c0_39, %c0_40] : memref<2x27x128x128xbf16, #tpu.memory_space<vmem>>, vector<1x1x128x128xbf16>
    %33 = vector.shape_cast %32 : vector<1x1x128x128xbf16> to vector<128x128xbf16>
    %cst_41 = arith.constant dense<0.000000e+00> : vector<256x128xf32>
    %34 = tpu.matmul %31, %33, %cst_41 {dimension_numbers = #tpu.dot_dimension_numbers<[1], [0], [0], [1], [0, 0, 1, 1], [], []>} : vector<256x128xbf16>, vector<128x128xbf16>, vector<256x128xf32> -> vector<256x128xf32>
    %35 = arith.addf %28, %34 : vector<256x128xf32>
    %c1_42 = arith.constant 1 : index
    %c1_43 = arith.constant 1 : index
    %c0_44 = arith.constant 0 : index
    %36 = vector.load %arg5[%c1_42, %c1_43, %c0_44] : memref<18x18x128xf32, #tpu.memory_space<vmem>>, vector<16x16x128xf32>
    %37 = vector.shape_cast %36 : vector<16x16x128xf32> to vector<256x128xf32>
    %38 = arith.truncf %37 : vector<256x128xf32> to vector<256x128xbf16>
    %c0_45 = arith.constant 0 : index
    %c4 = arith.constant 4 : index
    %c0_46 = arith.constant 0 : index
    %c0_47 = arith.constant 0 : index
    %39 = vector.load %arg2[%c0_45, %c4, %c0_46, %c0_47] : memref<2x27x128x128xbf16, #tpu.memory_space<vmem>>, vector<1x1x128x128xbf16>
    %40 = vector.shape_cast %39 : vector<1x1x128x128xbf16> to vector<128x128xbf16>
    %cst_48 = arith.constant dense<0.000000e+00> : vector<256x128xf32>
    %41 = tpu.matmul %38, %40, %cst_48 {dimension_numbers = #tpu.dot_dimension_numbers<[1], [0], [0], [1], [0, 0, 1, 1], [], []>} : vector<256x128xbf16>, vector<128x128xbf16>, vector<256x128xf32> -> vector<256x128xf32>
    %42 = arith.addf %35, %41 : vector<256x128xf32>
    %c1_49 = arith.constant 1 : index
    %c2_50 = arith.constant 2 : index
    %c0_51 = arith.constant 0 : index
    %43 = vector.load %arg5[%c1_49, %c2_50, %c0_51] : memref<18x18x128xf32, #tpu.memory_space<vmem>>, vector<16x16x128xf32>
    %44 = vector.shape_cast %43 : vector<16x16x128xf32> to vector<256x128xf32>
    %45 = arith.truncf %44 : vector<256x128xf32> to vector<256x128xbf16>
    %c0_52 = arith.constant 0 : index
    %c5 = arith.constant 5 : index
    %c0_53 = arith.constant 0 : index
    %c0_54 = arith.constant 0 : index
    %46 = vector.load %arg2[%c0_52, %c5, %c0_53, %c0_54] : memref<2x27x128x128xbf16, #tpu.memory_space<vmem>>, vector<1x1x128x128xbf16>
    %47 = vector.shape_cast %46 : vector<1x1x128x128xbf16> to vector<128x128xbf16>
    %cst_55 = arith.constant dense<0.000000e+00> : vector<256x128xf32>
    %48 = tpu.matmul %45, %47, %cst_55 {dimension_numbers = #tpu.dot_dimension_numbers<[1], [0], [0], [1], [0, 0, 1, 1], [], []>} : vector<256x128xbf16>, vector<128x128xbf16>, vector<256x128xf32> -> vector<256x128xf32>
    %49 = arith.addf %42, %48 : vector<256x128xf32>
    %c2_56 = arith.constant 2 : index
    %c0_57 = arith.constant 0 : index
    %c0_58 = arith.constant 0 : index
    %50 = vector.load %arg5[%c2_56, %c0_57, %c0_58] : memref<18x18x128xf32, #tpu.memory_space<vmem>>, vector<16x16x128xf32>
    %51 = vector.shape_cast %50 : vector<16x16x128xf32> to vector<256x128xf32>
    %52 = arith.truncf %51 : vector<256x128xf32> to vector<256x128xbf16>
    %c0_59 = arith.constant 0 : index
    %c6 = arith.constant 6 : index
    %c0_60 = arith.constant 0 : index
    %c0_61 = arith.constant 0 : index
    %53 = vector.load %arg2[%c0_59, %c6, %c0_60, %c0_61] : memref<2x27x128x128xbf16, #tpu.memory_space<vmem>>, vector<1x1x128x128xbf16>
    %54 = vector.shape_cast %53 : vector<1x1x128x128xbf16> to vector<128x128xbf16>
    %cst_62 = arith.constant dense<0.000000e+00> : vector<256x128xf32>
    %55 = tpu.matmul %52, %54, %cst_62 {dimension_numbers = #tpu.dot_dimension_numbers<[1], [0], [0], [1], [0, 0, 1, 1], [], []>} : vector<256x128xbf16>, vector<128x128xbf16>, vector<256x128xf32> -> vector<256x128xf32>
    %56 = arith.addf %49, %55 : vector<256x128xf32>
    %c2_63 = arith.constant 2 : index
    %c1_64 = arith.constant 1 : index
    %c0_65 = arith.constant 0 : index
    %57 = vector.load %arg5[%c2_63, %c1_64, %c0_65] : memref<18x18x128xf32, #tpu.memory_space<vmem>>, vector<16x16x128xf32>
    %58 = vector.shape_cast %57 : vector<16x16x128xf32> to vector<256x128xf32>
    %59 = arith.truncf %58 : vector<256x128xf32> to vector<256x128xbf16>
    %c0_66 = arith.constant 0 : index
    %c7 = arith.constant 7 : index
    %c0_67 = arith.constant 0 : index
    %c0_68 = arith.constant 0 : index
    %60 = vector.load %arg2[%c0_66, %c7, %c0_67, %c0_68] : memref<2x27x128x128xbf16, #tpu.memory_space<vmem>>, vector<1x1x128x128xbf16>
    %61 = vector.shape_cast %60 : vector<1x1x128x128xbf16> to vector<128x128xbf16>
    %cst_69 = arith.constant dense<0.000000e+00> : vector<256x128xf32>
    %62 = tpu.matmul %59, %61, %cst_69 {dimension_numbers = #tpu.dot_dimension_numbers<[1], [0], [0], [1], [0, 0, 1, 1], [], []>} : vector<256x128xbf16>, vector<128x128xbf16>, vector<256x128xf32> -> vector<256x128xf32>
    %63 = arith.addf %56, %62 : vector<256x128xf32>
    %c2_70 = arith.constant 2 : index
    %c2_71 = arith.constant 2 : index
    %c0_72 = arith.constant 0 : index
    %64 = vector.load %arg5[%c2_70, %c2_71, %c0_72] : memref<18x18x128xf32, #tpu.memory_space<vmem>>, vector<16x16x128xf32>
    %65 = vector.shape_cast %64 : vector<16x16x128xf32> to vector<256x128xf32>
    %66 = arith.truncf %65 : vector<256x128xf32> to vector<256x128xbf16>
    %c0_73 = arith.constant 0 : index
    %c8 = arith.constant 8 : index
    %c0_74 = arith.constant 0 : index
    %c0_75 = arith.constant 0 : index
    %67 = vector.load %arg2[%c0_73, %c8, %c0_74, %c0_75] : memref<2x27x128x128xbf16, #tpu.memory_space<vmem>>, vector<1x1x128x128xbf16>
    %68 = vector.shape_cast %67 : vector<1x1x128x128xbf16> to vector<128x128xbf16>
    %cst_76 = arith.constant dense<0.000000e+00> : vector<256x128xf32>
    %69 = tpu.matmul %66, %68, %cst_76 {dimension_numbers = #tpu.dot_dimension_numbers<[1], [0], [0], [1], [0, 0, 1, 1], [], []>} : vector<256x128xbf16>, vector<128x128xbf16>, vector<256x128xf32> -> vector<256x128xf32>
    %70 = arith.addf %63, %69 : vector<256x128xf32>
    %71 = vector.extract_strided_slice %6 {offsets = [0, 0], sizes = [1, 128], strides = [1, 1]} : vector<8x128xf32> to vector<1x128xf32>
    %72 = vector.broadcast %71 : vector<1x128xf32> to vector<256x128xf32>
    %73 = arith.mulf %70, %72 : vector<256x128xf32>
    %74 = vector.extract_strided_slice %6 {offsets = [1, 0], sizes = [1, 128], strides = [1, 1]} : vector<8x128xf32> to vector<1x128xf32>
    %75 = vector.broadcast %74 : vector<1x128xf32> to vector<256x128xf32>
    %76 = arith.addf %73, %75 : vector<256x128xf32>
    %cst_77 = arith.constant 0.000000e+00 : f32
    %77 = vector.broadcast %cst_77 : f32 to vector<256x128xf32>
    %78 = arith.maximumf %76, %77 : vector<256x128xf32>
    %79 = vector.shape_cast %78 : vector<256x128xf32> to vector<16x16x128xf32>
    %c1_78 = arith.constant 1 : index
    %c1_79 = arith.constant 1 : index
    %c0_80 = arith.constant 0 : index
    %80 = vector.load %arg5[%c1_78, %c1_79, %c0_80] : memref<18x18x128xf32, #tpu.memory_space<vmem>>, vector<16x16x128xf32>
    tpu.vector_store %arg5[%c1_78, %c1_79, %c0_80], %79 {strides = array<i32>} : memref<18x18x128xf32, #tpu.memory_space<vmem>>, vector<16x16x128xf32>,
    %cst_81 = arith.constant 0.000000e+00 : f32
    %81 = vector.broadcast %cst_81 : f32 to vector<256x128xf32>
    %c0_82 = arith.constant 0 : index
    %c0_83 = arith.constant 0 : index
    %c0_84 = arith.constant 0 : index
    %82 = vector.load %arg5[%c0_82, %c0_83, %c0_84] : memref<18x18x128xf32, #tpu.memory_space<vmem>>, vector<16x16x128xf32>
    %83 = vector.shape_cast %82 : vector<16x16x128xf32> to vector<256x128xf32>
    %84 = arith.truncf %83 : vector<256x128xf32> to vector<256x128xbf16>
    %c0_85 = arith.constant 0 : index
    %c9 = arith.constant 9 : index
    %c0_86 = arith.constant 0 : index
    %c0_87 = arith.constant 0 : index
    %85 = vector.load %arg2[%c0_85, %c9, %c0_86, %c0_87] : memref<2x27x128x128xbf16, #tpu.memory_space<vmem>>, vector<1x1x128x128xbf16>
    %86 = vector.shape_cast %85 : vector<1x1x128x128xbf16> to vector<128x128xbf16>
    %cst_88 = arith.constant dense<0.000000e+00> : vector<256x128xf32>
    %87 = tpu.matmul %84, %86, %cst_88 {dimension_numbers = #tpu.dot_dimension_numbers<[1], [0], [0], [1], [0, 0, 1, 1], [], []>} : vector<256x128xbf16>, vector<128x128xbf16>, vector<256x128xf32> -> vector<256x128xf32>
    %88 = arith.addf %81, %87 : vector<256x128xf32>
    %c0_89 = arith.constant 0 : index
    %c1_90 = arith.constant 1 : index
    %c0_91 = arith.constant 0 : index
    %89 = vector.load %arg5[%c0_89, %c1_90, %c0_91] : memref<18x18x128xf32, #tpu.memory_space<vmem>>, vector<16x16x128xf32>
    %90 = vector.shape_cast %89 : vector<16x16x128xf32> to vector<256x128xf32>
    %91 = arith.truncf %90 : vector<256x128xf32> to vector<256x128xbf16>
    %c0_92 = arith.constant 0 : index
    %c10 = arith.constant 10 : index
    %c0_93 = arith.constant 0 : index
    %c0_94 = arith.constant 0 : index
    %92 = vector.load %arg2[%c0_92, %c10, %c0_93, %c0_94] : memref<2x27x128x128xbf16, #tpu.memory_space<vmem>>, vector<1x1x128x128xbf16>
    %93 = vector.shape_cast %92 : vector<1x1x128x128xbf16> to vector<128x128xbf16>
    %cst_95 = arith.constant dense<0.000000e+00> : vector<256x128xf32>
    %94 = tpu.matmul %91, %93, %cst_95 {dimension_numbers = #tpu.dot_dimension_numbers<[1], [0], [0], [1], [0, 0, 1, 1], [], []>} : vector<256x128xbf16>, vector<128x128xbf16>, vector<256x128xf32> -> vector<256x128xf32>
    %95 = arith.addf %88, %94 : vector<256x128xf32>
    %c0_96 = arith.constant 0 : index
    %c2_97 = arith.constant 2 : index
    %c0_98 = arith.constant 0 : index
    %96 = vector.load %arg5[%c0_96, %c2_97, %c0_98] : memref<18x18x128xf32, #tpu.memory_space<vmem>>, vector<16x16x128xf32>
    %97 = vector.shape_cast %96 : vector<16x16x128xf32> to vector<256x128xf32>
    %98 = arith.truncf %97 : vector<256x128xf32> to vector<256x128xbf16>
    %c0_99 = arith.constant 0 : index
    %c11 = arith.constant 11 : index
    %c0_100 = arith.constant 0 : index
    %c0_101 = arith.constant 0 : index
    %99 = vector.load %arg2[%c0_99, %c11, %c0_100, %c0_101] : memref<2x27x128x128xbf16, #tpu.memory_space<vmem>>, vector<1x1x128x128xbf16>
    %100 = vector.shape_cast %99 : vector<1x1x128x128xbf16> to vector<128x128xbf16>
    %cst_102 = arith.constant dense<0.000000e+00> : vector<256x128xf32>
    %101 = tpu.matmul %98, %100, %cst_102 {dimension_numbers = #tpu.dot_dimension_numbers<[1], [0], [0], [1], [0, 0, 1, 1], [], []>} : vector<256x128xbf16>, vector<128x128xbf16>, vector<256x128xf32> -> vector<256x128xf32>
    %102 = arith.addf %95, %101 : vector<256x128xf32>
    %c1_103 = arith.constant 1 : index
    %c0_104 = arith.constant 0 : index
    %c0_105 = arith.constant 0 : index
    %103 = vector.load %arg5[%c1_103, %c0_104, %c0_105] : memref<18x18x128xf32, #tpu.memory_space<vmem>>, vector<16x16x128xf32>
    %104 = vector.shape_cast %103 : vector<16x16x128xf32> to vector<256x128xf32>
    %105 = arith.truncf %104 : vector<256x128xf32> to vector<256x128xbf16>
    %c0_106 = arith.constant 0 : index
    %c12 = arith.constant 12 : index
    %c0_107 = arith.constant 0 : index
    %c0_108 = arith.constant 0 : index
    %106 = vector.load %arg2[%c0_106, %c12, %c0_107, %c0_108] : memref<2x27x128x128xbf16, #tpu.memory_space<vmem>>, vector<1x1x128x128xbf16>
    %107 = vector.shape_cast %106 : vector<1x1x128x128xbf16> to vector<128x128xbf16>
    %cst_109 = arith.constant dense<0.000000e+00> : vector<256x128xf32>
    %108 = tpu.matmul %105, %107, %cst_109 {dimension_numbers = #tpu.dot_dimension_numbers<[1], [0], [0], [1], [0, 0, 1, 1], [], []>} : vector<256x128xbf16>, vector<128x128xbf16>, vector<256x128xf32> -> vector<256x128xf32>
    %109 = arith.addf %102, %108 : vector<256x128xf32>
    %c1_110 = arith.constant 1 : index
    %c1_111 = arith.constant 1 : index
    %c0_112 = arith.constant 0 : index
    %110 = vector.load %arg5[%c1_110, %c1_111, %c0_112] : memref<18x18x128xf32, #tpu.memory_space<vmem>>, vector<16x16x128xf32>
    %111 = vector.shape_cast %110 : vector<16x16x128xf32> to vector<256x128xf32>
    %112 = arith.truncf %111 : vector<256x128xf32> to vector<256x128xbf16>
    %c0_113 = arith.constant 0 : index
    %c13 = arith.constant 13 : index
    %c0_114 = arith.constant 0 : index
    %c0_115 = arith.constant 0 : index
    %113 = vector.load %arg2[%c0_113, %c13, %c0_114, %c0_115] : memref<2x27x128x128xbf16, #tpu.memory_space<vmem>>, vector<1x1x128x128xbf16>
    %114 = vector.shape_cast %113 : vector<1x1x128x128xbf16> to vector<128x128xbf16>
    %cst_116 = arith.constant dense<0.000000e+00> : vector<256x128xf32>
    %115 = tpu.matmul %112, %114, %cst_116 {dimension_numbers = #tpu.dot_dimension_numbers<[1], [0], [0], [1], [0, 0, 1, 1], [], []>} : vector<256x128xbf16>, vector<128x128xbf16>, vector<256x128xf32> -> vector<256x128xf32>
    %116 = arith.addf %109, %115 : vector<256x128xf32>
    %c1_117 = arith.constant 1 : index
    %c2_118 = arith.constant 2 : index
    %c0_119 = arith.constant 0 : index
    %117 = vector.load %arg5[%c1_117, %c2_118, %c0_119] : memref<18x18x128xf32, #tpu.memory_space<vmem>>, vector<16x16x128xf32>
    %118 = vector.shape_cast %117 : vector<16x16x128xf32> to vector<256x128xf32>
    %119 = arith.truncf %118 : vector<256x128xf32> to vector<256x128xbf16>
    %c0_120 = arith.constant 0 : index
    %c14 = arith.constant 14 : index
    %c0_121 = arith.constant 0 : index
    %c0_122 = arith.constant 0 : index
    %120 = vector.load %arg2[%c0_120, %c14, %c0_121, %c0_122] : memref<2x27x128x128xbf16, #tpu.memory_space<vmem>>, vector<1x1x128x128xbf16>
    %121 = vector.shape_cast %120 : vector<1x1x128x128xbf16> to vector<128x128xbf16>
    %cst_123 = arith.constant dense<0.000000e+00> : vector<256x128xf32>
    %122 = tpu.matmul %119, %121, %cst_123 {dimension_numbers = #tpu.dot_dimension_numbers<[1], [0], [0], [1], [0, 0, 1, 1], [], []>} : vector<256x128xbf16>, vector<128x128xbf16>, vector<256x128xf32> -> vector<256x128xf32>
    %123 = arith.addf %116, %122 : vector<256x128xf32>
    %c2_124 = arith.constant 2 : index
    %c0_125 = arith.constant 0 : index
    %c0_126 = arith.constant 0 : index
    %124 = vector.load %arg5[%c2_124, %c0_125, %c0_126] : memref<18x18x128xf32, #tpu.memory_space<vmem>>, vector<16x16x128xf32>
    %125 = vector.shape_cast %124 : vector<16x16x128xf32> to vector<256x128xf32>
    %126 = arith.truncf %125 : vector<256x128xf32> to vector<256x128xbf16>
    %c0_127 = arith.constant 0 : index
    %c15 = arith.constant 15 : index
    %c0_128 = arith.constant 0 : index
    %c0_129 = arith.constant 0 : index
    %127 = vector.load %arg2[%c0_127, %c15, %c0_128, %c0_129] : memref<2x27x128x128xbf16, #tpu.memory_space<vmem>>, vector<1x1x128x128xbf16>
    %128 = vector.shape_cast %127 : vector<1x1x128x128xbf16> to vector<128x128xbf16>
    %cst_130 = arith.constant dense<0.000000e+00> : vector<256x128xf32>
    %129 = tpu.matmul %126, %128, %cst_130 {dimension_numbers = #tpu.dot_dimension_numbers<[1], [0], [0], [1], [0, 0, 1, 1], [], []>} : vector<256x128xbf16>, vector<128x128xbf16>, vector<256x128xf32> -> vector<256x128xf32>
    %130 = arith.addf %123, %129 : vector<256x128xf32>
    %c2_131 = arith.constant 2 : index
    %c1_132 = arith.constant 1 : index
    %c0_133 = arith.constant 0 : index
    %131 = vector.load %arg5[%c2_131, %c1_132, %c0_133] : memref<18x18x128xf32, #tpu.memory_space<vmem>>, vector<16x16x128xf32>
    %132 = vector.shape_cast %131 : vector<16x16x128xf32> to vector<256x128xf32>
    %133 = arith.truncf %132 : vector<256x128xf32> to vector<256x128xbf16>
    %c0_134 = arith.constant 0 : index
    %c16 = arith.constant 16 : index
    %c0_135 = arith.constant 0 : index
    %c0_136 = arith.constant 0 : index
    %134 = vector.load %arg2[%c0_134, %c16, %c0_135, %c0_136] : memref<2x27x128x128xbf16, #tpu.memory_space<vmem>>, vector<1x1x128x128xbf16>
    %135 = vector.shape_cast %134 : vector<1x1x128x128xbf16> to vector<128x128xbf16>
    %cst_137 = arith.constant dense<0.000000e+00> : vector<256x128xf32>
    %136 = tpu.matmul %133, %135, %cst_137 {dimension_numbers = #tpu.dot_dimension_numbers<[1], [0], [0], [1], [0, 0, 1, 1], [], []>} : vector<256x128xbf16>, vector<128x128xbf16>, vector<256x128xf32> -> vector<256x128xf32>
    %137 = arith.addf %130, %136 : vector<256x128xf32>
    %c2_138 = arith.constant 2 : index
    %c2_139 = arith.constant 2 : index
    %c0_140 = arith.constant 0 : index
    %138 = vector.load %arg5[%c2_138, %c2_139, %c0_140] : memref<18x18x128xf32, #tpu.memory_space<vmem>>, vector<16x16x128xf32>
    %139 = vector.shape_cast %138 : vector<16x16x128xf32> to vector<256x128xf32>
    %140 = arith.truncf %139 : vector<256x128xf32> to vector<256x128xbf16>
    %c0_141 = arith.constant 0 : index
    %c17 = arith.constant 17 : index
    %c0_142 = arith.constant 0 : index
    %c0_143 = arith.constant 0 : index
    %141 = vector.load %arg2[%c0_141, %c17, %c0_142, %c0_143] : memref<2x27x128x128xbf16, #tpu.memory_space<vmem>>, vector<1x1x128x128xbf16>
    %142 = vector.shape_cast %141 : vector<1x1x128x128xbf16> to vector<128x128xbf16>
    %cst_144 = arith.constant dense<0.000000e+00> : vector<256x128xf32>
    %143 = tpu.matmul %140, %142, %cst_144 {dimension_numbers = #tpu.dot_dimension_numbers<[1], [0], [0], [1], [0, 0, 1, 1], [], []>} : vector<256x128xbf16>, vector<128x128xbf16>, vector<256x128xf32> -> vector<256x128xf32>
    %144 = arith.addf %137, %143 : vector<256x128xf32>
    %145 = vector.extract_strided_slice %6 {offsets = [2, 0], sizes = [1, 128], strides = [1, 1]} : vector<8x128xf32> to vector<1x128xf32>
    %146 = vector.broadcast %145 : vector<1x128xf32> to vector<256x128xf32>
    %147 = arith.mulf %144, %146 : vector<256x128xf32>
    %148 = vector.extract_strided_slice %6 {offsets = [3, 0], sizes = [1, 128], strides = [1, 1]} : vector<8x128xf32> to vector<1x128xf32>
    %149 = vector.broadcast %148 : vector<1x128xf32> to vector<256x128xf32>
    %150 = arith.addf %147, %149 : vector<256x128xf32>
    %cst_145 = arith.constant 0.000000e+00 : f32
    %151 = vector.broadcast %cst_145 : f32 to vector<256x128xf32>
    %152 = arith.maximumf %150, %151 : vector<256x128xf32>
    %153 = vector.shape_cast %152 : vector<256x128xf32> to vector<16x16x128xf32>
    %c1_146 = arith.constant 1 : index
    %c1_147 = arith.constant 1 : index
    %c0_148 = arith.constant 0 : index
    %154 = vector.load %arg5[%c1_146, %c1_147, %c0_148] : memref<18x18x128xf32, #tpu.memory_space<vmem>>, vector<16x16x128xf32>
    tpu.vector_store %arg5[%c1_146, %c1_147, %c0_148], %153 {strides = array<i32>} : memref<18x18x128xf32, #tpu.memory_space<vmem>>, vector<16x16x128xf32>,
    %cst_149 = arith.constant 0.000000e+00 : f32
    %155 = vector.broadcast %cst_149 : f32 to vector<256x128xf32>
    %c0_150 = arith.constant 0 : index
    %c0_151 = arith.constant 0 : index
    %c0_152 = arith.constant 0 : index
    %156 = vector.load %arg5[%c0_150, %c0_151, %c0_152] : memref<18x18x128xf32, #tpu.memory_space<vmem>>, vector<16x16x128xf32>
    %157 = vector.shape_cast %156 : vector<16x16x128xf32> to vector<256x128xf32>
    %158 = arith.truncf %157 : vector<256x128xf32> to vector<256x128xbf16>
    %c0_153 = arith.constant 0 : index
    %c18 = arith.constant 18 : index
    %c0_154 = arith.constant 0 : index
    %c0_155 = arith.constant 0 : index
    %159 = vector.load %arg2[%c0_153, %c18, %c0_154, %c0_155] : memref<2x27x128x128xbf16, #tpu.memory_space<vmem>>, vector<1x1x128x128xbf16>
    %160 = vector.shape_cast %159 : vector<1x1x128x128xbf16> to vector<128x128xbf16>
    %cst_156 = arith.constant dense<0.000000e+00> : vector<256x128xf32>
    %161 = tpu.matmul %158, %160, %cst_156 {dimension_numbers = #tpu.dot_dimension_numbers<[1], [0], [0], [1], [0, 0, 1, 1], [], []>} : vector<256x128xbf16>, vector<128x128xbf16>, vector<256x128xf32> -> vector<256x128xf32>
    %162 = arith.addf %155, %161 : vector<256x128xf32>
    %c0_157 = arith.constant 0 : index
    %c1_158 = arith.constant 1 : index
    %c0_159 = arith.constant 0 : index
    %163 = vector.load %arg5[%c0_157, %c1_158, %c0_159] : memref<18x18x128xf32, #tpu.memory_space<vmem>>, vector<16x16x128xf32>
    %164 = vector.shape_cast %163 : vector<16x16x128xf32> to vector<256x128xf32>
    %165 = arith.truncf %164 : vector<256x128xf32> to vector<256x128xbf16>
    %c0_160 = arith.constant 0 : index
    %c19 = arith.constant 19 : index
    %c0_161 = arith.constant 0 : index
    %c0_162 = arith.constant 0 : index
    %166 = vector.load %arg2[%c0_160, %c19, %c0_161, %c0_162] : memref<2x27x128x128xbf16, #tpu.memory_space<vmem>>, vector<1x1x128x128xbf16>
    %167 = vector.shape_cast %166 : vector<1x1x128x128xbf16> to vector<128x128xbf16>
    %cst_163 = arith.constant dense<0.000000e+00> : vector<256x128xf32>
    %168 = tpu.matmul %165, %167, %cst_163 {dimension_numbers = #tpu.dot_dimension_numbers<[1], [0], [0], [1], [0, 0, 1, 1], [], []>} : vector<256x128xbf16>, vector<128x128xbf16>, vector<256x128xf32> -> vector<256x128xf32>
    %169 = arith.addf %162, %168 : vector<256x128xf32>
    %c0_164 = arith.constant 0 : index
    %c2_165 = arith.constant 2 : index
    %c0_166 = arith.constant 0 : index
    %170 = vector.load %arg5[%c0_164, %c2_165, %c0_166] : memref<18x18x128xf32, #tpu.memory_space<vmem>>, vector<16x16x128xf32>
    %171 = vector.shape_cast %170 : vector<16x16x128xf32> to vector<256x128xf32>
    %172 = arith.truncf %171 : vector<256x128xf32> to vector<256x128xbf16>
    %c0_167 = arith.constant 0 : index
    %c20 = arith.constant 20 : index
    %c0_168 = arith.constant 0 : index
    %c0_169 = arith.constant 0 : index
    %173 = vector.load %arg2[%c0_167, %c20, %c0_168, %c0_169] : memref<2x27x128x128xbf16, #tpu.memory_space<vmem>>, vector<1x1x128x128xbf16>
    %174 = vector.shape_cast %173 : vector<1x1x128x128xbf16> to vector<128x128xbf16>
    %cst_170 = arith.constant dense<0.000000e+00> : vector<256x128xf32>
    %175 = tpu.matmul %172, %174, %cst_170 {dimension_numbers = #tpu.dot_dimension_numbers<[1], [0], [0], [1], [0, 0, 1, 1], [], []>} : vector<256x128xbf16>, vector<128x128xbf16>, vector<256x128xf32> -> vector<256x128xf32>
    %176 = arith.addf %169, %175 : vector<256x128xf32>
    %c1_171 = arith.constant 1 : index
    %c0_172 = arith.constant 0 : index
    %c0_173 = arith.constant 0 : index
    %177 = vector.load %arg5[%c1_171, %c0_172, %c0_173] : memref<18x18x128xf32, #tpu.memory_space<vmem>>, vector<16x16x128xf32>
    %178 = vector.shape_cast %177 : vector<16x16x128xf32> to vector<256x128xf32>
    %179 = arith.truncf %178 : vector<256x128xf32> to vector<256x128xbf16>
    %c0_174 = arith.constant 0 : index
    %c21 = arith.constant 21 : index
    %c0_175 = arith.constant 0 : index
    %c0_176 = arith.constant 0 : index
    %180 = vector.load %arg2[%c0_174, %c21, %c0_175, %c0_176] : memref<2x27x128x128xbf16, #tpu.memory_space<vmem>>, vector<1x1x128x128xbf16>
    %181 = vector.shape_cast %180 : vector<1x1x128x128xbf16> to vector<128x128xbf16>
    %cst_177 = arith.constant dense<0.000000e+00> : vector<256x128xf32>
    %182 = tpu.matmul %179, %181, %cst_177 {dimension_numbers = #tpu.dot_dimension_numbers<[1], [0], [0], [1], [0, 0, 1, 1], [], []>} : vector<256x128xbf16>, vector<128x128xbf16>, vector<256x128xf32> -> vector<256x128xf32>
    %183 = arith.addf %176, %182 : vector<256x128xf32>
    %c1_178 = arith.constant 1 : index
    %c1_179 = arith.constant 1 : index
    %c0_180 = arith.constant 0 : index
    %184 = vector.load %arg5[%c1_178, %c1_179, %c0_180] : memref<18x18x128xf32, #tpu.memory_space<vmem>>, vector<16x16x128xf32>
    %185 = vector.shape_cast %184 : vector<16x16x128xf32> to vector<256x128xf32>
    %186 = arith.truncf %185 : vector<256x128xf32> to vector<256x128xbf16>
    %c0_181 = arith.constant 0 : index
    %c22 = arith.constant 22 : index
    %c0_182 = arith.constant 0 : index
    %c0_183 = arith.constant 0 : index
    %187 = vector.load %arg2[%c0_181, %c22, %c0_182, %c0_183] : memref<2x27x128x128xbf16, #tpu.memory_space<vmem>>, vector<1x1x128x128xbf16>
    %188 = vector.shape_cast %187 : vector<1x1x128x128xbf16> to vector<128x128xbf16>
    %cst_184 = arith.constant dense<0.000000e+00> : vector<256x128xf32>
    %189 = tpu.matmul %186, %188, %cst_184 {dimension_numbers = #tpu.dot_dimension_numbers<[1], [0], [0], [1], [0, 0, 1, 1], [], []>} : vector<256x128xbf16>, vector<128x128xbf16>, vector<256x128xf32> -> vector<256x128xf32>
    %190 = arith.addf %183, %189 : vector<256x128xf32>
    %c1_185 = arith.constant 1 : index
    %c2_186 = arith.constant 2 : index
    %c0_187 = arith.constant 0 : index
    %191 = vector.load %arg5[%c1_185, %c2_186, %c0_187] : memref<18x18x128xf32, #tpu.memory_space<vmem>>, vector<16x16x128xf32>
    %192 = vector.shape_cast %191 : vector<16x16x128xf32> to vector<256x128xf32>
    %193 = arith.truncf %192 : vector<256x128xf32> to vector<256x128xbf16>
    %c0_188 = arith.constant 0 : index
    %c23 = arith.constant 23 : index
    %c0_189 = arith.constant 0 : index
    %c0_190 = arith.constant 0 : index
    %194 = vector.load %arg2[%c0_188, %c23, %c0_189, %c0_190] : memref<2x27x128x128xbf16, #tpu.memory_space<vmem>>, vector<1x1x128x128xbf16>
    %195 = vector.shape_cast %194 : vector<1x1x128x128xbf16> to vector<128x128xbf16>
    %cst_191 = arith.constant dense<0.000000e+00> : vector<256x128xf32>
    %196 = tpu.matmul %193, %195, %cst_191 {dimension_numbers = #tpu.dot_dimension_numbers<[1], [0], [0], [1], [0, 0, 1, 1], [], []>} : vector<256x128xbf16>, vector<128x128xbf16>, vector<256x128xf32> -> vector<256x128xf32>
    %197 = arith.addf %190, %196 : vector<256x128xf32>
    %c2_192 = arith.constant 2 : index
    %c0_193 = arith.constant 0 : index
    %c0_194 = arith.constant 0 : index
    %198 = vector.load %arg5[%c2_192, %c0_193, %c0_194] : memref<18x18x128xf32, #tpu.memory_space<vmem>>, vector<16x16x128xf32>
    %199 = vector.shape_cast %198 : vector<16x16x128xf32> to vector<256x128xf32>
    %200 = arith.truncf %199 : vector<256x128xf32> to vector<256x128xbf16>
    %c0_195 = arith.constant 0 : index
    %c24 = arith.constant 24 : index
    %c0_196 = arith.constant 0 : index
    %c0_197 = arith.constant 0 : index
    %201 = vector.load %arg2[%c0_195, %c24, %c0_196, %c0_197] : memref<2x27x128x128xbf16, #tpu.memory_space<vmem>>, vector<1x1x128x128xbf16>
    %202 = vector.shape_cast %201 : vector<1x1x128x128xbf16> to vector<128x128xbf16>
    %cst_198 = arith.constant dense<0.000000e+00> : vector<256x128xf32>
    %203 = tpu.matmul %200, %202, %cst_198 {dimension_numbers = #tpu.dot_dimension_numbers<[1], [0], [0], [1], [0, 0, 1, 1], [], []>} : vector<256x128xbf16>, vector<128x128xbf16>, vector<256x128xf32> -> vector<256x128xf32>
    %204 = arith.addf %197, %203 : vector<256x128xf32>
    %c2_199 = arith.constant 2 : index
    %c1_200 = arith.constant 1 : index
    %c0_201 = arith.constant 0 : index
    %205 = vector.load %arg5[%c2_199, %c1_200, %c0_201] : memref<18x18x128xf32, #tpu.memory_space<vmem>>, vector<16x16x128xf32>
    %206 = vector.shape_cast %205 : vector<16x16x128xf32> to vector<256x128xf32>
    %207 = arith.truncf %206 : vector<256x128xf32> to vector<256x128xbf16>
    %c0_202 = arith.constant 0 : index
    %c25 = arith.constant 25 : index
    %c0_203 = arith.constant 0 : index
    %c0_204 = arith.constant 0 : index
    %208 = vector.load %arg2[%c0_202, %c25, %c0_203, %c0_204] : memref<2x27x128x128xbf16, #tpu.memory_space<vmem>>, vector<1x1x128x128xbf16>
    %209 = vector.shape_cast %208 : vector<1x1x128x128xbf16> to vector<128x128xbf16>
    %cst_205 = arith.constant dense<0.000000e+00> : vector<256x128xf32>
    %210 = tpu.matmul %207, %209, %cst_205 {dimension_numbers = #tpu.dot_dimension_numbers<[1], [0], [0], [1], [0, 0, 1, 1], [], []>} : vector<256x128xbf16>, vector<128x128xbf16>, vector<256x128xf32> -> vector<256x128xf32>
    %211 = arith.addf %204, %210 : vector<256x128xf32>
    %c2_206 = arith.constant 2 : index
    %c2_207 = arith.constant 2 : index
    %c0_208 = arith.constant 0 : index
    %212 = vector.load %arg5[%c2_206, %c2_207, %c0_208] : memref<18x18x128xf32, #tpu.memory_space<vmem>>, vector<16x16x128xf32>
    %213 = vector.shape_cast %212 : vector<16x16x128xf32> to vector<256x128xf32>
    %214 = arith.truncf %213 : vector<256x128xf32> to vector<256x128xbf16>
    %c0_209 = arith.constant 0 : index
    %c26 = arith.constant 26 : index
    %c0_210 = arith.constant 0 : index
    %c0_211 = arith.constant 0 : index
    %215 = vector.load %arg2[%c0_209, %c26, %c0_210, %c0_211] : memref<2x27x128x128xbf16, #tpu.memory_space<vmem>>, vector<1x1x128x128xbf16>
    %216 = vector.shape_cast %215 : vector<1x1x128x128xbf16> to vector<128x128xbf16>
    %cst_212 = arith.constant dense<0.000000e+00> : vector<256x128xf32>
    %217 = tpu.matmul %214, %216, %cst_212 {dimension_numbers = #tpu.dot_dimension_numbers<[1], [0], [0], [1], [0, 0, 1, 1], [], []>} : vector<256x128xbf16>, vector<128x128xbf16>, vector<256x128xf32> -> vector<256x128xf32>
    %218 = arith.addf %211, %217 : vector<256x128xf32>
    %219 = vector.extract_strided_slice %6 {offsets = [4, 0], sizes = [1, 128], strides = [1, 1]} : vector<8x128xf32> to vector<1x128xf32>
    %220 = vector.broadcast %219 : vector<1x128xf32> to vector<256x128xf32>
    %221 = arith.addf %218, %220 : vector<256x128xf32>
    %222 = vector.shape_cast %221 : vector<256x128xf32> to vector<16x16x128xf32>
    %c1_213 = arith.constant 1 : index
    %c1_214 = arith.constant 1 : index
    %c0_215 = arith.constant 0 : index
    %223 = vector.load %arg5[%c1_213, %c1_214, %c0_215] : memref<18x18x128xf32, #tpu.memory_space<vmem>>, vector<16x16x128xf32>
    tpu.vector_store %arg5[%c1_213, %c1_214, %c0_215], %222 {strides = array<i32>} : memref<18x18x128xf32, #tpu.memory_space<vmem>>, vector<16x16x128xf32>,
    %c1_216 = arith.constant 1 : index
    %c0_217 = arith.constant 0 : index
    %c0_218 = arith.constant 0 : index
    %224 = vector.load %arg3[%c1_216, %c0_217, %c0_218] : memref<2x8x128xf32, #tpu.memory_space<vmem>>, vector<1x8x128xf32>
    %225 = vector.shape_cast %224 : vector<1x8x128xf32> to vector<8x128xf32>
    %cst_219 = arith.constant 0.000000e+00 : f32
    %226 = vector.broadcast %cst_219 : f32 to vector<256x128xf32>
    %c0_220 = arith.constant 0 : index
    %c0_221 = arith.constant 0 : index
    %c0_222 = arith.constant 0 : index
    %227 = vector.load %arg5[%c0_220, %c0_221, %c0_222] : memref<18x18x128xf32, #tpu.memory_space<vmem>>, vector<16x16x128xf32>
    %228 = vector.shape_cast %227 : vector<16x16x128xf32> to vector<256x128xf32>
    %229 = arith.truncf %228 : vector<256x128xf32> to vector<256x128xbf16>
    %c1_223 = arith.constant 1 : index
    %c0_224 = arith.constant 0 : index
    %c0_225 = arith.constant 0 : index
    %c0_226 = arith.constant 0 : index
    %230 = vector.load %arg2[%c1_223, %c0_224, %c0_225, %c0_226] : memref<2x27x128x128xbf16, #tpu.memory_space<vmem>>, vector<1x1x128x128xbf16>
    %231 = vector.shape_cast %230 : vector<1x1x128x128xbf16> to vector<128x128xbf16>
    %cst_227 = arith.constant dense<0.000000e+00> : vector<256x128xf32>
    %232 = tpu.matmul %229, %231, %cst_227 {dimension_numbers = #tpu.dot_dimension_numbers<[1], [0], [0], [1], [0, 0, 1, 1], [], []>} : vector<256x128xbf16>, vector<128x128xbf16>, vector<256x128xf32> -> vector<256x128xf32>
    %233 = arith.addf %226, %232 : vector<256x128xf32>
    %c0_228 = arith.constant 0 : index
    %c1_229 = arith.constant 1 : index
    %c0_230 = arith.constant 0 : index
    %234 = vector.load %arg5[%c0_228, %c1_229, %c0_230] : memref<18x18x128xf32, #tpu.memory_space<vmem>>, vector<16x16x128xf32>
    %235 = vector.shape_cast %234 : vector<16x16x128xf32> to vector<256x128xf32>
    %236 = arith.truncf %235 : vector<256x128xf32> to vector<256x128xbf16>
    %c1_231 = arith.constant 1 : index
    %c1_232 = arith.constant 1 : index
    %c0_233 = arith.constant 0 : index
    %c0_234 = arith.constant 0 : index
    %237 = vector.load %arg2[%c1_231, %c1_232, %c0_233, %c0_234] : memref<2x27x128x128xbf16, #tpu.memory_space<vmem>>, vector<1x1x128x128xbf16>
    %238 = vector.shape_cast %237 : vector<1x1x128x128xbf16> to vector<128x128xbf16>
    %cst_235 = arith.constant dense<0.000000e+00> : vector<256x128xf32>
    %239 = tpu.matmul %236, %238, %cst_235 {dimension_numbers = #tpu.dot_dimension_numbers<[1], [0], [0], [1], [0, 0, 1, 1], [], []>} : vector<256x128xbf16>, vector<128x128xbf16>, vector<256x128xf32> -> vector<256x128xf32>
    %240 = arith.addf %233, %239 : vector<256x128xf32>
    %c0_236 = arith.constant 0 : index
    %c2_237 = arith.constant 2 : index
    %c0_238 = arith.constant 0 : index
    %241 = vector.load %arg5[%c0_236, %c2_237, %c0_238] : memref<18x18x128xf32, #tpu.memory_space<vmem>>, vector<16x16x128xf32>
    %242 = vector.shape_cast %241 : vector<16x16x128xf32> to vector<256x128xf32>
    %243 = arith.truncf %242 : vector<256x128xf32> to vector<256x128xbf16>
    %c1_239 = arith.constant 1 : index
    %c2_240 = arith.constant 2 : index
    %c0_241 = arith.constant 0 : index
    %c0_242 = arith.constant 0 : index
    %244 = vector.load %arg2[%c1_239, %c2_240, %c0_241, %c0_242] : memref<2x27x128x128xbf16, #tpu.memory_space<vmem>>, vector<1x1x128x128xbf16>
    %245 = vector.shape_cast %244 : vector<1x1x128x128xbf16> to vector<128x128xbf16>
    %cst_243 = arith.constant dense<0.000000e+00> : vector<256x128xf32>
    %246 = tpu.matmul %243, %245, %cst_243 {dimension_numbers = #tpu.dot_dimension_numbers<[1], [0], [0], [1], [0, 0, 1, 1], [], []>} : vector<256x128xbf16>, vector<128x128xbf16>, vector<256x128xf32> -> vector<256x128xf32>
    %247 = arith.addf %240, %246 : vector<256x128xf32>
    %c1_244 = arith.constant 1 : index
    %c0_245 = arith.constant 0 : index
    %c0_246 = arith.constant 0 : index
    %248 = vector.load %arg5[%c1_244, %c0_245, %c0_246] : memref<18x18x128xf32, #tpu.memory_space<vmem>>, vector<16x16x128xf32>
    %249 = vector.shape_cast %248 : vector<16x16x128xf32> to vector<256x128xf32>
    %250 = arith.truncf %249 : vector<256x128xf32> to vector<256x128xbf16>
    %c1_247 = arith.constant 1 : index
    %c3_248 = arith.constant 3 : index
    %c0_249 = arith.constant 0 : index
    %c0_250 = arith.constant 0 : index
    %251 = vector.load %arg2[%c1_247, %c3_248, %c0_249, %c0_250] : memref<2x27x128x128xbf16, #tpu.memory_space<vmem>>, vector<1x1x128x128xbf16>
    %252 = vector.shape_cast %251 : vector<1x1x128x128xbf16> to vector<128x128xbf16>
    %cst_251 = arith.constant dense<0.000000e+00> : vector<256x128xf32>
    %253 = tpu.matmul %250, %252, %cst_251 {dimension_numbers = #tpu.dot_dimension_numbers<[1], [0], [0], [1], [0, 0, 1, 1], [], []>} : vector<256x128xbf16>, vector<128x128xbf16>, vector<256x128xf32> -> vector<256x128xf32>
    %254 = arith.addf %247, %253 : vector<256x128xf32>
    %c1_252 = arith.constant 1 : index
    %c1_253 = arith.constant 1 : index
    %c0_254 = arith.constant 0 : index
    %255 = vector.load %arg5[%c1_252, %c1_253, %c0_254] : memref<18x18x128xf32, #tpu.memory_space<vmem>>, vector<16x16x128xf32>
    %256 = vector.shape_cast %255 : vector<16x16x128xf32> to vector<256x128xf32>
    %257 = arith.truncf %256 : vector<256x128xf32> to vector<256x128xbf16>
    %c1_255 = arith.constant 1 : index
    %c4_256 = arith.constant 4 : index
    %c0_257 = arith.constant 0 : index
    %c0_258 = arith.constant 0 : index
    %258 = vector.load %arg2[%c1_255, %c4_256, %c0_257, %c0_258] : memref<2x27x128x128xbf16, #tpu.memory_space<vmem>>, vector<1x1x128x128xbf16>
    %259 = vector.shape_cast %258 : vector<1x1x128x128xbf16> to vector<128x128xbf16>
    %cst_259 = arith.constant dense<0.000000e+00> : vector<256x128xf32>
    %260 = tpu.matmul %257, %259, %cst_259 {dimension_numbers = #tpu.dot_dimension_numbers<[1], [0], [0], [1], [0, 0, 1, 1], [], []>} : vector<256x128xbf16>, vector<128x128xbf16>, vector<256x128xf32> -> vector<256x128xf32>
    %261 = arith.addf %254, %260 : vector<256x128xf32>
    %c1_260 = arith.constant 1 : index
    %c2_261 = arith.constant 2 : index
    %c0_262 = arith.constant 0 : index
    %262 = vector.load %arg5[%c1_260, %c2_261, %c0_262] : memref<18x18x128xf32, #tpu.memory_space<vmem>>, vector<16x16x128xf32>
    %263 = vector.shape_cast %262 : vector<16x16x128xf32> to vector<256x128xf32>
    %264 = arith.truncf %263 : vector<256x128xf32> to vector<256x128xbf16>
    %c1_263 = arith.constant 1 : index
    %c5_264 = arith.constant 5 : index
    %c0_265 = arith.constant 0 : index
    %c0_266 = arith.constant 0 : index
    %265 = vector.load %arg2[%c1_263, %c5_264, %c0_265, %c0_266] : memref<2x27x128x128xbf16, #tpu.memory_space<vmem>>, vector<1x1x128x128xbf16>
    %266 = vector.shape_cast %265 : vector<1x1x128x128xbf16> to vector<128x128xbf16>
    %cst_267 = arith.constant dense<0.000000e+00> : vector<256x128xf32>
    %267 = tpu.matmul %264, %266, %cst_267 {dimension_numbers = #tpu.dot_dimension_numbers<[1], [0], [0], [1], [0, 0, 1, 1], [], []>} : vector<256x128xbf16>, vector<128x128xbf16>, vector<256x128xf32> -> vector<256x128xf32>
    %268 = arith.addf %261, %267 : vector<256x128xf32>
    %c2_268 = arith.constant 2 : index
    %c0_269 = arith.constant 0 : index
    %c0_270 = arith.constant 0 : index
    %269 = vector.load %arg5[%c2_268, %c0_269, %c0_270] : memref<18x18x128xf32, #tpu.memory_space<vmem>>, vector<16x16x128xf32>
    %270 = vector.shape_cast %269 : vector<16x16x128xf32> to vector<256x128xf32>
    %271 = arith.truncf %270 : vector<256x128xf32> to vector<256x128xbf16>
    %c1_271 = arith.constant 1 : index
    %c6_272 = arith.constant 6 : index
    %c0_273 = arith.constant 0 : index
    %c0_274 = arith.constant 0 : index
    %272 = vector.load %arg2[%c1_271, %c6_272, %c0_273, %c0_274] : memref<2x27x128x128xbf16, #tpu.memory_space<vmem>>, vector<1x1x128x128xbf16>
    %273 = vector.shape_cast %272 : vector<1x1x128x128xbf16> to vector<128x128xbf16>
    %cst_275 = arith.constant dense<0.000000e+00> : vector<256x128xf32>
    %274 = tpu.matmul %271, %273, %cst_275 {dimension_numbers = #tpu.dot_dimension_numbers<[1], [0], [0], [1], [0, 0, 1, 1], [], []>} : vector<256x128xbf16>, vector<128x128xbf16>, vector<256x128xf32> -> vector<256x128xf32>
    %275 = arith.addf %268, %274 : vector<256x128xf32>
    %c2_276 = arith.constant 2 : index
    %c1_277 = arith.constant 1 : index
    %c0_278 = arith.constant 0 : index
    %276 = vector.load %arg5[%c2_276, %c1_277, %c0_278] : memref<18x18x128xf32, #tpu.memory_space<vmem>>, vector<16x16x128xf32>
    %277 = vector.shape_cast %276 : vector<16x16x128xf32> to vector<256x128xf32>
    %278 = arith.truncf %277 : vector<256x128xf32> to vector<256x128xbf16>
    %c1_279 = arith.constant 1 : index
    %c7_280 = arith.constant 7 : index
    %c0_281 = arith.constant 0 : index
    %c0_282 = arith.constant 0 : index
    %279 = vector.load %arg2[%c1_279, %c7_280, %c0_281, %c0_282] : memref<2x27x128x128xbf16, #tpu.memory_space<vmem>>, vector<1x1x128x128xbf16>
    %280 = vector.shape_cast %279 : vector<1x1x128x128xbf16> to vector<128x128xbf16>
    %cst_283 = arith.constant dense<0.000000e+00> : vector<256x128xf32>
    %281 = tpu.matmul %278, %280, %cst_283 {dimension_numbers = #tpu.dot_dimension_numbers<[1], [0], [0], [1], [0, 0, 1, 1], [], []>} : vector<256x128xbf16>, vector<128x128xbf16>, vector<256x128xf32> -> vector<256x128xf32>
    %282 = arith.addf %275, %281 : vector<256x128xf32>
    %c2_284 = arith.constant 2 : index
    %c2_285 = arith.constant 2 : index
    %c0_286 = arith.constant 0 : index
    %283 = vector.load %arg5[%c2_284, %c2_285, %c0_286] : memref<18x18x128xf32, #tpu.memory_space<vmem>>, vector<16x16x128xf32>
    %284 = vector.shape_cast %283 : vector<16x16x128xf32> to vector<256x128xf32>
    %285 = arith.truncf %284 : vector<256x128xf32> to vector<256x128xbf16>
    %c1_287 = arith.constant 1 : index
    %c8_288 = arith.constant 8 : index
    %c0_289 = arith.constant 0 : index
    %c0_290 = arith.constant 0 : index
    %286 = vector.load %arg2[%c1_287, %c8_288, %c0_289, %c0_290] : memref<2x27x128x128xbf16, #tpu.memory_space<vmem>>, vector<1x1x128x128xbf16>
    %287 = vector.shape_cast %286 : vector<1x1x128x128xbf16> to vector<128x128xbf16>
    %cst_291 = arith.constant dense<0.000000e+00> : vector<256x128xf32>
    %288 = tpu.matmul %285, %287, %cst_291 {dimension_numbers = #tpu.dot_dimension_numbers<[1], [0], [0], [1], [0, 0, 1, 1], [], []>} : vector<256x128xbf16>, vector<128x128xbf16>, vector<256x128xf32> -> vector<256x128xf32>
    %289 = arith.addf %282, %288 : vector<256x128xf32>
    %290 = vector.extract_strided_slice %225 {offsets = [0, 0], sizes = [1, 128], strides = [1, 1]} : vector<8x128xf32> to vector<1x128xf32>
    %291 = vector.broadcast %290 : vector<1x128xf32> to vector<256x128xf32>
    %292 = arith.mulf %289, %291 : vector<256x128xf32>
    %293 = vector.extract_strided_slice %225 {offsets = [1, 0], sizes = [1, 128], strides = [1, 1]} : vector<8x128xf32> to vector<1x128xf32>
    %294 = vector.broadcast %293 : vector<1x128xf32> to vector<256x128xf32>
    %295 = arith.addf %292, %294 : vector<256x128xf32>
    %cst_292 = arith.constant 0.000000e+00 : f32
    %296 = vector.broadcast %cst_292 : f32 to vector<256x128xf32>
    %297 = arith.maximumf %295, %296 : vector<256x128xf32>
    %298 = vector.shape_cast %297 : vector<256x128xf32> to vector<16x16x128xf32>
    %c1_293 = arith.constant 1 : index
    %c1_294 = arith.constant 1 : index
    %c0_295 = arith.constant 0 : index
    %299 = vector.load %arg5[%c1_293, %c1_294, %c0_295] : memref<18x18x128xf32, #tpu.memory_space<vmem>>, vector<16x16x128xf32>
    tpu.vector_store %arg5[%c1_293, %c1_294, %c0_295], %298 {strides = array<i32>} : memref<18x18x128xf32, #tpu.memory_space<vmem>>, vector<16x16x128xf32>,
    %cst_296 = arith.constant 0.000000e+00 : f32
    %300 = vector.broadcast %cst_296 : f32 to vector<256x128xf32>
    %c0_297 = arith.constant 0 : index
    %c0_298 = arith.constant 0 : index
    %c0_299 = arith.constant 0 : index
    %301 = vector.load %arg5[%c0_297, %c0_298, %c0_299] : memref<18x18x128xf32, #tpu.memory_space<vmem>>, vector<16x16x128xf32>
    %302 = vector.shape_cast %301 : vector<16x16x128xf32> to vector<256x128xf32>
    %303 = arith.truncf %302 : vector<256x128xf32> to vector<256x128xbf16>
    %c1_300 = arith.constant 1 : index
    %c9_301 = arith.constant 9 : index
    %c0_302 = arith.constant 0 : index
    %c0_303 = arith.constant 0 : index
    %304 = vector.load %arg2[%c1_300, %c9_301, %c0_302, %c0_303] : memref<2x27x128x128xbf16, #tpu.memory_space<vmem>>, vector<1x1x128x128xbf16>
    %305 = vector.shape_cast %304 : vector<1x1x128x128xbf16> to vector<128x128xbf16>
    %cst_304 = arith.constant dense<0.000000e+00> : vector<256x128xf32>
    %306 = tpu.matmul %303, %305, %cst_304 {dimension_numbers = #tpu.dot_dimension_numbers<[1], [0], [0], [1], [0, 0, 1, 1], [], []>} : vector<256x128xbf16>, vector<128x128xbf16>, vector<256x128xf32> -> vector<256x128xf32>
    %307 = arith.addf %300, %306 : vector<256x128xf32>
    %c0_305 = arith.constant 0 : index
    %c1_306 = arith.constant 1 : index
    %c0_307 = arith.constant 0 : index
    %308 = vector.load %arg5[%c0_305, %c1_306, %c0_307] : memref<18x18x128xf32, #tpu.memory_space<vmem>>, vector<16x16x128xf32>
    %309 = vector.shape_cast %308 : vector<16x16x128xf32> to vector<256x128xf32>
    %310 = arith.truncf %309 : vector<256x128xf32> to vector<256x128xbf16>
    %c1_308 = arith.constant 1 : index
    %c10_309 = arith.constant 10 : index
    %c0_310 = arith.constant 0 : index
    %c0_311 = arith.constant 0 : index
    %311 = vector.load %arg2[%c1_308, %c10_309, %c0_310, %c0_311] : memref<2x27x128x128xbf16, #tpu.memory_space<vmem>>, vector<1x1x128x128xbf16>
    %312 = vector.shape_cast %311 : vector<1x1x128x128xbf16> to vector<128x128xbf16>
    %cst_312 = arith.constant dense<0.000000e+00> : vector<256x128xf32>
    %313 = tpu.matmul %310, %312, %cst_312 {dimension_numbers = #tpu.dot_dimension_numbers<[1], [0], [0], [1], [0, 0, 1, 1], [], []>} : vector<256x128xbf16>, vector<128x128xbf16>, vector<256x128xf32> -> vector<256x128xf32>
    %314 = arith.addf %307, %313 : vector<256x128xf32>
    %c0_313 = arith.constant 0 : index
    %c2_314 = arith.constant 2 : index
    %c0_315 = arith.constant 0 : index
    %315 = vector.load %arg5[%c0_313, %c2_314, %c0_315] : memref<18x18x128xf32, #tpu.memory_space<vmem>>, vector<16x16x128xf32>
    %316 = vector.shape_cast %315 : vector<16x16x128xf32> to vector<256x128xf32>
    %317 = arith.truncf %316 : vector<256x128xf32> to vector<256x128xbf16>
    %c1_316 = arith.constant 1 : index
    %c11_317 = arith.constant 11 : index
    %c0_318 = arith.constant 0 : index
    %c0_319 = arith.constant 0 : index
    %318 = vector.load %arg2[%c1_316, %c11_317, %c0_318, %c0_319] : memref<2x27x128x128xbf16, #tpu.memory_space<vmem>>, vector<1x1x128x128xbf16>
    %319 = vector.shape_cast %318 : vector<1x1x128x128xbf16> to vector<128x128xbf16>
    %cst_320 = arith.constant dense<0.000000e+00> : vector<256x128xf32>
    %320 = tpu.matmul %317, %319, %cst_320 {dimension_numbers = #tpu.dot_dimension_numbers<[1], [0], [0], [1], [0, 0, 1, 1], [], []>} : vector<256x128xbf16>, vector<128x128xbf16>, vector<256x128xf32> -> vector<256x128xf32>
    %321 = arith.addf %314, %320 : vector<256x128xf32>
    %c1_321 = arith.constant 1 : index
    %c0_322 = arith.constant 0 : index
    %c0_323 = arith.constant 0 : index
    %322 = vector.load %arg5[%c1_321, %c0_322, %c0_323] : memref<18x18x128xf32, #tpu.memory_space<vmem>>, vector<16x16x128xf32>
    %323 = vector.shape_cast %322 : vector<16x16x128xf32> to vector<256x128xf32>
    %324 = arith.truncf %323 : vector<256x128xf32> to vector<256x128xbf16>
    %c1_324 = arith.constant 1 : index
    %c12_325 = arith.constant 12 : index
    %c0_326 = arith.constant 0 : index
    %c0_327 = arith.constant 0 : index
    %325 = vector.load %arg2[%c1_324, %c12_325, %c0_326, %c0_327] : memref<2x27x128x128xbf16, #tpu.memory_space<vmem>>, vector<1x1x128x128xbf16>
    %326 = vector.shape_cast %325 : vector<1x1x128x128xbf16> to vector<128x128xbf16>
    %cst_328 = arith.constant dense<0.000000e+00> : vector<256x128xf32>
    %327 = tpu.matmul %324, %326, %cst_328 {dimension_numbers = #tpu.dot_dimension_numbers<[1], [0], [0], [1], [0, 0, 1, 1], [], []>} : vector<256x128xbf16>, vector<128x128xbf16>, vector<256x128xf32> -> vector<256x128xf32>
    %328 = arith.addf %321, %327 : vector<256x128xf32>
    %c1_329 = arith.constant 1 : index
    %c1_330 = arith.constant 1 : index
    %c0_331 = arith.constant 0 : index
    %329 = vector.load %arg5[%c1_329, %c1_330, %c0_331] : memref<18x18x128xf32, #tpu.memory_space<vmem>>, vector<16x16x128xf32>
    %330 = vector.shape_cast %329 : vector<16x16x128xf32> to vector<256x128xf32>
    %331 = arith.truncf %330 : vector<256x128xf32> to vector<256x128xbf16>
    %c1_332 = arith.constant 1 : index
    %c13_333 = arith.constant 13 : index
    %c0_334 = arith.constant 0 : index
    %c0_335 = arith.constant 0 : index
    %332 = vector.load %arg2[%c1_332, %c13_333, %c0_334, %c0_335] : memref<2x27x128x128xbf16, #tpu.memory_space<vmem>>, vector<1x1x128x128xbf16>
    %333 = vector.shape_cast %332 : vector<1x1x128x128xbf16> to vector<128x128xbf16>
    %cst_336 = arith.constant dense<0.000000e+00> : vector<256x128xf32>
    %334 = tpu.matmul %331, %333, %cst_336 {dimension_numbers = #tpu.dot_dimension_numbers<[1], [0], [0], [1], [0, 0, 1, 1], [], []>} : vector<256x128xbf16>, vector<128x128xbf16>, vector<256x128xf32> -> vector<256x128xf32>
    %335 = arith.addf %328, %334 : vector<256x128xf32>
    %c1_337 = arith.constant 1 : index
    %c2_338 = arith.constant 2 : index
    %c0_339 = arith.constant 0 : index
    %336 = vector.load %arg5[%c1_337, %c2_338, %c0_339] : memref<18x18x128xf32, #tpu.memory_space<vmem>>, vector<16x16x128xf32>
    %337 = vector.shape_cast %336 : vector<16x16x128xf32> to vector<256x128xf32>
    %338 = arith.truncf %337 : vector<256x128xf32> to vector<256x128xbf16>
    %c1_340 = arith.constant 1 : index
    %c14_341 = arith.constant 14 : index
    %c0_342 = arith.constant 0 : index
    %c0_343 = arith.constant 0 : index
    %339 = vector.load %arg2[%c1_340, %c14_341, %c0_342, %c0_343] : memref<2x27x128x128xbf16, #tpu.memory_space<vmem>>, vector<1x1x128x128xbf16>
    %340 = vector.shape_cast %339 : vector<1x1x128x128xbf16> to vector<128x128xbf16>
    %cst_344 = arith.constant dense<0.000000e+00> : vector<256x128xf32>
    %341 = tpu.matmul %338, %340, %cst_344 {dimension_numbers = #tpu.dot_dimension_numbers<[1], [0], [0], [1], [0, 0, 1, 1], [], []>} : vector<256x128xbf16>, vector<128x128xbf16>, vector<256x128xf32> -> vector<256x128xf32>
    %342 = arith.addf %335, %341 : vector<256x128xf32>
    %c2_345 = arith.constant 2 : index
    %c0_346 = arith.constant 0 : index
    %c0_347 = arith.constant 0 : index
    %343 = vector.load %arg5[%c2_345, %c0_346, %c0_347] : memref<18x18x128xf32, #tpu.memory_space<vmem>>, vector<16x16x128xf32>
    %344 = vector.shape_cast %343 : vector<16x16x128xf32> to vector<256x128xf32>
    %345 = arith.truncf %344 : vector<256x128xf32> to vector<256x128xbf16>
    %c1_348 = arith.constant 1 : index
    %c15_349 = arith.constant 15 : index
    %c0_350 = arith.constant 0 : index
    %c0_351 = arith.constant 0 : index
    %346 = vector.load %arg2[%c1_348, %c15_349, %c0_350, %c0_351] : memref<2x27x128x128xbf16, #tpu.memory_space<vmem>>, vector<1x1x128x128xbf16>
    %347 = vector.shape_cast %346 : vector<1x1x128x128xbf16> to vector<128x128xbf16>
    %cst_352 = arith.constant dense<0.000000e+00> : vector<256x128xf32>
    %348 = tpu.matmul %345, %347, %cst_352 {dimension_numbers = #tpu.dot_dimension_numbers<[1], [0], [0], [1], [0, 0, 1, 1], [], []>} : vector<256x128xbf16>, vector<128x128xbf16>, vector<256x128xf32> -> vector<256x128xf32>
    %349 = arith.addf %342, %348 : vector<256x128xf32>
    %c2_353 = arith.constant 2 : index
    %c1_354 = arith.constant 1 : index
    %c0_355 = arith.constant 0 : index
    %350 = vector.load %arg5[%c2_353, %c1_354, %c0_355] : memref<18x18x128xf32, #tpu.memory_space<vmem>>, vector<16x16x128xf32>
    %351 = vector.shape_cast %350 : vector<16x16x128xf32> to vector<256x128xf32>
    %352 = arith.truncf %351 : vector<256x128xf32> to vector<256x128xbf16>
    %c1_356 = arith.constant 1 : index
    %c16_357 = arith.constant 16 : index
    %c0_358 = arith.constant 0 : index
    %c0_359 = arith.constant 0 : index
    %353 = vector.load %arg2[%c1_356, %c16_357, %c0_358, %c0_359] : memref<2x27x128x128xbf16, #tpu.memory_space<vmem>>, vector<1x1x128x128xbf16>
    %354 = vector.shape_cast %353 : vector<1x1x128x128xbf16> to vector<128x128xbf16>
    %cst_360 = arith.constant dense<0.000000e+00> : vector<256x128xf32>
    %355 = tpu.matmul %352, %354, %cst_360 {dimension_numbers = #tpu.dot_dimension_numbers<[1], [0], [0], [1], [0, 0, 1, 1], [], []>} : vector<256x128xbf16>, vector<128x128xbf16>, vector<256x128xf32> -> vector<256x128xf32>
    %356 = arith.addf %349, %355 : vector<256x128xf32>
    %c2_361 = arith.constant 2 : index
    %c2_362 = arith.constant 2 : index
    %c0_363 = arith.constant 0 : index
    %357 = vector.load %arg5[%c2_361, %c2_362, %c0_363] : memref<18x18x128xf32, #tpu.memory_space<vmem>>, vector<16x16x128xf32>
    %358 = vector.shape_cast %357 : vector<16x16x128xf32> to vector<256x128xf32>
    %359 = arith.truncf %358 : vector<256x128xf32> to vector<256x128xbf16>
    %c1_364 = arith.constant 1 : index
    %c17_365 = arith.constant 17 : index
    %c0_366 = arith.constant 0 : index
    %c0_367 = arith.constant 0 : index
    %360 = vector.load %arg2[%c1_364, %c17_365, %c0_366, %c0_367] : memref<2x27x128x128xbf16, #tpu.memory_space<vmem>>, vector<1x1x128x128xbf16>
    %361 = vector.shape_cast %360 : vector<1x1x128x128xbf16> to vector<128x128xbf16>
    %cst_368 = arith.constant dense<0.000000e+00> : vector<256x128xf32>
    %362 = tpu.matmul %359, %361, %cst_368 {dimension_numbers = #tpu.dot_dimension_numbers<[1], [0], [0], [1], [0, 0, 1, 1], [], []>} : vector<256x128xbf16>, vector<128x128xbf16>, vector<256x128xf32> -> vector<256x128xf32>
    %363 = arith.addf %356, %362 : vector<256x128xf32>
    %364 = vector.extract_strided_slice %225 {offsets = [2, 0], sizes = [1, 128], strides = [1, 1]} : vector<8x128xf32> to vector<1x128xf32>
    %365 = vector.broadcast %364 : vector<1x128xf32> to vector<256x128xf32>
    %366 = arith.mulf %363, %365 : vector<256x128xf32>
    %367 = vector.extract_strided_slice %225 {offsets = [3, 0], sizes = [1, 128], strides = [1, 1]} : vector<8x128xf32> to vector<1x128xf32>
    %368 = vector.broadcast %367 : vector<1x128xf32> to vector<256x128xf32>
    %369 = arith.addf %366, %368 : vector<256x128xf32>
    %cst_369 = arith.constant 0.000000e+00 : f32
    %370 = vector.broadcast %cst_369 : f32 to vector<256x128xf32>
    %371 = arith.maximumf %369, %370 : vector<256x128xf32>
    %372 = vector.shape_cast %371 : vector<256x128xf32> to vector<16x16x128xf32>
    %c1_370 = arith.constant 1 : index
    %c1_371 = arith.constant 1 : index
    %c0_372 = arith.constant 0 : index
    %373 = vector.load %arg5[%c1_370, %c1_371, %c0_372] : memref<18x18x128xf32, #tpu.memory_space<vmem>>, vector<16x16x128xf32>
    tpu.vector_store %arg5[%c1_370, %c1_371, %c0_372], %372 {strides = array<i32>} : memref<18x18x128xf32, #tpu.memory_space<vmem>>, vector<16x16x128xf32>,
    %cst_373 = arith.constant 0.000000e+00 : f32
    %374 = vector.broadcast %cst_373 : f32 to vector<256x128xf32>
    %c0_374 = arith.constant 0 : index
    %c0_375 = arith.constant 0 : index
    %c0_376 = arith.constant 0 : index
    %375 = vector.load %arg5[%c0_374, %c0_375, %c0_376] : memref<18x18x128xf32, #tpu.memory_space<vmem>>, vector<16x16x128xf32>
    %376 = vector.shape_cast %375 : vector<16x16x128xf32> to vector<256x128xf32>
    %377 = arith.truncf %376 : vector<256x128xf32> to vector<256x128xbf16>
    %c1_377 = arith.constant 1 : index
    %c18_378 = arith.constant 18 : index
    %c0_379 = arith.constant 0 : index
    %c0_380 = arith.constant 0 : index
    %378 = vector.load %arg2[%c1_377, %c18_378, %c0_379, %c0_380] : memref<2x27x128x128xbf16, #tpu.memory_space<vmem>>, vector<1x1x128x128xbf16>
    %379 = vector.shape_cast %378 : vector<1x1x128x128xbf16> to vector<128x128xbf16>
    %cst_381 = arith.constant dense<0.000000e+00> : vector<256x128xf32>
    %380 = tpu.matmul %377, %379, %cst_381 {dimension_numbers = #tpu.dot_dimension_numbers<[1], [0], [0], [1], [0, 0, 1, 1], [], []>} : vector<256x128xbf16>, vector<128x128xbf16>, vector<256x128xf32> -> vector<256x128xf32>
    %381 = arith.addf %374, %380 : vector<256x128xf32>
    %c0_382 = arith.constant 0 : index
    %c1_383 = arith.constant 1 : index
    %c0_384 = arith.constant 0 : index
    %382 = vector.load %arg5[%c0_382, %c1_383, %c0_384] : memref<18x18x128xf32, #tpu.memory_space<vmem>>, vector<16x16x128xf32>
    %383 = vector.shape_cast %382 : vector<16x16x128xf32> to vector<256x128xf32>
    %384 = arith.truncf %383 : vector<256x128xf32> to vector<256x128xbf16>
    %c1_385 = arith.constant 1 : index
    %c19_386 = arith.constant 19 : index
    %c0_387 = arith.constant 0 : index
    %c0_388 = arith.constant 0 : index
    %385 = vector.load %arg2[%c1_385, %c19_386, %c0_387, %c0_388] : memref<2x27x128x128xbf16, #tpu.memory_space<vmem>>, vector<1x1x128x128xbf16>
    %386 = vector.shape_cast %385 : vector<1x1x128x128xbf16> to vector<128x128xbf16>
    %cst_389 = arith.constant dense<0.000000e+00> : vector<256x128xf32>
    %387 = tpu.matmul %384, %386, %cst_389 {dimension_numbers = #tpu.dot_dimension_numbers<[1], [0], [0], [1], [0, 0, 1, 1], [], []>} : vector<256x128xbf16>, vector<128x128xbf16>, vector<256x128xf32> -> vector<256x128xf32>
    %388 = arith.addf %381, %387 : vector<256x128xf32>
    %c0_390 = arith.constant 0 : index
    %c2_391 = arith.constant 2 : index
    %c0_392 = arith.constant 0 : index
    %389 = vector.load %arg5[%c0_390, %c2_391, %c0_392] : memref<18x18x128xf32, #tpu.memory_space<vmem>>, vector<16x16x128xf32>
    %390 = vector.shape_cast %389 : vector<16x16x128xf32> to vector<256x128xf32>
    %391 = arith.truncf %390 : vector<256x128xf32> to vector<256x128xbf16>
    %c1_393 = arith.constant 1 : index
    %c20_394 = arith.constant 20 : index
    %c0_395 = arith.constant 0 : index
    %c0_396 = arith.constant 0 : index
    %392 = vector.load %arg2[%c1_393, %c20_394, %c0_395, %c0_396] : memref<2x27x128x128xbf16, #tpu.memory_space<vmem>>, vector<1x1x128x128xbf16>
    %393 = vector.shape_cast %392 : vector<1x1x128x128xbf16> to vector<128x128xbf16>
    %cst_397 = arith.constant dense<0.000000e+00> : vector<256x128xf32>
    %394 = tpu.matmul %391, %393, %cst_397 {dimension_numbers = #tpu.dot_dimension_numbers<[1], [0], [0], [1], [0, 0, 1, 1], [], []>} : vector<256x128xbf16>, vector<128x128xbf16>, vector<256x128xf32> -> vector<256x128xf32>
    %395 = arith.addf %388, %394 : vector<256x128xf32>
    %c1_398 = arith.constant 1 : index
    %c0_399 = arith.constant 0 : index
    %c0_400 = arith.constant 0 : index
    %396 = vector.load %arg5[%c1_398, %c0_399, %c0_400] : memref<18x18x128xf32, #tpu.memory_space<vmem>>, vector<16x16x128xf32>
    %397 = vector.shape_cast %396 : vector<16x16x128xf32> to vector<256x128xf32>
    %398 = arith.truncf %397 : vector<256x128xf32> to vector<256x128xbf16>
    %c1_401 = arith.constant 1 : index
    %c21_402 = arith.constant 21 : index
    %c0_403 = arith.constant 0 : index
    %c0_404 = arith.constant 0 : index
    %399 = vector.load %arg2[%c1_401, %c21_402, %c0_403, %c0_404] : memref<2x27x128x128xbf16, #tpu.memory_space<vmem>>, vector<1x1x128x128xbf16>
    %400 = vector.shape_cast %399 : vector<1x1x128x128xbf16> to vector<128x128xbf16>
    %cst_405 = arith.constant dense<0.000000e+00> : vector<256x128xf32>
    %401 = tpu.matmul %398, %400, %cst_405 {dimension_numbers = #tpu.dot_dimension_numbers<[1], [0], [0], [1], [0, 0, 1, 1], [], []>} : vector<256x128xbf16>, vector<128x128xbf16>, vector<256x128xf32> -> vector<256x128xf32>
    %402 = arith.addf %395, %401 : vector<256x128xf32>
    %c1_406 = arith.constant 1 : index
    %c1_407 = arith.constant 1 : index
    %c0_408 = arith.constant 0 : index
    %403 = vector.load %arg5[%c1_406, %c1_407, %c0_408] : memref<18x18x128xf32, #tpu.memory_space<vmem>>, vector<16x16x128xf32>
    %404 = vector.shape_cast %403 : vector<16x16x128xf32> to vector<256x128xf32>
    %405 = arith.truncf %404 : vector<256x128xf32> to vector<256x128xbf16>
    %c1_409 = arith.constant 1 : index
    %c22_410 = arith.constant 22 : index
    %c0_411 = arith.constant 0 : index
    %c0_412 = arith.constant 0 : index
    %406 = vector.load %arg2[%c1_409, %c22_410, %c0_411, %c0_412] : memref<2x27x128x128xbf16, #tpu.memory_space<vmem>>, vector<1x1x128x128xbf16>
    %407 = vector.shape_cast %406 : vector<1x1x128x128xbf16> to vector<128x128xbf16>
    %cst_413 = arith.constant dense<0.000000e+00> : vector<256x128xf32>
    %408 = tpu.matmul %405, %407, %cst_413 {dimension_numbers = #tpu.dot_dimension_numbers<[1], [0], [0], [1], [0, 0, 1, 1], [], []>} : vector<256x128xbf16>, vector<128x128xbf16>, vector<256x128xf32> -> vector<256x128xf32>
    %409 = arith.addf %402, %408 : vector<256x128xf32>
    %c1_414 = arith.constant 1 : index
    %c2_415 = arith.constant 2 : index
    %c0_416 = arith.constant 0 : index
    %410 = vector.load %arg5[%c1_414, %c2_415, %c0_416] : memref<18x18x128xf32, #tpu.memory_space<vmem>>, vector<16x16x128xf32>
    %411 = vector.shape_cast %410 : vector<16x16x128xf32> to vector<256x128xf32>
    %412 = arith.truncf %411 : vector<256x128xf32> to vector<256x128xbf16>
    %c1_417 = arith.constant 1 : index
    %c23_418 = arith.constant 23 : index
    %c0_419 = arith.constant 0 : index
    %c0_420 = arith.constant 0 : index
    %413 = vector.load %arg2[%c1_417, %c23_418, %c0_419, %c0_420] : memref<2x27x128x128xbf16, #tpu.memory_space<vmem>>, vector<1x1x128x128xbf16>
    %414 = vector.shape_cast %413 : vector<1x1x128x128xbf16> to vector<128x128xbf16>
    %cst_421 = arith.constant dense<0.000000e+00> : vector<256x128xf32>
    %415 = tpu.matmul %412, %414, %cst_421 {dimension_numbers = #tpu.dot_dimension_numbers<[1], [0], [0], [1], [0, 0, 1, 1], [], []>} : vector<256x128xbf16>, vector<128x128xbf16>, vector<256x128xf32> -> vector<256x128xf32>
    %416 = arith.addf %409, %415 : vector<256x128xf32>
    %c2_422 = arith.constant 2 : index
    %c0_423 = arith.constant 0 : index
    %c0_424 = arith.constant 0 : index
    %417 = vector.load %arg5[%c2_422, %c0_423, %c0_424] : memref<18x18x128xf32, #tpu.memory_space<vmem>>, vector<16x16x128xf32>
    %418 = vector.shape_cast %417 : vector<16x16x128xf32> to vector<256x128xf32>
    %419 = arith.truncf %418 : vector<256x128xf32> to vector<256x128xbf16>
    %c1_425 = arith.constant 1 : index
    %c24_426 = arith.constant 24 : index
    %c0_427 = arith.constant 0 : index
    %c0_428 = arith.constant 0 : index
    %420 = vector.load %arg2[%c1_425, %c24_426, %c0_427, %c0_428] : memref<2x27x128x128xbf16, #tpu.memory_space<vmem>>, vector<1x1x128x128xbf16>
    %421 = vector.shape_cast %420 : vector<1x1x128x128xbf16> to vector<128x128xbf16>
    %cst_429 = arith.constant dense<0.000000e+00> : vector<256x128xf32>
    %422 = tpu.matmul %419, %421, %cst_429 {dimension_numbers = #tpu.dot_dimension_numbers<[1], [0], [0], [1], [0, 0, 1, 1], [], []>} : vector<256x128xbf16>, vector<128x128xbf16>, vector<256x128xf32> -> vector<256x128xf32>
    %423 = arith.addf %416, %422 : vector<256x128xf32>
    %c2_430 = arith.constant 2 : index
    %c1_431 = arith.constant 1 : index
    %c0_432 = arith.constant 0 : index
    %424 = vector.load %arg5[%c2_430, %c1_431, %c0_432] : memref<18x18x128xf32, #tpu.memory_space<vmem>>, vector<16x16x128xf32>
    %425 = vector.shape_cast %424 : vector<16x16x128xf32> to vector<256x128xf32>
    %426 = arith.truncf %425 : vector<256x128xf32> to vector<256x128xbf16>
    %c1_433 = arith.constant 1 : index
    %c25_434 = arith.constant 25 : index
    %c0_435 = arith.constant 0 : index
    %c0_436 = arith.constant 0 : index
    %427 = vector.load %arg2[%c1_433, %c25_434, %c0_435, %c0_436] : memref<2x27x128x128xbf16, #tpu.memory_space<vmem>>, vector<1x1x128x128xbf16>
    %428 = vector.shape_cast %427 : vector<1x1x128x128xbf16> to vector<128x128xbf16>
    %cst_437 = arith.constant dense<0.000000e+00> : vector<256x128xf32>
    %429 = tpu.matmul %426, %428, %cst_437 {dimension_numbers = #tpu.dot_dimension_numbers<[1], [0], [0], [1], [0, 0, 1, 1], [], []>} : vector<256x128xbf16>, vector<128x128xbf16>, vector<256x128xf32> -> vector<256x128xf32>
    %430 = arith.addf %423, %429 : vector<256x128xf32>
    %c2_438 = arith.constant 2 : index
    %c2_439 = arith.constant 2 : index
    %c0_440 = arith.constant 0 : index
    %431 = vector.load %arg5[%c2_438, %c2_439, %c0_440] : memref<18x18x128xf32, #tpu.memory_space<vmem>>, vector<16x16x128xf32>
    %432 = vector.shape_cast %431 : vector<16x16x128xf32> to vector<256x128xf32>
    %433 = arith.truncf %432 : vector<256x128xf32> to vector<256x128xbf16>
    %c1_441 = arith.constant 1 : index
    %c26_442 = arith.constant 26 : index
    %c0_443 = arith.constant 0 : index
    %c0_444 = arith.constant 0 : index
    %434 = vector.load %arg2[%c1_441, %c26_442, %c0_443, %c0_444] : memref<2x27x128x128xbf16, #tpu.memory_space<vmem>>, vector<1x1x128x128xbf16>
    %435 = vector.shape_cast %434 : vector<1x1x128x128xbf16> to vector<128x128xbf16>
    %cst_445 = arith.constant dense<0.000000e+00> : vector<256x128xf32>
    %436 = tpu.matmul %433, %435, %cst_445 {dimension_numbers = #tpu.dot_dimension_numbers<[1], [0], [0], [1], [0, 0, 1, 1], [], []>} : vector<256x128xbf16>, vector<128x128xbf16>, vector<256x128xf32> -> vector<256x128xf32>
    %437 = arith.addf %430, %436 : vector<256x128xf32>
    %438 = vector.extract_strided_slice %225 {offsets = [4, 0], sizes = [1, 128], strides = [1, 1]} : vector<8x128xf32> to vector<1x128xf32>
    %439 = vector.broadcast %438 : vector<1x128xf32> to vector<256x128xf32>
    %440 = arith.addf %437, %439 : vector<256x128xf32>
    %441 = vector.shape_cast %440 : vector<256x128xf32> to vector<16x16x128xf32>
    %c0_446 = arith.constant 0 : index
    %c0_447 = arith.constant 0 : index
    %c0_448 = arith.constant 0 : index
    %c0_449 = arith.constant 0 : index
    %442 = vector.load %arg4[%c0_446, %c0_447, %c0_448, %c0_449] : memref<1x16x16x128xf32, #tpu.memory_space<vmem>>, vector<1x16x16x128xf32>
    %443 = vector.shape_cast %442 : vector<1x16x16x128xf32> to vector<16x16x128xf32>
    %444 = vector.shape_cast %441 : vector<16x16x128xf32> to vector<1x16x16x128xf32>
    tpu.vector_store %arg4[%c0_446, %c0_447, %c0_448, %c0_449], %444 {strides = array<i32>} : memref<1x16x16x128xf32, #tpu.memory_space<vmem>>, vector<1x16x16x128xf32>,
    return
  }
  func.func @transform_0(%arg0: i32) -> (i32, i32, i32, i32) {
    %c0_i32 = arith.constant 0 : i32
    %c0_i32_0 = arith.constant 0 : i32
    %c0_i32_1 = arith.constant 0 : i32
    %c0_i32_2 = arith.constant 0 : i32
    return %arg0, %c0_i32, %c0_i32_0, %c0_i32_1 : i32, i32, i32, i32
  }
  func.func @transform_1(%arg0: i32) -> (i32, i32, i32, i32) {
    %c0_i32 = arith.constant 0 : i32
    %c0_i32_0 = arith.constant 0 : i32
    %c0_i32_1 = arith.constant 0 : i32
    %c0_i32_2 = arith.constant 0 : i32
    %c0_i32_3 = arith.constant 0 : i32
    return %c0_i32, %c0_i32_0, %c0_i32_1, %c0_i32_2 : i32, i32, i32, i32
  }
  func.func @transform_2(%arg0: i32) -> (i32, i32, i32) {
    %c0_i32 = arith.constant 0 : i32
    %c0_i32_0 = arith.constant 0 : i32
    %c0_i32_1 = arith.constant 0 : i32
    %c0_i32_2 = arith.constant 0 : i32
    return %c0_i32, %c0_i32_0, %c0_i32_1 : i32, i32, i32
  }
  func.func @transform_3(%arg0: i32) -> (i32, i32, i32, i32) {
    %c0_i32 = arith.constant 0 : i32
    %c0_i32_0 = arith.constant 0 : i32
    %c0_i32_1 = arith.constant 0 : i32
    %c0_i32_2 = arith.constant 0 : i32
    return %arg0, %c0_i32, %c0_i32_0, %c0_i32_1 : i32, i32, i32, i32
  }
}

</mosaic_0001>

<bundles_post_ra>
// kernel: hourglass_neck_forward.1
= control target key start
LH: loop header
LB: loop body
LE: loop exit
PB: predicated region body
PF: predicated region fallthrough
CT: control target
= control target key end

     0   :  { %s24370_s12 = smov 0   ;;  %s27544_s0 = inlined_call_operand.vmem [shape: f32[2,16,16,128], index: 0, kind: input, shape index: {}]   ;;  %s27545_s1 = inlined_call_operand.vmem [shape: bf16[2,27,128,128], index: 1, kind: input, shape index: {}]   ;;  %s27546_s2 = inlined_call_operand.vmem [shape: f32[2,8,128], index: 2, kind: input, shape index: {}]   ;;  %s27547_s3 = inlined_call_operand.vmem [shape: f32[2,16,16,128], index: 3, kind: output, shape index: {}]  }
   0x1 LB: > { %s17169_s13 = sadd.s32 4294967295, %s24346_s12   ;;  %p17173_p0 = scmp.ge.s32.totalorder %s24346_s12, 1  ;;  %s24346_s12 = sphi %s24370_s12, %s13_s12  }
   0x2   : > { %p137_p1 = scmp.lt.s32.totalorder %s24346_s12, 3 }
   0x4   : > { %p138_p2 = pnand %p17173_p0, %p137_p1 }
   0x5   : > { %v23896_v0 = vld [vmem:[%s27545_s1 + $0x40] sm:$0xff] (!%p138_p2)   ;;  %v24384_v1 = vld [vmem:[%s27545_s1 + $0x48] sm:$0xff] (!%p138_p2)   ;;  %v24348_v2 = vmov (!%p138_p2), 0.0   ;;  %p161_p3 = scmp.lt.s32.totalorder (!%p138_p2), %s17169_s13, 1  ;;  %v23898_v3 = vld [vmem:[%s27545_s1 + $0x50] sm:$0xff] (!%p138_p2)  }
   0x6   : > { %141 = sbr.rel (%p138_p2) target bundleno = 4495 (0x118f), region = 32  ;;  %172 = vst [vmem:[#allocation2] sm:$0xff] (!%p138_p2), %v24348_v2  ;;  %173 = vst [vmem:[#allocation2 + $0x8] sm:$0xff] (!%p138_p2), %v24348_v2  ;;  %19759 = vmatprep.subr.bf16.mxu0 (!%p138_p2), %v23896_v0  ;;  %v23899_v4 = vld [vmem:[%s27545_s1 + $0x58] sm:$0xff] (!%p138_p2)   ;;  %v23900_v14 = vld [vmem:[%s27545_s1 + $0x60] sm:$0xff] (!%p138_p2)  }
   0x7   : > { %174 = vst [vmem:[#allocation2 + $0x10] sm:$0x3] (!%p138_p2), %v24348_v2  ;;  %175 = vst [vmem:[#allocation2 + $0x18] sm:$0xff] (!%p138_p2), %v24348_v2  ;;  %19760 = vmatpush3.bf16.msra.mxu0 (!%p138_p2), %v23896_v0  ;;  %v23901_v19 = vld [vmem:[%s27545_s1 + $0x68] sm:$0xff] (!%p138_p2)   ;;  %v23902_v28 = vld [vmem:[%s27545_s1 + $0x70] sm:$0xff] (!%p138_p2)  }
   0x8   : > { %176 = vst [vmem:[#allocation2 + $0x20] sm:$0xff] (!%p138_p2), %v24348_v2  ;;  %177 = vst [vmem:[#allocation2 + $0x28] sm:$0x3] (!%p138_p2), %v24348_v2  ;;  %19761 = vmatprep.subr.bf16.mxu0 (!%p138_p2), %v24384_v1  ;;  %v23903_v37 = vld [vmem:[%s27545_s1 + $0x78] sm:$0xff] (!%p138_p2)   ;;  %v23904_v42 = vld [vmem:[%s27545_s1] sm:$0xff] (!%p138_p2)  }
   0x9   : > { %178 = vst [vmem:[#allocation2 + $0x30] sm:$0xff] (!%p138_p2), %v24348_v2  ;;  %179 = vst [vmem:[#allocation2 + $0x38] sm:$0xff] (!%p138_p2), %v24348_v2  ;;  %v23905_v45 = vld [vmem:[%s27545_s1 + $0x8] sm:$0xff] (!%p138_p2)   ;;  %v23906_v46 = vld [vmem:[%s27545_s1 + $0x10] sm:$0xff] (!%p138_p2)  }
   0xa   : > { %180 = vst [vmem:[#allocation2 + $0x40] sm:$0x3] (!%p138_p2), %v24348_v2  ;;  %181 = vst [vmem:[#allocation2 + $0x48] sm:$0xff] (!%p138_p2), %v24348_v2  ;;  %v23907_v49 = vld [vmem:[%s27545_s1 + $0x18] sm:$0xff] (!%p138_p2)   ;;  %v23908_v50 = vld [vmem:[%s27545_s1 + $0x20] sm:$0xff] (!%p138_p2)  }
   0xb   : > { %182 = vst [vmem:[#allocation2 + $0x50] sm:$0xff] (!%p138_p2), %v24348_v2  ;;  %183 = vst [vmem:[#allocation2 + $0x58] sm:$0x3] (!%p138_p2), %v24348_v2  ;;  %19762 = vmatpush3.bf16.msra.mxu0 (!%p138_p2), %v24384_v1  ;;  %v23909_v53 = vld [vmem:[%s27545_s1 + $0x28] sm:$0xff] (!%p138_p2)   ;;  %v23910_v54 = vld [vmem:[%s27545_s1 + $0x30] sm:$0xff] (!%p138_p2)  }
   0xc   : > { %184 = vst [vmem:[#allocation2 + $0x60] sm:$0xff] (!%p138_p2), %v24348_v2  ;;  %185 = vst [vmem:[#allocation2 + $0x68] sm:$0xff] (!%p138_p2), %v24348_v2  ;;  %19763 = vmatprep.subr.bf16.mxu0 (!%p138_p2), %v23898_v3  ;;  %v23911_v56 = vld [vmem:[%s27545_s1 + $0x38] sm:$0xff] (!%p138_p2)   ;;  %v23912_v58 = vld [vmem:[%s27545_s1 + $0x80] sm:$0xff] (!%p138_p2)  }
   0xd   : > { %186 = vst [vmem:[#allocation2 + $0x70] sm:$0x3] %v24348_v2  ;;  %187 = vst [vmem:[#allocation2 + $0x78] sm:$0xff] %v24348_v2  ;;  %s27549_s13 = smov (!%p161_p3, %s17169_s13), 1  ;;  %v356_v5 = vld [vmem:[#allocation2 + $0x1] sm:$0xff] }
   0xe   : > { %188 = vst [vmem:[#allocation2 + $0x80] sm:$0xff] %v24348_v2  ;;  %189 = vst [vmem:[#allocation2 + $0x88] sm:$0x3] %v24348_v2  ;;  %s18461_s20 = sshll.u32 %s27549_s13, 8  ;;  %v357_v6 = vld [vmem:[#allocation2 + $0x9] sm:$0xff] }
   0xf   : > { %190 = vst [vmem:[#allocation2 + $0x90] sm:$0xff] %v24348_v2  ;;  %191 = vst [vmem:[#allocation2 + $0x98] sm:$0xff] %v24348_v2  ;;  %s24402_s23 = scalar_lea.vmem %s27544_s0, %s18461_s20  ;;  %v388_v8 = vpack.c.bf16 %v357_v6, %v356_v5  ;;  %19764 = vmatpush3.bf16.msra.mxu0 %v23898_v3  ;;  %v24349_v6 = vmov 0.0|0.0   ;;  %s27475_s6 = scalar_lea.vmem %s27547_s3, %s18461_s20 }
  0x10   : > { %192 = vst [vmem:[#allocation2 + $0xa0] sm:$0x3] %v24348_v2  ;;  %193 = vst [vmem:[#allocation2 + $0xa8] sm:$0xff] %v24348_v2  ;;  %v24409_v7 = vld [vmem:[%s24402_s23] sm:$0xff]  ;;  %v24412_v9 = vld [vmem:[%s24402_s23 + $0x8] sm:$0xff]  ;;  %19765 = vmatprep.subr.bf16.mxu0 %v23899_v4 }
  0x11   : > { %194 = vst [vmem:[#allocation2 + $0xb0] sm:$0xff] %v24348_v2  ;;  %195 = vst [vmem:[#allocation2 + $0xb8] sm:$0x3] %v24348_v2  ;;  %v24417_v10 = vld [vmem:[%s24402_s23 + $0x10] sm:$0xff]  ;;  %v24420_v11 = vld [vmem:[%s24402_s23 + $0x18] sm:$0xff]  ;;  %19775 = vmatprep.mubr.bf16.mxu0 %v388_v8  ;;  %v24533_v43 = vpack.c.bf16 %v24412_v9, %v24409_v7 }
  0x12   : > { %196 = vst [vmem:[#allocation2 + $0xc0] sm:$0xff] %v24348_v2  ;;  %197 = vst [vmem:[#allocation2 + $0xc8] sm:$0xff] %v24348_v2  ;;  %v24425_v12 = vld [vmem:[%s24402_s23 + $0x20] sm:$0xff]  ;;  %v24428_v13 = vld [vmem:[%s24402_s23 + $0x28] sm:$0xff]  ;;  %v24537_v44 = vpack.c.bf16 %v24420_v11, %v24417_v10 }
  0x13   : > { %198 = vst [vmem:[#allocation2 + $0xd0] sm:$0x3] %v24348_v2  ;;  %199 = vst [vmem:[#allocation2 + $0xd8] sm:$0xff] %v24348_v2  ;;  %v24436_v15 = vld [vmem:[%s24402_s23 + $0x30] sm:$0xff]  ;;  %v24439_v16 = vld [vmem:[%s24402_s23 + $0x38] sm:$0xff]  ;;  %19766 = vmatpush3.bf16.msra.mxu0 %v23899_v4  ;;  %v24549_v47 = vpack.c.bf16 %v24428_v13, %v24425_v12 }
  0x14   : > { %200 = vst [vmem:[#allocation2 + $0xe0] sm:$0xff] %v24348_v2  ;;  %201 = vst [vmem:[#allocation2 + $0xe8] sm:$0x3] %v24348_v2  ;;  %v24443_v17 = vld [vmem:[%s24402_s23 + $0x40] sm:$0xff]  ;;  %v24446_v18 = vld [vmem:[%s24402_s23 + $0x48] sm:$0xff]  ;;  %19767 = vmatprep.subr.bf16.mxu0 %v23900_v14  ;;  %v24553_v48 = vpack.c.bf16 %v24439_v16, %v24436_v15 }
  0x15   : > { %202 = vst [vmem:[#allocation2 + $0xf0] sm:$0xff] %v24348_v2  ;;  %203 = vst [vmem:[#allocation2 + $0xf8] sm:$0xff] %v24348_v2  ;;  %v24455_v20 = vld [vmem:[%s24402_s23 + $0x50] sm:$0xff]  ;;  %v24458_v21 = vld [vmem:[%s24402_s23 + $0x58] sm:$0xff]  ;;  %v24565_v51 = vpack.c.bf16 %v24446_v18, %v24443_v17 }
  0x16   : > { %204 = vst [vmem:[#allocation2 + $0x100] sm:$0x3] %v24348_v2  ;;  %205 = vst [vmem:[#allocation2 + $0x108] sm:$0xff] %v24348_v2  ;;  %v24461_v22 = vld [vmem:[%s24402_s23 + $0x60] sm:$0xff]  ;;  %v24466_v23 = vld [vmem:[%s24402_s23 + $0x68] sm:$0xff]  ;;  %v24569_v52 = vpack.c.bf16 %v24458_v21, %v24455_v20 }
  0x17   : > { %206 = vst [vmem:[#allocation2 + $0x110] sm:$0xff] %v24348_v2  ;;  %207 = vst [vmem:[#allocation2 + $0x118] sm:$0x3] %v24348_v2  ;;  %v24471_v24 = vld [vmem:[%s24402_s23 + $0x70] sm:$0xff]  ;;  %v24474_v25 = vld [vmem:[%s24402_s23 + $0x78] sm:$0xff]  ;;  %19768 = vmatpush3.bf16.msra.mxu0 %v23900_v14  ;;  %v24581_v55 = vpack.c.bf16 %v24466_v23, %v24461_v22 }
  0x18   : > { %208 = vst [vmem:[#allocation2 + $0x120] sm:$0xff] %v24348_v2  ;;  %209 = vst [vmem:[#allocation2 + $0x128] sm:$0xff] %v24348_v2  ;;  %v24479_v26 = vld [vmem:[%s24402_s23 + $0x80] sm:$0xff]  ;;  %v24482_v27 = vld [vmem:[%s24402_s23 + $0x88] sm:$0xff]  ;;  %19769 = vmatprep.subr.bf16.mxu0 %v23901_v19  ;;  %v24588_v57 = vpack.c.bf16 %v24474_v25, %v24471_v24 }
  0x19   : > { %210 = vst [vmem:[#allocation2 + $0x130] sm:$0x3] %v24348_v2  ;;  %211 = vst [vmem:[#allocation2 + $0x138] sm:$0xff] %v24348_v2  ;;  %v24490_v29 = vld [vmem:[%s24402_s23 + $0x90] sm:$0xff]  ;;  %v24493_v30 = vld [vmem:[%s24402_s23 + $0x98] sm:$0xff]  ;;  %v24597_v59 = vpack.c.bf16 %v24482_v27, %v24479_v26 }
  0x1a   : > { %212 = vst [vmem:[#allocation2 + $0x140] sm:$0xff] %v24348_v2  ;;  %213 = vst [vmem:[#allocation2 + $0x148] sm:$0x3] %v24348_v2  ;;  %v24497_v31 = vld [vmem:[%s24402_s23 + $0xa0] sm:$0xff]  ;;  %v24500_v32 = vld [vmem:[%s24402_s23 + $0xa8] sm:$0xff]  ;;  %v24601_v60 = vpack.c.bf16 %v24493_v30, %v24490_v29 }
  0x1b   : > { %214 = vst [vmem:[#allocation2 + $0x150] sm:$0xff] %v24348_v2  ;;  %215 = vst [vmem:[#allocation2 + $0x158] sm:$0xff] %v24348_v2  ;;  %v24506_v33 = vld [vmem:[%s24402_s23 + $0xb0] sm:$0xff]  ;;  %v24509_v34 = vld [vmem:[%s24402_s23 + $0xb8] sm:$0xff]  ;;  %19770 = vmatpush3.bf16.msra.mxu0 %v23901_v19  ;;  %v24607_v61 = vpack.c.bf16 %v24500_v32, %v24497_v31 }
  0x1c   : > { %216 = vst [vmem:[#allocation2 + $0x160] sm:$0x3] %v24348_v2  ;;  %217 = vst [vmem:[#allocation2 + $0x168] sm:$0xff] %v24348_v2  ;;  %v24512_v35 = vld [vmem:[%s24402_s23 + $0xc0] sm:$0xff]  ;;  %v24517_v36 = vld [vmem:[%s24402_s23 + $0xc8] sm:$0xff]  ;;  %19771 = vmatprep.subr.bf16.mxu0 %v23902_v28  ;;  %v24611_v62 = vpack.c.bf16 %v24509_v34, %v24506_v33 }
  0x1d   : > { %218 = vst [vmem:[#allocation2 + $0x170] sm:$0xff] %v24348_v2  ;;  %219 = vst [vmem:[#allocation2 + $0x178] sm:$0x3] %v24348_v2  ;;  %v252_v38 = vld [vmem:[%s24402_s23 + $0xd0] sm:$0xff]  ;;  %v253_v39 = vld [vmem:[%s24402_s23 + $0xd8] sm:$0xff]  ;;  %v24617_v63 = vpack.c.bf16 %v24517_v36, %v24512_v35 }
  0x1e   : > { %220 = vst [vmem:[#allocation2 + $0x180] sm:$0xff] %v24348_v2  ;;  %221 = vst [vmem:[#allocation2 + $0x188] sm:$0xff] %v24348_v2  ;;  %v254_v40 = vld [vmem:[%s24402_s23 + $0xe0] sm:$0xff]  ;;  %v255_v41 = vld [vmem:[%s24402_s23 + $0xe8] sm:$0xff]  ;;  %v24619_v0 = vpack.c.bf16 %v253_v39, %v252_v38 }
  0x1f   : > { %222 = vst [vmem:[#allocation2 + $0x190] sm:$0x3] %v24348_v2  ;;  %223 = vst [vmem:[#allocation2 + $0x198] sm:$0xff] %v24348_v2  ;;  %19772 = vmatpush3.bf16.msra.mxu0 %v23902_v28  ;;  %v24623_v1 = vpack.c.bf16 %v255_v41, %v254_v40  ;;  %v23913_v8 = vld [vmem:[%s27545_s1 + $0x88] sm:$0xff]   ;;  %v23914_v14 = vld [vmem:[%s27545_s1 + $0x90] sm:$0xff]  }
  0x20   : > { %224 = vst [vmem:[#allocation2 + $0x1a0] sm:$0xff] %v24348_v2  ;;  %225 = vst [vmem:[#allocation2 + $0x1a8] sm:$0x3] %v24348_v2  ;;  %19773 = vmatprep.subr.bf16.mxu0 %v23903_v37 }
  0x21   : > { %259 = vst [vmem:[#allocation2 + $0x19] sm:$0xff] %v24409_v7  ;;  %260 = vst [vmem:[#allocation2 + $0x21] sm:$0xff] %v24412_v9 }
  0x22   : > { %261 = vst [vmem:[#allocation2 + $0x31] sm:$0xff] %v24417_v10  ;;  %262 = vst [vmem:[#allocation2 + $0x39] sm:$0xff] %v24420_v11 }
  0x23   : > { %263 = vst [vmem:[#allocation2 + $0x49] sm:$0xff] %v24425_v12  ;;  %264 = vst [vmem:[#allocation2 + $0x51] sm:$0xff] %v24428_v13  ;;  %19774 = vmatpush3.bf16.msra.mxu0 %v23903_v37 }
  0x24   : > { %265 = vst [vmem:[#allocation2 + $0x61] sm:$0xff] %v24436_v15  ;;  %266 = vst [vmem:[#allocation2 + $0x69] sm:$0xff] %v24439_v16  ;;  %19807 = vmatprep.subr.bf16.mxu0 %v23904_v42  ;;  %v23915_v16 = vld [vmem:[%s27545_s1 + $0x98] sm:$0xff]  }
  0x25   : > { %267 = vst [vmem:[#allocation2 + $0x79] sm:$0xff] %v24443_v17  ;;  %268 = vst [vmem:[#allocation2 + $0x81] sm:$0xff] %v24446_v18 }
  0x26   : > { %269 = vst [vmem:[#allocation2 + $0x91] sm:$0xff] %v24455_v20  ;;  %270 = vst [vmem:[#allocation2 + $0x99] sm:$0xff] %v24458_v21  ;;  %19776 = vmatmul.mubr.bf16.vlgmr.msra.gmra.mrb[0].mxu0 %v24533_v43 }
  0x27   : > { %271 = vst [vmem:[#allocation2 + $0xa9] sm:$0xff] %v24461_v22  ;;  %272 = vst [vmem:[#allocation2 + $0xb1] sm:$0xff] %v24466_v23  ;;  %19808 = vmatpush3.bf16.msra.mxu0 %v23904_v42  ;;  %19779 = vmatprep.mubr.bf16.mxu0 %v24537_v44  ;;  %v23916_v22 = vld [vmem:[%s27545_s1 + $0xa0] sm:$0xff]  }
  0x28   : > { %273 = vst [vmem:[#allocation2 + $0xc1] sm:$0xff] %v24471_v24  ;;  %274 = vst [vmem:[#allocation2 + $0xc9] sm:$0xff] %v24474_v25  ;;  %19809 = vmatprep.subr.bf16.mxu0 %v23905_v45  ;;  %v294_v2 = vld [vmem:[#allocation2 + $0x18] sm:$0xff]  ;;  %v295_v3 = vld [vmem:[#allocation2 + $0x20] sm:$0xff] }
  0x29   : > { %275 = vst [vmem:[#allocation2 + $0xd9] sm:$0xff] %v24479_v26  ;;  %276 = vst [vmem:[#allocation2 + $0xe1] sm:$0xff] %v24482_v27  ;;  %v296_v4 = vld [vmem:[#allocation2 + $0x30] sm:$0xff]  ;;  %v297_v5 = vld [vmem:[#allocation2 + $0x38] sm:$0xff]  ;;  %v24626_v7 = vpack.c.bf16 %v295_v3, %v294_v2 }
  0x2a   : > { %277 = vst [vmem:[#allocation2 + $0xf1] sm:$0xff] %v24490_v29  ;;  %278 = vst [vmem:[#allocation2 + $0xf9] sm:$0xff] %v24493_v30  ;;  %v24631_v9 = vpack.c.bf16 %v297_v5, %v296_v4  ;;  %v298_v10 = vld [vmem:[#allocation2 + $0x48] sm:$0xff]  ;;  %v299_v11 = vld [vmem:[#allocation2 + $0x50] sm:$0xff] }
  0x2b   : > { %279 = vst [vmem:[#allocation2 + $0x109] sm:$0xff] %v24497_v31  ;;  %280 = vst [vmem:[#allocation2 + $0x111] sm:$0xff] %v24500_v32  ;;  %19810 = vmatpush3.bf16.msra.mxu0 %v23905_v45  ;;  %v300_v12 = vld [vmem:[#allocation2 + $0x60] sm:$0xff]  ;;  %v301_v13 = vld [vmem:[#allocation2 + $0x68] sm:$0xff]  ;;  %v24638_v15 = vpack.c.bf16 %v299_v11, %v298_v10 }
  0x2c   : > { %281 = vst [vmem:[#allocation2 + $0x121] sm:$0xff] %v24506_v33  ;;  %282 = vst [vmem:[#allocation2 + $0x129] sm:$0xff] %v24509_v34  ;;  %19811 = vmatprep.subr.bf16.mxu0 %v23906_v46  ;;  %v24643_v17 = vpack.c.bf16 %v301_v13, %v300_v12  ;;  %v302_v18 = vld [vmem:[#allocation2 + $0x78] sm:$0xff]  ;;  %v303_v19 = vld [vmem:[#allocation2 + $0x80] sm:$0xff] }
  0x2d   : > { %283 = vst [vmem:[#allocation2 + $0x139] sm:$0xff] %v24512_v35  ;;  %284 = vst [vmem:[#allocation2 + $0x141] sm:$0xff] %v24517_v36  ;;  %v304_v20 = vld [vmem:[#allocation2 + $0x90] sm:$0xff]  ;;  %v305_v21 = vld [vmem:[#allocation2 + $0x98] sm:$0xff]  ;;  %v24650_v23 = vpack.c.bf16 %v303_v19, %v302_v18 }
  0x2e   : > { %285 = vst [vmem:[#allocation2 + $0x151] sm:$0xff] %v252_v38  ;;  %286 = vst [vmem:[#allocation2 + $0x159] sm:$0xff] %v253_v39  ;;  %19780 = vmatmul.mubr.bf16.gmra.mrb[4].mxu0 %v24549_v47  ;;  %v23917_v24 = vld [vmem:[%s27545_s1 + $0xa8] sm:$0xff]   ;;  %v24655_v25 = vpack.c.bf16 %v305_v21, %v304_v20  ;;  %v307_v27 = vld [vmem:[#allocation2 + $0xb0] sm:$0xff] }
  0x2f   : > { %287 = vst [vmem:[#allocation2 + $0x169] sm:$0xff] %v254_v40  ;;  %288 = vst [vmem:[#allocation2 + $0x171] sm:$0xff] %v255_v41  ;;  %19783 = vmatprep.mubr.bf16.mxu0 %v24553_v48  ;;  %19812 = vmatpush3.bf16.msra.mxu0 %v23906_v46  ;;  %v306_v26 = vld [vmem:[#allocation2 + $0xa8] sm:$0xff]  ;;  %v308_v28 = vld [vmem:[#allocation2 + $0xc0] sm:$0xff] }
  0x30   : > { %19813 = vmatprep.subr.bf16.mxu0 %v23907_v49  ;;  %v309_v29 = vld [vmem:[#allocation2 + $0xc8] sm:$0xff]  ;;  %v23918_v30 = vld [vmem:[%s27545_s1 + $0xb0] sm:$0xff]   ;;  %v24662_v31 = vpack.c.bf16 %v307_v27, %v306_v26  ;;  %v23919_v32 = vld [vmem:[%s27545_s1 + $0xb8] sm:$0xff]  }
  0x31   : > { %v24667_v33 = vpack.c.bf16 %v309_v29, %v308_v28  ;;  %v310_v34 = vld [vmem:[#allocation2 + $0xd8] sm:$0xff]  ;;  %v311_v35 = vld [vmem:[#allocation2 + $0xe0] sm:$0xff]  ;;  %v312_v36 = vld [vmem:[#allocation2 + $0xf0] sm:$0xff] }
  0x32   : > { %v313_v37 = vld [vmem:[#allocation2 + $0xf8] sm:$0xff]  ;;  %v23920_v38 = vld [vmem:[%s27545_s1 + $0xc0] sm:$0xff]   ;;  %v24674_v39 = vpack.c.bf16 %v311_v35, %v310_v34  ;;  %v314_v41 = vld [vmem:[#allocation2 + $0x108] sm:$0xff] }
  0x33   : > { %19814 = vmatpush3.bf16.msra.mxu0 %v23907_v49  ;;  %v24676_v40 = vpack.c.bf16 %v313_v37, %v312_v36  ;;  %v315_v42 = vld [vmem:[#allocation2 + $0x110] sm:$0xff]  ;;  %v316_v45 = vld [vmem:[#allocation2 + $0x120] sm:$0xff]  ;;  %v317_v46 = vld [vmem:[#allocation2 + $0x128] sm:$0xff] }
  0x34   : > { %19815 = vmatprep.subr.bf16.mxu0 %v23908_v50  ;;  %v24680_v49 = vpack.c.bf16 %v315_v42, %v314_v41  ;;  %v256_v4 = vld [vmem:[%s24402_s23 + $0xf0] sm:$0xff]  ;;  %v257_v5 = vld [vmem:[%s24402_s23 + $0xf8] sm:$0xff]  ;;  %v839_v10 = vld [vmem:[#allocation2 + $0x2] sm:$0xff] }
  0x35   : > { %289 = vst [vmem:[#allocation2 + $0x181] sm:$0xff] %v256_v4  ;;  %290 = vst [vmem:[#allocation2 + $0x189] sm:$0xff] %v257_v5  ;;  %v840_v11 = vld [vmem:[#allocation2 + $0xa] sm:$0xff]  ;;  %v843_v18 = vld [vmem:[#allocation2 + $0x32] sm:$0xff] }
  0x36   : > { %19784 = vmatmul.mubr.bf16.gmra.mrb[8].mxu0 %v24565_v51  ;;  %v871_v13 = vpack.c.bf16 %v840_v11, %v839_v10  ;;  %v844_v19 = vld [vmem:[#allocation2 + $0x3a] sm:$0xff]  ;;  %v23921_v21 = vld [vmem:[%s27545_s1 + $0xc8] sm:$0xff]   ;;  %v846_v26 = vld [vmem:[#allocation2 + $0x52] sm:$0xff] }
  0x37   : > { %19787 = vmatprep.mubr.bf16.mxu0 %v24569_v52  ;;  %19816 = vmatpush3.bf16.msra.mxu0 %v23908_v50  ;;  %v24682_v50 = vpack.c.bf16 %v317_v46, %v316_v45  ;;  %v847_v27 = vld [vmem:[#allocation2 + $0x62] sm:$0xff]  ;;  %v848_v28 = vld [vmem:[#allocation2 + $0x6a] sm:$0xff]  ;;  %v849_v35 = vld [vmem:[#allocation2 + $0x7a] sm:$0xff] }
  0x38   : > { %19817 = vmatprep.subr.bf16.mxu0 %v23909_v53  ;;  %v23922_v29 = vld [vmem:[%s27545_s1 + $0xd0] sm:$0xff]   ;;  %v24714_v34 = vpack.c.bf16 %v848_v28, %v847_v27  ;;  %v850_v36 = vld [vmem:[#allocation2 + $0x82] sm:$0xff]  ;;  %v852_v41 = vld [vmem:[#allocation2 + $0x9a] sm:$0xff] }
  0x39   : > { %v851_v37 = vld [vmem:[#allocation2 + $0x92] sm:$0xff]  ;;  %v24721_v42 = vpack.c.bf16 %v850_v36, %v849_v35  ;;  %v23925_v45 = vld [vmem:[%s27545_s1 + $0xe8] sm:$0xff]   ;;  %v857_v10 = vld [vmem:[#allocation2 + $0xda] sm:$0xff] }
  0x3a   : > { %v24726_v46 = vpack.c.bf16 %v852_v41, %v851_v37  ;;  %v23926_v4 = vld [vmem:[%s27545_s1 + $0xf0] sm:$0xff]   ;;  %v858_v11 = vld [vmem:[#allocation2 + $0xe2] sm:$0xff]  ;;  %v868_v37 = vld [vmem:[#allocation2 + $0x15a] sm:$0xff] }
  0x3b   : > { %19818 = vmatpush3.bf16.msra.mxu0 %v23909_v53  ;;  %v318_v53 = vld [vmem:[#allocation2 + $0x138] sm:$0xff]  ;;  %v864_v27 = vld [vmem:[#allocation2 + $0x12a] sm:$0xff]  ;;  %v866_v35 = vld [vmem:[#allocation2 + $0x142] sm:$0xff] }
  0x3c   : > { %19819 = vmatprep.subr.bf16.mxu0 %v23910_v54  ;;  %v867_v36 = vld [vmem:[#allocation2 + $0x152] sm:$0xff] }
  0x3e   : > { %19788 = vmatmul.mubr.bf16.gmra.mrb[12].mxu0 %v24581_v55 }
  0x3f   : > { %19791 = vmatprep.mubr.bf16.mxu0 %v24588_v57  ;;  %19820 = vmatpush3.bf16.msra.mxu0 %v23910_v54  ;;  %v319_v54 = vld [vmem:[#allocation2 + $0x140] sm:$0xff] }
  0x40   : > { %19821 = vmatprep.subr.bf16.mxu0 %v23911_v56  ;;  %v24686_v2 = vpack.c.bf16 %v319_v54, %v318_v53  ;;  %v853_v53 = vld [vmem:[#allocation2 + $0xaa] sm:$0xff]  ;;  %v854_v54 = vld [vmem:[#allocation2 + $0xb2] sm:$0xff] }
  0x41   : > { %v24733_v5 = vpack.c.bf16 %v854_v54, %v853_v53  ;;  %v870_v53 = vld [vmem:[#allocation2 + $0x172] sm:$0xff] }
  0x43   : > { %19822 = vmatpush3.bf16.msra.mxu0 %v23911_v56  ;;  %v320_v56 = vld [vmem:[#allocation2 + $0x150] sm:$0xff] }
  0x44   : > { %19855 = vmatprep.subr.bf16.mxu0 %v23912_v58 }
  0x46   : > { %19792 = vmatmul.mubr.bf16.gmra.mrb[16].mxu0 %v24597_v59 }
  0x47   : > { %19795 = vmatprep.mubr.bf16.mxu0 %v24601_v60 }
  0x4e   : > { %19796 = vmatmul.mubr.bf16.gmra.mrb[20].mxu0 %v24607_v61 }
  0x4f   : > { %19799 = vmatprep.mubr.bf16.mxu0 %v24611_v62 }
  0x56   : > { %19800 = vmatmul.mubr.bf16.gmra.mrb[24].mxu0 %v24617_v63 }
  0x57   : > { %19803 = vmatprep.mubr.bf16.mxu0 %v24619_v0 }
  0x5e   : > { %19804 = vmatmul.mubr.bf16.gmra.mrb[28].mxu0 %v24623_v1 }
  0x5f   : > { %19823 = vmatprep.mubr.bf16.mxu0 %v24349_v6  ;;  %v322_v6 = vld [vmem:[#allocation2 + $0x168] sm:$0xff] }
  0x66   : > { %19824 = vmatmul.mubr.bf16.vlgmr.msra.gmra.mrb[0].mxu0 %v24626_v7 }
  0x67   : > { %19856 = vmatpush3.bf16.msra.mxu0 %v23912_v58  ;;  %19827 = vmatprep.mubr.bf16.mxu0 %v24631_v9  ;;  %v321_v58 = vld [vmem:[#allocation2 + $0x158] sm:$0xff] }
  0x68   : > { %19857 = vmatprep.subr.bf16.mxu0 %v23913_v8  ;;  %v24688_v3 = vpack.c.bf16 %v321_v58, %v320_v56  ;;  %v855_v56 = vld [vmem:[#allocation2 + $0xc2] sm:$0xff]  ;;  %v856_v58 = vld [vmem:[#allocation2 + $0xca] sm:$0xff] }
  0x6b   : > { %19858 = vmatpush3.bf16.msra.mxu0 %v23913_v8  ;;  %v323_v8 = vld [vmem:[#allocation2 + $0x170] sm:$0xff] }
  0x6c   : > { %19859 = vmatprep.subr.bf16.mxu0 %v23914_v14  ;;  %v24694_v12 = vpack.c.bf16 %v323_v8, %v322_v6  ;;  %v23927_v6 = vld [vmem:[%s27545_s1 + $0xf8] sm:$0xff]   ;;  %v24738_v8 = vpack.c.bf16 %v856_v58, %v855_v56  ;;  %v23929_v56 = vld [vmem:[%s27545_s1 + $0x108] sm:$0xff]   ;;  %v23930_v58 = vld [vmem:[%s27545_s1 + $0x110] sm:$0xff]  }
  0x6e   : > { %19828 = vmatmul.mubr.bf16.gmra.mrb[4].mxu0 %v24638_v15 }
  0x6f   : > { %19831 = vmatprep.mubr.bf16.mxu0 %v24643_v17  ;;  %19860 = vmatpush3.bf16.msra.mxu0 %v23914_v14  ;;  %v841_v14 = vld [vmem:[#allocation2 + $0x1a] sm:$0xff] }
  0x70   : > { %19861 = vmatprep.subr.bf16.mxu0 %v23915_v16 }
  0x73   : > { %19862 = vmatpush3.bf16.msra.mxu0 %v23915_v16  ;;  %v842_v16 = vld [vmem:[#allocation2 + $0x22] sm:$0xff] }
  0x74   : > { %19863 = vmatprep.subr.bf16.mxu0 %v23916_v22  ;;  %v24697_v20 = vpack.c.bf16 %v842_v16, %v841_v14  ;;  %v860_v14 = vld [vmem:[#allocation2 + $0xfa] sm:$0xff] }
  0x75   : > { %v23928_v16 = vld [vmem:[%s27545_s1 + $0x100] sm:$0xff]  }
  0x76   : > { %19832 = vmatmul.mubr.bf16.gmra.mrb[8].mxu0 %v24650_v23 }
  0x77   : > { %19835 = vmatprep.mubr.bf16.mxu0 %v24655_v25  ;;  %19864 = vmatpush3.bf16.msra.mxu0 %v23916_v22  ;;  %v24702_v22 = vpack.c.bf16 %v844_v19, %v843_v18  ;;  %v24745_v18 = vpack.c.bf16 %v858_v11, %v857_v10  ;;  %v23934_v10 = vld [vmem:[%s27545_s1 + $0x130] sm:$0xff]   ;;  %v23935_v11 = vld [vmem:[%s27545_s1 + $0x138] sm:$0xff]  }
  0x78   : > { %19865 = vmatprep.subr.bf16.mxu0 %v23917_v24 }
  0x7b   : > { %19866 = vmatpush3.bf16.msra.mxu0 %v23917_v24  ;;  %v845_v24 = vld [vmem:[#allocation2 + $0x4a] sm:$0xff] }
  0x7c   : > { %19867 = vmatprep.subr.bf16.mxu0 %v23918_v30 }
  0x7e   : > { %19836 = vmatmul.mubr.bf16.gmra.mrb[12].mxu0 %v24662_v31 }
  0x7f   : > { %19839 = vmatprep.mubr.bf16.mxu0 %v24667_v33  ;;  %19868 = vmatpush3.bf16.msra.mxu0 %v23918_v30  ;;  %v24709_v30 = vpack.c.bf16 %v846_v26, %v845_v24  ;;  %v862_v24 = vld [vmem:[#allocation2 + $0x112] sm:$0xff]  ;;  %v863_v26 = vld [vmem:[#allocation2 + $0x122] sm:$0xff] }
  0x80   : > { %19869 = vmatprep.subr.bf16.mxu0 %v23919_v32 }
  0x83   : > { %19870 = vmatpush3.bf16.msra.mxu0 %v23919_v32  ;;  %v23923_v32 = vld [vmem:[%s27545_s1 + $0xd8] sm:$0xff]  }
  0x84   : > { %19903 = vmatprep.subr.bf16.mxu0 %v23920_v38 }
  0x86   : > { %19840 = vmatmul.mubr.bf16.gmra.mrb[16].mxu0 %v24674_v39 }
  0x87   : > { %19843 = vmatprep.mubr.bf16.mxu0 %v24676_v40 }
  0x8e   : > { %19844 = vmatmul.mubr.bf16.gmra.mrb[20].mxu0 %v24680_v49 }
  0x8f   : > { %19847 = vmatprep.mubr.bf16.mxu0 %v24682_v50 }
  0x96   : > { %19848 = vmatmul.mubr.bf16.gmra.mrb[24].mxu0 %v24686_v2 }
  0x97   : > { %19851 = vmatprep.mubr.bf16.mxu0 %v24688_v3 }
  0x9e   : > { %19852 = vmatmul.mubr.bf16.gmra.mrb[28].mxu0 %v24694_v12 }
  0x9f   : > { %19871 = vmatprep.mubr.bf16.mxu0 %v871_v13  ;;  %v859_v13 = vld [vmem:[#allocation2 + $0xf2] sm:$0xff] }
  0xa0   : > { %v24747_v19 = vpack.c.bf16 %v860_v14, %v859_v13  ;;  %v23936_v13 = vld [vmem:[%s27545_s1 + $0x140] sm:$0xff]  }
  0xa1   : > { %v1175_v14 = vld [vmem:[#allocation2 + $0x180] sm:$0xff] }
  0xa6   : > { %19872 = vmatmul.mubr.bf16.vlgmr.msra.gmra.mrb[0].mxu0 %v24697_v20 }
  0xa7   : > { %19904 = vmatpush3.bf16.msra.mxu0 %v23920_v38  ;;  %19875 = vmatprep.mubr.bf16.mxu0 %v24702_v22  ;;  %v23924_v38 = vld [vmem:[%s27545_s1 + $0xe0] sm:$0xff]  }
  0xa8   : > { %19905 = vmatprep.subr.bf16.mxu0 %v23921_v21 }
  0xab   : > { %19906 = vmatpush3.bf16.msra.mxu0 %v23921_v21  ;;  %v861_v21 = vld [vmem:[#allocation2 + $0x10a] sm:$0xff] }
  0xac   : > { %19907 = vmatprep.subr.bf16.mxu0 %v23922_v29  ;;  %v24751_v28 = vpack.c.bf16 %v862_v24, %v861_v21  ;;  %v23937_v24 = vld [vmem:[%s27545_s1 + $0x148] sm:$0xff]  }
  0xae   : > { %19876 = vmatmul.mubr.bf16.gmra.mrb[4].mxu0 %v24709_v30 }
  0xaf   : > { %19879 = vmatprep.mubr.bf16.mxu0 %v24714_v34  ;;  %19908 = vmatpush3.bf16.msra.mxu0 %v23922_v29  ;;  %v24753_v29 = vpack.c.bf16 %v864_v27, %v863_v26  ;;  %v23938_v26 = vld [vmem:[%s27545_s1 + $0x150] sm:$0xff]   ;;  %v23939_v27 = vld [vmem:[%s27545_s1 + $0x158] sm:$0xff]  }
  0xb0   : > { %19909 = vmatprep.subr.bf16.mxu0 %v23923_v32 }
  0xb3   : > { %19910 = vmatpush3.bf16.msra.mxu0 %v23923_v32  ;;  %v865_v32 = vld [vmem:[#allocation2 + $0x13a] sm:$0xff] }
  0xb4   : > { %19911 = vmatprep.subr.bf16.mxu0 %v23924_v38  ;;  %v24757_v41 = vpack.c.bf16 %v866_v35, %v865_v32  ;;  %v23961_v32 = vld [vmem:[%s27545_s1 + $0x208] sm:$0xff]   ;;  %v2376_v35 = vld [vmem:[#allocation2 + $0x79] sm:$0xff] }
  0xb6   : > { %19880 = vmatmul.mubr.bf16.gmra.mrb[8].mxu0 %v24721_v42 }
  0xb7   : > { %19883 = vmatprep.mubr.bf16.mxu0 %v24726_v46  ;;  %19912 = vmatpush3.bf16.msra.mxu0 %v23924_v38  ;;  %v24759_v38 = vpack.c.bf16 %v868_v37, %v867_v36  ;;  %v2377_v36 = vld [vmem:[#allocation2 + $0x81] sm:$0xff]  ;;  %v2378_v37 = vld [vmem:[#allocation2 + $0x91] sm:$0xff] }
  0xb8   : > { %19913 = vmatprep.subr.bf16.mxu0 %v23925_v45 }
  0xbb   : > { %19914 = vmatpush3.bf16.msra.mxu0 %v23925_v45  ;;  %v869_v45 = vld [vmem:[#allocation2 + $0x16a] sm:$0xff] }
  0xbc   : > { %19915 = vmatprep.subr.bf16.mxu0 %v23926_v4  ;;  %v24763_v54 = vpack.c.bf16 %v870_v53, %v869_v45  ;;  %v2405_v45 = vpack.c.bf16 %v2377_v36, %v2376_v35  ;;  %v2690_v36 = vld [vmem:[#allocation2 + $0xda] sm:$0xff] }
  0xbe   : > { %19884 = vmatmul.mubr.bf16.gmra.mrb[12].mxu0 %v24733_v5 }
  0xbf   : > { %19887 = vmatprep.mubr.bf16.mxu0 %v24738_v8  ;;  %19916 = vmatpush3.bf16.msra.mxu0 %v23926_v4  ;;  %v23931_v4 = vld [vmem:[%s27545_s1 + $0x118] sm:$0xff]  }
  0xc0   : > { %19917 = vmatprep.subr.bf16.mxu0 %v23927_v6 }
  0xc3   : > { %19918 = vmatpush3.bf16.msra.mxu0 %v23927_v6  ;;  %v23933_v6 = vld [vmem:[%s27545_s1 + $0x128] sm:$0xff]  }
  0xc4   : > { %19951 = vmatprep.subr.bf16.mxu0 %v23928_v16 }
  0xc6   : > { %19888 = vmatmul.mubr.bf16.gmra.mrb[16].mxu0 %v24745_v18 }
  0xc7   : > { %19891 = vmatprep.mubr.bf16.mxu0 %v24747_v19 }
  0xce   : > { %19892 = vmatmul.mubr.bf16.gmra.mrb[20].mxu0 %v24751_v28 }
  0xcf   : > { %19895 = vmatprep.mubr.bf16.mxu0 %v24753_v29 }
  0xd6   : > { %19896 = vmatmul.mubr.bf16.gmra.mrb[24].mxu0 %v24757_v41 }
  0xd7   : > { %19899 = vmatprep.mubr.bf16.mxu0 %v24759_v38 }
  0xde   : > { %19900 = vmatmul.mubr.bf16.gmra.mrb[28].mxu0 %v24763_v54 }
  0xdf   : > { %19919 = vmatprep.mubr.bf16.mxu0 %v24626_v7  ;;  %v23932_v7 = vld [vmem:[%s27545_s1 + $0x120] sm:$0xff]  }
  0xe6   : > { %19920 = vmatmul.mubr.bf16.vlgmr.msra.gmra.mrb[0].mxu0 %v24631_v9 }
  0xe7   : > { %19952 = vmatpush3.bf16.msra.mxu0 %v23928_v16  ;;  %19923 = vmatprep.mubr.bf16.mxu0 %v24638_v15  ;;  %v1176_v16 = vld [vmem:[#allocation2 + $0x188] sm:$0xff] }
  0xe8   : > { %19953 = vmatprep.subr.bf16.mxu0 %v23929_v56  ;;  %v24805_v21 = vpack.c.bf16 %v1176_v16, %v1175_v14  ;;  %v2384_v14 = vld [vmem:[#allocation2 + $0xd9] sm:$0xff]  ;;  %v2385_v16 = vld [vmem:[#allocation2 + $0xe1] sm:$0xff] }
  0xeb   : > { %19954 = vmatpush3.bf16.msra.mxu0 %v23929_v56  ;;  %v2380_v56 = vld [vmem:[#allocation2 + $0xa9] sm:$0xff] }
  0xec   : > { %19955 = vmatprep.subr.bf16.mxu0 %v23930_v58 }
  0xee   : > { %19924 = vmatmul.mubr.bf16.gmra.mrb[4].mxu0 %v24643_v17 }
  0xef   : > { %19927 = vmatprep.mubr.bf16.mxu0 %v24650_v23  ;;  %19956 = vmatpush3.bf16.msra.mxu0 %v23930_v58  ;;  %v2381_v58 = vld [vmem:[#allocation2 + $0xb1] sm:$0xff] }
  0xf0   : > { %19957 = vmatprep.subr.bf16.mxu0 %v23931_v4 }
  0xf3   : > { %19958 = vmatpush3.bf16.msra.mxu0 %v23931_v4  ;;  %v2382_v4 = vld [vmem:[#allocation2 + $0xc1] sm:$0xff] }
  0xf4   : > { %19959 = vmatprep.subr.bf16.mxu0 %v23932_v7 }
  0xf6   : > { %19928 = vmatmul.mubr.bf16.gmra.mrb[8].mxu0 %v24655_v25 }
  0xf7   : > { %19931 = vmatprep.mubr.bf16.mxu0 %v24662_v31  ;;  %19960 = vmatpush3.bf16.msra.mxu0 %v23932_v7  ;;  %v2383_v7 = vld [vmem:[#allocation2 + $0xc9] sm:$0xff] }
  0xf8   : > { %19961 = vmatprep.subr.bf16.mxu0 %v23933_v6 }
  0xfb   : > { %19962 = vmatpush3.bf16.msra.mxu0 %v23933_v6  ;;  %v23964_v6 = vld [vmem:[%s27545_s1 + $0x220] sm:$0xff]  }
  0xfc   : > { %19963 = vmatprep.subr.bf16.mxu0 %v23934_v10 }
  0xfe   : > { %19932 = vmatmul.mubr.bf16.gmra.mrb[12].mxu0 %v24667_v33 }
  0xff   : > { %19935 = vmatprep.mubr.bf16.mxu0 %v24674_v39  ;;  %19964 = vmatpush3.bf16.msra.mxu0 %v23934_v10  ;;  %v2407_v10 = vpack.c.bf16 %v2381_v58, %v2380_v56  ;;  %v2695_v56 = vld [vmem:[#allocation2 + $0x112] sm:$0xff]  ;;  %v2696_v58 = vld [vmem:[#allocation2 + $0x122] sm:$0xff] }
 0x100   : > { %19965 = vmatprep.subr.bf16.mxu0 %v23935_v11 }
 0x103   : > { %19966 = vmatpush3.bf16.msra.mxu0 %v23935_v11  ;;  %v2408_v11 = vpack.c.bf16 %v2383_v7, %v2382_v4  ;;  %v2697_v4 = vld [vmem:[#allocation2 + $0x12a] sm:$0xff] }
 0x104   : > { %19999 = vmatprep.subr.bf16.mxu0 %v23936_v13 }
 0x106   : > { %19936 = vmatmul.mubr.bf16.gmra.mrb[16].mxu0 %v24676_v40 }
 0x107   : > { %19939 = vmatprep.mubr.bf16.mxu0 %v24680_v49 }
 0x10e   : > { %19940 = vmatmul.mubr.bf16.gmra.mrb[20].mxu0 %v24682_v50 }
 0x10f   : > { %19943 = vmatprep.mubr.bf16.mxu0 %v24686_v2 }
 0x116   : > { %19944 = vmatmul.mubr.bf16.gmra.mrb[24].mxu0 %v24688_v3 }
 0x117   : > { %19947 = vmatprep.mubr.bf16.mxu0 %v24694_v12 }
 0x11e   : > { %19948 = vmatmul.mubr.bf16.gmra.mrb[28].mxu0 %v24805_v21 }
 0x11f   : > { %19967 = vmatprep.mubr.bf16.mxu0 %v24533_v43  ;;  %v23940_v43 = vld [vmem:[%s27545_s1 + $0x160] sm:$0xff]  }
 0x126   : > { %19968 = vmatmul.mubr.bf16.vlgmr.msra.gmra.mrb[0].mxu0 %v24537_v44  ;;  %v23941_v44 = vld [vmem:[%s27545_s1 + $0x168] sm:$0xff]  }
 0x127   : > { %20000 = vmatpush3.bf16.msra.mxu0 %v23936_v13  ;;  %19971 = vmatprep.mubr.bf16.mxu0 %v24549_v47  ;;  %v23942_v47 = vld [vmem:[%s27545_s1 + $0x170] sm:$0xff]   ;;  %v23965_v13 = vld [vmem:[%s27545_s1 + $0x228] sm:$0xff]  }
 0x128   : > { %20001 = vmatprep.subr.bf16.mxu0 %v23937_v24 }
 0x12b   : > { %20002 = vmatpush3.bf16.msra.mxu0 %v23937_v24  ;;  %v2387_v24 = vld [vmem:[#allocation2 + $0xf9] sm:$0xff] }
 0x12c   : > { %20003 = vmatprep.subr.bf16.mxu0 %v23938_v26 }
 0x12e   : > { %19972 = vmatmul.mubr.bf16.gmra.mrb[4].mxu0 %v24553_v48  ;;  %v23943_v48 = vld [vmem:[%s27545_s1 + $0x178] sm:$0xff]  }
 0x12f   : > { %19975 = vmatprep.mubr.bf16.mxu0 %v24565_v51  ;;  %20004 = vmatpush3.bf16.msra.mxu0 %v23938_v26  ;;  %v23944_v51 = vld [vmem:[%s27545_s1 + $0x180] sm:$0xff]   ;;  %v23966_v26 = vld [vmem:[%s27545_s1 + $0x230] sm:$0xff]  }
 0x130   : > { %20005 = vmatprep.subr.bf16.mxu0 %v23939_v27 }
 0x133   : > { %20006 = vmatpush3.bf16.msra.mxu0 %v23939_v27  ;;  %v2409_v27 = vpack.c.bf16 %v2385_v16, %v2384_v14  ;;  %v2701_v14 = vld [vmem:[#allocation2 + $0x15a] sm:$0xff] }
 0x134   : > { %20007 = vmatprep.subr.bf16.mxu0 %v23940_v43 }
 0x136   : > { %19976 = vmatmul.mubr.bf16.gmra.mrb[8].mxu0 %v24569_v52  ;;  %v24328_v52 = vld [vmem:[#allocation2 + $0x181] sm:$0xff] }
 0x137   : > { %19979 = vmatprep.mubr.bf16.mxu0 %v24581_v55  ;;  %20008 = vmatpush3.bf16.msra.mxu0 %v23940_v43  ;;  %v24329_v55 = vld [vmem:[#allocation2 + $0x189] sm:$0xff] }
 0x138   : > { %20009 = vmatprep.subr.bf16.mxu0 %v23941_v44 }
 0x13b   : > { %20010 = vmatpush3.bf16.msra.mxu0 %v23941_v44  ;;  %v23967_v44 = vld [vmem:[%s27545_s1 + $0x238] sm:$0xff]  }
 0x13c   : > { %20011 = vmatprep.subr.bf16.mxu0 %v23942_v47 }
 0x13e   : > { %19980 = vmatmul.mubr.bf16.gmra.mrb[12].mxu0 %v24588_v57  ;;  %v24847_v57 = vpack.c.bf16 %v24329_v55, %v24328_v52  ;;  %v2391_v52 = vld [vmem:[#allocation2 + $0x129] sm:$0xff] }
 0x13f   : > { %19983 = vmatprep.mubr.bf16.mxu0 %v24597_v59  ;;  %20012 = vmatpush3.bf16.msra.mxu0 %v23942_v47  ;;  %v23945_v59 = vld [vmem:[%s27545_s1 + $0x188] sm:$0xff]  }
 0x140   : > { %20013 = vmatprep.subr.bf16.mxu0 %v23943_v48  ;;  %v2388_v47 = vld [vmem:[#allocation2 + $0x109] sm:$0xff] }
 0x143   : > { %20014 = vmatpush3.bf16.msra.mxu0 %v23943_v48  ;;  %v2389_v48 = vld [vmem:[#allocation2 + $0x111] sm:$0xff] }
 0x144   : > { %20047 = vmatprep.subr.bf16.mxu0 %v23944_v51  ;;  %v2411_v55 = vpack.c.bf16 %v2389_v48, %v2388_v47  ;;  %v23971_v48 = vld [vmem:[%s27545_s1 + $0x298] sm:$0xff]  }
 0x146   : > { %19984 = vmatmul.mubr.bf16.gmra.mrb[16].mxu0 %v24601_v60  ;;  %v23946_v60 = vld [vmem:[%s27545_s1 + $0x190] sm:$0xff]  }
 0x147   : > { %19987 = vmatprep.mubr.bf16.mxu0 %v24607_v61  ;;  %v23947_v61 = vld [vmem:[%s27545_s1 + $0x198] sm:$0xff]  }
 0x14e   : > { %19988 = vmatmul.mubr.bf16.gmra.mrb[20].mxu0 %v24611_v62  ;;  %v23948_v62 = vld [vmem:[%s27545_s1 + $0x1a0] sm:$0xff]  }
 0x14f   : > { %19991 = vmatprep.mubr.bf16.mxu0 %v24617_v63  ;;  %v23949_v63 = vld [vmem:[%s27545_s1 + $0x1a8] sm:$0xff]  }
 0x156   : > { %19992 = vmatmul.mubr.bf16.gmra.mrb[24].mxu0 %v24619_v0  ;;  %v23950_v0 = vld [vmem:[%s27545_s1 + $0x1b0] sm:$0xff]  }
 0x157   : > { %19995 = vmatprep.mubr.bf16.mxu0 %v24623_v1  ;;  %v23951_v1 = vld [vmem:[%s27545_s1 + $0x1b8] sm:$0xff]  }
 0x15e   : > { %19996 = vmatmul.mubr.bf16.gmra.mrb[28].mxu0 %v24847_v57 }
 0x15f   : > { %20015 = vmatprep.mubr.bf16.mxu0 %v24697_v20  ;;  %v23952_v20 = vld [vmem:[%s27545_s1 + $0x1c0] sm:$0xff]  }
 0x166   : > { %20016 = vmatmul.mubr.bf16.vlgmr.msra.gmra.mrb[0].mxu0 %v24702_v22  ;;  %v1787_v22 = vld [vmem:[#allocation2 + $0x182] sm:$0xff] }
 0x167   : > { %20048 = vmatpush3.bf16.msra.mxu0 %v23944_v51  ;;  %20019 = vmatprep.mubr.bf16.mxu0 %v24709_v30  ;;  %v1788_v30 = vld [vmem:[#allocation2 + $0x18a] sm:$0xff]  ;;  %v2390_v51 = vld [vmem:[#allocation2 + $0x121] sm:$0xff] }
 0x168   : > { %20049 = vmatprep.subr.bf16.mxu0 %v23945_v59 }
 0x16b   : > { %20050 = vmatpush3.bf16.msra.mxu0 %v23945_v59  ;;  %v2412_v59 = vpack.c.bf16 %v2391_v52, %v2390_v51  ;;  %v23972_v51 = vld [vmem:[%s27545_s1 + $0x2a0] sm:$0xff]   ;;  %v23974_v52 = vld [vmem:[%s27545_s1 + $0x2b0] sm:$0xff]  }
 0x16c   : > { %20051 = vmatprep.subr.bf16.mxu0 %v23946_v60 }
 0x16e   : > { %20020 = vmatmul.mubr.bf16.gmra.mrb[4].mxu0 %v24714_v34  ;;  %v24889_v34 = vpack.c.bf16 %v1788_v30, %v1787_v22  ;;  %v2397_v22 = vld [vmem:[#allocation2 + $0x171] sm:$0xff] }
 0x16f   : > { %20023 = vmatprep.mubr.bf16.mxu0 %v24721_v42  ;;  %20052 = vmatpush3.bf16.msra.mxu0 %v23946_v60  ;;  %v23953_v42 = vld [vmem:[%s27545_s1 + $0x1c8] sm:$0xff]   ;;  %v2392_v60 = vld [vmem:[#allocation2 + $0x139] sm:$0xff] }
 0x170   : > { %20053 = vmatprep.subr.bf16.mxu0 %v23947_v61 }
 0x173   : > { %20054 = vmatpush3.bf16.msra.mxu0 %v23947_v61  ;;  %v2393_v61 = vld [vmem:[#allocation2 + $0x141] sm:$0xff] }
 0x174   : > { %20055 = vmatprep.subr.bf16.mxu0 %v23948_v62 }
 0x176   : > { %20024 = vmatmul.mubr.bf16.gmra.mrb[8].mxu0 %v24726_v46  ;;  %v23954_v46 = vld [vmem:[%s27545_s1 + $0x1d0] sm:$0xff]  }
 0x177   : > { %20027 = vmatprep.mubr.bf16.mxu0 %v24733_v5  ;;  %20056 = vmatpush3.bf16.msra.mxu0 %v23948_v62  ;;  %v2394_v62 = vld [vmem:[#allocation2 + $0x151] sm:$0xff] }
 0x178   : > { %20057 = vmatprep.subr.bf16.mxu0 %v23949_v63 }
 0x17b   : > { %20058 = vmatpush3.bf16.msra.mxu0 %v23949_v63  ;;  %v2395_v63 = vld [vmem:[#allocation2 + $0x159] sm:$0xff] }
 0x17c   : > { %20059 = vmatprep.subr.bf16.mxu0 %v23950_v0 }
 0x17e   : > { %20028 = vmatmul.mubr.bf16.gmra.mrb[12].mxu0 %v24738_v8 }
 0x17f   : > { %20031 = vmatprep.mubr.bf16.mxu0 %v24745_v18  ;;  %20060 = vmatpush3.bf16.msra.mxu0 %v23950_v0  ;;  %v2375_v18 = vld [vmem:[#allocation2 + $0x69] sm:$0xff]  ;;  %v2413_v0 = vpack.c.bf16 %v2393_v61, %v2392_v60 }
 0x180   : > { %20061 = vmatprep.subr.bf16.mxu0 %v23951_v1  ;;  %v3184_v60 = vld [vmem:[#allocation2 + $0x9] sm:$0xff] }
 0x183   : > { %20062 = vmatpush3.bf16.msra.mxu0 %v23951_v1  ;;  %v2414_v1 = vpack.c.bf16 %v2395_v63, %v2394_v62  ;;  %v23976_v62 = vld [vmem:[%s27545_s1 + $0x240] sm:$0xff]   ;;  %v2982_v63 = vlaneseq }
 0x184   : > { %20095 = vmatprep.subr.bf16.mxu0 %v23952_v20 }
 0x186   : > { %20032 = vmatmul.mubr.bf16.gmra.mrb[16].mxu0 %v24747_v19 }
 0x187   : > { %20035 = vmatprep.mubr.bf16.mxu0 %v24751_v28  ;;  %v23970_v28 = vld [vmem:[%s27545_s1 + $0x290] sm:$0xff]  }
 0x18e   : > { %20036 = vmatmul.mubr.bf16.gmra.mrb[20].mxu0 %v24753_v29 }
 0x18f   : > { %20039 = vmatprep.mubr.bf16.mxu0 %v24757_v41  ;;  %v2379_v41 = vld [vmem:[#allocation2 + $0x99] sm:$0xff] }
 0x190   : > { %v2406_v53 = vpack.c.bf16 %v2379_v41, %v2378_v37  ;;  %v2691_v37 = vld [vmem:[#allocation2 + $0xe2] sm:$0xff]  ;;  %v2692_v41 = vld [vmem:[#allocation2 + $0xf2] sm:$0xff] }
 0x196   : > { %20040 = vmatmul.mubr.bf16.gmra.mrb[24].mxu0 %v24759_v38  ;;  %v23962_v38 = vld [vmem:[%s27545_s1 + $0x210] sm:$0xff]  }
 0x197   : > { %20043 = vmatprep.mubr.bf16.mxu0 %v24763_v54  ;;  %v23963_v54 = vld [vmem:[%s27545_s1 + $0x218] sm:$0xff]  }
 0x19e   : > { %20044 = vmatmul.mubr.bf16.gmra.mrb[28].mxu0 %v24889_v34 }
 0x19f   : > { %20063 = vmatprep.mubr.bf16.mxu0 %v24631_v9  ;;  %v23955_v9 = vld [vmem:[%s27545_s1 + $0x1d8] sm:$0xff]  }
 0x1a6   : > { %20064 = vmatmul.mubr.bf16.vlgmr.msra.gmra.mrb[0].mxu0 %v24638_v15  ;;  %v23956_v15 = vld [vmem:[%s27545_s1 + $0x1e0] sm:$0xff]  }
 0x1a7   : > { %20096 = vmatpush3.bf16.msra.mxu0 %v23952_v20  ;;  %20067 = vmatprep.mubr.bf16.mxu0 %v24643_v17  ;;  %v23957_v17 = vld [vmem:[%s27545_s1 + $0x1e8] sm:$0xff]  }
 0x1a8   : > { %20097 = vmatprep.subr.bf16.mxu0 %v23953_v42  ;;  %v2396_v20 = vld [vmem:[#allocation2 + $0x169] sm:$0xff] }
 0x1a9   : > { %v2415_v30 = vpack.c.bf16 %v2397_v22, %v2396_v20  ;;  %v291_v20 = vld [vmem:[%s27546_s2] sm:$0xff] }
 0x1ab   : > { %20098 = vmatpush3.bf16.msra.mxu0 %v23953_v42  ;;  %v2400_v42 = vld [vmem:[#allocation2 + $0x199] sm:$0xff] }
 0x1ac   : > { %20099 = vmatprep.subr.bf16.mxu0 %v23954_v46 }
 0x1ae   : > { %20068 = vmatmul.mubr.bf16.gmra.mrb[4].mxu0 %v24650_v23  ;;  %v23958_v23 = vld [vmem:[%s27545_s1 + $0x1f0] sm:$0xff]  }
 0x1af   : > { %20071 = vmatprep.mubr.bf16.mxu0 %v24655_v25  ;;  %20100 = vmatpush3.bf16.msra.mxu0 %v23954_v46  ;;  %v23959_v25 = vld [vmem:[%s27545_s1 + $0x1f8] sm:$0xff]   ;;  %v2401_v46 = vld [vmem:[#allocation2 + $0x1a1] sm:$0xff] }
 0x1b0   : > { %20101 = vmatprep.subr.bf16.mxu0 %v23955_v9 }
 0x1b3   : > { %20102 = vmatpush3.bf16.msra.mxu0 %v23955_v9  ;;  %v2676_v9 = vld [vmem:[#allocation2 + $0x32] sm:$0xff] }
 0x1b4   : > { %20103 = vmatprep.subr.bf16.mxu0 %v23956_v15 }
 0x1b6   : > { %20072 = vmatmul.mubr.bf16.gmra.mrb[8].mxu0 %v24662_v31  ;;  %v23960_v31 = vld [vmem:[%s27545_s1 + $0x200] sm:$0xff]  }
 0x1b7   : > { %20075 = vmatprep.mubr.bf16.mxu0 %v24667_v33  ;;  %20104 = vmatpush3.bf16.msra.mxu0 %v23956_v15  ;;  %v2370_v33 = vld [vmem:[#allocation2 + $0x31] sm:$0xff]  ;;  %v2677_v15 = vld [vmem:[#allocation2 + $0x3a] sm:$0xff] }
 0x1b8   : > { %20105 = vmatprep.subr.bf16.mxu0 %v23957_v17 }
 0x1bb   : > { %20106 = vmatpush3.bf16.msra.mxu0 %v23957_v17  ;;  %v2417_v17 = vpack.c.bf16 %v2401_v46, %v2400_v42 }
 0x1bc   : > { %20107 = vmatprep.subr.bf16.mxu0 %v23958_v23 }
 0x1be   : > { %20076 = vmatmul.mubr.bf16.gmra.mrb[12].mxu0 %v24674_v39  ;;  %v2371_v39 = vld [vmem:[#allocation2 + $0x39] sm:$0xff] }
 0x1bf   : > { %20079 = vmatprep.mubr.bf16.mxu0 %v24676_v40  ;;  %20108 = vmatpush3.bf16.msra.mxu0 %v23958_v23  ;;  %v24330_v40 = vld [vmem:[#allocation2] sm:$0xff]  ;;  %v2402_v8 = vpack.c.bf16 %v2371_v39, %v2370_v33  ;;  %v2708_v23 = vpack.c.bf16 %v2677_v15, %v2676_v9  ;;  %v2681_v39 = vld [vmem:[#allocation2 + $0x6a] sm:$0xff] }
 0x1c0   : > { %20109 = vmatprep.subr.bf16.mxu0 %v23959_v25  ;;  %v24931_v5 = vpack.c.bf16 %v24330_v40, %v24330_v40  ;;  %v2680_v33 = vld [vmem:[#allocation2 + $0x62] sm:$0xff] }
 0x1c3   : > { %20110 = vmatpush3.bf16.msra.mxu0 %v23959_v25  ;;  %v2678_v25 = vld [vmem:[#allocation2 + $0x4a] sm:$0xff] }
 0x1c4   : > { %20143 = vmatprep.subr.bf16.mxu0 %v23960_v31 }
 0x1c6   : > { %20080 = vmatmul.mubr.bf16.gmra.mrb[16].mxu0 %v24680_v49  ;;  %v23968_v49 = vld [vmem:[%s27545_s1 + $0x280] sm:$0xff]  }
 0x1c7   : > { %20083 = vmatprep.mubr.bf16.mxu0 %v24682_v50  ;;  %v23969_v50 = vld [vmem:[%s27545_s1 + $0x288] sm:$0xff]   ;;  %20191 = vmatprep.subr.bf16.mxu1 %v23968_v49 }
 0x1c8   : > { %20192 = vmatpush3.bf16.msra.mxu1 %v23968_v49  ;;  %v2682_v49 = vld [vmem:[#allocation2 + $0x7a] sm:$0xff] }
 0x1c9   : > { %20193 = vmatprep.subr.bf16.mxu1 %v23969_v50 }
 0x1cc   : > { %20194 = vmatpush3.bf16.msra.mxu1 %v23969_v50  ;;  %v2683_v50 = vld [vmem:[#allocation2 + $0x82] sm:$0xff] }
 0x1cd   : > { %20195 = vmatprep.subr.bf16.mxu1 %v23970_v28 }
 0x1ce   : > { %20084 = vmatmul.mubr.bf16.gmra.mrb[20].mxu0 %v24686_v2  ;;  %v2372_v2 = vld [vmem:[#allocation2 + $0x49] sm:$0xff] }
 0x1cf   : > { %20087 = vmatprep.mubr.bf16.mxu0 %v24688_v3  ;;  %v2373_v3 = vld [vmem:[#allocation2 + $0x51] sm:$0xff] }
 0x1d0   : > { %v2403_v19 = vpack.c.bf16 %v2373_v3, %v2372_v2  ;;  %20196 = vmatpush3.bf16.msra.mxu1 %v23970_v28  ;;  %v2684_v2 = vld [vmem:[#allocation2 + $0x92] sm:$0xff]  ;;  %v2711_v3 = vpack.c.bf16 %v2683_v50, %v2682_v49  ;;  %v2688_v28 = vld [vmem:[#allocation2 + $0xc2] sm:$0xff] }
 0x1d1   : > { %20197 = vmatprep.subr.bf16.mxu1 %v23971_v48 }
 0x1d4   : > { %20198 = vmatpush3.bf16.msra.mxu1 %v23971_v48 }
 0x1d5   : > { %20199 = vmatprep.subr.bf16.mxu1 %v23972_v51 }
 0x1d6   : > { %20088 = vmatmul.mubr.bf16.gmra.mrb[24].mxu0 %v24694_v12  ;;  %v2374_v12 = vld [vmem:[#allocation2 + $0x61] sm:$0xff] }
 0x1d7   : > { %20091 = vmatprep.mubr.bf16.mxu0 %v24805_v21  ;;  %v2404_v29 = vpack.c.bf16 %v2375_v18, %v2374_v12  ;;  %v2386_v21 = vld [vmem:[#allocation2 + $0xf1] sm:$0xff] }
 0x1d8   : > { %v2410_v43 = vpack.c.bf16 %v2387_v24, %v2386_v21  ;;  %v2686_v18 = vld [vmem:[#allocation2 + $0xaa] sm:$0xff]  ;;  %20200 = vmatpush3.bf16.msra.mxu1 %v23972_v51 }
 0x1d9   : > { %v2702_v24 = vld [vmem:[#allocation2 + $0x16a] sm:$0xff] }
 0x1de   : > { %20092 = vmatmul.mubr.bf16.gmra.mrb[28].mxu0 %v24931_v5 }
 0x1df   : > { %20111 = vmatprep.mubr.bf16.mxu0 %v2402_v8  ;;  %v2710_v8 = vpack.c.bf16 %v2681_v39, %v2680_v33 }
 0x1e6   : > { %20112 = vmatmul.mubr.bf16.vlgmr.msra.gmra.mrb[0].mxu0 %v2403_v19  ;;  %v2687_v19 = vld [vmem:[#allocation2 + $0xb2] sm:$0xff] }
 0x1e7   : > { %20144 = vmatpush3.bf16.msra.mxu0 %v23960_v31  ;;  %20115 = vmatprep.mubr.bf16.mxu0 %v2404_v29  ;;  %v2679_v31 = vld [vmem:[#allocation2 + $0x52] sm:$0xff]  ;;  %v2689_v29 = vld [vmem:[#allocation2 + $0xca] sm:$0xff] }
 0x1e8   : > { %20145 = vmatprep.subr.bf16.mxu0 %v23961_v32  ;;  %v2709_v40 = vpack.c.bf16 %v2679_v31, %v2678_v25  ;;  %v2714_v35 = vpack.c.bf16 %v2689_v29, %v2688_v28 }
 0x1eb   : > { %20146 = vmatpush3.bf16.msra.mxu0 %v23961_v32  ;;  %v2713_v32 = vpack.c.bf16 %v2687_v19, %v2686_v18 }
 0x1ec   : > { %20147 = vmatprep.subr.bf16.mxu0 %v23962_v38 }
 0x1ee   : > { %20116 = vmatmul.mubr.bf16.gmra.mrb[4].mxu0 %v2405_v45  ;;  %v2715_v45 = vpack.c.bf16 %v2691_v37, %v2690_v36  ;;  %v23977_v36 = vld [vmem:[%s27545_s1 + $0x248] sm:$0xff]  }
 0x1ef   : > { %20119 = vmatprep.mubr.bf16.mxu0 %v2406_v53  ;;  %20148 = vmatpush3.bf16.msra.mxu0 %v23962_v38  ;;  %v2693_v38 = vld [vmem:[#allocation2 + $0xfa] sm:$0xff] }
 0x1f0   : > { %20149 = vmatprep.subr.bf16.mxu0 %v23963_v54  ;;  %v2716_v53 = vpack.c.bf16 %v2693_v38, %v2692_v41 }
 0x1f3   : > { %20150 = vmatpush3.bf16.msra.mxu0 %v23963_v54  ;;  %v2694_v54 = vld [vmem:[#allocation2 + $0x10a] sm:$0xff] }
 0x1f4   : > { %20151 = vmatprep.subr.bf16.mxu0 %v23964_v6  ;;  %v2717_v7 = vpack.c.bf16 %v2695_v56, %v2694_v54 }
 0x1f6   : > { %20120 = vmatmul.mubr.bf16.gmra.mrb[8].mxu0 %v2407_v10  ;;  %v2698_v10 = vld [vmem:[#allocation2 + $0x13a] sm:$0xff] }
 0x1f7   : > { %20123 = vmatprep.mubr.bf16.mxu0 %v2408_v11  ;;  %20152 = vmatpush3.bf16.msra.mxu0 %v23964_v6  ;;  %v2718_v6 = vpack.c.bf16 %v2697_v4, %v2696_v58  ;;  %v2699_v11 = vld [vmem:[#allocation2 + $0x142] sm:$0xff] }
 0x1f8   : > { %20153 = vmatprep.subr.bf16.mxu0 %v23965_v13  ;;  %v2719_v16 = vpack.c.bf16 %v2699_v11, %v2698_v10 }
 0x1fb   : > { %20154 = vmatpush3.bf16.msra.mxu0 %v23965_v13  ;;  %v2700_v13 = vld [vmem:[#allocation2 + $0x152] sm:$0xff] }
 0x1fc   : > { %20155 = vmatprep.subr.bf16.mxu0 %v23966_v26  ;;  %v2720_v21 = vpack.c.bf16 %v2701_v14, %v2700_v13 }
 0x1fe   : > { %20124 = vmatmul.mubr.bf16.gmra.mrb[12].mxu0 %v2409_v27 }
 0x1ff   : > { %20127 = vmatprep.mubr.bf16.mxu0 %v2410_v43  ;;  %20156 = vmatpush3.bf16.msra.mxu0 %v23966_v26  ;;  %v2703_v26 = vld [vmem:[#allocation2 + $0x172] sm:$0xff]  ;;  %v2706_v43 = vld [vmem:[#allocation2 + $0x19a] sm:$0xff] }
 0x200   : > { %20157 = vmatprep.subr.bf16.mxu0 %v23967_v44  ;;  %v2721_v27 = vpack.c.bf16 %v2703_v26, %v2702_v24 }
 0x203   : > { %20158 = vmatpush3.bf16.msra.mxu0 %v23967_v44  ;;  %v2707_v44 = vld [vmem:[#allocation2 + $0x1a2] sm:$0xff] }
 0x204   : > { %v2723_v47 = vpack.c.bf16 %v2707_v44, %v2706_v43 }
 0x206   : > { %20128 = vmatmul.mubr.bf16.gmra.mrb[16].mxu0 %v2411_v55  ;;  %v23975_v55 = vld [vmem:[%s27545_s1 + $0x2b8] sm:$0xff]  }
 0x207   : > { %20131 = vmatprep.mubr.bf16.mxu0 %v2412_v59  ;;  %v3183_v59 = vld [vmem:[#allocation2 + $0x1] sm:$0xff] }
 0x208   : > { %v3215_v61 = vpack.c.bf16 %v3184_v60, %v3183_v59  ;;  %v23980_v60 = vld [vmem:[%s27545_s1 + $0x260] sm:$0xff]  }
 0x20a   : > { %20207 = vmatprep.mubr.bf16.mxu1 %v3215_v61 }
 0x20e   : > { %20132 = vmatmul.mubr.bf16.gmra.mrb[20].mxu0 %v2413_v0  ;;  %v24984_v0 = vshrl.u32 %v2982_v63, 7 }
 0x20f   : > { %20135 = vmatprep.mubr.bf16.mxu0 %v2414_v1 }
 0x210   : > { %v2984_v1 = vsub.s32 0, %v24984_v0  ;;  %v3020_v22 = vsub.s32 1, %v24984_v0 }
 0x212   : > { %v24997_v42 = vrot.slane %v291_v20, %v3020_v22 }
 0x216   : > { %20136 = vmatmul.mubr.bf16.gmra.mrb[24].mxu0 %v2415_v30  ;;  %v24993_v30 = vrot.slane %v291_v20, %v2984_v1 }
 0x217   : > { %20139 = vmatprep.mubr.bf16.mxu0 %v24847_v57  ;;  %v2685_v57 = vld [vmem:[#allocation2 + $0x9a] sm:$0xff] }
 0x218   : > { %v2712_v12 = vpack.c.bf16 %v2685_v57, %v2684_v2 }
 0x21e   : > { %20140 = vmatmul.mubr.bf16.gmra.mrb[28].mxu0 %v2417_v17 }
 0x21f   : > { %20159 = vmatprep.mubr.bf16.mxu0 %v2708_v23 }
 0x226   : > { %20160 = vmatmul.mubr.bf16.vlgmr.msra.gmra.mrb[0].mxu0 %v2709_v40 }
 0x227   : > { %20163 = vmatprep.mubr.bf16.mxu0 %v2710_v8 }
 0x22e   : > { %20164 = vmatmul.mubr.bf16.gmra.mrb[4].mxu0 %v2711_v3 }
 0x22f   : > { %20167 = vmatprep.mubr.bf16.mxu0 %v2712_v12 }
 0x236   : > { %20168 = vmatmul.mubr.bf16.gmra.mrb[8].mxu0 %v2713_v32 }
 0x237   : > { %20171 = vmatprep.mubr.bf16.mxu0 %v2714_v35 }
 0x23e   : > { %20172 = vmatmul.mubr.bf16.gmra.mrb[12].mxu0 %v2715_v45 }
 0x23f   : > { %20175 = vmatprep.mubr.bf16.mxu0 %v2716_v53 }
 0x246   : > { %20176 = vmatmul.mubr.bf16.gmra.mrb[16].mxu0 %v2717_v7  ;;  %v23978_v7 = vld [vmem:[%s27545_s1 + $0x250] sm:$0xff]  }
 0x247   : > { %20179 = vmatprep.mubr.bf16.mxu0 %v2718_v6 }
 0x24e   : > { %20180 = vmatmul.mubr.bf16.gmra.mrb[20].mxu0 %v2719_v16 }
 0x24f   : > { %20183 = vmatprep.mubr.bf16.mxu0 %v2720_v21 }
 0x256   : > { %20184 = vmatmul.mubr.bf16.gmra.mrb[24].mxu0 %v2721_v27  ;;  %v23979_v27 = vld [vmem:[%s27545_s1 + $0x258] sm:$0xff]  }
 0x257   : > { %20187 = vmatprep.mubr.bf16.mxu0 %v24889_v34  ;;  %v23973_v34 = vld [vmem:[%s27545_s1 + $0x2a8] sm:$0xff]  }
 0x258   : > { %20201 = vmatprep.subr.bf16.mxu1 %v23973_v34 }
 0x259   : > { %20202 = vmatpush3.bf16.msra.mxu1 %v23973_v34 }
 0x25a   : > { %20203 = vmatprep.subr.bf16.mxu1 %v23974_v52 }
 0x25d   : > { %20204 = vmatpush3.bf16.msra.mxu1 %v23974_v52 }
 0x25e   : > { %20188 = vmatmul.mubr.bf16.gmra.mrb[28].mxu0 %v2723_v47  ;;  %20205 = vmatprep.subr.bf16.mxu1 %v23975_v55 }
 0x261   : > { %20206 = vmatpush3.bf16.msra.mxu1 %v23975_v55 }
 0x262   : > { %20239 = vmatprep.subr.bf16.mxu1 %v23976_v62 }
 0x2f9   : > { %v20161_v46 = vpop.f32.mrb[0].mxu0 }
 0x2fa   : > { %v2988_v9 = vmul.f32 %v20161_v46, %v24993_v30  ;;  %v2823_v15 = vpop.f32.mrb[1].mxu0 }
 0x2fb   : > { %v2986_v17 = vmul.f32 %v24993_v30, %v2823_v15  ;;  %v20162_v23 = vpop.f32.mrb[2].mxu0 }
 0x2fc   : > { %v3024_v25 = vadd.f32 %v24997_v42, %v2988_v9  ;;  %v2989_v31 = vmul.f32 %v20162_v23, %v24993_v30  ;;  %v2826_v33 = vpop.f32.mrb[3].mxu0 }
 0x2fd   : > { %v3022_v39 = vadd.f32 %v24997_v42, %v2986_v17  ;;  %v2987_v40 = vmul.f32 %v24993_v30, %v2826_v33 }
 0x2fe   : > { %v3056_v8 = vmax.f32 %v3024_v25, 0.0  ;;  %v3025_v49 = vadd.f32 %v24997_v42, %v2989_v31  ;;  %v23981_v25 = vld [vmem:[%s27545_s1 + $0x268] sm:$0xff]  }
 0x2ff   : > { %v3054_v50 = vmax.f32 %v3022_v39, 0.0  ;;  %v3023_v2 = vadd.f32 %v24997_v42, %v2987_v40 }
 0x300   : > { %3088 = vst [vmem:[#allocation2 + $0x31] sm:$0xff] %v3056_v8  ;;  %v3057_v57 = vmax.f32 %v3025_v49, 0.0 }
 0x301   : > { %3086 = vst [vmem:[#allocation2 + $0x19] sm:$0xff] %v3054_v50  ;;  %v3055_v3 = vmax.f32 %v3023_v2, 0.0  ;;  %v20165_v12 = vpop.f32.mrb[4].mxu0 }
 0x302   : > { %3089 = vst [vmem:[#allocation2 + $0x39] sm:$0xff] %v3057_v57  ;;  %v2992_v18 = vmul.f32 %v20165_v12, %v24993_v30  ;;  %v2839_v19 = vpop.f32.mrb[5].mxu0  ;;  %v3217_v28 = vpack.c.bf16 %v3057_v57, %v3056_v8 }
 0x303   : > { %3087 = vst [vmem:[#allocation2 + $0x21] sm:$0xff] %v3055_v3  ;;  %v2990_v29 = vmul.f32 %v24993_v30, %v2839_v19  ;;  %v20166_v32 = vpop.f32.mrb[6].mxu0  ;;  %v3216_v35 = vpack.c.bf16 %v3055_v3, %v3054_v50  ;;  %v23982_v3 = vld [vmem:[%s27545_s1 + $0x270] sm:$0xff]  }
 0x304   : > { %v3028_v37 = vadd.f32 %v24997_v42, %v2992_v18  ;;  %v2993_v41 = vmul.f32 %v20166_v32, %v24993_v30  ;;  %v2842_v38 = vpop.f32.mrb[7].mxu0 }
 0x305   : > { %v3026_v45 = vadd.f32 %v24997_v42, %v2990_v29  ;;  %v2991_v53 = vmul.f32 %v24993_v30, %v2842_v38  ;;  %20208 = vmatmul.mubr.bf16.vlgmr.msra.gmra.mrb[0].mxu1 %v3216_v35 }
 0x306   : > { %v3060_v54 = vmax.f32 %v3028_v37, 0.0  ;;  %v3029_v56 = vadd.f32 %v24997_v42, %v2993_v41  ;;  %20211 = vmatprep.mubr.bf16.mxu1 %v3217_v28  ;;  %20240 = vmatpush3.bf16.msra.mxu1 %v23976_v62  ;;  %v23983_v41 = vld [vmem:[%s27545_s1 + $0x278] sm:$0xff]  }
 0x307   : > { %v3058_v58 = vmax.f32 %v3026_v45, 0.0  ;;  %v3027_v4 = vadd.f32 %v24997_v42, %v2991_v53  ;;  %20241 = vmatprep.subr.bf16.mxu1 %v23977_v36 }
 0x308   : > { %3092 = vst [vmem:[#allocation2 + $0x61] sm:$0xff] %v3060_v54  ;;  %v3061_v6 = vmax.f32 %v3029_v56, 0.0 }
 0x309   : > { %3090 = vst [vmem:[#allocation2 + $0x49] sm:$0xff] %v3058_v58  ;;  %v3059_v10 = vmax.f32 %v3027_v4, 0.0  ;;  %v20169_v11 = vpop.f32.mrb[8].mxu0 }
 0x30a   : > { %3093 = vst [vmem:[#allocation2 + $0x69] sm:$0xff] %v3061_v6  ;;  %v2996_v13 = vmul.f32 %v20169_v11, %v24993_v30  ;;  %v2855_v14 = vpop.f32.mrb[9].mxu0  ;;  %v3219_v16 = vpack.c.bf16 %v3061_v6, %v3060_v54  ;;  %20242 = vmatpush3.bf16.msra.mxu1 %v23977_v36 }
 0x30b   : > { %3091 = vst [vmem:[#allocation2 + $0x51] sm:$0xff] %v3059_v10  ;;  %v2994_v21 = vmul.f32 %v24993_v30, %v2855_v14  ;;  %v20170_v24 = vpop.f32.mrb[10].mxu0  ;;  %v3218_v26 = vpack.c.bf16 %v3059_v10, %v3058_v58  ;;  %20243 = vmatprep.subr.bf16.mxu1 %v23978_v7  ;;  %v25063_v10 = vld [vmem:[%s27545_s1 + $0x2c0] sm:$0xff]  }
 0x30c   : > { %v3032_v43 = vadd.f32 %v24997_v42, %v2996_v13  ;;  %v2997_v44 = vmul.f32 %v20170_v24, %v24993_v30  ;;  %v2858_v47 = vpop.f32.mrb[11].mxu0 }
 0x30d   : > { %v3030_v48 = vadd.f32 %v24997_v42, %v2994_v21  ;;  %v2995_v51 = vmul.f32 %v24993_v30, %v2858_v47  ;;  %20212 = vmatmul.mubr.bf16.gmra.mrb[4].mxu1 %v3218_v26 }
 0x30e   : > { %v3064_v34 = vmax.f32 %v3032_v43, 0.0  ;;  %v3033_v52 = vadd.f32 %v24997_v42, %v2997_v44  ;;  %20215 = vmatprep.mubr.bf16.mxu1 %v3219_v16  ;;  %20244 = vmatpush3.bf16.msra.mxu1 %v23978_v7 }
 0x30f   : > { %v3062_v55 = vmax.f32 %v3030_v48, 0.0  ;;  %v3031_v59 = vadd.f32 %v24997_v42, %v2995_v51  ;;  %20245 = vmatprep.subr.bf16.mxu1 %v23979_v27 }
 0x310   : > { %3096 = vst [vmem:[#allocation2 + $0x91] sm:$0xff] %v3064_v34  ;;  %v3065_v61 = vmax.f32 %v3033_v52, 0.0 }
 0x311   : > { %3094 = vst [vmem:[#allocation2 + $0x79] sm:$0xff] %v3062_v55  ;;  %v3063_v62 = vmax.f32 %v3031_v59, 0.0  ;;  %v20173_v63 = vpop.f32.mrb[12].mxu0 }
 0x312   : > { %3097 = vst [vmem:[#allocation2 + $0x99] sm:$0xff] %v3065_v61  ;;  %v3000_v20 = vmul.f32 %v20173_v63, %v24993_v30  ;;  %v2871_v46 = vpop.f32.mrb[13].mxu0  ;;  %v3221_v9 = vpack.c.bf16 %v3065_v61, %v3064_v34  ;;  %20246 = vmatpush3.bf16.msra.mxu1 %v23979_v27 }
 0x313   : > { %3095 = vst [vmem:[#allocation2 + $0x81] sm:$0xff] %v3063_v62  ;;  %v2998_v15 = vmul.f32 %v24993_v30, %v2871_v46  ;;  %v20174_v17 = vpop.f32.mrb[14].mxu0  ;;  %v3220_v23 = vpack.c.bf16 %v3063_v62, %v3062_v55  ;;  %20247 = vmatprep.subr.bf16.mxu1 %v23980_v60 }
 0x314   : > { %v3036_v31 = vadd.f32 %v24997_v42, %v3000_v20  ;;  %v3001_v33 = vmul.f32 %v20174_v17, %v24993_v30  ;;  %v2874_v39 = vpop.f32.mrb[15].mxu0 }
 0x315   : > { %v3034_v40 = vadd.f32 %v24997_v42, %v2998_v15  ;;  %v2999_v8 = vmul.f32 %v24993_v30, %v2874_v39  ;;  %20216 = vmatmul.mubr.bf16.gmra.mrb[8].mxu1 %v3220_v23 }
 0x316   : > { %v3068_v49 = vmax.f32 %v3036_v31, 0.0  ;;  %v3037_v50 = vadd.f32 %v24997_v42, %v3001_v33  ;;  %20219 = vmatprep.mubr.bf16.mxu1 %v3221_v9  ;;  %20248 = vmatpush3.bf16.msra.mxu1 %v23980_v60 }
 0x317   : > { %v3066_v2 = vmax.f32 %v3034_v40, 0.0  ;;  %v3035_v57 = vadd.f32 %v24997_v42, %v2999_v8  ;;  %20249 = vmatprep.subr.bf16.mxu1 %v23981_v25 }
 0x318   : > { %3100 = vst [vmem:[#allocation2 + $0xc1] sm:$0xff] %v3068_v49  ;;  %v3069_v12 = vmax.f32 %v3037_v50, 0.0 }
 0x319   : > { %3098 = vst [vmem:[#allocation2 + $0xa9] sm:$0xff] %v3066_v2  ;;  %v3067_v18 = vmax.f32 %v3035_v57, 0.0  ;;  %v20177_v19 = vpop.f32.mrb[16].mxu0 }
 0x31a   : > { %3101 = vst [vmem:[#allocation2 + $0xc9] sm:$0xff] %v3069_v12  ;;  %v3004_v28 = vmul.f32 %v20177_v19, %v24993_v30  ;;  %v2887_v29 = vpop.f32.mrb[17].mxu0  ;;  %v3223_v32 = vpack.c.bf16 %v3069_v12, %v3068_v49  ;;  %20250 = vmatpush3.bf16.msra.mxu1 %v23981_v25 }
 0x31b   : > { %3099 = vst [vmem:[#allocation2 + $0xb1] sm:$0xff] %v3067_v18  ;;  %v3002_v35 = vmul.f32 %v24993_v30, %v2887_v29  ;;  %v20178_v36 = vpop.f32.mrb[18].mxu0  ;;  %v3222_v37 = vpack.c.bf16 %v3067_v18, %v3066_v2  ;;  %20251 = vmatprep.subr.bf16.mxu1 %v23982_v3 }
 0x31c   : > { %v3040_v38 = vadd.f32 %v24997_v42, %v3004_v28  ;;  %v3005_v45 = vmul.f32 %v20178_v36, %v24993_v30  ;;  %v2890_v53 = vpop.f32.mrb[19].mxu0 }
 0x31d   : > { %v3038_v54 = vadd.f32 %v24997_v42, %v3002_v35  ;;  %v3003_v56 = vmul.f32 %v24993_v30, %v2890_v53  ;;  %20220 = vmatmul.mubr.bf16.gmra.mrb[12].mxu1 %v3222_v37 }
 0x31e   : > { %v3072_v58 = vmax.f32 %v3040_v38, 0.0  ;;  %v3041_v4 = vadd.f32 %v24997_v42, %v3005_v45  ;;  %20223 = vmatprep.mubr.bf16.mxu1 %v3223_v32  ;;  %20252 = vmatpush3.bf16.msra.mxu1 %v23982_v3 }
 0x31f   : > { %v3070_v7 = vmax.f32 %v3038_v54, 0.0  ;;  %v3039_v6 = vadd.f32 %v24997_v42, %v3003_v56  ;;  %20253 = vmatprep.subr.bf16.mxu1 %v23983_v41 }
 0x320   : > { %3104 = vst [vmem:[#allocation2 + $0xf1] sm:$0xff] %v3072_v58  ;;  %v25065_v11 = vmax.f32 %v3041_v4, 0.0 }
 0x321   : > { %3102 = vst [vmem:[#allocation2 + $0xd9] sm:$0xff] %v3070_v7  ;;  %v3071_v13 = vmax.f32 %v3039_v6, 0.0  ;;  %v20181_v14 = vpop.f32.mrb[20].mxu0 }
 0x322   : > { %3105 = vst [vmem:[#allocation2 + $0xf9] sm:$0xff] %v25065_v11  ;;  %v3008_v16 = vmul.f32 %v20181_v14, %v24993_v30  ;;  %v2903_v21 = vpop.f32.mrb[21].mxu0  ;;  %v3225_v24 = vpack.c.bf16 %v25065_v11, %v3072_v58  ;;  %20254 = vmatpush3.bf16.msra.mxu1 %v23983_v41  ;;  %v3123_v14 = vld [vmem:[#allocation2 + $0x38] sm:$0xff] }
 0x323   : > { %3103 = vst [vmem:[#allocation2 + $0xe1] sm:$0xff] %v3071_v13  ;;  %v3006_v26 = vmul.f32 %v24993_v30, %v2903_v21  ;;  %v20182_v27 = vpop.f32.mrb[22].mxu0  ;;  %v25071_v43 = vpack.c.bf16 %v3071_v13, %v3070_v7  ;;  %20287 = vmatprep.subr.bf16.mxu1 %v25063_v10 }
 0x324   : > { %v3044_v44 = vadd.f32 %v24997_v42, %v3008_v16  ;;  %v3009_v47 = vmul.f32 %v20182_v27, %v24993_v30  ;;  %v2906_v48 = vpop.f32.mrb[23].mxu0  ;;  %v3120_v16 = vld [vmem:[#allocation2 + $0x18] sm:$0xff]  ;;  %v3125_v27 = vld [vmem:[#allocation2 + $0x50] sm:$0xff] }
 0x325   : > { %v3042_v51 = vadd.f32 %v24997_v42, %v3006_v26  ;;  %v3007_v34 = vmul.f32 %v24993_v30, %v2906_v48  ;;  %20224 = vmatmul.mubr.bf16.gmra.mrb[16].mxu1 %v25071_v43 }
 0x326   : > { %v3076_v52 = vmax.f32 %v3044_v44, 0.0  ;;  %v3045_v55 = vadd.f32 %v24997_v42, %v3009_v47  ;;  %20227 = vmatprep.mubr.bf16.mxu1 %v3225_v24  ;;  %v23985_v24 = vld [vmem:[%s27545_s1 + $0x2c8] sm:$0xff]  }
 0x327   : > { %v3074_v59 = vmax.f32 %v3042_v51, 0.0  ;;  %v3043_v60 = vadd.f32 %v24997_v42, %v3007_v34  ;;  %v3127_v44 = vld [vmem:[#allocation2 + $0x68] sm:$0xff]  ;;  %v3126_v51 = vld [vmem:[#allocation2 + $0x60] sm:$0xff]  ;;  %v23987_v34 = vld [vmem:[%s27545_s1 + $0x2d8] sm:$0xff]  }
 0x328   : > { %3108 = vst [vmem:[#allocation2 + $0x121] sm:$0xff] %v3076_v52  ;;  %v3077_v61 = vmax.f32 %v3045_v55, 0.0  ;;  %v3124_v47 = vld [vmem:[#allocation2 + $0x48] sm:$0xff]  ;;  %v3129_v55 = vld [vmem:[#allocation2 + $0x80] sm:$0xff] }
 0x329   : > { %3106 = vst [vmem:[#allocation2 + $0x109] sm:$0xff] %v3074_v59  ;;  %v3075_v62 = vmax.f32 %v3043_v60, 0.0  ;;  %v20185_v63 = vpop.f32.mrb[24].mxu0  ;;  %v25128_v48 = vpack.c.bf16 %v3125_v27, %v3124_v47  ;;  %v3128_v60 = vld [vmem:[#allocation2 + $0x78] sm:$0xff]  ;;  %v23993_v47 = vld [vmem:[%s27545_s1 + $0x308] sm:$0xff]  }
 0x32a   : > { %3109 = vst [vmem:[#allocation2 + $0x129] sm:$0xff] %v3077_v61  ;;  %v3012_v20 = vmul.f32 %v20185_v63, %v24993_v30  ;;  %v2919_v46 = vpop.f32.mrb[25].mxu0  ;;  %v25082_v9 = vpack.c.bf16 %v3077_v61, %v3076_v52  ;;  %v25133_v52 = vpack.c.bf16 %v3127_v44, %v3126_v51  ;;  %v25140_v61 = vpack.c.bf16 %v3129_v55, %v3128_v60  ;;  %v23989_v63 = vld [vmem:[%s27545_s1 + $0x2e8] sm:$0xff]   ;;  %v3671_v27 = vld [vmem:[#allocation2 + $0x3a] sm:$0xff]  ;;  %v3673_v55 = vld [vmem:[#allocation2 + $0x52] sm:$0xff] }
 0x32b   : > { %3107 = vst [vmem:[#allocation2 + $0x111] sm:$0xff] %v3075_v62  ;;  %v3010_v15 = vmul.f32 %v24993_v30, %v2919_v46  ;;  %v20186_v17 = vpop.f32.mrb[26].mxu0  ;;  %v25085_v23 = vpack.c.bf16 %v3075_v62, %v3074_v59  ;;  %v3131_v59 = vld [vmem:[#allocation2 + $0x98] sm:$0xff]  ;;  %v3130_v62 = vld [vmem:[#allocation2 + $0x90] sm:$0xff] }
 0x32c   : > { %v3048_v25 = vadd.f32 %v24997_v42, %v3012_v20  ;;  %v3013_v31 = vmul.f32 %v20186_v17, %v24993_v30  ;;  %v2922_v33 = vpop.f32.mrb[27].mxu0  ;;  %v25145_v20 = vpack.c.bf16 %v3131_v59, %v3130_v62  ;;  %v23990_v46 = vld [vmem:[%s27545_s1 + $0x2f0] sm:$0xff]   ;;  %v3135_v17 = vld [vmem:[#allocation2 + $0xc8] sm:$0xff] }
 0x32d   : > { %v3046_v39 = vadd.f32 %v24997_v42, %v3010_v15  ;;  %v3011_v40 = vmul.f32 %v24993_v30, %v2922_v33  ;;  %20228 = vmatmul.mubr.bf16.gmra.mrb[20].mxu1 %v25085_v23  ;;  %v3133_v15 = vld [vmem:[#allocation2 + $0xb0] sm:$0xff]  ;;  %v3134_v33 = vld [vmem:[#allocation2 + $0xc0] sm:$0xff] }
 0x32e   : > { %v3080_v8 = vmax.f32 %v3048_v25, 0.0  ;;  %v3049_v49 = vadd.f32 %v24997_v42, %v3013_v31  ;;  %20231 = vmatprep.mubr.bf16.mxu1 %v25082_v9  ;;  %v3132_v25 = vld [vmem:[#allocation2 + $0xa8] sm:$0xff] }
 0x32f   : > { %v3078_v50 = vmax.f32 %v3046_v39, 0.0  ;;  %v3047_v2 = vadd.f32 %v24997_v42, %v3011_v40  ;;  %v25152_v31 = vpack.c.bf16 %v3133_v15, %v3132_v25  ;;  %v23991_v39 = vld [vmem:[%s27545_s1 + $0x2f8] sm:$0xff]   ;;  %v25157_v40 = vpack.c.bf16 %v3135_v17, %v3134_v33  ;;  %v3674_v59 = vld [vmem:[#allocation2 + $0x62] sm:$0xff]  ;;  %v3675_v60 = vld [vmem:[#allocation2 + $0x6a] sm:$0xff] }
 0x330   : > { %3112 = vst [vmem:[#allocation2 + $0x151] sm:$0xff] %v3080_v8  ;;  %v3081_v57 = vmax.f32 %v3049_v49, 0.0  ;;  %v3137_v49 = vld [vmem:[#allocation2 + $0xe0] sm:$0xff]  ;;  %v3678_v33 = vld [vmem:[#allocation2 + $0x92] sm:$0xff] }
 0x331   : > { %3110 = vst [vmem:[#allocation2 + $0x139] sm:$0xff] %v3078_v50  ;;  %v3079_v3 = vmax.f32 %v3047_v2, 0.0  ;;  %v20189_v12 = vpop.f32.mrb[28].mxu0  ;;  %v3136_v2 = vld [vmem:[#allocation2 + $0xd8] sm:$0xff]  ;;  %v23996_v15 = vld [vmem:[%s27545_s1 + $0x320] sm:$0xff]  }
 0x332   : > { %3113 = vst [vmem:[#allocation2 + $0x159] sm:$0xff] %v3081_v57  ;;  %v3016_v18 = vmul.f32 %v20189_v12, %v24993_v30  ;;  %v2935_v19 = vpop.f32.mrb[29].mxu0  ;;  %v25096_v28 = vpack.c.bf16 %v3081_v57, %v3080_v8  ;;  %v23992_v8 = vld [vmem:[%s27545_s1 + $0x300] sm:$0xff]   ;;  %v25164_v57 = vpack.c.bf16 %v3137_v49, %v3136_v2  ;;  %v23997_v49 = vld [vmem:[%s27545_s1 + $0x328] sm:$0xff]   ;;  %v23998_v2 = vld [vmem:[%s27545_s1 + $0x330] sm:$0xff]  }
 0x333   : > { %3111 = vst [vmem:[#allocation2 + $0x141] sm:$0xff] %v3079_v3  ;;  %v3014_v29 = vmul.f32 %v24993_v30, %v2935_v19  ;;  %v20190_v32 = vpop.f32.mrb[30].mxu0  ;;  %v25099_v35 = vpack.c.bf16 %v3079_v3, %v3078_v50  ;;  %v3139_v50 = vld [vmem:[#allocation2 + $0xf8] sm:$0xff]  ;;  %v3138_v3 = vld [vmem:[#allocation2 + $0xf0] sm:$0xff]  ;;  %v3143_v19 = vld [vmem:[#allocation2 + $0x128] sm:$0xff] }
 0x334   : > { %v3052_v36 = vadd.f32 %v24997_v42, %v3016_v18  ;;  %v3017_v37 = vmul.f32 %v20190_v32, %v24993_v30  ;;  %v2938_v41 = vpop.f32.mrb[31].mxu0  ;;  %v25166_v12 = vpack.c.bf16 %v3139_v50, %v3138_v3  ;;  %v3141_v18 = vld [vmem:[#allocation2 + $0x110] sm:$0xff]  ;;  %v3676_v17 = vld [vmem:[#allocation2 + $0x7a] sm:$0xff]  ;;  %v3677_v25 = vld [vmem:[#allocation2 + $0x82] sm:$0xff] }
 0x335   : > { %v3050_v38 = vadd.f32 %v24997_v42, %v3014_v29  ;;  %v3015_v45 = vmul.f32 %v24993_v30, %v2938_v41  ;;  %20232 = vmatmul.mubr.bf16.gmra.mrb[24].mxu1 %v25099_v35  ;;  %v3121_v30 = vld [vmem:[#allocation2 + $0x20] sm:$0xff]  ;;  %v3140_v29 = vld [vmem:[#allocation2 + $0x108] sm:$0xff] }
 0x336   : > { %v3084_v53 = vmax.f32 %v3052_v36, 0.0  ;;  %v3053_v54 = vadd.f32 %v24997_v42, %v3017_v37  ;;  %20235 = vmatprep.mubr.bf16.mxu1 %v25096_v28  ;;  %v25115_v21 = vpack.c.bf16 %v3121_v30, %v3120_v16  ;;  %v25170_v32 = vpack.c.bf16 %v3141_v18, %v3140_v29  ;;  %v3142_v36 = vld [vmem:[#allocation2 + $0x120] sm:$0xff]  ;;  %v3680_v3 = vld [vmem:[#allocation2 + $0xaa] sm:$0xff]  ;;  %v3681_v18 = vld [vmem:[#allocation2 + $0xb2] sm:$0xff] }
 0x337   : > { %v3082_v56 = vmax.f32 %v3050_v38, 0.0  ;;  %v3051_v58 = vadd.f32 %v24997_v42, %v3015_v45  ;;  %v3122_v42 = vld [vmem:[#allocation2 + $0x30] sm:$0xff]  ;;  %v25172_v37 = vpack.c.bf16 %v3143_v19, %v3142_v36  ;;  %v3682_v19 = vld [vmem:[#allocation2 + $0xc2] sm:$0xff]  ;;  %v25221_v36 = vpack.c.bf16 %v3681_v18, %v3680_v3 }
 0x338   : > { %3116 = vst [vmem:[#allocation2 + $0x181] sm:$0xff] %v3084_v53  ;;  %v3085_v4 = vmax.f32 %v3053_v54, 0.0  ;;  %v25120_v26 = vpack.c.bf16 %v3123_v14, %v3122_v42  ;;  %v3144_v45 = vld [vmem:[#allocation2 + $0x138] sm:$0xff]  ;;  %v3146_v54 = vld [vmem:[#allocation2 + $0x150] sm:$0xff]  ;;  %v24005_v3 = vld [vmem:[%s27545_s1 + $0x368] sm:$0xff]  }
 0x339   : > { %3114 = vst [vmem:[#allocation2 + $0x169] sm:$0xff] %v3082_v56  ;;  %v3083_v7 = vmax.f32 %v3051_v58, 0.0  ;;  %v3147_v38 = vld [vmem:[#allocation2 + $0x158] sm:$0xff]  ;;  %v3666_v58 = vld [vmem:[#allocation2 + $0x2] sm:$0xff]  ;;  %v3683_v29 = vld [vmem:[#allocation2 + $0xca] sm:$0xff] }
 0x33a   : > { %3117 = vst [vmem:[#allocation2 + $0x189] sm:$0xff] %v3085_v4  ;;  %v25109_v6 = vpack.c.bf16 %v3085_v4, %v3084_v53  ;;  %v3145_v41 = vld [vmem:[#allocation2 + $0x140] sm:$0xff]  ;;  %v3667_v4 = vld [vmem:[#allocation2 + $0xa] sm:$0xff] }
 0x33b   : > { %3115 = vst [vmem:[#allocation2 + $0x171] sm:$0xff] %v3083_v7  ;;  %v25111_v13 = vpack.c.bf16 %v3083_v7, %v3082_v56  ;;  %v25176_v53 = vpack.c.bf16 %v3145_v41, %v3144_v45  ;;  %v25178_v56 = vpack.c.bf16 %v3147_v38, %v3146_v54  ;;  %v3698_v14 = vpack.c.bf16 %v3667_v4, %v3666_v58  ;;  %v3668_v42 = vld [vmem:[#allocation2 + $0x1a] sm:$0xff]  ;;  %v3685_v58 = vld [vmem:[#allocation2 + $0xe2] sm:$0xff]  ;;  %v3686_v4 = vld [vmem:[#allocation2 + $0xf2] sm:$0xff] }
 0x33c   : > { %v23999_v41 = vld [vmem:[%s27545_s1 + $0x338] sm:$0xff]   ;;  %v25226_v38 = vpack.c.bf16 %v3683_v29, %v3682_v19  ;;  %v24000_v45 = vld [vmem:[%s27545_s1 + $0x340] sm:$0xff]   ;;  %v24006_v18 = vld [vmem:[%s27545_s1 + $0x370] sm:$0xff]  }
 0x33d   : > { %20236 = vmatmul.mubr.bf16.gmra.mrb[28].mxu1 %v25111_v13  ;;  %v3684_v54 = vld [vmem:[#allocation2 + $0xda] sm:$0xff] }
 0x33e   : > { %20255 = vmatprep.mubr.bf16.mxu1 %v24931_v5  ;;  %v23986_v5 = vld [vmem:[%s27545_s1 + $0x2d0] sm:$0xff]   ;;  %v24007_v19 = vld [vmem:[%s27545_s1 + $0x378] sm:$0xff]   ;;  %v24008_v29 = vld [vmem:[%s27545_s1 + $0x380] sm:$0xff]  }
 0x340   : > { %v3148_v30 = vld [vmem:[#allocation2 + $0x168] sm:$0xff] }
 0x342   : > { %v3149_v7 = vld [vmem:[#allocation2 + $0x170] sm:$0xff] }
 0x343   : > { %v25182_v16 = vpack.c.bf16 %v3149_v7, %v3148_v30  ;;  %v3687_v7 = vld [vmem:[#allocation2 + $0xfa] sm:$0xff]  ;;  %v25233_v30 = vpack.c.bf16 %v3685_v58, %v3684_v54 }
 0x344   : > { %v4002_v54 = vld [vmem:[#allocation2 + $0x180] sm:$0xff] }
 0x345   : > { %20256 = vmatmul.mubr.bf16.vlgmr.msra.gmra.mrb[0].mxu1 %v25115_v21 }
 0x346   : > { %20259 = vmatprep.mubr.bf16.mxu1 %v25120_v26  ;;  %20288 = vmatpush3.bf16.msra.mxu1 %v25063_v10  ;;  %v23988_v10 = vld [vmem:[%s27545_s1 + $0x2e0] sm:$0xff]  }
 0x347   : > { %20289 = vmatprep.subr.bf16.mxu1 %v23985_v24 }
 0x34a   : > { %20290 = vmatpush3.bf16.msra.mxu1 %v23985_v24  ;;  %v3669_v24 = vld [vmem:[#allocation2 + $0x22] sm:$0xff] }
 0x34b   : > { %20291 = vmatprep.subr.bf16.mxu1 %v23986_v5  ;;  %v25185_v44 = vpack.c.bf16 %v3669_v24, %v3668_v42  ;;  %v3688_v42 = vld [vmem:[#allocation2 + $0x10a] sm:$0xff]  ;;  %v3689_v24 = vld [vmem:[#allocation2 + $0x112] sm:$0xff] }
 0x34d   : > { %20260 = vmatmul.mubr.bf16.gmra.mrb[4].mxu1 %v25128_v48 }
 0x34e   : > { %20263 = vmatprep.mubr.bf16.mxu1 %v25133_v52  ;;  %20292 = vmatpush3.bf16.msra.mxu1 %v23986_v5  ;;  %v3670_v5 = vld [vmem:[#allocation2 + $0x32] sm:$0xff] }
 0x34f   : > { %20293 = vmatprep.subr.bf16.mxu1 %v23987_v34  ;;  %v25190_v51 = vpack.c.bf16 %v3671_v27, %v3670_v5  ;;  %v3690_v5 = vld [vmem:[#allocation2 + $0x122] sm:$0xff]  ;;  %v3691_v27 = vld [vmem:[#allocation2 + $0x12a] sm:$0xff] }
 0x352   : > { %20294 = vmatpush3.bf16.msra.mxu1 %v23987_v34  ;;  %v23994_v34 = vld [vmem:[%s27545_s1 + $0x310] sm:$0xff]  }
 0x353   : > { %20295 = vmatprep.subr.bf16.mxu1 %v23988_v10 }
 0x355   : > { %20264 = vmatmul.mubr.bf16.gmra.mrb[8].mxu1 %v25140_v61 }
 0x356   : > { %20267 = vmatprep.mubr.bf16.mxu1 %v25145_v20  ;;  %20296 = vmatpush3.bf16.msra.mxu1 %v23988_v10  ;;  %v3672_v10 = vld [vmem:[#allocation2 + $0x4a] sm:$0xff] }
 0x357   : > { %20297 = vmatprep.subr.bf16.mxu1 %v23989_v63  ;;  %v25197_v62 = vpack.c.bf16 %v3673_v55, %v3672_v10  ;;  %v3692_v10 = vld [vmem:[#allocation2 + $0x13a] sm:$0xff]  ;;  %v3693_v55 = vld [vmem:[#allocation2 + $0x142] sm:$0xff] }
 0x35a   : > { %20298 = vmatpush3.bf16.msra.mxu1 %v23989_v63  ;;  %v23995_v63 = vld [vmem:[%s27545_s1 + $0x318] sm:$0xff]  }
 0x35b   : > { %20299 = vmatprep.subr.bf16.mxu1 %v23990_v46 }
 0x35d   : > { %20268 = vmatmul.mubr.bf16.gmra.mrb[12].mxu1 %v25152_v31 }
 0x35e   : > { %20271 = vmatprep.mubr.bf16.mxu1 %v25157_v40  ;;  %20300 = vmatpush3.bf16.msra.mxu1 %v23990_v46  ;;  %v25202_v46 = vpack.c.bf16 %v3675_v60, %v3674_v59  ;;  %v3694_v59 = vld [vmem:[#allocation2 + $0x152] sm:$0xff]  ;;  %v3695_v60 = vld [vmem:[#allocation2 + $0x15a] sm:$0xff] }
 0x35f   : > { %20301 = vmatprep.subr.bf16.mxu1 %v23991_v39 }
 0x362   : > { %20302 = vmatpush3.bf16.msra.mxu1 %v23991_v39  ;;  %v3679_v39 = vld [vmem:[#allocation2 + $0x9a] sm:$0xff] }
 0x363   : > { %20335 = vmatprep.subr.bf16.mxu1 %v23992_v8  ;;  %v25214_v50 = vpack.c.bf16 %v3679_v39, %v3678_v33  ;;  %v24001_v39 = vld [vmem:[%s27545_s1 + $0x348] sm:$0xff]  }
 0x365   : > { %20272 = vmatmul.mubr.bf16.gmra.mrb[16].mxu1 %v25164_v57 }
 0x366   : > { %20275 = vmatprep.mubr.bf16.mxu1 %v25166_v12 }
 0x36d   : > { %20276 = vmatmul.mubr.bf16.gmra.mrb[20].mxu1 %v25170_v32 }
 0x36e   : > { %20279 = vmatprep.mubr.bf16.mxu1 %v25172_v37 }
 0x375   : > { %20280 = vmatmul.mubr.bf16.gmra.mrb[24].mxu1 %v25176_v53 }
 0x376   : > { %20283 = vmatprep.mubr.bf16.mxu1 %v25178_v56 }
 0x37d   : > { %20284 = vmatmul.mubr.bf16.gmra.mrb[28].mxu1 %v25182_v16 }
 0x37e   : > { %20303 = vmatprep.mubr.bf16.mxu1 %v3698_v14  ;;  %v25235_v14 = vpack.c.bf16 %v3687_v7, %v3686_v4  ;;  %v4278_v4 = vld [vmem:[#allocation2 + $0x19] sm:$0xff] }
 0x385   : > { %20304 = vmatmul.mubr.bf16.vlgmr.msra.gmra.mrb[0].mxu1 %v25185_v44 }
 0x386   : > { %20307 = vmatprep.mubr.bf16.mxu1 %v25190_v51  ;;  %20336 = vmatpush3.bf16.msra.mxu1 %v23992_v8  ;;  %v25209_v8 = vpack.c.bf16 %v3677_v25, %v3676_v17  ;;  %v3696_v17 = vld [vmem:[#allocation2 + $0x16a] sm:$0xff]  ;;  %v3697_v25 = vld [vmem:[#allocation2 + $0x172] sm:$0xff] }
 0x387   : > { %20337 = vmatprep.subr.bf16.mxu1 %v23993_v47  ;;  %v25251_v33 = vpack.c.bf16 %v3697_v25, %v3696_v17  ;;  %v4285_v17 = vld [vmem:[#allocation2 + $0x69] sm:$0xff]  ;;  %v4287_v25 = vld [vmem:[#allocation2 + $0x81] sm:$0xff] }
 0x38a   : > { %20338 = vmatpush3.bf16.msra.mxu1 %v23993_v47  ;;  %v25239_v47 = vpack.c.bf16 %v3689_v24, %v3688_v42  ;;  %v4281_v42 = vld [vmem:[#allocation2 + $0x39] sm:$0xff]  ;;  %v4283_v24 = vld [vmem:[#allocation2 + $0x51] sm:$0xff] }
 0x38b   : > { %20339 = vmatprep.subr.bf16.mxu1 %v23994_v34 }
 0x38d   : > { %20308 = vmatmul.mubr.bf16.gmra.mrb[4].mxu1 %v25197_v62 }
 0x38e   : > { %20311 = vmatprep.mubr.bf16.mxu1 %v25202_v46  ;;  %20340 = vmatpush3.bf16.msra.mxu1 %v23994_v34  ;;  %v25241_v34 = vpack.c.bf16 %v3691_v27, %v3690_v5  ;;  %v4280_v5 = vld [vmem:[#allocation2 + $0x31] sm:$0xff] }
 0x38f   : > { %20341 = vmatprep.subr.bf16.mxu1 %v23995_v63  ;;  %v25296_v27 = vpack.c.bf16 %v4281_v42, %v4280_v5  ;;  %v24014_v42 = vld [vmem:[%s27545_s1 + $0x3b0] sm:$0xff]   ;;  %v4292_v5 = vld [vmem:[#allocation2 + $0xc1] sm:$0xff] }
 0x392   : > { %20342 = vmatpush3.bf16.msra.mxu1 %v23995_v63  ;;  %v25245_v63 = vpack.c.bf16 %v3693_v55, %v3692_v10  ;;  %v4282_v10 = vld [vmem:[#allocation2 + $0x49] sm:$0xff] }
 0x393   : > { %20343 = vmatprep.subr.bf16.mxu1 %v23996_v15  ;;  %v24009_v55 = vld [vmem:[%s27545_s1 + $0x388] sm:$0xff]  }
 0x395   : > { %20312 = vmatmul.mubr.bf16.gmra.mrb[8].mxu1 %v25209_v8 }
 0x396   : > { %20315 = vmatprep.mubr.bf16.mxu1 %v25214_v50  ;;  %20344 = vmatpush3.bf16.msra.mxu1 %v23996_v15  ;;  %v25247_v15 = vpack.c.bf16 %v3695_v60, %v3694_v59  ;;  %v25301_v59 = vpack.c.bf16 %v4283_v24, %v4282_v10  ;;  %v24010_v60 = vld [vmem:[%s27545_s1 + $0x390] sm:$0xff]  }
 0x397   : > { %20345 = vmatprep.subr.bf16.mxu1 %v23997_v49  ;;  %v4293_v24 = vld [vmem:[#allocation2 + $0xc9] sm:$0xff] }
 0x398   : > { %v25332_v10 = vpack.c.bf16 %v4293_v24, %v4292_v5  ;;  %v5224_v5 = vld [vmem:[#allocation2 + $0x181] sm:$0xff] }
 0x39a   : > { %20346 = vmatpush3.bf16.msra.mxu1 %v23997_v49  ;;  %v24002_v49 = vld [vmem:[%s27545_s1 + $0x350] sm:$0xff]  }
 0x39b   : > { %20347 = vmatprep.subr.bf16.mxu1 %v23998_v2 }
 0x39d   : > { %20316 = vmatmul.mubr.bf16.gmra.mrb[12].mxu1 %v25221_v36 }
 0x39e   : > { %20319 = vmatprep.mubr.bf16.mxu1 %v25226_v38  ;;  %20348 = vmatpush3.bf16.msra.mxu1 %v23998_v2  ;;  %v24004_v2 = vld [vmem:[%s27545_s1 + $0x360] sm:$0xff]  }
 0x39f   : > { %20349 = vmatprep.subr.bf16.mxu1 %v23999_v41 }
 0x3a2   : > { %20350 = vmatpush3.bf16.msra.mxu1 %v23999_v41  ;;  %v4003_v41 = vld [vmem:[#allocation2 + $0x188] sm:$0xff] }
 0x3a3   : > { %20383 = vmatprep.subr.bf16.mxu1 %v24000_v45  ;;  %v25293_v58 = vpack.c.bf16 %v4003_v41, %v4002_v54  ;;  %v4288_v41 = vld [vmem:[#allocation2 + $0x91] sm:$0xff]  ;;  %v4290_v54 = vld [vmem:[#allocation2 + $0xa9] sm:$0xff] }
 0x3a5   : > { %20320 = vmatmul.mubr.bf16.gmra.mrb[16].mxu1 %v25233_v30 }
 0x3a6   : > { %20323 = vmatprep.mubr.bf16.mxu1 %v25235_v14 }
 0x3ad   : > { %20324 = vmatmul.mubr.bf16.gmra.mrb[20].mxu1 %v25239_v47 }
 0x3ae   : > { %20327 = vmatprep.mubr.bf16.mxu1 %v25241_v34 }
 0x3b5   : > { %20328 = vmatmul.mubr.bf16.gmra.mrb[24].mxu1 %v25245_v63 }
 0x3b6   : > { %20331 = vmatprep.mubr.bf16.mxu1 %v25247_v15 }
 0x3bd   : > { %20332 = vmatmul.mubr.bf16.gmra.mrb[28].mxu1 %v25251_v33 }
 0x3be   : > { %20351 = vmatprep.mubr.bf16.mxu1 %v25115_v21  ;;  %v24003_v21 = vld [vmem:[%s27545_s1 + $0x358] sm:$0xff]  }
 0x3c5   : > { %20352 = vmatmul.mubr.bf16.vlgmr.msra.gmra.mrb[0].mxu1 %v25120_v26 }
 0x3c6   : > { %20355 = vmatprep.mubr.bf16.mxu1 %v25128_v48  ;;  %20384 = vmatpush3.bf16.msra.mxu1 %v24000_v45  ;;  %v4279_v45 = vld [vmem:[#allocation2 + $0x21] sm:$0xff] }
 0x3c7   : > { %20385 = vmatprep.subr.bf16.mxu1 %v24001_v39  ;;  %v4310_v7 = vpack.c.bf16 %v4279_v45, %v4278_v4  ;;  %v24013_v4 = vld [vmem:[%s27545_s1 + $0x3a8] sm:$0xff]  }
 0x3ca   : > { %20386 = vmatpush3.bf16.msra.mxu1 %v24001_v39  ;;  %v4284_v39 = vld [vmem:[#allocation2 + $0x61] sm:$0xff] }
 0x3cb   : > { %20387 = vmatprep.subr.bf16.mxu1 %v24002_v49 }
 0x3cd   : > { %20356 = vmatmul.mubr.bf16.gmra.mrb[4].mxu1 %v25133_v52 }
 0x3ce   : > { %20359 = vmatprep.mubr.bf16.mxu1 %v25140_v61  ;;  %20388 = vmatpush3.bf16.msra.mxu1 %v24002_v49  ;;  %v25308_v49 = vpack.c.bf16 %v4285_v17, %v4284_v39  ;;  %v25342_v17 = vld [vmem:[#allocation2 + $0xf1] sm:$0xff]  ;;  %v5217_v39 = vld [vmem:[#allocation2 + $0x129] sm:$0xff] }
 0x3cf   : > { %20389 = vmatprep.subr.bf16.mxu1 %v24003_v21 }
 0x3d2   : > { %20390 = vmatpush3.bf16.msra.mxu1 %v24003_v21  ;;  %v4286_v21 = vld [vmem:[#allocation2 + $0x79] sm:$0xff] }
 0x3d3   : > { %20391 = vmatprep.subr.bf16.mxu1 %v24004_v2 }
 0x3d5   : > { %20360 = vmatmul.mubr.bf16.gmra.mrb[8].mxu1 %v25145_v20 }
 0x3d6   : > { %20363 = vmatprep.mubr.bf16.mxu1 %v25152_v31  ;;  %20392 = vmatpush3.bf16.msra.mxu1 %v24004_v2  ;;  %v24011_v2 = vld [vmem:[%s27545_s1 + $0x398] sm:$0xff]  }
 0x3d7   : > { %20393 = vmatprep.subr.bf16.mxu1 %v24005_v3 }
 0x3da   : > { %20394 = vmatpush3.bf16.msra.mxu1 %v24005_v3  ;;  %v25313_v3 = vpack.c.bf16 %v4287_v25, %v4286_v21  ;;  %v4319_v25 = vpack.c.bf16 %v25065_v11, %v25342_v17  ;;  %v24017_v11 = vld [vmem:[%s27545_s1 + $0x3c8] sm:$0xff]  }
 0x3db   : > { %20395 = vmatprep.subr.bf16.mxu1 %v24006_v18 }
 0x3dd   : > { %20364 = vmatmul.mubr.bf16.gmra.mrb[12].mxu1 %v25157_v40 }
 0x3de   : > { %20367 = vmatprep.mubr.bf16.mxu1 %v25164_v57  ;;  %20396 = vmatpush3.bf16.msra.mxu1 %v24006_v18  ;;  %v24012_v18 = vld [vmem:[%s27545_s1 + $0x3a0] sm:$0xff]  }
 0x3df   : > { %20397 = vmatprep.subr.bf16.mxu1 %v24007_v19 }
 0x3e2   : > { %20398 = vmatpush3.bf16.msra.mxu1 %v24007_v19  ;;  %v4289_v19 = vld [vmem:[#allocation2 + $0x99] sm:$0xff] }
 0x3e3   : > { %20431 = vmatprep.subr.bf16.mxu1 %v24008_v29  ;;  %v25320_v45 = vpack.c.bf16 %v4289_v19, %v4288_v41  ;;  %v5221_v19 = vld [vmem:[#allocation2 + $0x159] sm:$0xff] }
 0x3e5   : > { %20368 = vmatmul.mubr.bf16.gmra.mrb[16].mxu1 %v25166_v12 }
 0x3e6   : > { %20371 = vmatprep.mubr.bf16.mxu1 %v25170_v32 }
 0x3ed   : > { %20372 = vmatmul.mubr.bf16.gmra.mrb[20].mxu1 %v25172_v37 }
 0x3ee   : > { %20375 = vmatprep.mubr.bf16.mxu1 %v25176_v53 }
 0x3f5   : > { %20376 = vmatmul.mubr.bf16.gmra.mrb[24].mxu1 %v25178_v56 }
 0x3f6   : > { %20379 = vmatprep.mubr.bf16.mxu1 %v25182_v16 }
 0x3fd   : > { %20380 = vmatmul.mubr.bf16.gmra.mrb[28].mxu1 %v25293_v58 }
 0x3fe   : > { %20399 = vmatprep.mubr.bf16.mxu1 %v4310_v7 }
 0x405   : > { %20400 = vmatmul.mubr.bf16.vlgmr.msra.gmra.mrb[0].mxu1 %v25296_v27 }
 0x406   : > { %20403 = vmatprep.mubr.bf16.mxu1 %v25301_v59  ;;  %20432 = vmatpush3.bf16.msra.mxu1 %v24008_v29  ;;  %v4291_v29 = vld [vmem:[#allocation2 + $0xb1] sm:$0xff] }
 0x407   : > { %20433 = vmatprep.subr.bf16.mxu1 %v24009_v55  ;;  %v25325_v7 = vpack.c.bf16 %v4291_v29, %v4290_v54  ;;  %v5218_v29 = vld [vmem:[#allocation2 + $0x139] sm:$0xff] }
 0x40a   : > { %20434 = vmatpush3.bf16.msra.mxu1 %v24009_v55  ;;  %v24015_v55 = vld [vmem:[%s27545_s1 + $0x3b8] sm:$0xff]  }
 0x40b   : > { %20435 = vmatprep.subr.bf16.mxu1 %v24010_v60 }
 0x40d   : > { %20404 = vmatmul.mubr.bf16.gmra.mrb[4].mxu1 %v25308_v49 }
 0x40e   : > { %20407 = vmatprep.mubr.bf16.mxu1 %v25313_v3  ;;  %20436 = vmatpush3.bf16.msra.mxu1 %v24010_v60  ;;  %v24016_v60 = vld [vmem:[%s27545_s1 + $0x3c0] sm:$0xff]  }
 0x40f   : > { %20437 = vmatprep.subr.bf16.mxu1 %v24011_v2 }
 0x412   : > { %20438 = vmatpush3.bf16.msra.mxu1 %v24011_v2  ;;  %v5216_v2 = vld [vmem:[#allocation2 + $0x121] sm:$0xff] }
 0x413   : > { %20439 = vmatprep.subr.bf16.mxu1 %v24012_v18 }
 0x415   : > { %20408 = vmatmul.mubr.bf16.gmra.mrb[8].mxu1 %v25320_v45 }
 0x416   : > { %20411 = vmatprep.mubr.bf16.mxu1 %v25325_v7  ;;  %20440 = vmatpush3.bf16.msra.mxu1 %v24012_v18  ;;  %v5219_v18 = vld [vmem:[#allocation2 + $0x141] sm:$0xff] }
 0x417   : > { %20441 = vmatprep.subr.bf16.mxu1 %v24013_v4  ;;  %v5239_v41 = vpack.c.bf16 %v5219_v18, %v5218_v29  ;;  %v24047_v29 = vld [vmem:[%s27545_s1 + $0x4f8] sm:$0xff]  }
 0x41a   : > { %20442 = vmatpush3.bf16.msra.mxu1 %v24013_v4  ;;  %v5223_v4 = vld [vmem:[#allocation2 + $0x171] sm:$0xff] }
 0x41b   : > { %20443 = vmatprep.subr.bf16.mxu1 %v24014_v42 }
 0x41d   : > { %20412 = vmatmul.mubr.bf16.gmra.mrb[12].mxu1 %v25332_v10 }
 0x41e   : > { %20415 = vmatprep.mubr.bf16.mxu1 %v25071_v43  ;;  %20444 = vmatpush3.bf16.msra.mxu1 %v24014_v42  ;;  %v24018_v43 = vld [vmem:[%s27545_s1 + $0x3d0] sm:$0xff]  }
 0x41f   : > { %20445 = vmatprep.subr.bf16.mxu1 %v24015_v55  ;;  %v5222_v42 = vld [vmem:[#allocation2 + $0x169] sm:$0xff] }
 0x420   : > { %v5241_v24 = vpack.c.bf16 %v5223_v4, %v5222_v42  ;;  %v5810_v4 = vsub.s32 2, %v24984_v0  ;;  %v24332_v42 = vld [vmem:[%s27546_s2] sm:$0xff] }
 0x422   : > { %20446 = vmatpush3.bf16.msra.mxu1 %v24015_v55  ;;  %v5226_v55 = vld [vmem:[#allocation2 + $0x199] sm:$0xff] }
 0x423   : > { %20479 = vmatprep.subr.bf16.mxu1 %v24016_v60 }
 0x425   : > { %20416 = vmatmul.mubr.bf16.gmra.mrb[16].mxu1 %v4319_v25  ;;  %v5502_v25 = vld [vmem:[#allocation2 + $0x32] sm:$0xff] }
 0x426   : > { %20419 = vmatprep.mubr.bf16.mxu1 %v25085_v23  ;;  %v24020_v23 = vld [vmem:[%s27545_s1 + $0x3e0] sm:$0xff]  }
 0x42d   : > { %20420 = vmatmul.mubr.bf16.gmra.mrb[20].mxu1 %v25082_v9  ;;  %v24019_v9 = vld [vmem:[%s27545_s1 + $0x3d8] sm:$0xff]  }
 0x42e   : > { %20423 = vmatprep.mubr.bf16.mxu1 %v25099_v35  ;;  %v24022_v35 = vld [vmem:[%s27545_s1 + $0x3f0] sm:$0xff]  }
 0x435   : > { %20424 = vmatmul.mubr.bf16.gmra.mrb[24].mxu1 %v25096_v28  ;;  %v24021_v28 = vld [vmem:[%s27545_s1 + $0x3e8] sm:$0xff]  }
 0x436   : > { %20427 = vmatprep.mubr.bf16.mxu1 %v25111_v13  ;;  %v24024_v13 = vld [vmem:[%s27545_s1 + $0x400] sm:$0xff]  }
 0x43d   : > { %20428 = vmatmul.mubr.bf16.gmra.mrb[28].mxu1 %v25109_v6  ;;  %v24023_v6 = vld [vmem:[%s27545_s1 + $0x3f8] sm:$0xff]  }
 0x43e   : > { %20447 = vmatprep.mubr.bf16.mxu1 %v25185_v44  ;;  %v4614_v44 = vld [vmem:[#allocation2 + $0x182] sm:$0xff] }
 0x445   : > { %20448 = vmatmul.mubr.bf16.vlgmr.msra.gmra.mrb[0].mxu1 %v25190_v51  ;;  %v4615_v51 = vld [vmem:[#allocation2 + $0x18a] sm:$0xff] }
 0x446   : > { %20451 = vmatprep.mubr.bf16.mxu1 %v25197_v62  ;;  %20480 = vmatpush3.bf16.msra.mxu1 %v24016_v60  ;;  %v25391_v62 = vpack.c.bf16 %v4615_v51, %v4614_v44  ;;  %v5227_v60 = vld [vmem:[#allocation2 + $0x1a1] sm:$0xff] }
 0x447   : > { %20481 = vmatprep.subr.bf16.mxu1 %v24017_v11  ;;  %v5508_v44 = vld [vmem:[#allocation2 + $0x7a] sm:$0xff]  ;;  %v5509_v51 = vld [vmem:[#allocation2 + $0x82] sm:$0xff] }
 0x44a   : > { %20482 = vmatpush3.bf16.msra.mxu1 %v24017_v11  ;;  %v5503_v11 = vld [vmem:[#allocation2 + $0x3a] sm:$0xff] }
 0x44b   : > { %20483 = vmatprep.subr.bf16.mxu1 %v24018_v43 }
 0x44d   : > { %20452 = vmatmul.mubr.bf16.gmra.mrb[4].mxu1 %v25202_v46  ;;  %v24025_v46 = vld [vmem:[%s27545_s1 + $0x408] sm:$0xff]  }
 0x44e   : > { %20455 = vmatprep.mubr.bf16.mxu1 %v25209_v8  ;;  %20484 = vmatpush3.bf16.msra.mxu1 %v24018_v43  ;;  %v24026_v8 = vld [vmem:[%s27545_s1 + $0x410] sm:$0xff]   ;;  %v5534_v43 = vpack.c.bf16 %v5503_v11, %v5502_v25 }
 0x44f   : > { %20485 = vmatprep.subr.bf16.mxu1 %v24019_v9 }
 0x452   : > { %20486 = vmatpush3.bf16.msra.mxu1 %v24019_v9  ;;  %v5504_v9 = vld [vmem:[#allocation2 + $0x4a] sm:$0xff] }
 0x453   : > { %20487 = vmatprep.subr.bf16.mxu1 %v24020_v23 }
 0x455   : > { %20456 = vmatmul.mubr.bf16.gmra.mrb[8].mxu1 %v25214_v50  ;;  %v24044_v50 = vld [vmem:[%s27545_s1 + $0x4e0] sm:$0xff]  }
 0x456   : > { %20459 = vmatprep.mubr.bf16.mxu1 %v25221_v36  ;;  %20488 = vmatpush3.bf16.msra.mxu1 %v24020_v23  ;;  %v24035_v36 = vld [vmem:[%s27545_s1 + $0x458] sm:$0xff]  }
 0x457   : > { %20489 = vmatprep.subr.bf16.mxu1 %v24021_v28  ;;  %v5505_v23 = vld [vmem:[#allocation2 + $0x52] sm:$0xff] }
 0x45a   : > { %20490 = vmatpush3.bf16.msra.mxu1 %v24021_v28  ;;  %v5506_v28 = vld [vmem:[#allocation2 + $0x62] sm:$0xff] }
 0x45b   : > { %20491 = vmatprep.subr.bf16.mxu1 %v24022_v35 }
 0x45d   : > { %20460 = vmatmul.mubr.bf16.gmra.mrb[12].mxu1 %v25226_v38  ;;  %v24045_v38 = vld [vmem:[%s27545_s1 + $0x4e8] sm:$0xff]  }
 0x45e   : > { %20463 = vmatprep.mubr.bf16.mxu1 %v25233_v30  ;;  %20492 = vmatpush3.bf16.msra.mxu1 %v24022_v35  ;;  %v24036_v30 = vld [vmem:[%s27545_s1 + $0x460] sm:$0xff]   ;;  %v5507_v35 = vld [vmem:[#allocation2 + $0x6a] sm:$0xff] }
 0x45f   : > { %20493 = vmatprep.subr.bf16.mxu1 %v24023_v6 }
 0x462   : > { %20494 = vmatpush3.bf16.msra.mxu1 %v24023_v6  ;;  %v5535_v6 = vpack.c.bf16 %v5505_v23, %v5504_v9 }
 0x463   : > { %20527 = vmatprep.subr.bf16.mxu1 %v24024_v13 }
 0x465   : > { %20464 = vmatmul.mubr.bf16.gmra.mrb[16].mxu1 %v25235_v14  ;;  %v24037_v14 = vld [vmem:[%s27545_s1 + $0x468] sm:$0xff]  }
 0x466   : > { %20467 = vmatprep.mubr.bf16.mxu1 %v25239_v47  ;;  %v24038_v47 = vld [vmem:[%s27545_s1 + $0x470] sm:$0xff]  }
 0x46d   : > { %20468 = vmatmul.mubr.bf16.gmra.mrb[20].mxu1 %v25241_v34  ;;  %v5211_v34 = vld [vmem:[#allocation2 + $0xe1] sm:$0xff] }
 0x46e   : > { %20471 = vmatprep.mubr.bf16.mxu1 %v25245_v63  ;;  %v5213_v63 = vld [vmem:[#allocation2 + $0xf9] sm:$0xff] }
 0x475   : > { %20472 = vmatmul.mubr.bf16.gmra.mrb[24].mxu1 %v25247_v15  ;;  %v5210_v15 = vld [vmem:[#allocation2 + $0xd9] sm:$0xff] }
 0x476   : > { %20475 = vmatprep.mubr.bf16.mxu1 %v25251_v33  ;;  %v5235_v33 = vpack.c.bf16 %v5211_v34, %v5210_v15  ;;  %v5525_v15 = vld [vmem:[#allocation2 + $0x142] sm:$0xff] }
 0x47d   : > { %20476 = vmatmul.mubr.bf16.gmra.mrb[28].mxu1 %v25391_v62 }
 0x47e   : > { %20495 = vmatprep.mubr.bf16.mxu1 %v25120_v26  ;;  %v24027_v26 = vld [vmem:[%s27545_s1 + $0x418] sm:$0xff]  }
 0x485   : > { %20496 = vmatmul.mubr.bf16.vlgmr.msra.gmra.mrb[0].mxu1 %v25128_v48  ;;  %v24028_v48 = vld [vmem:[%s27545_s1 + $0x420] sm:$0xff]  }
 0x486   : > { %20499 = vmatprep.mubr.bf16.mxu1 %v25133_v52  ;;  %20528 = vmatpush3.bf16.msra.mxu1 %v24024_v13  ;;  %v24029_v52 = vld [vmem:[%s27545_s1 + $0x428] sm:$0xff]   ;;  %v5536_v13 = vpack.c.bf16 %v5507_v35, %v5506_v28 }
 0x487   : > { %20529 = vmatprep.subr.bf16.mxu1 %v24025_v46 }
 0x48a   : > { %20530 = vmatpush3.bf16.msra.mxu1 %v24025_v46  ;;  %v5510_v46 = vld [vmem:[#allocation2 + $0x92] sm:$0xff] }
 0x48b   : > { %20531 = vmatprep.subr.bf16.mxu1 %v24026_v8 }
 0x48d   : > { %20500 = vmatmul.mubr.bf16.gmra.mrb[4].mxu1 %v25140_v61  ;;  %v24030_v61 = vld [vmem:[%s27545_s1 + $0x430] sm:$0xff]  }
 0x48e   : > { %20503 = vmatprep.mubr.bf16.mxu1 %v25145_v20  ;;  %20532 = vmatpush3.bf16.msra.mxu1 %v24026_v8  ;;  %v24031_v20 = vld [vmem:[%s27545_s1 + $0x438] sm:$0xff]  }
 0x48f   : > { %20533 = vmatprep.subr.bf16.mxu1 %v24027_v26  ;;  %v5511_v8 = vld [vmem:[#allocation2 + $0x9a] sm:$0xff] }
 0x492   : > { %20534 = vmatpush3.bf16.msra.mxu1 %v24027_v26  ;;  %v5537_v26 = vpack.c.bf16 %v5509_v51, %v5508_v44 }
 0x493   : > { %20535 = vmatprep.subr.bf16.mxu1 %v24028_v48 }
 0x495   : > { %20504 = vmatmul.mubr.bf16.gmra.mrb[8].mxu1 %v25152_v31  ;;  %v24032_v31 = vld [vmem:[%s27545_s1 + $0x440] sm:$0xff]  }
 0x496   : > { %20507 = vmatprep.mubr.bf16.mxu1 %v25157_v40  ;;  %20536 = vmatpush3.bf16.msra.mxu1 %v24028_v48  ;;  %v24331_v40 = vld [vmem:[#allocation2] sm:$0xff]  ;;  %v5538_v48 = vpack.c.bf16 %v5511_v8, %v5510_v46 }
 0x497   : > { %20537 = vmatprep.subr.bf16.mxu1 %v24029_v52 }
 0x49a   : > { %20538 = vmatpush3.bf16.msra.mxu1 %v24029_v52  ;;  %v5512_v52 = vld [vmem:[#allocation2 + $0xaa] sm:$0xff] }
 0x49b   : > { %20539 = vmatprep.subr.bf16.mxu1 %v24030_v61 }
 0x49d   : > { %20508 = vmatmul.mubr.bf16.gmra.mrb[12].mxu1 %v25164_v57  ;;  %v25433_v57 = vpack.c.bf16 %v24331_v40, %v24331_v40 }
 0x49e   : > { %20511 = vmatprep.mubr.bf16.mxu1 %v25166_v12  ;;  %20540 = vmatpush3.bf16.msra.mxu1 %v24030_v61  ;;  %v24040_v12 = vld [vmem:[%s27545_s1 + $0x4c0] sm:$0xff]   ;;  %v5513_v61 = vld [vmem:[#allocation2 + $0xb2] sm:$0xff] }
 0x49f   : > { %20541 = vmatprep.subr.bf16.mxu1 %v24031_v20  ;;  %20623 = vmatprep.subr.bf16.mxu0 %v24040_v12  ;;  %v5539_v40 = vpack.c.bf16 %v5513_v61, %v5512_v52 }
 0x4a0   : > { %20624 = vmatpush3.bf16.msra.mxu0 %v24040_v12 }
 0x4a2   : > { %20542 = vmatpush3.bf16.msra.mxu1 %v24031_v20  ;;  %v5514_v20 = vld [vmem:[#allocation2 + $0xc2] sm:$0xff] }
 0x4a3   : > { %20575 = vmatprep.subr.bf16.mxu1 %v24032_v31 }
 0x4a5   : > { %20512 = vmatmul.mubr.bf16.gmra.mrb[16].mxu1 %v25170_v32  ;;  %v24041_v32 = vld [vmem:[%s27545_s1 + $0x4c8] sm:$0xff]  }
 0x4a6   : > { %20515 = vmatprep.mubr.bf16.mxu1 %v25172_v37  ;;  %20625 = vmatprep.subr.bf16.mxu0 %v24041_v32  ;;  %v24042_v37 = vld [vmem:[%s27545_s1 + $0x4d0] sm:$0xff]  }
 0x4a7   : > { %20626 = vmatpush3.bf16.msra.mxu0 %v24041_v32  ;;  %v5516_v32 = vld [vmem:[#allocation2 + $0xda] sm:$0xff] }
 0x4a8   : > { %20627 = vmatprep.subr.bf16.mxu0 %v24042_v37 }
 0x4ab   : > { %20628 = vmatpush3.bf16.msra.mxu0 %v24042_v37  ;;  %v5517_v37 = vld [vmem:[#allocation2 + $0xe2] sm:$0xff] }
 0x4ad   : > { %20516 = vmatmul.mubr.bf16.gmra.mrb[20].mxu1 %v25176_v53  ;;  %v24033_v53 = vld [vmem:[%s27545_s1 + $0x448] sm:$0xff]  }
 0x4ae   : > { %20519 = vmatprep.mubr.bf16.mxu1 %v25178_v56  ;;  %v24043_v56 = vld [vmem:[%s27545_s1 + $0x4d8] sm:$0xff]  }
 0x4af   : > { %20629 = vmatprep.subr.bf16.mxu0 %v24043_v56 }
 0x4b0   : > { %20630 = vmatpush3.bf16.msra.mxu0 %v24043_v56  ;;  %v5519_v56 = vld [vmem:[#allocation2 + $0xfa] sm:$0xff] }
 0x4b1   : > { %20631 = vmatprep.subr.bf16.mxu0 %v24044_v50 }
 0x4b4   : > { %20632 = vmatpush3.bf16.msra.mxu0 %v24044_v50 }
 0x4b5   : > { %20520 = vmatmul.mubr.bf16.gmra.mrb[24].mxu1 %v25182_v16  ;;  %v24034_v16 = vld [vmem:[%s27545_s1 + $0x450] sm:$0xff]   ;;  %20633 = vmatprep.subr.bf16.mxu0 %v24045_v38 }
 0x4b6   : > { %20523 = vmatprep.mubr.bf16.mxu1 %v25293_v58  ;;  %v24039_v58 = vld [vmem:[%s27545_s1 + $0x478] sm:$0xff]  }
 0x4b8   : > { %20634 = vmatpush3.bf16.msra.mxu0 %v24045_v38  ;;  %v5521_v38 = vld [vmem:[#allocation2 + $0x112] sm:$0xff] }
 0x4bd   : > { %20524 = vmatmul.mubr.bf16.gmra.mrb[28].mxu1 %v25433_v57 }
 0x4be   : > { %20543 = vmatprep.mubr.bf16.mxu1 %v25296_v27  ;;  %v5236_v27 = vpack.c.bf16 %v5213_v63, %v25342_v17  ;;  %v5243_v17 = vpack.c.bf16 %v5227_v60, %v5226_v55  ;;  %v5524_v63 = vld [vmem:[#allocation2 + $0x13a] sm:$0xff] }
 0x4c5   : > { %20544 = vmatmul.mubr.bf16.vlgmr.msra.gmra.mrb[0].mxu1 %v25301_v59  ;;  %v5215_v59 = vld [vmem:[#allocation2 + $0x111] sm:$0xff] }
 0x4c6   : > { %20547 = vmatprep.mubr.bf16.mxu1 %v25308_v49  ;;  %20576 = vmatpush3.bf16.msra.mxu1 %v24032_v31  ;;  %v5214_v49 = vld [vmem:[#allocation2 + $0x109] sm:$0xff] }
 0x4c7   : > { %20577 = vmatprep.subr.bf16.mxu1 %v24033_v53  ;;  %v5237_v21 = vpack.c.bf16 %v5215_v59, %v5214_v49  ;;  %v5515_v31 = vld [vmem:[#allocation2 + $0xca] sm:$0xff]  ;;  %v5529_v49 = vld [vmem:[#allocation2 + $0x172] sm:$0xff] }
 0x4c8   : > { %v5540_v12 = vpack.c.bf16 %v5515_v31, %v5514_v20 }
 0x4ca   : > { %20578 = vmatpush3.bf16.msra.mxu1 %v24033_v53  ;;  %v5518_v53 = vld [vmem:[#allocation2 + $0xf2] sm:$0xff] }
 0x4cb   : > { %20579 = vmatprep.subr.bf16.mxu1 %v24034_v16  ;;  %v5542_v50 = vpack.c.bf16 %v5519_v56, %v5518_v53 }
 0x4cd   : > { %20548 = vmatmul.mubr.bf16.gmra.mrb[4].mxu1 %v25313_v3  ;;  %v5238_v3 = vpack.c.bf16 %v5217_v39, %v5216_v2  ;;  %v5528_v39 = vld [vmem:[#allocation2 + $0x16a] sm:$0xff]  ;;  %v5532_v2 = vld [vmem:[#allocation2 + $0x19a] sm:$0xff] }
 0x4ce   : > { %20551 = vmatprep.mubr.bf16.mxu1 %v25320_v45  ;;  %20580 = vmatpush3.bf16.msra.mxu1 %v24034_v16  ;;  %v5220_v45 = vld [vmem:[#allocation2 + $0x151] sm:$0xff]  ;;  %v5541_v16 = vpack.c.bf16 %v5517_v37, %v5516_v32 }
 0x4cf   : > { %20581 = vmatprep.subr.bf16.mxu1 %v24035_v36  ;;  %v5240_v54 = vpack.c.bf16 %v5221_v19, %v5220_v45  ;;  %v24046_v19 = vld [vmem:[%s27545_s1 + $0x4f0] sm:$0xff]  }
 0x4d0   : > { %20635 = vmatprep.subr.bf16.mxu0 %v24046_v19  ;;  %v6010_v45 = vld [vmem:[#allocation2 + $0x9] sm:$0xff] }
 0x4d1   : > { %20636 = vmatpush3.bf16.msra.mxu0 %v24046_v19 }
 0x4d2   : > { %20582 = vmatpush3.bf16.msra.mxu1 %v24035_v36  ;;  %v5520_v36 = vld [vmem:[#allocation2 + $0x10a] sm:$0xff]  ;;  %20637 = vmatprep.subr.bf16.mxu0 %v24047_v29 }
 0x4d3   : > { %20583 = vmatprep.subr.bf16.mxu1 %v24036_v30 }
 0x4d5   : > { %20552 = vmatmul.mubr.bf16.gmra.mrb[8].mxu1 %v25325_v7  ;;  %v5225_v7 = vld [vmem:[#allocation2 + $0x189] sm:$0xff]  ;;  %20638 = vmatpush3.bf16.msra.mxu0 %v24047_v29 }
 0x4d6   : > { %20555 = vmatprep.mubr.bf16.mxu1 %v25332_v10  ;;  %20584 = vmatpush3.bf16.msra.mxu1 %v24036_v30  ;;  %v5242_v10 = vpack.c.bf16 %v5225_v7, %v5224_v5  ;;  %v5522_v30 = vld [vmem:[#allocation2 + $0x122] sm:$0xff]  ;;  %v5846_v7 = vsub.s32 3, %v24984_v0 }
 0x4d7   : > { %20585 = vmatprep.subr.bf16.mxu1 %v24037_v14 }
 0x4d8   : > { %v25504_v5 = vrot.slane %v24332_v42, %v5846_v7 }
 0x4da   : > { %20586 = vmatpush3.bf16.msra.mxu1 %v24037_v14  ;;  %v5523_v14 = vld [vmem:[#allocation2 + $0x12a] sm:$0xff] }
 0x4db   : > { %20587 = vmatprep.subr.bf16.mxu1 %v24038_v47  ;;  %v5544_v34 = vpack.c.bf16 %v5523_v14, %v5522_v30  ;;  %v24050_v30 = vld [vmem:[%s27545_s1 + $0x490] sm:$0xff]  }
 0x4dd   : > { %20556 = vmatmul.mubr.bf16.gmra.mrb[12].mxu1 %v5235_v33  ;;  %v5526_v33 = vld [vmem:[#allocation2 + $0x152] sm:$0xff] }
 0x4de   : > { %20559 = vmatprep.mubr.bf16.mxu1 %v5236_v27  ;;  %20588 = vmatpush3.bf16.msra.mxu1 %v24038_v47  ;;  %v5543_v47 = vpack.c.bf16 %v5521_v38, %v5520_v36  ;;  %v5545_v27 = vpack.c.bf16 %v5525_v15, %v5524_v63 }
 0x4df   : > { %20589 = vmatprep.subr.bf16.mxu1 %v24039_v58 }
 0x4e2   : > { %20590 = vmatpush3.bf16.msra.mxu1 %v24039_v58  ;;  %v5527_v58 = vld [vmem:[#allocation2 + $0x15a] sm:$0xff] }
 0x4e3   : > { %v5546_v59 = vpack.c.bf16 %v5527_v58, %v5526_v33 }
 0x4e5   : > { %20560 = vmatmul.mubr.bf16.gmra.mrb[16].mxu1 %v5237_v21  ;;  %v5547_v21 = vpack.c.bf16 %v5529_v49, %v5528_v39  ;;  %v24051_v39 = vld [vmem:[%s27545_s1 + $0x498] sm:$0xff]  }
 0x4e6   : > { %20563 = vmatprep.mubr.bf16.mxu1 %v5238_v3  ;;  %v5533_v3 = vld [vmem:[#allocation2 + $0x1a2] sm:$0xff] }
 0x4e7   : > { %v5549_v18 = vpack.c.bf16 %v5533_v3, %v5532_v2 }
 0x4ed   : > { %20564 = vmatmul.mubr.bf16.gmra.mrb[20].mxu1 %v5239_v41  ;;  %v6009_v41 = vld [vmem:[#allocation2 + $0x1] sm:$0xff] }
 0x4ee   : > { %20567 = vmatprep.mubr.bf16.mxu1 %v5240_v54  ;;  %v6041_v54 = vpack.c.bf16 %v6010_v45, %v6009_v41 }
 0x4f0   : > { %20639 = vmatprep.mubr.bf16.mxu0 %v6041_v54  ;;  %v24052_v54 = vld [vmem:[%s27545_s1 + $0x4a0] sm:$0xff]  }
 0x4f5   : > { %20568 = vmatmul.mubr.bf16.gmra.mrb[24].mxu1 %v5241_v24  ;;  %v25500_v24 = vrot.slane %v24332_v42, %v5810_v4 }
 0x4f6   : > { %20571 = vmatprep.mubr.bf16.mxu1 %v5242_v10 }
 0x4fd   : > { %20572 = vmatmul.mubr.bf16.gmra.mrb[28].mxu1 %v5243_v17 }
 0x4fe   : > { %20591 = vmatprep.mubr.bf16.mxu1 %v5534_v43 }
 0x505   : > { %20592 = vmatmul.mubr.bf16.vlgmr.msra.gmra.mrb[0].mxu1 %v5535_v6 }
 0x506   : > { %20595 = vmatprep.mubr.bf16.mxu1 %v5536_v13 }
 0x50d   : > { %20596 = vmatmul.mubr.bf16.gmra.mrb[4].mxu1 %v5537_v26 }
 0x50e   : > { %20599 = vmatprep.mubr.bf16.mxu1 %v5538_v48 }
 0x515   : > { %20600 = vmatmul.mubr.bf16.gmra.mrb[8].mxu1 %v5539_v40  ;;  %v24049_v40 = vld [vmem:[%s27545_s1 + $0x488] sm:$0xff]  }
 0x516   : > { %20603 = vmatprep.mubr.bf16.mxu1 %v5540_v12 }
 0x51d   : > { %20604 = vmatmul.mubr.bf16.gmra.mrb[12].mxu1 %v5541_v16 }
 0x51e   : > { %20607 = vmatprep.mubr.bf16.mxu1 %v5542_v50 }
 0x525   : > { %20608 = vmatmul.mubr.bf16.gmra.mrb[16].mxu1 %v5543_v47 }
 0x526   : > { %20611 = vmatprep.mubr.bf16.mxu1 %v5544_v34 }
 0x52d   : > { %20612 = vmatmul.mubr.bf16.gmra.mrb[20].mxu1 %v5545_v27 }
 0x52e   : > { %20615 = vmatprep.mubr.bf16.mxu1 %v5546_v59 }
 0x535   : > { %20616 = vmatmul.mubr.bf16.gmra.mrb[24].mxu1 %v5547_v21 }
 0x536   : > { %20619 = vmatprep.mubr.bf16.mxu1 %v25391_v62  ;;  %v24048_v62 = vld [vmem:[%s27545_s1 + $0x480] sm:$0xff]  }
 0x537   : > { %20671 = vmatprep.subr.bf16.mxu0 %v24048_v62 }
 0x53d   : > { %20620 = vmatmul.mubr.bf16.gmra.mrb[28].mxu1 %v5549_v18 }
 0x5d8   : > { %v20593_v10 = vpop.f32.mrb[0].mxu1 }
 0x5d9   : > { %v5814_v55 = vmul.f32 %v20593_v10, %v25500_v24  ;;  %v5649_v60 = vpop.f32.mrb[1].mxu1 }
 0x5da   : > { %v5812_v17 = vmul.f32 %v25500_v24, %v5649_v60  ;;  %v20594_v25 = vpop.f32.mrb[2].mxu1 }
 0x5db   : > { %v5850_v11 = vadd.f32 %v25504_v5, %v5814_v55  ;;  %v5815_v43 = vmul.f32 %v20594_v25, %v25500_v24  ;;  %v5652_v9 = vpop.f32.mrb[3].mxu1 }
 0x5dc   : > { %v5848_v23 = vadd.f32 %v25504_v5, %v5812_v17  ;;  %v5813_v28 = vmul.f32 %v25500_v24, %v5652_v9  ;;  %v24053_v9 = vld [vmem:[%s27545_s1 + $0x4a8] sm:$0xff]  }
 0x5dd   : > { %v5882_v35 = vmax.f32 %v5850_v11, 0.0  ;;  %v5851_v6 = vadd.f32 %v25504_v5, %v5815_v43 }
 0x5de   : > { %v5880_v13 = vmax.f32 %v5848_v23, 0.0  ;;  %v5849_v44 = vadd.f32 %v25504_v5, %v5813_v28 }
 0x5df   : > { %5914 = vst [vmem:[#allocation2 + $0x31] sm:$0xff] %v5882_v35  ;;  %v5883_v51 = vmax.f32 %v5851_v6, 0.0 }
 0x5e0   : > { %5912 = vst [vmem:[#allocation2 + $0x19] sm:$0xff] %v5880_v13  ;;  %v5881_v46 = vmax.f32 %v5849_v44, 0.0  ;;  %v20597_v8 = vpop.f32.mrb[4].mxu1 }
 0x5e1   : > { %5915 = vst [vmem:[#allocation2 + $0x39] sm:$0xff] %v5883_v51  ;;  %v5818_v26 = vmul.f32 %v20597_v8, %v25500_v24  ;;  %v5665_v48 = vpop.f32.mrb[5].mxu1  ;;  %v6043_v52 = vpack.c.bf16 %v5883_v51, %v5882_v35 }
 0x5e2   : > { %5913 = vst [vmem:[#allocation2 + $0x21] sm:$0xff] %v5881_v46  ;;  %v5816_v61 = vmul.f32 %v25500_v24, %v5665_v48  ;;  %v20598_v20 = vpop.f32.mrb[6].mxu1  ;;  %v6042_v31 = vpack.c.bf16 %v5881_v46, %v5880_v13 }
 0x5e3   : > { %v5854_v12 = vadd.f32 %v25504_v5, %v5818_v26  ;;  %v5819_v32 = vmul.f32 %v20598_v20, %v25500_v24  ;;  %v5668_v37 = vpop.f32.mrb[7].mxu1  ;;  %v24054_v26 = vld [vmem:[%s27545_s1 + $0x4b0] sm:$0xff]  }
 0x5e4   : > { %v5852_v53 = vadd.f32 %v25504_v5, %v5816_v61  ;;  %v5817_v56 = vmul.f32 %v25500_v24, %v5668_v37  ;;  %20640 = vmatmul.mubr.bf16.vlgmr.msra.gmra.mrb[32].mxu0 %v6042_v31 }
 0x5e5   : > { %v5886_v16 = vmax.f32 %v5854_v12, 0.0  ;;  %v5855_v50 = vadd.f32 %v25504_v5, %v5819_v32  ;;  %20643 = vmatprep.mubr.bf16.mxu0 %v6043_v52  ;;  %20672 = vmatpush3.bf16.msra.mxu0 %v24048_v62 }
 0x5e6   : > { %v5884_v36 = vmax.f32 %v5852_v53, 0.0  ;;  %v5853_v38 = vadd.f32 %v25504_v5, %v5817_v56  ;;  %20673 = vmatprep.subr.bf16.mxu0 %v24049_v40  ;;  %v24055_v53 = vld [vmem:[%s27545_s1 + $0x4b8] sm:$0xff]  }
 0x5e7   : > { %5918 = vst [vmem:[#allocation2 + $0x61] sm:$0xff] %v5886_v16  ;;  %v5887_v14 = vmax.f32 %v5855_v50, 0.0 }
 0x5e8   : > { %5916 = vst [vmem:[#allocation2 + $0x49] sm:$0xff] %v5884_v36  ;;  %v5885_v47 = vmax.f32 %v5853_v38, 0.0  ;;  %v20601_v34 = vpop.f32.mrb[8].mxu1 }
 0x5e9   : > { %5919 = vst [vmem:[#allocation2 + $0x69] sm:$0xff] %v5887_v14  ;;  %v5822_v63 = vmul.f32 %v20601_v34, %v25500_v24  ;;  %v5681_v15 = vpop.f32.mrb[9].mxu1  ;;  %v6045_v33 = vpack.c.bf16 %v5887_v14, %v5886_v16  ;;  %20674 = vmatpush3.bf16.msra.mxu0 %v24049_v40 }
 0x5ea   : > { %5917 = vst [vmem:[#allocation2 + $0x51] sm:$0xff] %v5885_v47  ;;  %v5820_v58 = vmul.f32 %v25500_v24, %v5681_v15  ;;  %v20602_v27 = vpop.f32.mrb[10].mxu1  ;;  %v6044_v59 = vpack.c.bf16 %v5885_v47, %v5884_v36  ;;  %20675 = vmatprep.subr.bf16.mxu0 %v24050_v30 }
 0x5eb   : > { %v5858_v49 = vadd.f32 %v25504_v5, %v5822_v63  ;;  %v5823_v21 = vmul.f32 %v20602_v27, %v25500_v24  ;;  %v5684_v2 = vpop.f32.mrb[11].mxu1  ;;  %v25570_v63 = vld [vmem:[%s27545_s1 + $0x500] sm:$0xff]  }
 0x5ec   : > { %v5856_v3 = vadd.f32 %v25504_v5, %v5820_v58  ;;  %v5821_v18 = vmul.f32 %v25500_v24, %v5684_v2  ;;  %20644 = vmatmul.mubr.bf16.gmra.mrb[36].mxu0 %v6044_v59 }
 0x5ed   : > { %v5890_v19 = vmax.f32 %v5858_v49, 0.0  ;;  %v5859_v29 = vadd.f32 %v25504_v5, %v5823_v21  ;;  %20647 = vmatprep.mubr.bf16.mxu0 %v6045_v33  ;;  %20676 = vmatpush3.bf16.msra.mxu0 %v24050_v30 }
 0x5ee   : > { %v5888_v41 = vmax.f32 %v5856_v3, 0.0  ;;  %v5857_v45 = vadd.f32 %v25504_v5, %v5821_v18  ;;  %20677 = vmatprep.subr.bf16.mxu0 %v24051_v39 }
 0x5ef   : > { %5922 = vst [vmem:[#allocation2 + $0x91] sm:$0xff] %v5890_v19  ;;  %v5891_v62 = vmax.f32 %v5859_v29, 0.0 }
 0x5f0   : > { %5920 = vst [vmem:[#allocation2 + $0x79] sm:$0xff] %v5888_v41  ;;  %v5889_v42 = vmax.f32 %v5857_v45, 0.0  ;;  %v20605_v10 = vpop.f32.mrb[12].mxu1 }
 0x5f1   : > { %5923 = vst [vmem:[#allocation2 + $0x99] sm:$0xff] %v5891_v62  ;;  %v5826_v55 = vmul.f32 %v20605_v10, %v25500_v24  ;;  %v5697_v60 = vpop.f32.mrb[13].mxu1  ;;  %v6047_v17 = vpack.c.bf16 %v5891_v62, %v5890_v19  ;;  %20678 = vmatpush3.bf16.msra.mxu0 %v24051_v39 }
 0x5f2   : > { %5921 = vst [vmem:[#allocation2 + $0x81] sm:$0xff] %v5889_v42  ;;  %v5824_v25 = vmul.f32 %v25500_v24, %v5697_v60  ;;  %v20606_v11 = vpop.f32.mrb[14].mxu1  ;;  %v6046_v43 = vpack.c.bf16 %v5889_v42, %v5888_v41  ;;  %20679 = vmatprep.subr.bf16.mxu0 %v24052_v54 }
 0x5f3   : > { %v5862_v23 = vadd.f32 %v25504_v5, %v5826_v55  ;;  %v5827_v28 = vmul.f32 %v20606_v11, %v25500_v24  ;;  %v5700_v35 = vpop.f32.mrb[15].mxu1 }
 0x5f4   : > { %v5860_v6 = vadd.f32 %v25504_v5, %v5824_v25  ;;  %v5825_v13 = vmul.f32 %v25500_v24, %v5700_v35  ;;  %20648 = vmatmul.mubr.bf16.gmra.mrb[40].mxu0 %v6046_v43 }
 0x5f5   : > { %v5894_v44 = vmax.f32 %v5862_v23, 0.0  ;;  %v5863_v51 = vadd.f32 %v25504_v5, %v5827_v28  ;;  %20651 = vmatprep.mubr.bf16.mxu0 %v6047_v17  ;;  %20680 = vmatpush3.bf16.msra.mxu0 %v24052_v54 }
 0x5f6   : > { %v5892_v46 = vmax.f32 %v5860_v6, 0.0  ;;  %v5861_v8 = vadd.f32 %v25504_v5, %v5825_v13  ;;  %20681 = vmatprep.subr.bf16.mxu0 %v24053_v9 }
 0x5f7   : > { %5926 = vst [vmem:[#allocation2 + $0xc1] sm:$0xff] %v5894_v44  ;;  %v5895_v48 = vmax.f32 %v5863_v51, 0.0 }
 0x5f8   : > { %5924 = vst [vmem:[#allocation2 + $0xa9] sm:$0xff] %v5892_v46  ;;  %v5893_v52 = vmax.f32 %v5861_v8, 0.0  ;;  %v20609_v61 = vpop.f32.mrb[16].mxu1 }
 0x5f9   : > { %5927 = vst [vmem:[#allocation2 + $0xc9] sm:$0xff] %v5895_v48  ;;  %v5830_v20 = vmul.f32 %v20609_v61, %v25500_v24  ;;  %v5713_v31 = vpop.f32.mrb[17].mxu1  ;;  %v6049_v40 = vpack.c.bf16 %v5895_v48, %v5894_v44  ;;  %20682 = vmatpush3.bf16.msra.mxu0 %v24053_v9 }
 0x5fa   : > { %5925 = vst [vmem:[#allocation2 + $0xb1] sm:$0xff] %v5893_v52  ;;  %v5828_v12 = vmul.f32 %v25500_v24, %v5713_v31  ;;  %v20610_v32 = vpop.f32.mrb[18].mxu1  ;;  %v6048_v37 = vpack.c.bf16 %v5893_v52, %v5892_v46  ;;  %20683 = vmatprep.subr.bf16.mxu0 %v24054_v26 }
 0x5fb   : > { %v5866_v56 = vadd.f32 %v25504_v5, %v5830_v20  ;;  %v5831_v16 = vmul.f32 %v20610_v32, %v25500_v24  ;;  %v5716_v50 = vpop.f32.mrb[19].mxu1 }
 0x5fc   : > { %v5864_v36 = vadd.f32 %v25504_v5, %v5828_v12  ;;  %v5829_v38 = vmul.f32 %v25500_v24, %v5716_v50  ;;  %20652 = vmatmul.mubr.bf16.gmra.mrb[44].mxu0 %v6048_v37 }
 0x5fd   : > { %v5898_v30 = vmax.f32 %v5866_v56, 0.0  ;;  %v5867_v14 = vadd.f32 %v25504_v5, %v5831_v16  ;;  %20655 = vmatprep.mubr.bf16.mxu0 %v6049_v40  ;;  %20684 = vmatpush3.bf16.msra.mxu0 %v24054_v26 }
 0x5fe   : > { %v5896_v47 = vmax.f32 %v5864_v36, 0.0  ;;  %v5865_v34 = vadd.f32 %v25504_v5, %v5829_v38  ;;  %20685 = vmatprep.subr.bf16.mxu0 %v24055_v53 }
 0x5ff   : > { %5930 = vst [vmem:[#allocation2 + $0xf1] sm:$0xff] %v5898_v30  ;;  %v25572_v15 = vmax.f32 %v5867_v14, 0.0 }
 0x600   : > { %5928 = vst [vmem:[#allocation2 + $0xd9] sm:$0xff] %v5896_v47  ;;  %v5897_v33 = vmax.f32 %v5865_v34, 0.0  ;;  %v20613_v58 = vpop.f32.mrb[20].mxu1 }
 0x601   : > { %5931 = vst [vmem:[#allocation2 + $0xf9] sm:$0xff] %v25572_v15  ;;  %v5834_v27 = vmul.f32 %v20613_v58, %v25500_v24  ;;  %v5729_v59 = vpop.f32.mrb[21].mxu1  ;;  %v6051_v39 = vpack.c.bf16 %v25572_v15, %v5898_v30  ;;  %20686 = vmatpush3.bf16.msra.mxu0 %v24055_v53 }
 0x602   : > { %5929 = vst [vmem:[#allocation2 + $0xe1] sm:$0xff] %v5897_v33  ;;  %v5832_v49 = vmul.f32 %v25500_v24, %v5729_v59  ;;  %v20614_v21 = vpop.f32.mrb[22].mxu1  ;;  %v25578_v2 = vpack.c.bf16 %v5897_v33, %v5896_v47  ;;  %20719 = vmatprep.subr.bf16.mxu0 %v25570_v63  ;;  %v5949_v59 = vld [vmem:[#allocation2 + $0x38] sm:$0xff] }
 0x603   : > { %v5870_v3 = vadd.f32 %v25504_v5, %v5834_v27  ;;  %v5835_v18 = vmul.f32 %v20614_v21, %v25500_v24  ;;  %v5732_v19 = vpop.f32.mrb[23].mxu1  ;;  %v24057_v21 = vld [vmem:[%s27545_s1 + $0x508] sm:$0xff]  }
 0x604   : > { %v5868_v29 = vadd.f32 %v25504_v5, %v5832_v49  ;;  %v5833_v41 = vmul.f32 %v25500_v24, %v5732_v19  ;;  %20656 = vmatmul.mubr.bf16.gmra.mrb[48].mxu0 %v25578_v2  ;;  %v5953_v19 = vld [vmem:[#allocation2 + $0x68] sm:$0xff] }
 0x605   : > { %v5902_v45 = vmax.f32 %v5870_v3, 0.0  ;;  %v5871_v54 = vadd.f32 %v25504_v5, %v5835_v18  ;;  %20659 = vmatprep.mubr.bf16.mxu0 %v6051_v39  ;;  %v5946_v39 = vld [vmem:[#allocation2 + $0x18] sm:$0xff]  ;;  %v5951_v18 = vld [vmem:[#allocation2 + $0x50] sm:$0xff] }
 0x606   : > { %v5900_v62 = vmax.f32 %v5868_v29, 0.0  ;;  %v5869_v42 = vadd.f32 %v25504_v5, %v5833_v41  ;;  %v5950_v29 = vld [vmem:[#allocation2 + $0x48] sm:$0xff] }
 0x607   : > { %5934 = vst [vmem:[#allocation2 + $0x121] sm:$0xff] %v5902_v45  ;;  %v5903_v10 = vmax.f32 %v5871_v54, 0.0  ;;  %v25635_v41 = vpack.c.bf16 %v5951_v18, %v5950_v29  ;;  %v24059_v54 = vld [vmem:[%s27545_s1 + $0x518] sm:$0xff]   ;;  %v6495_v18 = vld [vmem:[#allocation2 + $0x22] sm:$0xff] }
 0x608   : > { %5932 = vst [vmem:[#allocation2 + $0x109] sm:$0xff] %v5900_v62  ;;  %v5901_v55 = vmax.f32 %v5869_v42, 0.0  ;;  %v20617_v60 = vpop.f32.mrb[24].mxu1  ;;  %v5955_v42 = vld [vmem:[#allocation2 + $0x80] sm:$0xff] }
 0x609   : > { %5935 = vst [vmem:[#allocation2 + $0x129] sm:$0xff] %v5903_v10  ;;  %v5838_v17 = vmul.f32 %v20617_v60, %v25500_v24  ;;  %v5745_v25 = vpop.f32.mrb[25].mxu1  ;;  %v25589_v11 = vpack.c.bf16 %v5903_v10, %v5902_v45  ;;  %v5952_v45 = vld [vmem:[#allocation2 + $0x60] sm:$0xff]  ;;  %v5957_v10 = vld [vmem:[#allocation2 + $0x98] sm:$0xff] }
 0x60a   : > { %5933 = vst [vmem:[#allocation2 + $0x111] sm:$0xff] %v5901_v55  ;;  %v5836_v43 = vmul.f32 %v25500_v24, %v5745_v25  ;;  %v20618_v9 = vpop.f32.mrb[26].mxu1  ;;  %v25592_v23 = vpack.c.bf16 %v5901_v55, %v5900_v62  ;;  %v25640_v62 = vpack.c.bf16 %v5953_v19, %v5952_v45  ;;  %v5954_v55 = vld [vmem:[#allocation2 + $0x78] sm:$0xff]  ;;  %v24061_v25 = vld [vmem:[%s27545_s1 + $0x528] sm:$0xff]  }
 0x60b   : > { %v5874_v28 = vadd.f32 %v25504_v5, %v5838_v17  ;;  %v5839_v35 = vmul.f32 %v20618_v9, %v25500_v24  ;;  %v5748_v6 = vpop.f32.mrb[27].mxu1  ;;  %v25647_v60 = vpack.c.bf16 %v5955_v42, %v5954_v55  ;;  %v5956_v17 = vld [vmem:[#allocation2 + $0x90] sm:$0xff]  ;;  %v6497_v29 = vld [vmem:[#allocation2 + $0x3a] sm:$0xff] }
 0x60c   : > { %v5872_v13 = vadd.f32 %v25504_v5, %v5836_v43  ;;  %v5837_v44 = vmul.f32 %v25500_v24, %v5748_v6  ;;  %20660 = vmatmul.mubr.bf16.gmra.mrb[52].mxu0 %v25592_v23  ;;  %v25652_v43 = vpack.c.bf16 %v5957_v10, %v5956_v17  ;;  %v24062_v9 = vld [vmem:[%s27545_s1 + $0x530] sm:$0xff]   ;;  %v5958_v6 = vld [vmem:[#allocation2 + $0xa8] sm:$0xff] }
 0x60d   : > { %v5906_v51 = vmax.f32 %v5874_v28, 0.0  ;;  %v5875_v46 = vadd.f32 %v25504_v5, %v5839_v35  ;;  %20663 = vmatprep.mubr.bf16.mxu0 %v25589_v11  ;;  %v5959_v28 = vld [vmem:[#allocation2 + $0xb0] sm:$0xff]  ;;  %v5961_v35 = vld [vmem:[#allocation2 + $0xc8] sm:$0xff] }
 0x60e   : > { %v5904_v8 = vmax.f32 %v5872_v13, 0.0  ;;  %v5873_v26 = vadd.f32 %v25504_v5, %v5837_v44  ;;  %v25659_v13 = vpack.c.bf16 %v5959_v28, %v5958_v6  ;;  %v5960_v44 = vld [vmem:[#allocation2 + $0xc0] sm:$0xff]  ;;  %v6496_v19 = vld [vmem:[#allocation2 + $0x32] sm:$0xff]  ;;  %v6498_v10 = vld [vmem:[#allocation2 + $0x4a] sm:$0xff] }
 0x60f   : > { %5938 = vst [vmem:[#allocation2 + $0x151] sm:$0xff] %v5906_v51  ;;  %v5907_v48 = vmax.f32 %v5875_v46, 0.0  ;;  %v25664_v46 = vpack.c.bf16 %v5961_v35, %v5960_v44  ;;  %v24066_v42 = vld [vmem:[%s27545_s1 + $0x550] sm:$0xff]   ;;  %v6500_v17 = vld [vmem:[#allocation2 + $0x62] sm:$0xff]  ;;  %v24067_v28 = vld [vmem:[%s27545_s1 + $0x558] sm:$0xff]  }
 0x610   : > { %5936 = vst [vmem:[#allocation2 + $0x139] sm:$0xff] %v5904_v8  ;;  %v5905_v52 = vmax.f32 %v5873_v26, 0.0  ;;  %v20621_v61 = vpop.f32.mrb[28].mxu1  ;;  %v5963_v26 = vld [vmem:[#allocation2 + $0xe0] sm:$0xff]  ;;  %v6499_v55 = vld [vmem:[#allocation2 + $0x52] sm:$0xff] }
 0x611   : > { %5939 = vst [vmem:[#allocation2 + $0x159] sm:$0xff] %v5907_v48  ;;  %v5842_v20 = vmul.f32 %v20621_v61, %v25500_v24  ;;  %v5761_v31 = vpop.f32.mrb[29].mxu1  ;;  %v25603_v40 = vpack.c.bf16 %v5907_v48, %v5906_v51  ;;  %v24063_v51 = vld [vmem:[%s27545_s1 + $0x538] sm:$0xff]   ;;  %v24068_v6 = vld [vmem:[%s27545_s1 + $0x560] sm:$0xff]  }
 0x612   : > { %5937 = vst [vmem:[#allocation2 + $0x141] sm:$0xff] %v5905_v52  ;;  %v5840_v12 = vmul.f32 %v25500_v24, %v5761_v31  ;;  %v20622_v32 = vpop.f32.mrb[30].mxu1  ;;  %v25606_v37 = vpack.c.bf16 %v5905_v52, %v5904_v8  ;;  %v24064_v8 = vld [vmem:[%s27545_s1 + $0x540] sm:$0xff]   ;;  %v5965_v48 = vld [vmem:[#allocation2 + $0xf8] sm:$0xff] }
 0x613   : > { %v5878_v53 = vadd.f32 %v25504_v5, %v5842_v20  ;;  %v5843_v56 = vmul.f32 %v20622_v32, %v25500_v24  ;;  %v5764_v16 = vpop.f32.mrb[31].mxu1  ;;  %v5962_v52 = vld [vmem:[#allocation2 + $0xd8] sm:$0xff]  ;;  %v5964_v20 = vld [vmem:[#allocation2 + $0xf0] sm:$0xff]  ;;  %v5969_v32 = vld [vmem:[#allocation2 + $0x128] sm:$0xff] }
 0x614   : > { %v5876_v50 = vadd.f32 %v25504_v5, %v5840_v12  ;;  %v5841_v36 = vmul.f32 %v25500_v24, %v5764_v16  ;;  %20664 = vmatmul.mubr.bf16.gmra.mrb[56].mxu0 %v25606_v37  ;;  %v5947_v24 = vld [vmem:[#allocation2 + $0x20] sm:$0xff]  ;;  %v25671_v61 = vpack.c.bf16 %v5963_v26, %v5962_v52  ;;  %v25673_v31 = vpack.c.bf16 %v5965_v48, %v5964_v20  ;;  %v5967_v12 = vld [vmem:[#allocation2 + $0x110] sm:$0xff]  ;;  %v24069_v52 = vld [vmem:[%s27545_s1 + $0x568] sm:$0xff]  }
 0x615   : > { %v5910_v38 = vmax.f32 %v5878_v53, 0.0  ;;  %v5879_v30 = vadd.f32 %v25504_v5, %v5843_v56  ;;  %20667 = vmatprep.mubr.bf16.mxu0 %v25603_v40  ;;  %v25622_v49 = vpack.c.bf16 %v5947_v24, %v5946_v39  ;;  %v5966_v53 = vld [vmem:[#allocation2 + $0x108] sm:$0xff]  ;;  %v5968_v16 = vld [vmem:[#allocation2 + $0x120] sm:$0xff] }
 0x616   : > { %v5908_v14 = vmax.f32 %v5876_v50, 0.0  ;;  %v5877_v47 = vadd.f32 %v25504_v5, %v5841_v36  ;;  %v5948_v5 = vld [vmem:[#allocation2 + $0x30] sm:$0xff]  ;;  %v25677_v56 = vpack.c.bf16 %v5967_v12, %v5966_v53  ;;  %v25679_v50 = vpack.c.bf16 %v5969_v32, %v5968_v16  ;;  %v6502_v44 = vld [vmem:[#allocation2 + $0x7a] sm:$0xff]  ;;  %v6508_v16 = vld [vmem:[#allocation2 + $0xc2] sm:$0xff] }
 0x617   : > { %5942 = vst [vmem:[#allocation2 + $0x181] sm:$0xff] %v5910_v38  ;;  %v5911_v34 = vmax.f32 %v5879_v30, 0.0  ;;  %v25627_v3 = vpack.c.bf16 %v5949_v59, %v5948_v5  ;;  %v5970_v30 = vld [vmem:[#allocation2 + $0x138] sm:$0xff]  ;;  %v6493_v24 = vld [vmem:[#allocation2 + $0xa] sm:$0xff] }
 0x618   : > { %5940 = vst [vmem:[#allocation2 + $0x169] sm:$0xff] %v5908_v14  ;;  %v5909_v33 = vmax.f32 %v5877_v47, 0.0  ;;  %v5972_v47 = vld [vmem:[#allocation2 + $0x150] sm:$0xff]  ;;  %v6505_v26 = vld [vmem:[#allocation2 + $0x9a] sm:$0xff] }
 0x619   : > { %5943 = vst [vmem:[#allocation2 + $0x189] sm:$0xff] %v5911_v34  ;;  %v25616_v58 = vpack.c.bf16 %v5911_v34, %v5910_v38  ;;  %v5971_v36 = vld [vmem:[#allocation2 + $0x140] sm:$0xff]  ;;  %v5973_v38 = vld [vmem:[#allocation2 + $0x158] sm:$0xff]  ;;  %v24070_v12 = vld [vmem:[%s27545_s1 + $0x570] sm:$0xff]  }
 0x61a   : > { %5941 = vst [vmem:[#allocation2 + $0x171] sm:$0xff] %v5909_v33  ;;  %v25618_v27 = vpack.c.bf16 %v5909_v33, %v5908_v14  ;;  %v25683_v14 = vpack.c.bf16 %v5971_v36, %v5970_v30  ;;  %v25685_v34 = vpack.c.bf16 %v5973_v38, %v5972_v47  ;;  %v6492_v33 = vld [vmem:[#allocation2 + $0x2] sm:$0xff]  ;;  %v6506_v32 = vld [vmem:[#allocation2 + $0xaa] sm:$0xff]  ;;  %v6507_v53 = vld [vmem:[#allocation2 + $0xb2] sm:$0xff] }
 0x61b   : > { %v6524_v5 = vpack.c.bf16 %v6493_v24, %v6492_v33  ;;  %v6509_v36 = vld [vmem:[#allocation2 + $0xca] sm:$0xff]  ;;  %v25728_v38 = vpack.c.bf16 %v6507_v53, %v6506_v32  ;;  %v24071_v30 = vld [vmem:[%s27545_s1 + $0x578] sm:$0xff]   ;;  %v24072_v33 = vld [vmem:[%s27545_s1 + $0x580] sm:$0xff]  }
 0x61c   : > { %20668 = vmatmul.mubr.bf16.gmra.mrb[60].mxu0 %v25618_v27  ;;  %v25733_v47 = vpack.c.bf16 %v6509_v36, %v6508_v16  ;;  %v6510_v24 = vld [vmem:[#allocation2 + $0xda] sm:$0xff]  ;;  %v24074_v32 = vld [vmem:[%s27545_s1 + $0x590] sm:$0xff]   ;;  %v24077_v16 = vld [vmem:[%s27545_s1 + $0x5a8] sm:$0xff]  }
 0x61d   : > { %20687 = vmatprep.mubr.bf16.mxu0 %v25433_v57  ;;  %v24058_v57 = vld [vmem:[%s27545_s1 + $0x510] sm:$0xff]   ;;  %v24076_v53 = vld [vmem:[%s27545_s1 + $0x5a0] sm:$0xff]  }
 0x61e   : > { %v24078_v36 = vld [vmem:[%s27545_s1 + $0x5b0] sm:$0xff]  }
 0x61f   : > { %v5974_v39 = vld [vmem:[#allocation2 + $0x168] sm:$0xff] }
 0x621   : > { %v5975_v59 = vld [vmem:[#allocation2 + $0x170] sm:$0xff] }
 0x624   : > { %20688 = vmatmul.mubr.bf16.vlgmr.msra.gmra.mrb[32].mxu0 %v25622_v49 }
 0x625   : > { %20691 = vmatprep.mubr.bf16.mxu0 %v25627_v3  ;;  %20720 = vmatpush3.bf16.msra.mxu0 %v25570_v63  ;;  %v24060_v63 = vld [vmem:[%s27545_s1 + $0x520] sm:$0xff]  }
 0x626   : > { %20721 = vmatprep.subr.bf16.mxu0 %v24057_v21 }
 0x629   : > { %20722 = vmatpush3.bf16.msra.mxu0 %v24057_v21  ;;  %v25689_v21 = vpack.c.bf16 %v5975_v59, %v5974_v39  ;;  %v6511_v59 = vld [vmem:[#allocation2 + $0xe2] sm:$0xff]  ;;  %v6512_v39 = vld [vmem:[#allocation2 + $0xf2] sm:$0xff] }
 0x62a   : > { %20723 = vmatprep.subr.bf16.mxu0 %v24058_v57 }
 0x62c   : > { %20692 = vmatmul.mubr.bf16.gmra.mrb[36].mxu0 %v25635_v41 }
 0x62d   : > { %20695 = vmatprep.mubr.bf16.mxu0 %v25640_v62  ;;  %20724 = vmatpush3.bf16.msra.mxu0 %v24058_v57  ;;  %v6494_v57 = vld [vmem:[#allocation2 + $0x1a] sm:$0xff] }
 0x62e   : > { %20725 = vmatprep.subr.bf16.mxu0 %v24059_v54  ;;  %v25692_v45 = vpack.c.bf16 %v6495_v18, %v6494_v57  ;;  %v25740_v57 = vpack.c.bf16 %v6511_v59, %v6510_v24  ;;  %v6829_v24 = vld [vmem:[#allocation2 + $0x188] sm:$0xff] }
 0x62f   : > { %v7105_v59 = vld [vmem:[#allocation2 + $0x21] sm:$0xff] }
 0x631   : > { %20726 = vmatpush3.bf16.msra.mxu0 %v24059_v54  ;;  %v24065_v54 = vld [vmem:[%s27545_s1 + $0x548] sm:$0xff]  }
 0x632   : > { %20727 = vmatprep.subr.bf16.mxu0 %v24060_v63 }
 0x634   : > { %20696 = vmatmul.mubr.bf16.gmra.mrb[40].mxu0 %v25647_v60 }
 0x635   : > { %20699 = vmatprep.mubr.bf16.mxu0 %v25652_v43  ;;  %20728 = vmatpush3.bf16.msra.mxu0 %v24060_v63  ;;  %v25697_v63 = vpack.c.bf16 %v6497_v29, %v6496_v19  ;;  %v6514_v19 = vld [vmem:[#allocation2 + $0x10a] sm:$0xff]  ;;  %v6515_v29 = vld [vmem:[#allocation2 + $0x112] sm:$0xff] }
 0x636   : > { %20729 = vmatprep.subr.bf16.mxu0 %v24061_v25 }
 0x639   : > { %20730 = vmatpush3.bf16.msra.mxu0 %v24061_v25  ;;  %v6501_v25 = vld [vmem:[#allocation2 + $0x6a] sm:$0xff] }
 0x63a   : > { %20731 = vmatprep.subr.bf16.mxu0 %v24062_v9  ;;  %v25709_v35 = vpack.c.bf16 %v6501_v25, %v6500_v17  ;;  %v6518_v17 = vld [vmem:[#allocation2 + $0x13a] sm:$0xff]  ;;  %v6519_v25 = vld [vmem:[#allocation2 + $0x142] sm:$0xff] }
 0x63c   : > { %20700 = vmatmul.mubr.bf16.gmra.mrb[44].mxu0 %v25659_v13 }
 0x63d   : > { %20703 = vmatprep.mubr.bf16.mxu0 %v25664_v46  ;;  %20732 = vmatpush3.bf16.msra.mxu0 %v24062_v9  ;;  %v25704_v9 = vpack.c.bf16 %v6499_v55, %v6498_v10  ;;  %v25746_v10 = vpack.c.bf16 %v6515_v29, %v6514_v19  ;;  %v7104_v19 = vld [vmem:[#allocation2 + $0x19] sm:$0xff] }
 0x63e   : > { %20733 = vmatprep.subr.bf16.mxu0 %v24063_v51  ;;  %v7136_v29 = vpack.c.bf16 %v7105_v59, %v7104_v19  ;;  %v7117_v59 = vld [vmem:[#allocation2 + $0xb1] sm:$0xff] }
 0x641   : > { %20734 = vmatpush3.bf16.msra.mxu0 %v24063_v51  ;;  %v6503_v51 = vld [vmem:[#allocation2 + $0x82] sm:$0xff] }
 0x642   : > { %20767 = vmatprep.subr.bf16.mxu0 %v24064_v8  ;;  %v25716_v48 = vpack.c.bf16 %v6503_v51, %v6502_v44  ;;  %v25752_v44 = vpack.c.bf16 %v6519_v25, %v6518_v17  ;;  %v7106_v17 = vld [vmem:[#allocation2 + $0x31] sm:$0xff] }
 0x644   : > { %20704 = vmatmul.mubr.bf16.gmra.mrb[48].mxu0 %v25671_v61 }
 0x645   : > { %20707 = vmatprep.mubr.bf16.mxu0 %v25673_v31 }
 0x64c   : > { %20708 = vmatmul.mubr.bf16.gmra.mrb[52].mxu0 %v25677_v56 }
 0x64d   : > { %20711 = vmatprep.mubr.bf16.mxu0 %v25679_v50 }
 0x654   : > { %20712 = vmatmul.mubr.bf16.gmra.mrb[56].mxu0 %v25683_v14 }
 0x655   : > { %20715 = vmatprep.mubr.bf16.mxu0 %v25685_v34 }
 0x65c   : > { %20716 = vmatmul.mubr.bf16.gmra.mrb[60].mxu0 %v25689_v21 }
 0x65d   : > { %20735 = vmatprep.mubr.bf16.mxu0 %v6524_v5  ;;  %v6513_v5 = vld [vmem:[#allocation2 + $0xfa] sm:$0xff] }
 0x65e   : > { %v25742_v18 = vpack.c.bf16 %v6513_v5, %v6512_v39  ;;  %v6828_v39 = vld [vmem:[#allocation2 + $0x180] sm:$0xff] }
 0x65f   : > { %v25800_v5 = vpack.c.bf16 %v6829_v24, %v6828_v39  ;;  %v7115_v24 = vld [vmem:[#allocation2 + $0x99] sm:$0xff]  ;;  %v7114_v39 = vld [vmem:[#allocation2 + $0x91] sm:$0xff] }
 0x660   : > { %v25827_v19 = vpack.c.bf16 %v7115_v24, %v7114_v39  ;;  %v8047_v39 = vld [vmem:[#allocation2 + $0x159] sm:$0xff] }
 0x664   : > { %20736 = vmatmul.mubr.bf16.vlgmr.msra.gmra.mrb[32].mxu0 %v25692_v45 }
 0x665   : > { %20739 = vmatprep.mubr.bf16.mxu0 %v25697_v63  ;;  %20768 = vmatpush3.bf16.msra.mxu0 %v24064_v8  ;;  %v6504_v8 = vld [vmem:[#allocation2 + $0x92] sm:$0xff] }
 0x666   : > { %20769 = vmatprep.subr.bf16.mxu0 %v24065_v54  ;;  %v25721_v20 = vpack.c.bf16 %v6505_v26, %v6504_v8  ;;  %v6522_v8 = vld [vmem:[#allocation2 + $0x16a] sm:$0xff]  ;;  %v6523_v26 = vld [vmem:[#allocation2 + $0x172] sm:$0xff] }
 0x669   : > { %20770 = vmatpush3.bf16.msra.mxu0 %v24065_v54  ;;  %v6516_v54 = vld [vmem:[#allocation2 + $0x122] sm:$0xff] }
 0x66a   : > { %20771 = vmatprep.subr.bf16.mxu0 %v24066_v42 }
 0x66c   : > { %20740 = vmatmul.mubr.bf16.gmra.mrb[36].mxu0 %v25704_v9 }
 0x66d   : > { %20743 = vmatprep.mubr.bf16.mxu0 %v25709_v35  ;;  %20772 = vmatpush3.bf16.msra.mxu0 %v24066_v42  ;;  %v6517_v42 = vld [vmem:[#allocation2 + $0x12a] sm:$0xff] }
 0x66e   : > { %20773 = vmatprep.subr.bf16.mxu0 %v24067_v28  ;;  %v25748_v55 = vpack.c.bf16 %v6517_v42, %v6516_v54  ;;  %v7107_v54 = vld [vmem:[#allocation2 + $0x39] sm:$0xff]  ;;  %v7109_v42 = vld [vmem:[#allocation2 + $0x51] sm:$0xff] }
 0x66f   : > { %v25803_v25 = vpack.c.bf16 %v7107_v54, %v7106_v17  ;;  %v24085_v54 = vld [vmem:[%s27545_s1 + $0x5e8] sm:$0xff]   ;;  %v24086_v17 = vld [vmem:[%s27545_s1 + $0x5f0] sm:$0xff]  }
 0x671   : > { %20774 = vmatpush3.bf16.msra.mxu0 %v24067_v28  ;;  %v6520_v28 = vld [vmem:[#allocation2 + $0x152] sm:$0xff] }
 0x672   : > { %20775 = vmatprep.subr.bf16.mxu0 %v24068_v6 }
 0x674   : > { %20744 = vmatmul.mubr.bf16.gmra.mrb[40].mxu0 %v25716_v48 }
 0x675   : > { %20747 = vmatprep.mubr.bf16.mxu0 %v25721_v20  ;;  %20776 = vmatpush3.bf16.msra.mxu0 %v24068_v6  ;;  %v6521_v6 = vld [vmem:[#allocation2 + $0x15a] sm:$0xff] }
 0x676   : > { %20777 = vmatprep.subr.bf16.mxu0 %v24069_v52  ;;  %v25754_v51 = vpack.c.bf16 %v6521_v6, %v6520_v28  ;;  %v7108_v28 = vld [vmem:[#allocation2 + $0x49] sm:$0xff] }
 0x677   : > { %v24081_v6 = vld [vmem:[%s27545_s1 + $0x5c8] sm:$0xff]  }
 0x679   : > { %20778 = vmatpush3.bf16.msra.mxu0 %v24069_v52  ;;  %v25758_v52 = vpack.c.bf16 %v6523_v26, %v6522_v8  ;;  %v25808_v8 = vpack.c.bf16 %v7109_v42, %v7108_v28  ;;  %v24082_v26 = vld [vmem:[%s27545_s1 + $0x5d0] sm:$0xff]  }
 0x67a   : > { %20779 = vmatprep.subr.bf16.mxu0 %v24070_v12  ;;  %v7119_v28 = vld [vmem:[#allocation2 + $0xc9] sm:$0xff] }
 0x67c   : > { %20748 = vmatmul.mubr.bf16.gmra.mrb[44].mxu0 %v25728_v38 }
 0x67d   : > { %20751 = vmatprep.mubr.bf16.mxu0 %v25733_v47  ;;  %20780 = vmatpush3.bf16.msra.mxu0 %v24070_v12  ;;  %v24073_v12 = vld [vmem:[%s27545_s1 + $0x588] sm:$0xff]  }
 0x67e   : > { %20781 = vmatprep.subr.bf16.mxu0 %v24071_v30 }
 0x681   : > { %20782 = vmatpush3.bf16.msra.mxu0 %v24071_v30  ;;  %v24079_v30 = vld [vmem:[%s27545_s1 + $0x5b8] sm:$0xff]  }
 0x682   : > { %20815 = vmatprep.subr.bf16.mxu0 %v24072_v33 }
 0x684   : > { %20752 = vmatmul.mubr.bf16.gmra.mrb[48].mxu0 %v25740_v57 }
 0x685   : > { %20755 = vmatprep.mubr.bf16.mxu0 %v25742_v18 }
 0x68c   : > { %20756 = vmatmul.mubr.bf16.gmra.mrb[52].mxu0 %v25746_v10 }
 0x68d   : > { %20759 = vmatprep.mubr.bf16.mxu0 %v25748_v55 }
 0x694   : > { %20760 = vmatmul.mubr.bf16.gmra.mrb[56].mxu0 %v25752_v44 }
 0x695   : > { %20763 = vmatprep.mubr.bf16.mxu0 %v25754_v51 }
 0x69c   : > { %20764 = vmatmul.mubr.bf16.gmra.mrb[60].mxu0 %v25758_v52 }
 0x69d   : > { %20783 = vmatprep.mubr.bf16.mxu0 %v25622_v49  ;;  %v24075_v49 = vld [vmem:[%s27545_s1 + $0x598] sm:$0xff]  }
 0x6a4   : > { %20784 = vmatmul.mubr.bf16.vlgmr.msra.gmra.mrb[32].mxu0 %v25627_v3 }
 0x6a5   : > { %20787 = vmatprep.mubr.bf16.mxu0 %v25635_v41  ;;  %20816 = vmatpush3.bf16.msra.mxu0 %v24072_v33  ;;  %v24080_v33 = vld [vmem:[%s27545_s1 + $0x5c0] sm:$0xff]  }
 0x6a6   : > { %20817 = vmatprep.subr.bf16.mxu0 %v24073_v12 }
 0x6a9   : > { %20818 = vmatpush3.bf16.msra.mxu0 %v24073_v12  ;;  %v7111_v12 = vld [vmem:[#allocation2 + $0x69] sm:$0xff] }
 0x6aa   : > { %20819 = vmatprep.subr.bf16.mxu0 %v24074_v32 }
 0x6ac   : > { %20788 = vmatmul.mubr.bf16.gmra.mrb[36].mxu0 %v25640_v62 }
 0x6ad   : > { %20791 = vmatprep.mubr.bf16.mxu0 %v25647_v60  ;;  %20820 = vmatpush3.bf16.msra.mxu0 %v24074_v32  ;;  %v7113_v32 = vld [vmem:[#allocation2 + $0x81] sm:$0xff] }
 0x6ae   : > { %20821 = vmatprep.subr.bf16.mxu0 %v24075_v49 }
 0x6b1   : > { %20822 = vmatpush3.bf16.msra.mxu0 %v24075_v49  ;;  %v7110_v49 = vld [vmem:[#allocation2 + $0x61] sm:$0xff] }
 0x6b2   : > { %20823 = vmatprep.subr.bf16.mxu0 %v24076_v53 }
 0x6b4   : > { %20792 = vmatmul.mubr.bf16.gmra.mrb[40].mxu0 %v25652_v43 }
 0x6b5   : > { %20795 = vmatprep.mubr.bf16.mxu0 %v25659_v13  ;;  %20824 = vmatpush3.bf16.msra.mxu0 %v24076_v53  ;;  %v25815_v53 = vpack.c.bf16 %v7111_v12, %v7110_v49  ;;  %v24087_v12 = vld [vmem:[%s27545_s1 + $0x5f8] sm:$0xff]  }
 0x6b6   : > { %20825 = vmatprep.subr.bf16.mxu0 %v24077_v16  ;;  %v25849_v49 = vld [vmem:[#allocation2 + $0xf1] sm:$0xff] }
 0x6b9   : > { %20826 = vmatpush3.bf16.msra.mxu0 %v24077_v16  ;;  %v7112_v16 = vld [vmem:[#allocation2 + $0x79] sm:$0xff] }
 0x6ba   : > { %20827 = vmatprep.subr.bf16.mxu0 %v24078_v36 }
 0x6bc   : > { %20796 = vmatmul.mubr.bf16.gmra.mrb[44].mxu0 %v25664_v46 }
 0x6bd   : > { %20799 = vmatprep.mubr.bf16.mxu0 %v25671_v61  ;;  %20828 = vmatpush3.bf16.msra.mxu0 %v24078_v36  ;;  %v24083_v36 = vld [vmem:[%s27545_s1 + $0x5d8] sm:$0xff]  }
 0x6be   : > { %20829 = vmatprep.subr.bf16.mxu0 %v24079_v30 }
 0x6c1   : > { %20830 = vmatpush3.bf16.msra.mxu0 %v24079_v30  ;;  %v25820_v30 = vpack.c.bf16 %v7113_v32, %v7112_v16  ;;  %v24088_v32 = vld [vmem:[%s27545_s1 + $0x600] sm:$0xff]   ;;  %v7145_v16 = vpack.c.bf16 %v25572_v15, %v25849_v49  ;;  %v24089_v15 = vld [vmem:[%s27545_s1 + $0x608] sm:$0xff]  }
 0x6c2   : > { %20863 = vmatprep.subr.bf16.mxu0 %v24080_v33 }
 0x6c4   : > { %20800 = vmatmul.mubr.bf16.gmra.mrb[48].mxu0 %v25673_v31 }
 0x6c5   : > { %20803 = vmatprep.mubr.bf16.mxu0 %v25677_v56 }
 0x6cc   : > { %20804 = vmatmul.mubr.bf16.gmra.mrb[52].mxu0 %v25679_v50 }
 0x6cd   : > { %20807 = vmatprep.mubr.bf16.mxu0 %v25683_v14 }
 0x6d4   : > { %20808 = vmatmul.mubr.bf16.gmra.mrb[56].mxu0 %v25685_v34 }
 0x6d5   : > { %20811 = vmatprep.mubr.bf16.mxu0 %v25689_v21 }
 0x6dc   : > { %20812 = vmatmul.mubr.bf16.gmra.mrb[60].mxu0 %v25800_v5 }
 0x6dd   : > { %20831 = vmatprep.mubr.bf16.mxu0 %v7136_v29  ;;  %v7116_v29 = vld [vmem:[#allocation2 + $0xa9] sm:$0xff] }
 0x6de   : > { %v25832_v42 = vpack.c.bf16 %v7117_v59, %v7116_v29  ;;  %v8045_v59 = vld [vmem:[#allocation2 + $0x141] sm:$0xff] }
 0x6e4   : > { %20832 = vmatmul.mubr.bf16.vlgmr.msra.gmra.mrb[32].mxu0 %v25803_v25 }
 0x6e5   : > { %20835 = vmatprep.mubr.bf16.mxu0 %v25808_v8  ;;  %20864 = vmatpush3.bf16.msra.mxu0 %v24080_v33  ;;  %v24084_v33 = vld [vmem:[%s27545_s1 + $0x5e0] sm:$0xff]  }
 0x6e6   : > { %20865 = vmatprep.subr.bf16.mxu0 %v24081_v6 }
 0x6e9   : > { %20866 = vmatpush3.bf16.msra.mxu0 %v24081_v6  ;;  %v7118_v6 = vld [vmem:[#allocation2 + $0xc1] sm:$0xff] }
 0x6ea   : > { %20867 = vmatprep.subr.bf16.mxu0 %v24082_v26 }
 0x6ec   : > { %20836 = vmatmul.mubr.bf16.gmra.mrb[36].mxu0 %v25815_v53 }
 0x6ed   : > { %20839 = vmatprep.mubr.bf16.mxu0 %v25820_v30  ;;  %20868 = vmatpush3.bf16.msra.mxu0 %v24082_v26  ;;  %v25839_v26 = vpack.c.bf16 %v7119_v28, %v7118_v6  ;;  %v8051_v28 = vld [vmem:[#allocation2 + $0x189] sm:$0xff] }
 0x6ee   : > { %20869 = vmatprep.subr.bf16.mxu0 %v24083_v36  ;;  %v8048_v6 = vld [vmem:[#allocation2 + $0x169] sm:$0xff] }
 0x6f1   : > { %20870 = vmatpush3.bf16.msra.mxu0 %v24083_v36  ;;  %v8040_v36 = vld [vmem:[#allocation2 + $0x109] sm:$0xff] }
 0x6f2   : > { %20871 = vmatprep.subr.bf16.mxu0 %v24084_v33 }
 0x6f4   : > { %20840 = vmatmul.mubr.bf16.gmra.mrb[40].mxu0 %v25827_v19 }
 0x6f5   : > { %20843 = vmatprep.mubr.bf16.mxu0 %v25832_v42  ;;  %20872 = vmatpush3.bf16.msra.mxu0 %v24084_v33  ;;  %v8042_v33 = vld [vmem:[#allocation2 + $0x121] sm:$0xff] }
 0x6f6   : > { %20873 = vmatprep.subr.bf16.mxu0 %v24085_v54 }
 0x6f9   : > { %20874 = vmatpush3.bf16.msra.mxu0 %v24085_v54  ;;  %v8046_v54 = vld [vmem:[#allocation2 + $0x151] sm:$0xff] }
 0x6fa   : > { %20875 = vmatprep.subr.bf16.mxu0 %v24086_v17 }
 0x6fc   : > { %20844 = vmatmul.mubr.bf16.gmra.mrb[44].mxu0 %v25839_v26 }
 0x6fd   : > { %20847 = vmatprep.mubr.bf16.mxu0 %v25578_v2  ;;  %20876 = vmatpush3.bf16.msra.mxu0 %v24086_v17  ;;  %v24090_v2 = vld [vmem:[%s27545_s1 + $0x610] sm:$0xff]  }
 0x6fe   : > { %20877 = vmatprep.subr.bf16.mxu0 %v24087_v12  ;;  %v8049_v17 = vld [vmem:[#allocation2 + $0x171] sm:$0xff] }
 0x701   : > { %20878 = vmatpush3.bf16.msra.mxu0 %v24087_v12  ;;  %v8050_v12 = vld [vmem:[#allocation2 + $0x181] sm:$0xff] }
 0x702   : > { %20911 = vmatprep.subr.bf16.mxu0 %v24088_v32 }
 0x704   : > { %20848 = vmatmul.mubr.bf16.gmra.mrb[48].mxu0 %v7145_v16  ;;  %v8053_v16 = vld [vmem:[#allocation2 + $0x1a1] sm:$0xff] }
 0x705   : > { %20851 = vmatprep.mubr.bf16.mxu0 %v25592_v23  ;;  %v24092_v23 = vld [vmem:[%s27545_s1 + $0x620] sm:$0xff]  }
 0x70c   : > { %20852 = vmatmul.mubr.bf16.gmra.mrb[52].mxu0 %v25589_v11  ;;  %v24091_v11 = vld [vmem:[%s27545_s1 + $0x618] sm:$0xff]  }
 0x70d   : > { %20855 = vmatprep.mubr.bf16.mxu0 %v25606_v37  ;;  %v24094_v37 = vld [vmem:[%s27545_s1 + $0x630] sm:$0xff]  }
 0x714   : > { %20856 = vmatmul.mubr.bf16.gmra.mrb[56].mxu0 %v25603_v40  ;;  %v24093_v40 = vld [vmem:[%s27545_s1 + $0x628] sm:$0xff]  }
 0x715   : > { %20859 = vmatprep.mubr.bf16.mxu0 %v25618_v27  ;;  %v24096_v27 = vld [vmem:[%s27545_s1 + $0x640] sm:$0xff]  }
 0x71c   : > { %20860 = vmatmul.mubr.bf16.gmra.mrb[60].mxu0 %v25616_v58  ;;  %v24095_v58 = vld [vmem:[%s27545_s1 + $0x638] sm:$0xff]  }
 0x71d   : > { %20879 = vmatprep.mubr.bf16.mxu0 %v25692_v45  ;;  %v7440_v45 = vld [vmem:[#allocation2 + $0x182] sm:$0xff] }
 0x724   : > { %20880 = vmatmul.mubr.bf16.vlgmr.msra.gmra.mrb[32].mxu0 %v25697_v63  ;;  %v7441_v63 = vld [vmem:[#allocation2 + $0x18a] sm:$0xff] }
 0x725   : > { %20883 = vmatprep.mubr.bf16.mxu0 %v25704_v9  ;;  %20912 = vmatpush3.bf16.msra.mxu0 %v24088_v32  ;;  %v25898_v9 = vpack.c.bf16 %v7441_v63, %v7440_v45  ;;  %v8068_v32 = vpack.c.bf16 %v8051_v28, %v8050_v12 }
 0x726   : > { %20913 = vmatprep.subr.bf16.mxu0 %v24089_v15 }
 0x729   : > { %20914 = vmatpush3.bf16.msra.mxu0 %v24089_v15 }
 0x72a   : > { %20915 = vmatprep.subr.bf16.mxu0 %v24090_v2 }
 0x72c   : > { %20884 = vmatmul.mubr.bf16.gmra.mrb[36].mxu0 %v25709_v35  ;;  %v24097_v35 = vld [vmem:[%s27545_s1 + $0x648] sm:$0xff]  }
 0x72d   : > { %20887 = vmatprep.mubr.bf16.mxu0 %v25716_v48  ;;  %20916 = vmatpush3.bf16.msra.mxu0 %v24090_v2  ;;  %v24098_v48 = vld [vmem:[%s27545_s1 + $0x650] sm:$0xff]  }
 0x72e   : > { %20917 = vmatprep.subr.bf16.mxu0 %v24091_v11  ;;  %v8328_v2 = vld [vmem:[#allocation2 + $0x32] sm:$0xff] }
 0x731   : > { %20918 = vmatpush3.bf16.msra.mxu0 %v24091_v11  ;;  %v8329_v11 = vld [vmem:[#allocation2 + $0x3a] sm:$0xff] }
 0x732   : > { %20919 = vmatprep.subr.bf16.mxu0 %v24092_v23 }
 0x734   : > { %20888 = vmatmul.mubr.bf16.gmra.mrb[40].mxu0 %v25721_v20  ;;  %v24116_v20 = vld [vmem:[%s27545_s1 + $0x720] sm:$0xff]  }
 0x735   : > { %20891 = vmatprep.mubr.bf16.mxu0 %v25728_v38  ;;  %20920 = vmatpush3.bf16.msra.mxu0 %v24092_v23  ;;  %v24107_v38 = vld [vmem:[%s27545_s1 + $0x698] sm:$0xff]   ;;  %v8360_v23 = vpack.c.bf16 %v8329_v11, %v8328_v2 }
 0x736   : > { %20921 = vmatprep.subr.bf16.mxu0 %v24093_v40 }
 0x739   : > { %20922 = vmatpush3.bf16.msra.mxu0 %v24093_v40  ;;  %v8330_v40 = vld [vmem:[#allocation2 + $0x4a] sm:$0xff] }
 0x73a   : > { %20923 = vmatprep.subr.bf16.mxu0 %v24094_v37 }
 0x73c   : > { %20892 = vmatmul.mubr.bf16.gmra.mrb[44].mxu0 %v25733_v47  ;;  %v24117_v47 = vld [vmem:[%s27545_s1 + $0x728] sm:$0xff]  }
 0x73d   : > { %20895 = vmatprep.mubr.bf16.mxu0 %v25740_v57  ;;  %20924 = vmatpush3.bf16.msra.mxu0 %v24094_v37  ;;  %v24108_v57 = vld [vmem:[%s27545_s1 + $0x6a0] sm:$0xff]   ;;  %v8331_v37 = vld [vmem:[#allocation2 + $0x52] sm:$0xff] }
 0x73e   : > { %20925 = vmatprep.subr.bf16.mxu0 %v24095_v58  ;;  %v8361_v45 = vpack.c.bf16 %v8331_v37, %v8330_v40 }
 0x741   : > { %20926 = vmatpush3.bf16.msra.mxu0 %v24095_v58  ;;  %v8332_v58 = vld [vmem:[#allocation2 + $0x62] sm:$0xff] }
 0x742   : > { %20959 = vmatprep.subr.bf16.mxu0 %v24096_v27 }
 0x744   : > { %20896 = vmatmul.mubr.bf16.gmra.mrb[48].mxu0 %v25742_v18  ;;  %v24109_v18 = vld [vmem:[%s27545_s1 + $0x6a8] sm:$0xff]  }
 0x745   : > { %20899 = vmatprep.mubr.bf16.mxu0 %v25746_v10  ;;  %v24110_v10 = vld [vmem:[%s27545_s1 + $0x6b0] sm:$0xff]  }
 0x74c   : > { %20900 = vmatmul.mubr.bf16.gmra.mrb[52].mxu0 %v25748_v55  ;;  %v8037_v55 = vld [vmem:[#allocation2 + $0xe1] sm:$0xff] }
 0x74d   : > { %20903 = vmatprep.mubr.bf16.mxu0 %v25752_v44  ;;  %v8039_v44 = vld [vmem:[#allocation2 + $0xf9] sm:$0xff] }
 0x754   : > { %20904 = vmatmul.mubr.bf16.gmra.mrb[56].mxu0 %v25754_v51  ;;  %v8036_v51 = vld [vmem:[#allocation2 + $0xd9] sm:$0xff] }
 0x755   : > { %20907 = vmatprep.mubr.bf16.mxu0 %v25758_v52  ;;  %v8061_v52 = vpack.c.bf16 %v8037_v55, %v8036_v51  ;;  %v8349_v55 = vld [vmem:[#allocation2 + $0x12a] sm:$0xff] }
 0x75c   : > { %20908 = vmatmul.mubr.bf16.gmra.mrb[60].mxu0 %v25898_v9 }
 0x75d   : > { %20927 = vmatprep.mubr.bf16.mxu0 %v25627_v3  ;;  %v24099_v3 = vld [vmem:[%s27545_s1 + $0x658] sm:$0xff]  }
 0x764   : > { %20928 = vmatmul.mubr.bf16.vlgmr.msra.gmra.mrb[32].mxu0 %v25635_v41  ;;  %v24100_v41 = vld [vmem:[%s27545_s1 + $0x660] sm:$0xff]  }
 0x765   : > { %20931 = vmatprep.mubr.bf16.mxu0 %v25640_v62  ;;  %20960 = vmatpush3.bf16.msra.mxu0 %v24096_v27  ;;  %v24101_v62 = vld [vmem:[%s27545_s1 + $0x668] sm:$0xff]  }
 0x766   : > { %20961 = vmatprep.subr.bf16.mxu0 %v24097_v35  ;;  %v8333_v27 = vld [vmem:[#allocation2 + $0x6a] sm:$0xff] }
 0x767   : > { %v8362_v63 = vpack.c.bf16 %v8333_v27, %v8332_v58  ;;  %v24121_v27 = vld [vmem:[%s27545_s1 + $0x6c8] sm:$0xff]  }
 0x769   : > { %20962 = vmatpush3.bf16.msra.mxu0 %v24097_v35  ;;  %v8334_v35 = vld [vmem:[#allocation2 + $0x7a] sm:$0xff] }
 0x76a   : > { %20963 = vmatprep.subr.bf16.mxu0 %v24098_v48 }
 0x76c   : > { %20932 = vmatmul.mubr.bf16.gmra.mrb[36].mxu0 %v25647_v60  ;;  %v24102_v60 = vld [vmem:[%s27545_s1 + $0x670] sm:$0xff]  }
 0x76d   : > { %20935 = vmatprep.mubr.bf16.mxu0 %v25652_v43  ;;  %20964 = vmatpush3.bf16.msra.mxu0 %v24098_v48  ;;  %v24103_v43 = vld [vmem:[%s27545_s1 + $0x678] sm:$0xff]   ;;  %v8335_v48 = vld [vmem:[#allocation2 + $0x82] sm:$0xff] }
 0x76e   : > { %20965 = vmatprep.subr.bf16.mxu0 %v24099_v3 }
 0x771   : > { %20966 = vmatpush3.bf16.msra.mxu0 %v24099_v3  ;;  %v8336_v3 = vld [vmem:[#allocation2 + $0x92] sm:$0xff] }
 0x772   : > { %20967 = vmatprep.subr.bf16.mxu0 %v24100_v41 }
 0x774   : > { %20936 = vmatmul.mubr.bf16.gmra.mrb[40].mxu0 %v25659_v13  ;;  %v24104_v13 = vld [vmem:[%s27545_s1 + $0x680] sm:$0xff]  }
 0x775   : > { %20939 = vmatprep.mubr.bf16.mxu0 %v25664_v46  ;;  %20968 = vmatpush3.bf16.msra.mxu0 %v24100_v41  ;;  %v24333_v46 = vld [vmem:[#allocation2] sm:$0xff] }
 0x776   : > { %20969 = vmatprep.subr.bf16.mxu0 %v24101_v62  ;;  %v8337_v41 = vld [vmem:[#allocation2 + $0x9a] sm:$0xff] }
 0x779   : > { %20970 = vmatpush3.bf16.msra.mxu0 %v24101_v62  ;;  %v8363_v62 = vpack.c.bf16 %v8335_v48, %v8334_v35 }
 0x77a   : > { %20971 = vmatprep.subr.bf16.mxu0 %v24102_v60 }
 0x77c   : > { %20940 = vmatmul.mubr.bf16.gmra.mrb[44].mxu0 %v25671_v61  ;;  %v25940_v61 = vpack.c.bf16 %v24333_v46, %v24333_v46  ;;  %v8340_v46 = vld [vmem:[#allocation2 + $0xc2] sm:$0xff] }
 0x77d   : > { %20943 = vmatprep.mubr.bf16.mxu0 %v25673_v31  ;;  %20972 = vmatpush3.bf16.msra.mxu0 %v24102_v60  ;;  %v24112_v31 = vld [vmem:[%s27545_s1 + $0x700] sm:$0xff]   ;;  %v8364_v60 = vpack.c.bf16 %v8337_v41, %v8336_v3  ;;  %v24122_v41 = vld [vmem:[%s27545_s1 + $0x6d0] sm:$0xff]  }
 0x77e   : > { %20973 = vmatprep.subr.bf16.mxu0 %v24103_v43  ;;  %21055 = vmatprep.subr.bf16.mxu1 %v24112_v31 }
 0x77f   : > { %21056 = vmatpush3.bf16.msra.mxu1 %v24112_v31  ;;  %v8341_v31 = vld [vmem:[#allocation2 + $0xca] sm:$0xff] }
 0x781   : > { %20974 = vmatpush3.bf16.msra.mxu0 %v24103_v43  ;;  %v8338_v43 = vld [vmem:[#allocation2 + $0xaa] sm:$0xff] }
 0x782   : > { %21007 = vmatprep.subr.bf16.mxu0 %v24104_v13 }
 0x784   : > { %20944 = vmatmul.mubr.bf16.gmra.mrb[48].mxu0 %v25677_v56  ;;  %v24113_v56 = vld [vmem:[%s27545_s1 + $0x708] sm:$0xff]  }
 0x785   : > { %20947 = vmatprep.mubr.bf16.mxu0 %v25679_v50  ;;  %21057 = vmatprep.subr.bf16.mxu1 %v24113_v56  ;;  %v24114_v50 = vld [vmem:[%s27545_s1 + $0x710] sm:$0xff]  }
 0x786   : > { %21058 = vmatpush3.bf16.msra.mxu1 %v24113_v56 }
 0x787   : > { %21059 = vmatprep.subr.bf16.mxu1 %v24114_v50 }
 0x78a   : > { %21060 = vmatpush3.bf16.msra.mxu1 %v24114_v50  ;;  %v8366_v50 = vpack.c.bf16 %v8341_v31, %v8340_v46  ;;  %v24123_v31 = vld [vmem:[%s27545_s1 + $0x6d8] sm:$0xff]  }
 0x78c   : > { %20948 = vmatmul.mubr.bf16.gmra.mrb[52].mxu0 %v25683_v14  ;;  %v24105_v14 = vld [vmem:[%s27545_s1 + $0x688] sm:$0xff]  }
 0x78d   : > { %20951 = vmatprep.mubr.bf16.mxu0 %v25685_v34  ;;  %v24115_v34 = vld [vmem:[%s27545_s1 + $0x718] sm:$0xff]  }
 0x78e   : > { %21061 = vmatprep.subr.bf16.mxu1 %v24115_v34 }
 0x78f   : > { %21062 = vmatpush3.bf16.msra.mxu1 %v24115_v34  ;;  %v8343_v34 = vld [vmem:[#allocation2 + $0xe2] sm:$0xff] }
 0x790   : > { %21063 = vmatprep.subr.bf16.mxu1 %v24116_v20 }
 0x793   : > { %21064 = vmatpush3.bf16.msra.mxu1 %v24116_v20  ;;  %v8345_v20 = vld [vmem:[#allocation2 + $0xfa] sm:$0xff] }
 0x794   : > { %20952 = vmatmul.mubr.bf16.gmra.mrb[56].mxu0 %v25689_v21  ;;  %v24106_v21 = vld [vmem:[%s27545_s1 + $0x690] sm:$0xff]   ;;  %21065 = vmatprep.subr.bf16.mxu1 %v24117_v47 }
 0x795   : > { %20955 = vmatprep.mubr.bf16.mxu0 %v25800_v5  ;;  %v24111_v5 = vld [vmem:[%s27545_s1 + $0x6b8] sm:$0xff]  }
 0x797   : > { %21066 = vmatpush3.bf16.msra.mxu1 %v24117_v47 }
 0x79c   : > { %20956 = vmatmul.mubr.bf16.gmra.mrb[60].mxu0 %v25940_v61 }
 0x79d   : > { %20975 = vmatprep.mubr.bf16.mxu0 %v25803_v25  ;;  %v8062_v25 = vpack.c.bf16 %v8039_v44, %v25849_v49  ;;  %v8052_v49 = vld [vmem:[#allocation2 + $0x199] sm:$0xff] }
 0x79e   : > { %v8069_v15 = vpack.c.bf16 %v8053_v16, %v8052_v49 }
 0x7a4   : > { %20976 = vmatmul.mubr.bf16.vlgmr.msra.gmra.mrb[32].mxu0 %v25808_v8  ;;  %v8041_v8 = vld [vmem:[#allocation2 + $0x111] sm:$0xff] }
 0x7a5   : > { %20979 = vmatprep.mubr.bf16.mxu0 %v25815_v53  ;;  %21008 = vmatpush3.bf16.msra.mxu0 %v24104_v13  ;;  %v8043_v53 = vld [vmem:[#allocation2 + $0x129] sm:$0xff]  ;;  %v8339_v13 = vld [vmem:[#allocation2 + $0xb2] sm:$0xff] }
 0x7a6   : > { %21009 = vmatprep.subr.bf16.mxu0 %v24105_v14  ;;  %v8064_v24 = vpack.c.bf16 %v8043_v53, %v8042_v33  ;;  %v8365_v56 = vpack.c.bf16 %v8339_v13, %v8338_v43  ;;  %v8355_v33 = vld [vmem:[#allocation2 + $0x172] sm:$0xff] }
 0x7a9   : > { %21010 = vmatpush3.bf16.msra.mxu0 %v24105_v14  ;;  %v8342_v14 = vld [vmem:[#allocation2 + $0xda] sm:$0xff] }
 0x7aa   : > { %21011 = vmatprep.subr.bf16.mxu0 %v24106_v21 }
 0x7ac   : > { %20980 = vmatmul.mubr.bf16.gmra.mrb[36].mxu0 %v25820_v30  ;;  %v8063_v30 = vpack.c.bf16 %v8041_v8, %v8040_v36  ;;  %v8353_v8 = vld [vmem:[#allocation2 + $0x15a] sm:$0xff] }
 0x7ad   : > { %20983 = vmatprep.mubr.bf16.mxu0 %v25827_v19  ;;  %21012 = vmatpush3.bf16.msra.mxu0 %v24106_v21  ;;  %v8044_v19 = vld [vmem:[#allocation2 + $0x139] sm:$0xff] }
 0x7ae   : > { %21013 = vmatprep.subr.bf16.mxu0 %v24107_v38  ;;  %v8065_v29 = vpack.c.bf16 %v8045_v59, %v8044_v19  ;;  %v8344_v21 = vld [vmem:[#allocation2 + $0xf2] sm:$0xff]  ;;  %v8358_v59 = vld [vmem:[#allocation2 + $0x19a] sm:$0xff] }
 0x7af   : > { %v8368_v47 = vpack.c.bf16 %v8345_v20, %v8344_v21  ;;  %v24124_v20 = vld [vmem:[%s27545_s1 + $0x6e0] sm:$0xff]  }
 0x7b1   : > { %21014 = vmatpush3.bf16.msra.mxu0 %v24107_v38  ;;  %v8367_v38 = vpack.c.bf16 %v8343_v34, %v8342_v14 }
 0x7b2   : > { %21015 = vmatprep.subr.bf16.mxu0 %v24108_v57 }
 0x7b4   : > { %20984 = vmatmul.mubr.bf16.gmra.mrb[40].mxu0 %v25832_v42  ;;  %v8066_v42 = vpack.c.bf16 %v8047_v39, %v8046_v54  ;;  %v8359_v39 = vld [vmem:[#allocation2 + $0x1a2] sm:$0xff]  ;;  %v24119_v54 = vld [vmem:[%s27545_s1 + $0x738] sm:$0xff]  }
 0x7b5   : > { %20987 = vmatprep.mubr.bf16.mxu0 %v25839_v26  ;;  %21016 = vmatpush3.bf16.msra.mxu0 %v24108_v57  ;;  %v8067_v26 = vpack.c.bf16 %v8049_v17, %v8048_v6  ;;  %v8346_v57 = vld [vmem:[#allocation2 + $0x10a] sm:$0xff]  ;;  %v8375_v19 = vpack.c.bf16 %v8359_v39, %v8358_v59  ;;  %v8636_v6 = vsub.s32 4, %v24984_v0  ;;  %v24127_v59 = vld [vmem:[%s27545_s1 + $0x6f8] sm:$0xff]  }
 0x7b6   : > { %21017 = vmatprep.subr.bf16.mxu0 %v24109_v18  ;;  %v8770_v17 = vld [vmem:[#allocation2 + $0x9] sm:$0xff] }
 0x7b9   : > { %21018 = vmatpush3.bf16.msra.mxu0 %v24109_v18  ;;  %v8347_v18 = vld [vmem:[#allocation2 + $0x112] sm:$0xff] }
 0x7ba   : > { %21019 = vmatprep.subr.bf16.mxu0 %v24110_v10  ;;  %v8369_v44 = vpack.c.bf16 %v8347_v18, %v8346_v57 }
 0x7bc   : > { %20988 = vmatmul.mubr.bf16.gmra.mrb[44].mxu0 %v8061_v52  ;;  %v8350_v52 = vld [vmem:[#allocation2 + $0x13a] sm:$0xff] }
 0x7bd   : > { %20991 = vmatprep.mubr.bf16.mxu0 %v8062_v25  ;;  %21020 = vmatpush3.bf16.msra.mxu0 %v24110_v10  ;;  %v8348_v10 = vld [vmem:[#allocation2 + $0x122] sm:$0xff]  ;;  %v8352_v25 = vld [vmem:[#allocation2 + $0x152] sm:$0xff] }
 0x7be   : > { %21021 = vmatprep.subr.bf16.mxu0 %v24111_v5  ;;  %v8370_v51 = vpack.c.bf16 %v8349_v55, %v8348_v10  ;;  %v8372_v36 = vpack.c.bf16 %v8353_v8, %v8352_v25  ;;  %v24125_v55 = vld [vmem:[%s27545_s1 + $0x6e8] sm:$0xff]   ;;  %v24126_v8 = vld [vmem:[%s27545_s1 + $0x6f0] sm:$0xff]  }
 0x7c1   : > { %21022 = vmatpush3.bf16.msra.mxu0 %v24111_v5  ;;  %v8351_v5 = vld [vmem:[#allocation2 + $0x142] sm:$0xff] }
 0x7c2   : > { %v8371_v53 = vpack.c.bf16 %v8351_v5, %v8350_v52 }
 0x7c4   : > { %20992 = vmatmul.mubr.bf16.gmra.mrb[48].mxu0 %v8063_v30  ;;  %v8354_v30 = vld [vmem:[#allocation2 + $0x16a] sm:$0xff] }
 0x7c5   : > { %20995 = vmatprep.mubr.bf16.mxu0 %v8064_v24  ;;  %v8373_v24 = vpack.c.bf16 %v8355_v33, %v8354_v30 }
 0x7cc   : > { %20996 = vmatmul.mubr.bf16.gmra.mrb[52].mxu0 %v8065_v29  ;;  %v24118_v29 = vld [vmem:[%s27545_s1 + $0x730] sm:$0xff]  }
 0x7cd   : > { %20999 = vmatprep.mubr.bf16.mxu0 %v8066_v42  ;;  %21067 = vmatprep.subr.bf16.mxu1 %v24118_v29  ;;  %v8769_v42 = vld [vmem:[#allocation2 + $0x1] sm:$0xff] }
 0x7ce   : > { %21068 = vmatpush3.bf16.msra.mxu1 %v24118_v29  ;;  %v8801_v28 = vpack.c.bf16 %v8770_v17, %v8769_v42  ;;  %v26073_v17 = vld [vmem:[%s27545_s1 + $0x740] sm:$0xff]  }
 0x7cf   : > { %21069 = vmatprep.subr.bf16.mxu1 %v24119_v54 }
 0x7d0   : > { %21071 = vmatprep.mubr.bf16.mxu1 %v8801_v28 }
 0x7d2   : > { %21070 = vmatpush3.bf16.msra.mxu1 %v24119_v54 }
 0x7d4   : > { %21000 = vmatmul.mubr.bf16.gmra.mrb[56].mxu0 %v8067_v26  ;;  %v24334_v26 = vld [vmem:[%s27546_s2] sm:$0xff] }
 0x7d5   : > { %21003 = vmatprep.mubr.bf16.mxu0 %v8068_v32  ;;  %v26006_v12 = vrot.slane %v24334_v26, %v8636_v6 }
 0x7dc   : > { %21004 = vmatmul.mubr.bf16.gmra.mrb[60].mxu0 %v8069_v15 }
 0x7dd   : > { %21023 = vmatprep.mubr.bf16.mxu0 %v8360_v23 }
 0x7e4   : > { %21024 = vmatmul.mubr.bf16.vlgmr.msra.gmra.mrb[32].mxu0 %v8361_v45 }
 0x7e5   : > { %21027 = vmatprep.mubr.bf16.mxu0 %v8362_v63 }
 0x7ec   : > { %21028 = vmatmul.mubr.bf16.gmra.mrb[36].mxu0 %v8363_v62 }
 0x7ed   : > { %21031 = vmatprep.mubr.bf16.mxu0 %v8364_v60 }
 0x7f4   : > { %21032 = vmatmul.mubr.bf16.gmra.mrb[40].mxu0 %v8365_v56 }
 0x7f5   : > { %21035 = vmatprep.mubr.bf16.mxu0 %v8366_v50 }
 0x7fc   : > { %21036 = vmatmul.mubr.bf16.gmra.mrb[44].mxu0 %v8367_v38 }
 0x7fd   : > { %21039 = vmatprep.mubr.bf16.mxu0 %v8368_v47 }
 0x804   : > { %21040 = vmatmul.mubr.bf16.gmra.mrb[48].mxu0 %v8369_v44 }
 0x805   : > { %21043 = vmatprep.mubr.bf16.mxu0 %v8370_v51 }
 0x80c   : > { %21044 = vmatmul.mubr.bf16.gmra.mrb[52].mxu0 %v8371_v53 }
 0x80d   : > { %21047 = vmatprep.mubr.bf16.mxu0 %v8372_v36 }
 0x814   : > { %21048 = vmatmul.mubr.bf16.gmra.mrb[56].mxu0 %v8373_v24 }
 0x815   : > { %21051 = vmatprep.mubr.bf16.mxu0 %v25898_v9  ;;  %v24120_v9 = vld [vmem:[%s27545_s1 + $0x6c0] sm:$0xff]  }
 0x816   : > { %21103 = vmatprep.subr.bf16.mxu1 %v24120_v9 }
 0x81c   : > { %21052 = vmatmul.mubr.bf16.gmra.mrb[60].mxu0 %v8375_v19 }
 0x8b7   : > { %v21025_v32 = vpop.f32.mrb[32].mxu0 }
 0x8b8   : > { %v8640_v49 = vadd.f32 %v21025_v32, %v26006_v12  ;;  %v8475_v16 = vpop.f32.mrb[33].mxu0 }
 0x8b9   : > { %v8638_v15 = vadd.f32 %v26006_v12, %v8475_v16  ;;  %v21026_v2 = vpop.f32.mrb[34].mxu0 }
 0x8ba   : > { %8672 = vst [vmem:[#allocation2 + $0x31] sm:$0xff] %v8640_v49  ;;  %v8641_v11 = vadd.f32 %v21026_v2, %v26006_v12  ;;  %v8478_v23 = vpop.f32.mrb[35].mxu0 }
 0x8bb   : > { %8670 = vst [vmem:[#allocation2 + $0x19] sm:$0xff] %v8638_v15  ;;  %v26012_v40 = vadd.f32 %v26006_v12, %v8478_v23 }
 0x8bc   : > { %8673 = vst [vmem:[#allocation2 + $0x39] sm:$0xff] %v8641_v11  ;;  %v8803_v37 = vpack.c.bf16 %v8641_v11, %v8640_v49 }
 0x8bd   : > { %8671 = vst [vmem:[#allocation2 + $0x21] sm:$0xff] %v26012_v40  ;;  %v8802_v58 = vpack.c.bf16 %v26012_v40, %v8638_v15 }
 0x8bf   : > { %v21029_v45 = vpop.f32.mrb[36].mxu0  ;;  %21072 = vmatmul.mubr.bf16.vlgmr.msra.gmra.mrb[32].mxu1 %v8802_v58 }
 0x8c0   : > { %v8644_v63 = vadd.f32 %v21029_v45, %v26006_v12  ;;  %v8491_v35 = vpop.f32.mrb[37].mxu0  ;;  %21075 = vmatprep.mubr.bf16.mxu1 %v8803_v37  ;;  %21104 = vmatpush3.bf16.msra.mxu1 %v24120_v9 }
 0x8c1   : > { %v8642_v48 = vadd.f32 %v26006_v12, %v8491_v35  ;;  %v21030_v3 = vpop.f32.mrb[38].mxu0  ;;  %21105 = vmatprep.subr.bf16.mxu1 %v24121_v27 }
 0x8c2   : > { %8676 = vst [vmem:[#allocation2 + $0x61] sm:$0xff] %v8644_v63  ;;  %v26025_v62 = vadd.f32 %v21030_v3, %v26006_v12  ;;  %v8494_v60 = vpop.f32.mrb[39].mxu0 }
 0x8c3   : > { %8674 = vst [vmem:[#allocation2 + $0x49] sm:$0xff] %v8642_v48  ;;  %v8643_v43 = vadd.f32 %v26006_v12, %v8494_v60 }
 0x8c4   : > { %8677 = vst [vmem:[#allocation2 + $0x69] sm:$0xff] %v26025_v62  ;;  %v8805_v13 = vpack.c.bf16 %v26025_v62, %v8644_v63  ;;  %21106 = vmatpush3.bf16.msra.mxu1 %v24121_v27 }
 0x8c5   : > { %8675 = vst [vmem:[#allocation2 + $0x51] sm:$0xff] %v8643_v43  ;;  %v26030_v46 = vpack.c.bf16 %v8643_v43, %v8642_v48  ;;  %21107 = vmatprep.subr.bf16.mxu1 %v24122_v41 }
 0x8c7   : > { %v21033_v56 = vpop.f32.mrb[40].mxu0  ;;  %21076 = vmatmul.mubr.bf16.gmra.mrb[36].mxu1 %v26030_v46 }
 0x8c8   : > { %v8648_v50 = vadd.f32 %v21033_v56, %v26006_v12  ;;  %v8507_v14 = vpop.f32.mrb[41].mxu0  ;;  %21079 = vmatprep.mubr.bf16.mxu1 %v8805_v13  ;;  %21108 = vmatpush3.bf16.msra.mxu1 %v24122_v41 }
 0x8c9   : > { %v8646_v34 = vadd.f32 %v26006_v12, %v8507_v14  ;;  %v21034_v21 = vpop.f32.mrb[42].mxu0  ;;  %21109 = vmatprep.subr.bf16.mxu1 %v24123_v31 }
 0x8ca   : > { %8680 = vst [vmem:[#allocation2 + $0x91] sm:$0xff] %v8648_v50  ;;  %v8649_v38 = vadd.f32 %v21034_v21, %v26006_v12  ;;  %v8510_v47 = vpop.f32.mrb[43].mxu0 }
 0x8cb   : > { %8678 = vst [vmem:[#allocation2 + $0x79] sm:$0xff] %v8646_v34  ;;  %v8647_v57 = vadd.f32 %v26006_v12, %v8510_v47 }
 0x8cc   : > { %8681 = vst [vmem:[#allocation2 + $0x99] sm:$0xff] %v8649_v38  ;;  %v26043_v18 = vpack.c.bf16 %v8649_v38, %v8648_v50  ;;  %21110 = vmatpush3.bf16.msra.mxu1 %v24123_v31 }
 0x8cd   : > { %8679 = vst [vmem:[#allocation2 + $0x81] sm:$0xff] %v8647_v57  ;;  %v26045_v10 = vpack.c.bf16 %v8647_v57, %v8646_v34  ;;  %21111 = vmatprep.subr.bf16.mxu1 %v24124_v20 }
 0x8cf   : > { %v21037_v44 = vpop.f32.mrb[44].mxu0  ;;  %21080 = vmatmul.mubr.bf16.gmra.mrb[40].mxu1 %v26045_v10 }
 0x8d0   : > { %v8652_v51 = vadd.f32 %v21037_v44, %v26006_v12  ;;  %v8523_v52 = vpop.f32.mrb[45].mxu0  ;;  %21083 = vmatprep.mubr.bf16.mxu1 %v26043_v18  ;;  %21112 = vmatpush3.bf16.msra.mxu1 %v24124_v20 }
 0x8d1   : > { %v8650_v5 = vadd.f32 %v26006_v12, %v8523_v52  ;;  %v21038_v25 = vpop.f32.mrb[46].mxu0  ;;  %21113 = vmatprep.subr.bf16.mxu1 %v24125_v55  ;;  %v8707_v52 = vld [vmem:[#allocation2 + $0x20] sm:$0xff] }
 0x8d2   : > { %8684 = vst [vmem:[#allocation2 + $0xc1] sm:$0xff] %v8652_v51  ;;  %v8653_v53 = vadd.f32 %v21038_v25, %v26006_v12  ;;  %v8526_v36 = vpop.f32.mrb[47].mxu0  ;;  %v8706_v25 = vld [vmem:[#allocation2 + $0x18] sm:$0xff] }
 0x8d3   : > { %8682 = vst [vmem:[#allocation2 + $0xa9] sm:$0xff] %v8650_v5  ;;  %v8651_v30 = vadd.f32 %v26006_v12, %v8526_v36 }
 0x8d4   : > { %8685 = vst [vmem:[#allocation2 + $0xc9] sm:$0xff] %v8653_v53  ;;  %v26059_v33 = vpack.c.bf16 %v8653_v53, %v8652_v51  ;;  %21114 = vmatpush3.bf16.msra.mxu1 %v24125_v55  ;;  %v8708_v53 = vld [vmem:[#allocation2 + $0x30] sm:$0xff] }
 0x8d5   : > { %8683 = vst [vmem:[#allocation2 + $0xb1] sm:$0xff] %v8651_v30  ;;  %v26061_v24 = vpack.c.bf16 %v8651_v30, %v8650_v5  ;;  %21115 = vmatprep.subr.bf16.mxu1 %v24126_v8  ;;  %v8709_v5 = vld [vmem:[#allocation2 + $0x38] sm:$0xff]  ;;  %v8711_v30 = vld [vmem:[#allocation2 + $0x50] sm:$0xff] }
 0x8d6   : > { %v26125_v36 = vpack.c.bf16 %v8709_v5, %v8708_v53 }
 0x8d7   : > { %v21041_v39 = vpop.f32.mrb[48].mxu0  ;;  %21084 = vmatmul.mubr.bf16.gmra.mrb[44].mxu1 %v26061_v24 }
 0x8d8   : > { %v8656_v19 = vadd.f32 %v21041_v39, %v26006_v12  ;;  %v8539_v29 = vpop.f32.mrb[49].mxu0  ;;  %21087 = vmatprep.mubr.bf16.mxu1 %v26059_v33  ;;  %21116 = vmatpush3.bf16.msra.mxu1 %v24126_v8  ;;  %v26120_v8 = vpack.c.bf16 %v8707_v52, %v8706_v25  ;;  %v8710_v39 = vld [vmem:[#allocation2 + $0x48] sm:$0xff] }
 0x8d9   : > { %v8654_v54 = vadd.f32 %v26006_v12, %v8539_v29  ;;  %v21042_v42 = vpop.f32.mrb[50].mxu0  ;;  %21117 = vmatprep.subr.bf16.mxu1 %v24127_v59  ;;  %v8712_v29 = vld [vmem:[#allocation2 + $0x60] sm:$0xff] }
 0x8da   : > { %8688 = vst [vmem:[#allocation2 + $0xf1] sm:$0xff] %v8656_v19  ;;  %v8657_v28 = vadd.f32 %v21042_v42, %v26006_v12  ;;  %v8542_v9 = vpop.f32.mrb[51].mxu0 }
 0x8db   : > { %8686 = vst [vmem:[#allocation2 + $0xd9] sm:$0xff] %v8654_v54  ;;  %v8655_v26 = vadd.f32 %v26006_v12, %v8542_v9  ;;  %v8717_v9 = vld [vmem:[#allocation2 + $0x98] sm:$0xff] }
 0x8dc   : > { %8689 = vst [vmem:[#allocation2 + $0xf9] sm:$0xff] %v8657_v28  ;;  %v26077_v32 = vpack.c.bf16 %v8657_v28, %v8656_v19  ;;  %21118 = vmatpush3.bf16.msra.mxu1 %v24127_v59  ;;  %v8713_v59 = vld [vmem:[#allocation2 + $0x68] sm:$0xff]  ;;  %v26133_v19 = vpack.c.bf16 %v8711_v30, %v8710_v39  ;;  %v8715_v28 = vld [vmem:[#allocation2 + $0x80] sm:$0xff] }
 0x8dd   : > { %8687 = vst [vmem:[#allocation2 + $0xe1] sm:$0xff] %v8655_v26  ;;  %v26079_v49 = vpack.c.bf16 %v8655_v26, %v8654_v54  ;;  %21151 = vmatprep.subr.bf16.mxu1 %v26073_v17  ;;  %v24131_v54 = vld [vmem:[%s27545_s1 + $0x758] sm:$0xff]   ;;  %v26138_v42 = vpack.c.bf16 %v8713_v59, %v8712_v29  ;;  %v9252_v29 = vld [vmem:[#allocation2 + $0x2] sm:$0xff] }
 0x8de   : > { %v8714_v26 = vld [vmem:[#allocation2 + $0x78] sm:$0xff] }
 0x8df   : > { %v21045_v16 = vpop.f32.mrb[52].mxu0  ;;  %21088 = vmatmul.mubr.bf16.gmra.mrb[48].mxu1 %v26079_v49 }
 0x8e0   : > { %v8660_v15 = vadd.f32 %v21045_v16, %v26006_v12  ;;  %v8555_v2 = vpop.f32.mrb[53].mxu0  ;;  %21091 = vmatprep.mubr.bf16.mxu1 %v26077_v32  ;;  %v26145_v16 = vpack.c.bf16 %v8715_v28, %v8714_v26 }
 0x8e1   : > { %v8658_v11 = vadd.f32 %v26006_v12, %v8555_v2  ;;  %v21046_v23 = vpop.f32.mrb[54].mxu0  ;;  %v24133_v2 = vld [vmem:[%s27545_s1 + $0x768] sm:$0xff]  }
 0x8e2   : > { %8692 = vst [vmem:[#allocation2 + $0x121] sm:$0xff] %v8660_v15  ;;  %v8661_v37 = vadd.f32 %v21046_v23, %v26006_v12  ;;  %v8558_v58 = vpop.f32.mrb[55].mxu0  ;;  %v24134_v23 = vld [vmem:[%s27545_s1 + $0x770] sm:$0xff]  }
 0x8e3   : > { %8690 = vst [vmem:[#allocation2 + $0x109] sm:$0xff] %v8658_v11  ;;  %v8659_v27 = vadd.f32 %v26006_v12, %v8558_v58  ;;  %v8721_v58 = vld [vmem:[#allocation2 + $0xc8] sm:$0xff] }
 0x8e4   : > { %8693 = vst [vmem:[#allocation2 + $0x129] sm:$0xff] %v8661_v37  ;;  %v26088_v45 = vpack.c.bf16 %v8661_v37, %v8660_v15  ;;  %v8716_v15 = vld [vmem:[#allocation2 + $0x90] sm:$0xff] }
 0x8e5   : > { %8691 = vst [vmem:[#allocation2 + $0x111] sm:$0xff] %v8659_v27  ;;  %v26090_v63 = vpack.c.bf16 %v8659_v27, %v8658_v11  ;;  %v26150_v11 = vpack.c.bf16 %v8717_v9, %v8716_v15  ;;  %v8719_v37 = vld [vmem:[#allocation2 + $0xb0] sm:$0xff]  ;;  %v8718_v27 = vld [vmem:[#allocation2 + $0xa8] sm:$0xff]  ;;  %v9254_v15 = vld [vmem:[#allocation2 + $0x1a] sm:$0xff] }
 0x8e7   : > { %v21049_v35 = vpop.f32.mrb[56].mxu0  ;;  %21092 = vmatmul.mubr.bf16.gmra.mrb[52].mxu1 %v26090_v63 }
 0x8e8   : > { %v8664_v48 = vadd.f32 %v21049_v35, %v26006_v12  ;;  %v8571_v3 = vpop.f32.mrb[57].mxu0  ;;  %21095 = vmatprep.mubr.bf16.mxu1 %v26088_v45  ;;  %v26157_v35 = vpack.c.bf16 %v8719_v37, %v8718_v27  ;;  %v9257_v37 = vld [vmem:[#allocation2 + $0x3a] sm:$0xff]  ;;  %v24137_v27 = vld [vmem:[%s27545_s1 + $0x788] sm:$0xff]  }
 0x8e9   : > { %v8662_v41 = vadd.f32 %v26006_v12, %v8571_v3  ;;  %v21050_v60 = vpop.f32.mrb[58].mxu0  ;;  %v24135_v3 = vld [vmem:[%s27545_s1 + $0x778] sm:$0xff]   ;;  %v8728_v5 = vld [vmem:[#allocation2 + $0x120] sm:$0xff] }
 0x8ea   : > { %8696 = vst [vmem:[#allocation2 + $0x151] sm:$0xff] %v8664_v48  ;;  %v8665_v43 = vadd.f32 %v21050_v60, %v26006_v12  ;;  %v8574_v13 = vpop.f32.mrb[59].mxu0  ;;  %v24136_v60 = vld [vmem:[%s27545_s1 + $0x780] sm:$0xff]  }
 0x8eb   : > { %8694 = vst [vmem:[#allocation2 + $0x139] sm:$0xff] %v8662_v41  ;;  %v8663_v31 = vadd.f32 %v26006_v12, %v8574_v13  ;;  %v8725_v13 = vld [vmem:[#allocation2 + $0xf8] sm:$0xff] }
 0x8ec   : > { %8697 = vst [vmem:[#allocation2 + $0x159] sm:$0xff] %v8665_v43  ;;  %v26098_v56 = vpack.c.bf16 %v8665_v43, %v8664_v48  ;;  %v8720_v48 = vld [vmem:[#allocation2 + $0xc0] sm:$0xff] }
 0x8ed   : > { %8695 = vst [vmem:[#allocation2 + $0x141] sm:$0xff] %v8663_v31  ;;  %v26100_v50 = vpack.c.bf16 %v8663_v31, %v8662_v41  ;;  %v26162_v41 = vpack.c.bf16 %v8721_v58, %v8720_v48  ;;  %v8723_v43 = vld [vmem:[#allocation2 + $0xe0] sm:$0xff]  ;;  %v8722_v31 = vld [vmem:[#allocation2 + $0xd8] sm:$0xff] }
 0x8ef   : > { %v21053_v14 = vpop.f32.mrb[60].mxu0  ;;  %21096 = vmatmul.mubr.bf16.gmra.mrb[56].mxu1 %v26100_v50 }
 0x8f0   : > { %v26104_v34 = vadd.f32 %v21053_v14, %v26006_v12  ;;  %v8587_v21 = vpop.f32.mrb[61].mxu0  ;;  %21099 = vmatprep.mubr.bf16.mxu1 %v26098_v56  ;;  %v26169_v14 = vpack.c.bf16 %v8723_v43, %v8722_v31  ;;  %v9258_v43 = vld [vmem:[#allocation2 + $0x4a] sm:$0xff]  ;;  %v9260_v31 = vld [vmem:[#allocation2 + $0x62] sm:$0xff] }
 0x8f1   : > { %v8666_v20 = vadd.f32 %v26006_v12, %v8587_v21  ;;  %v21054_v38 = vpop.f32.mrb[62].mxu0  ;;  %v8724_v21 = vld [vmem:[#allocation2 + $0xf0] sm:$0xff] }
 0x8f2   : > { %8700 = vst [vmem:[#allocation2 + $0x181] sm:$0xff] %v26104_v34  ;;  %v26110_v47 = vadd.f32 %v21054_v38, %v26006_v12  ;;  %v8590_v57 = vpop.f32.mrb[63].mxu0  ;;  %v8727_v38 = vld [vmem:[#allocation2 + $0x110] sm:$0xff] }
 0x8f3   : > { %8698 = vst [vmem:[#allocation2 + $0x169] sm:$0xff] %v8666_v20  ;;  %v8667_v55 = vadd.f32 %v26006_v12, %v8590_v57  ;;  %v24129_v12 = vld [vmem:[%s27545_s1 + $0x748] sm:$0xff]   ;;  %v8732_v59 = vld [vmem:[#allocation2 + $0x150] sm:$0xff] }
 0x8f4   : > { %8701 = vst [vmem:[#allocation2 + $0x189] sm:$0xff] %v26110_v47  ;;  %v9911_v44 = vpack.c.bf16 %v26110_v47, %v26104_v34  ;;  %v8729_v57 = vld [vmem:[#allocation2 + $0x128] sm:$0xff]  ;;  %v8731_v53 = vld [vmem:[#allocation2 + $0x140] sm:$0xff] }
 0x8f5   : > { %8699 = vst [vmem:[#allocation2 + $0x171] sm:$0xff] %v8667_v55  ;;  %v26116_v51 = vpack.c.bf16 %v8667_v55, %v8666_v20  ;;  %v26171_v20 = vpack.c.bf16 %v8725_v13, %v8724_v21  ;;  %v8726_v55 = vld [vmem:[#allocation2 + $0x108] sm:$0xff]  ;;  %v26177_v25 = vpack.c.bf16 %v8729_v57, %v8728_v5  ;;  %v9259_v13 = vld [vmem:[#allocation2 + $0x52] sm:$0xff]  ;;  %v9262_v5 = vld [vmem:[#allocation2 + $0x7a] sm:$0xff] }
 0x8f6   : > { %v26175_v52 = vpack.c.bf16 %v8727_v38, %v8726_v55  ;;  %v9261_v21 = vld [vmem:[#allocation2 + $0x6a] sm:$0xff]  ;;  %v26202_v38 = vpack.c.bf16 %v9259_v13, %v9258_v43  ;;  %v24139_v57 = vld [vmem:[%s27545_s1 + $0x798] sm:$0xff]   ;;  %v9271_v13 = vld [vmem:[#allocation2 + $0xe2] sm:$0xff] }
 0x8f7   : > { %21100 = vmatmul.mubr.bf16.gmra.mrb[60].mxu1 %v26116_v51  ;;  %v26207_v55 = vpack.c.bf16 %v9261_v21, %v9260_v31  ;;  %v9270_v43 = vld [vmem:[#allocation2 + $0xda] sm:$0xff]  ;;  %v9272_v31 = vld [vmem:[#allocation2 + $0xf2] sm:$0xff] }
 0x8f8   : > { %21119 = vmatprep.mubr.bf16.mxu1 %v25940_v61  ;;  %v24130_v61 = vld [vmem:[%s27545_s1 + $0x750] sm:$0xff]   ;;  %v9273_v21 = vld [vmem:[#allocation2 + $0xfa] sm:$0xff] }
 0x8fa   : > { %v8734_v28 = vld [vmem:[#allocation2 + $0x168] sm:$0xff] }
 0x8fb   : > { %v10200_v34 = vld [vmem:[#allocation2 + $0x182] sm:$0xff]  ;;  %v10201_v47 = vld [vmem:[#allocation2 + $0x18a] sm:$0xff] }
 0x8ff   : > { %21120 = vmatmul.mubr.bf16.vlgmr.msra.gmra.mrb[32].mxu1 %v26120_v8 }
 0x900   : > { %21123 = vmatprep.mubr.bf16.mxu1 %v26125_v36  ;;  %21152 = vmatpush3.bf16.msra.mxu1 %v26073_v17  ;;  %v24132_v17 = vld [vmem:[%s27545_s1 + $0x760] sm:$0xff]  }
 0x901   : > { %21153 = vmatprep.subr.bf16.mxu1 %v24129_v12 }
 0x904   : > { %21154 = vmatpush3.bf16.msra.mxu1 %v24129_v12  ;;  %v8733_v12 = vld [vmem:[#allocation2 + $0x158] sm:$0xff] }
 0x905   : > { %21155 = vmatprep.subr.bf16.mxu1 %v24130_v61  ;;  %v26183_v39 = vpack.c.bf16 %v8733_v12, %v8732_v59  ;;  %v9264_v12 = vld [vmem:[#allocation2 + $0x92] sm:$0xff] }
 0x907   : > { %21124 = vmatmul.mubr.bf16.gmra.mrb[36].mxu1 %v26133_v19 }
 0x908   : > { %21127 = vmatprep.mubr.bf16.mxu1 %v26138_v42  ;;  %21156 = vmatpush3.bf16.msra.mxu1 %v24130_v61  ;;  %v8730_v61 = vld [vmem:[#allocation2 + $0x138] sm:$0xff] }
 0x909   : > { %21157 = vmatprep.subr.bf16.mxu1 %v24131_v54  ;;  %v26181_v30 = vpack.c.bf16 %v8731_v53, %v8730_v61  ;;  %v9263_v53 = vld [vmem:[#allocation2 + $0x82] sm:$0xff]  ;;  %v9265_v61 = vld [vmem:[#allocation2 + $0x9a] sm:$0xff] }
 0x90a   : > { %v26214_v59 = vpack.c.bf16 %v9263_v53, %v9262_v5  ;;  %v9274_v5 = vld [vmem:[#allocation2 + $0x10a] sm:$0xff]  ;;  %v9275_v53 = vld [vmem:[#allocation2 + $0x112] sm:$0xff] }
 0x90c   : > { %21158 = vmatpush3.bf16.msra.mxu1 %v24131_v54  ;;  %v9253_v54 = vld [vmem:[#allocation2 + $0xa] sm:$0xff] }
 0x90d   : > { %21159 = vmatprep.subr.bf16.mxu1 %v24132_v17  ;;  %v9284_v9 = vpack.c.bf16 %v9253_v54, %v9252_v29  ;;  %v24141_v29 = vld [vmem:[%s27545_s1 + $0x7a8] sm:$0xff]   ;;  %v26219_v54 = vpack.c.bf16 %v9265_v61, %v9264_v12 }
 0x90e   : > { %v9276_v12 = vld [vmem:[#allocation2 + $0x122] sm:$0xff]  ;;  %v9277_v61 = vld [vmem:[#allocation2 + $0x12a] sm:$0xff] }
 0x90f   : > { %21128 = vmatmul.mubr.bf16.gmra.mrb[40].mxu1 %v26145_v16 }
 0x910   : > { %21131 = vmatprep.mubr.bf16.mxu1 %v26150_v11  ;;  %21160 = vmatpush3.bf16.msra.mxu1 %v24132_v17  ;;  %v8735_v17 = vld [vmem:[#allocation2 + $0x170] sm:$0xff] }
 0x911   : > { %21161 = vmatprep.subr.bf16.mxu1 %v24133_v2  ;;  %v26187_v26 = vpack.c.bf16 %v8735_v17, %v8734_v28  ;;  %v24142_v17 = vld [vmem:[%s27545_s1 + $0x7b0] sm:$0xff]  }
 0x912   : > { %v9266_v28 = vld [vmem:[#allocation2 + $0xaa] sm:$0xff] }
 0x914   : > { %21162 = vmatpush3.bf16.msra.mxu1 %v24133_v2  ;;  %v9255_v2 = vld [vmem:[#allocation2 + $0x22] sm:$0xff] }
 0x915   : > { %21163 = vmatprep.subr.bf16.mxu1 %v24134_v23  ;;  %v26190_v58 = vpack.c.bf16 %v9255_v2, %v9254_v15  ;;  %v9268_v15 = vld [vmem:[#allocation2 + $0xc2] sm:$0xff]  ;;  %v9269_v2 = vld [vmem:[#allocation2 + $0xca] sm:$0xff] }
 0x917   : > { %21132 = vmatmul.mubr.bf16.gmra.mrb[44].mxu1 %v26157_v35 }
 0x918   : > { %21135 = vmatprep.mubr.bf16.mxu1 %v26162_v41  ;;  %21164 = vmatpush3.bf16.msra.mxu1 %v24134_v23  ;;  %v9256_v23 = vld [vmem:[#allocation2 + $0x32] sm:$0xff] }
 0x919   : > { %21165 = vmatprep.subr.bf16.mxu1 %v24135_v3  ;;  %v26195_v48 = vpack.c.bf16 %v9257_v37, %v9256_v23  ;;  %v24143_v37 = vld [vmem:[%s27545_s1 + $0x7b8] sm:$0xff]  }
 0x91c   : > { %21166 = vmatpush3.bf16.msra.mxu1 %v24135_v3  ;;  %v24138_v3 = vld [vmem:[%s27545_s1 + $0x790] sm:$0xff]  }
 0x91d   : > { %21199 = vmatprep.subr.bf16.mxu1 %v24136_v60 }
 0x91f   : > { %21136 = vmatmul.mubr.bf16.gmra.mrb[48].mxu1 %v26169_v14 }
 0x920   : > { %21139 = vmatprep.mubr.bf16.mxu1 %v26171_v20 }
 0x927   : > { %21140 = vmatmul.mubr.bf16.gmra.mrb[52].mxu1 %v26175_v52 }
 0x928   : > { %21143 = vmatprep.mubr.bf16.mxu1 %v26177_v25 }
 0x92f   : > { %21144 = vmatmul.mubr.bf16.gmra.mrb[56].mxu1 %v26181_v30 }
 0x930   : > { %21147 = vmatprep.mubr.bf16.mxu1 %v26183_v39 }
 0x937   : > { %21148 = vmatmul.mubr.bf16.gmra.mrb[60].mxu1 %v26187_v26 }
 0x938   : > { %21167 = vmatprep.mubr.bf16.mxu1 %v9284_v9  ;;  %v9267_v9 = vld [vmem:[#allocation2 + $0xb2] sm:$0xff] }
 0x939   : > { %v26226_v23 = vpack.c.bf16 %v9267_v9, %v9266_v28  ;;  %v9278_v28 = vld [vmem:[#allocation2 + $0x13a] sm:$0xff]  ;;  %v9279_v9 = vld [vmem:[#allocation2 + $0x142] sm:$0xff] }
 0x93f   : > { %21168 = vmatmul.mubr.bf16.vlgmr.msra.gmra.mrb[32].mxu1 %v26190_v58 }
 0x940   : > { %21171 = vmatprep.mubr.bf16.mxu1 %v26195_v48  ;;  %21200 = vmatpush3.bf16.msra.mxu1 %v24136_v60  ;;  %v24140_v60 = vld [vmem:[%s27545_s1 + $0x7a0] sm:$0xff]  }
 0x941   : > { %21201 = vmatprep.subr.bf16.mxu1 %v24137_v27 }
 0x944   : > { %21202 = vmatpush3.bf16.msra.mxu1 %v24137_v27  ;;  %v26231_v27 = vpack.c.bf16 %v9269_v2, %v9268_v15  ;;  %v9280_v15 = vld [vmem:[#allocation2 + $0x152] sm:$0xff]  ;;  %v9281_v2 = vld [vmem:[#allocation2 + $0x15a] sm:$0xff] }
 0x945   : > { %21203 = vmatprep.subr.bf16.mxu1 %v24138_v3 }
 0x947   : > { %21172 = vmatmul.mubr.bf16.gmra.mrb[36].mxu1 %v26202_v38 }
 0x948   : > { %21175 = vmatprep.mubr.bf16.mxu1 %v26207_v55  ;;  %21204 = vmatpush3.bf16.msra.mxu1 %v24138_v3  ;;  %v24144_v3 = vld [vmem:[%s27545_s1 + $0x7c0] sm:$0xff]  }
 0x949   : > { %21205 = vmatprep.subr.bf16.mxu1 %v24139_v57 }
 0x94c   : > { %21206 = vmatpush3.bf16.msra.mxu1 %v24139_v57  ;;  %v26238_v57 = vpack.c.bf16 %v9271_v13, %v9270_v43  ;;  %v26252_v43 = vpack.c.bf16 %v9281_v2, %v9280_v15  ;;  %v9282_v13 = vld [vmem:[#allocation2 + $0x16a] sm:$0xff]  ;;  %v9864_v2 = vld [vmem:[#allocation2 + $0x19] sm:$0xff] }
 0x94d   : > { %21207 = vmatprep.subr.bf16.mxu1 %v24140_v60  ;;  %v9589_v15 = vld [vmem:[#allocation2 + $0x188] sm:$0xff] }
 0x94f   : > { %21176 = vmatmul.mubr.bf16.gmra.mrb[40].mxu1 %v26214_v59 }
 0x950   : > { %21179 = vmatprep.mubr.bf16.mxu1 %v26219_v54  ;;  %21208 = vmatpush3.bf16.msra.mxu1 %v24140_v60  ;;  %v26240_v60 = vpack.c.bf16 %v9273_v21, %v9272_v31  ;;  %v9283_v31 = vld [vmem:[#allocation2 + $0x172] sm:$0xff] }
 0x951   : > { %21209 = vmatprep.subr.bf16.mxu1 %v24141_v29  ;;  %v26256_v21 = vpack.c.bf16 %v9283_v31, %v9282_v13  ;;  %v9588_v13 = vld [vmem:[#allocation2 + $0x180] sm:$0xff] }
 0x952   : > { %v26298_v31 = vpack.c.bf16 %v9589_v15, %v9588_v13  ;;  %v24155_v15 = vld [vmem:[%s27545_s1 + $0x818] sm:$0xff]  }
 0x953   : > { %v10793_v13 = vld [vmem:[#allocation2 + $0xb1] sm:$0xff] }
 0x954   : > { %21210 = vmatpush3.bf16.msra.mxu1 %v24141_v29  ;;  %v26244_v29 = vpack.c.bf16 %v9275_v53, %v9274_v5  ;;  %v24145_v5 = vld [vmem:[%s27545_s1 + $0x7c8] sm:$0xff]   ;;  %v24146_v53 = vld [vmem:[%s27545_s1 + $0x7d0] sm:$0xff]  }
 0x955   : > { %21211 = vmatprep.subr.bf16.mxu1 %v24142_v17 }
 0x957   : > { %21180 = vmatmul.mubr.bf16.gmra.mrb[44].mxu1 %v26226_v23 }
 0x958   : > { %21183 = vmatprep.mubr.bf16.mxu1 %v26231_v27  ;;  %21212 = vmatpush3.bf16.msra.mxu1 %v24142_v17  ;;  %v26246_v17 = vpack.c.bf16 %v9277_v61, %v9276_v12  ;;  %v24149_v12 = vld [vmem:[%s27545_s1 + $0x7e8] sm:$0xff]   ;;  %v24150_v61 = vld [vmem:[%s27545_s1 + $0x7f0] sm:$0xff]  }
 0x959   : > { %21213 = vmatprep.subr.bf16.mxu1 %v24143_v37 }
 0x95c   : > { %21214 = vmatpush3.bf16.msra.mxu1 %v24143_v37  ;;  %v26250_v37 = vpack.c.bf16 %v9279_v9, %v9278_v28  ;;  %v24151_v28 = vld [vmem:[%s27545_s1 + $0x7f8] sm:$0xff]   ;;  %v24152_v9 = vld [vmem:[%s27545_s1 + $0x800] sm:$0xff]  }
 0x95d   : > { %21247 = vmatprep.subr.bf16.mxu1 %v24144_v3 }
 0x95f   : > { %21184 = vmatmul.mubr.bf16.gmra.mrb[48].mxu1 %v26238_v57 }
 0x960   : > { %21187 = vmatprep.mubr.bf16.mxu1 %v26240_v60 }
 0x967   : > { %21188 = vmatmul.mubr.bf16.gmra.mrb[52].mxu1 %v26244_v29 }
 0x968   : > { %21191 = vmatprep.mubr.bf16.mxu1 %v26246_v17 }
 0x96f   : > { %21192 = vmatmul.mubr.bf16.gmra.mrb[56].mxu1 %v26250_v37 }
 0x970   : > { %21195 = vmatprep.mubr.bf16.mxu1 %v26252_v43 }
 0x977   : > { %21196 = vmatmul.mubr.bf16.gmra.mrb[60].mxu1 %v26256_v21 }
 0x978   : > { %21215 = vmatprep.mubr.bf16.mxu1 %v26120_v8  ;;  %v24147_v8 = vld [vmem:[%s27545_s1 + $0x7d8] sm:$0xff]  }
 0x97f   : > { %21216 = vmatmul.mubr.bf16.vlgmr.msra.gmra.mrb[32].mxu1 %v26125_v36 }
 0x980   : > { %21219 = vmatprep.mubr.bf16.mxu1 %v26133_v19  ;;  %21248 = vmatpush3.bf16.msra.mxu1 %v24144_v3  ;;  %v24148_v3 = vld [vmem:[%s27545_s1 + $0x7e0] sm:$0xff]  }
 0x981   : > { %21249 = vmatprep.subr.bf16.mxu1 %v24145_v5 }
 0x984   : > { %21250 = vmatpush3.bf16.msra.mxu1 %v24145_v5  ;;  %v9896_v5 = vpack.c.bf16 %v26012_v40, %v9864_v2  ;;  %v24154_v40 = vld [vmem:[%s27545_s1 + $0x810] sm:$0xff]   ;;  %v24180_v2 = vld [vmem:[%s27545_s1 + $0x8e0] sm:$0xff]  }
 0x985   : > { %21251 = vmatprep.subr.bf16.mxu1 %v24146_v53 }
 0x987   : > { %21220 = vmatmul.mubr.bf16.gmra.mrb[36].mxu1 %v26138_v42 }
 0x988   : > { %21223 = vmatprep.mubr.bf16.mxu1 %v26145_v16  ;;  %21252 = vmatpush3.bf16.msra.mxu1 %v24146_v53  ;;  %v9867_v53 = vld [vmem:[#allocation2 + $0x39] sm:$0xff] }
 0x989   : > { %21253 = vmatprep.subr.bf16.mxu1 %v24147_v8 }
 0x98c   : > { %21254 = vmatpush3.bf16.msra.mxu1 %v24147_v8  ;;  %v9866_v8 = vld [vmem:[#allocation2 + $0x31] sm:$0xff] }
 0x98d   : > { %21255 = vmatprep.subr.bf16.mxu1 %v24148_v3 }
 0x98f   : > { %21224 = vmatmul.mubr.bf16.gmra.mrb[40].mxu1 %v26150_v11 }
 0x990   : > { %21227 = vmatprep.mubr.bf16.mxu1 %v26157_v35  ;;  %21256 = vmatpush3.bf16.msra.mxu1 %v24148_v3  ;;  %v26302_v3 = vpack.c.bf16 %v9867_v53, %v9866_v8  ;;  %v10794_v8 = vld [vmem:[#allocation2 + $0xc1] sm:$0xff] }
 0x991   : > { %21257 = vmatprep.subr.bf16.mxu1 %v24149_v12 }
 0x994   : > { %21258 = vmatpush3.bf16.msra.mxu1 %v24149_v12  ;;  %v24153_v12 = vld [vmem:[%s27545_s1 + $0x808] sm:$0xff]  }
 0x995   : > { %21259 = vmatprep.subr.bf16.mxu1 %v24150_v61 }
 0x997   : > { %21228 = vmatmul.mubr.bf16.gmra.mrb[44].mxu1 %v26162_v41 }
 0x998   : > { %21231 = vmatprep.mubr.bf16.mxu1 %v26169_v14  ;;  %21260 = vmatpush3.bf16.msra.mxu1 %v24150_v61  ;;  %v26312_v61 = vld [vmem:[#allocation2 + $0x61] sm:$0xff] }
 0x999   : > { %21261 = vmatprep.subr.bf16.mxu1 %v24151_v28 }
 0x99c   : > { %21262 = vmatpush3.bf16.msra.mxu1 %v24151_v28  ;;  %v9899_v28 = vpack.c.bf16 %v26025_v62, %v26312_v61  ;;  %v24157_v62 = vld [vmem:[%s27545_s1 + $0x828] sm:$0xff]  }
 0x99d   : > { %21295 = vmatprep.subr.bf16.mxu1 %v24152_v9 }
 0x99f   : > { %21232 = vmatmul.mubr.bf16.gmra.mrb[48].mxu1 %v26171_v20 }
 0x9a0   : > { %21235 = vmatprep.mubr.bf16.mxu1 %v26175_v52 }
 0x9a7   : > { %21236 = vmatmul.mubr.bf16.gmra.mrb[52].mxu1 %v26177_v25 }
 0x9a8   : > { %21239 = vmatprep.mubr.bf16.mxu1 %v26181_v30 }
 0x9af   : > { %21240 = vmatmul.mubr.bf16.gmra.mrb[56].mxu1 %v26183_v39 }
 0x9b0   : > { %21243 = vmatprep.mubr.bf16.mxu1 %v26187_v26 }
 0x9b7   : > { %21244 = vmatmul.mubr.bf16.gmra.mrb[60].mxu1 %v26298_v31 }
 0x9b8   : > { %21263 = vmatprep.mubr.bf16.mxu1 %v9896_v5  ;;  %v10792_v5 = vld [vmem:[#allocation2 + $0xa9] sm:$0xff] }
 0x9b9   : > { %v10819_v53 = vpack.c.bf16 %v10793_v13, %v10792_v5  ;;  %v11103_v5 = vld [vmem:[#allocation2 + $0xe2] sm:$0xff] }
 0x9bf   : > { %21264 = vmatmul.mubr.bf16.vlgmr.msra.gmra.mrb[32].mxu1 %v26302_v3 }
 0x9c0   : > { %21267 = vmatprep.mubr.bf16.mxu1 %v26030_v46  ;;  %21296 = vmatpush3.bf16.msra.mxu1 %v24152_v9  ;;  %v24156_v46 = vld [vmem:[%s27545_s1 + $0x820] sm:$0xff]   ;;  %v24159_v9 = vld [vmem:[%s27545_s1 + $0x838] sm:$0xff]  }
 0x9c1   : > { %21297 = vmatprep.subr.bf16.mxu1 %v24153_v12 }
 0x9c4   : > { %21298 = vmatpush3.bf16.msra.mxu1 %v24153_v12 }
 0x9c5   : > { %21299 = vmatprep.subr.bf16.mxu1 %v24154_v40 }
 0x9c7   : > { %21268 = vmatmul.mubr.bf16.gmra.mrb[36].mxu1 %v9899_v28  ;;  %v10799_v28 = vld [vmem:[#allocation2 + $0xf9] sm:$0xff] }
 0x9c8   : > { %21271 = vmatprep.mubr.bf16.mxu1 %v26045_v10  ;;  %21300 = vmatpush3.bf16.msra.mxu1 %v24154_v40  ;;  %v24158_v10 = vld [vmem:[%s27545_s1 + $0x830] sm:$0xff]  }
 0x9c9   : > { %21301 = vmatprep.subr.bf16.mxu1 %v24155_v15  ;;  %v24182_v40 = vld [vmem:[%s27545_s1 + $0x8f0] sm:$0xff]  }
 0x9cc   : > { %21302 = vmatpush3.bf16.msra.mxu1 %v24155_v15  ;;  %v10796_v15 = vld [vmem:[#allocation2 + $0xd9] sm:$0xff] }
 0x9cd   : > { %21303 = vmatprep.subr.bf16.mxu1 %v24156_v46 }
 0x9cf   : > { %21272 = vmatmul.mubr.bf16.gmra.mrb[40].mxu1 %v26043_v18  ;;  %v24160_v18 = vld [vmem:[%s27545_s1 + $0x840] sm:$0xff]  }
 0x9d0   : > { %21275 = vmatprep.mubr.bf16.mxu1 %v26061_v24  ;;  %21304 = vmatpush3.bf16.msra.mxu1 %v24156_v46  ;;  %v24162_v24 = vld [vmem:[%s27545_s1 + $0x850] sm:$0xff]  }
 0x9d1   : > { %21305 = vmatprep.subr.bf16.mxu1 %v24157_v62 }
 0x9d4   : > { %21306 = vmatpush3.bf16.msra.mxu1 %v24157_v62  ;;  %v10798_v62 = vld [vmem:[#allocation2 + $0xf1] sm:$0xff] }
 0x9d5   : > { %21307 = vmatprep.subr.bf16.mxu1 %v24158_v10 }
 0x9d7   : > { %21276 = vmatmul.mubr.bf16.gmra.mrb[44].mxu1 %v26059_v33  ;;  %v24161_v33 = vld [vmem:[%s27545_s1 + $0x848] sm:$0xff]  }
 0x9d8   : > { %21279 = vmatprep.mubr.bf16.mxu1 %v26079_v49  ;;  %21308 = vmatpush3.bf16.msra.mxu1 %v24158_v10  ;;  %v24164_v49 = vld [vmem:[%s27545_s1 + $0x860] sm:$0xff]   ;;  %v24183_v10 = vld [vmem:[%s27545_s1 + $0x8f8] sm:$0xff]  }
 0x9d9   : > { %21309 = vmatprep.subr.bf16.mxu1 %v24159_v9 }
 0x9dc   : > { %21310 = vmatpush3.bf16.msra.mxu1 %v24159_v9  ;;  %v10822_v9 = vpack.c.bf16 %v10799_v28, %v10798_v62  ;;  %v11108_v28 = vld [vmem:[#allocation2 + $0x122] sm:$0xff] }
 0x9dd   : > { %21343 = vmatprep.subr.bf16.mxu1 %v24160_v18 }
 0x9df   : > { %21280 = vmatmul.mubr.bf16.gmra.mrb[48].mxu1 %v26077_v32  ;;  %v24163_v32 = vld [vmem:[%s27545_s1 + $0x858] sm:$0xff]  }
 0x9e0   : > { %21283 = vmatprep.mubr.bf16.mxu1 %v26090_v63  ;;  %v24166_v63 = vld [vmem:[%s27545_s1 + $0x870] sm:$0xff]  }
 0x9e7   : > { %21284 = vmatmul.mubr.bf16.gmra.mrb[52].mxu1 %v26088_v45  ;;  %v24165_v45 = vld [vmem:[%s27545_s1 + $0x868] sm:$0xff]  }
 0x9e8   : > { %21287 = vmatprep.mubr.bf16.mxu1 %v26100_v50  ;;  %v24168_v50 = vld [vmem:[%s27545_s1 + $0x880] sm:$0xff]  }
 0x9ef   : > { %21288 = vmatmul.mubr.bf16.gmra.mrb[56].mxu1 %v26098_v56  ;;  %v24167_v56 = vld [vmem:[%s27545_s1 + $0x878] sm:$0xff]  }
 0x9f0   : > { %21291 = vmatprep.mubr.bf16.mxu1 %v26116_v51  ;;  %v24169_v51 = vld [vmem:[%s27545_s1 + $0x888] sm:$0xff]  }
 0x9f7   : > { %21292 = vmatmul.mubr.bf16.gmra.mrb[60].mxu1 %v9911_v44  ;;  %v26387_v44 = vpack.c.bf16 %v10201_v47, %v10200_v34  ;;  %v10806_v47 = vld [vmem:[#allocation2 + $0x151] sm:$0xff] }
 0x9f8   : > { %21311 = vmatprep.mubr.bf16.mxu1 %v26190_v58  ;;  %v24170_v58 = vld [vmem:[%s27545_s1 + $0x890] sm:$0xff]  }
 0x9ff   : > { %21312 = vmatmul.mubr.bf16.vlgmr.msra.gmra.mrb[32].mxu1 %v26195_v48 }
 0xa00   : > { %21315 = vmatprep.mubr.bf16.mxu1 %v26202_v38  ;;  %21344 = vmatpush3.bf16.msra.mxu1 %v24160_v18  ;;  %v24177_v38 = vld [vmem:[%s27545_s1 + $0x8c8] sm:$0xff]   ;;  %v10801_v18 = vld [vmem:[#allocation2 + $0x111] sm:$0xff] }
 0xa01   : > { %21345 = vmatprep.subr.bf16.mxu1 %v24161_v33 }
 0xa04   : > { %21346 = vmatpush3.bf16.msra.mxu1 %v24161_v33  ;;  %v10803_v33 = vld [vmem:[#allocation2 + $0x129] sm:$0xff] }
 0xa05   : > { %21347 = vmatprep.subr.bf16.mxu1 %v24162_v24 }
 0xa07   : > { %21316 = vmatmul.mubr.bf16.gmra.mrb[36].mxu1 %v26207_v55 }
 0xa08   : > { %21319 = vmatprep.mubr.bf16.mxu1 %v26214_v59  ;;  %21348 = vmatpush3.bf16.msra.mxu1 %v24162_v24  ;;  %v24187_v59 = vld [vmem:[%s27545_s1 + $0x958] sm:$0xff]   ;;  %v10800_v24 = vld [vmem:[#allocation2 + $0x109] sm:$0xff] }
 0xa09   : > { %21349 = vmatprep.subr.bf16.mxu1 %v24163_v32 }
 0xa0c   : > { %21350 = vmatpush3.bf16.msra.mxu1 %v24163_v32  ;;  %v10823_v32 = vpack.c.bf16 %v10801_v18, %v10800_v24  ;;  %v11112_v18 = vld [vmem:[#allocation2 + $0x152] sm:$0xff] }
 0xa0d   : > { %21351 = vmatprep.subr.bf16.mxu1 %v24164_v49 }
 0xa0f   : > { %21320 = vmatmul.mubr.bf16.gmra.mrb[40].mxu1 %v26219_v54  ;;  %v24178_v54 = vld [vmem:[%s27545_s1 + $0x8d0] sm:$0xff]  }
 0xa10   : > { %21323 = vmatprep.mubr.bf16.mxu1 %v26226_v23  ;;  %21352 = vmatpush3.bf16.msra.mxu1 %v24164_v49  ;;  %v10789_v23 = vld [vmem:[#allocation2 + $0x81] sm:$0xff] }
 0xa11   : > { %21353 = vmatprep.subr.bf16.mxu1 %v24165_v45  ;;  %v10802_v49 = vld [vmem:[#allocation2 + $0x121] sm:$0xff] }
 0xa14   : > { %21354 = vmatpush3.bf16.msra.mxu1 %v24165_v45  ;;  %v10824_v45 = vpack.c.bf16 %v10803_v33, %v10802_v49  ;;  %v11113_v33 = vld [vmem:[#allocation2 + $0x15a] sm:$0xff]  ;;  %v11114_v49 = vld [vmem:[#allocation2 + $0x16a] sm:$0xff] }
 0xa15   : > { %21355 = vmatprep.subr.bf16.mxu1 %v24166_v63 }
 0xa17   : > { %21324 = vmatmul.mubr.bf16.gmra.mrb[44].mxu1 %v26231_v27  ;;  %v10791_v27 = vld [vmem:[#allocation2 + $0x99] sm:$0xff] }
 0xa18   : > { %21327 = vmatprep.mubr.bf16.mxu1 %v26238_v57  ;;  %21356 = vmatpush3.bf16.msra.mxu1 %v24166_v63  ;;  %v24188_v57 = vld [vmem:[%s27545_s1 + $0x960] sm:$0xff]  }
 0xa19   : > { %21357 = vmatprep.subr.bf16.mxu1 %v24167_v56  ;;  %v10805_v63 = vld [vmem:[#allocation2 + $0x141] sm:$0xff] }
 0xa1c   : > { %21358 = vmatpush3.bf16.msra.mxu1 %v24167_v56  ;;  %v10807_v56 = vld [vmem:[#allocation2 + $0x159] sm:$0xff] }
 0xa1d   : > { %21391 = vmatprep.subr.bf16.mxu1 %v24168_v50 }
 0xa1f   : > { %21328 = vmatmul.mubr.bf16.gmra.mrb[48].mxu1 %v26240_v60  ;;  %v10788_v60 = vld [vmem:[#allocation2 + $0x79] sm:$0xff] }
 0xa20   : > { %21331 = vmatprep.mubr.bf16.mxu1 %v26244_v29  ;;  %v10817_v29 = vpack.c.bf16 %v10789_v23, %v10788_v60  ;;  %v11095_v23 = vld [vmem:[#allocation2 + $0x82] sm:$0xff] }
 0xa27   : > { %21332 = vmatmul.mubr.bf16.gmra.mrb[52].mxu1 %v26246_v17  ;;  %v10790_v17 = vld [vmem:[#allocation2 + $0x91] sm:$0xff] }
 0xa28   : > { %21335 = vmatprep.mubr.bf16.mxu1 %v26250_v37  ;;  %v24179_v37 = vld [vmem:[%s27545_s1 + $0x8d8] sm:$0xff]  }
 0xa2f   : > { %21336 = vmatmul.mubr.bf16.gmra.mrb[56].mxu1 %v26252_v43  ;;  %v10818_v43 = vpack.c.bf16 %v10791_v27, %v10790_v17  ;;  %v11096_v27 = vld [vmem:[#allocation2 + $0x92] sm:$0xff]  ;;  %v11098_v17 = vld [vmem:[#allocation2 + $0xaa] sm:$0xff] }
 0xa30   : > { %21339 = vmatprep.mubr.bf16.mxu1 %v26256_v21  ;;  %v24189_v21 = vld [vmem:[%s27545_s1 + $0x968] sm:$0xff]  }
 0xa37   : > { %21340 = vmatmul.mubr.bf16.gmra.mrb[60].mxu1 %v26387_v44 }
 0xa38   : > { %21359 = vmatprep.mubr.bf16.mxu1 %v26125_v36  ;;  %v24171_v36 = vld [vmem:[%s27545_s1 + $0x898] sm:$0xff]  }
 0xa3f   : > { %21360 = vmatmul.mubr.bf16.vlgmr.msra.gmra.mrb[32].mxu1 %v26133_v19  ;;  %v24172_v19 = vld [vmem:[%s27545_s1 + $0x8a0] sm:$0xff]  }
 0xa40   : > { %21363 = vmatprep.mubr.bf16.mxu1 %v26138_v42  ;;  %21392 = vmatpush3.bf16.msra.mxu1 %v24168_v50  ;;  %v24173_v42 = vld [vmem:[%s27545_s1 + $0x8a8] sm:$0xff]   ;;  %v10804_v50 = vld [vmem:[#allocation2 + $0x139] sm:$0xff] }
 0xa41   : > { %21393 = vmatprep.subr.bf16.mxu1 %v24169_v51  ;;  %v10825_v34 = vpack.c.bf16 %v10805_v63, %v10804_v50  ;;  %v11119_v50 = vld [vmem:[#allocation2 + $0x1a2] sm:$0xff] }
 0xa44   : > { %21394 = vmatpush3.bf16.msra.mxu1 %v24169_v51  ;;  %v10826_v51 = vpack.c.bf16 %v10807_v56, %v10806_v47  ;;  %v11118_v56 = vld [vmem:[#allocation2 + $0x19a] sm:$0xff]  ;;  %v24190_v47 = vld [vmem:[%s27545_s1 + $0x970] sm:$0xff]  }
 0xa45   : > { %21395 = vmatprep.subr.bf16.mxu1 %v24170_v58 }
 0xa47   : > { %21364 = vmatmul.mubr.bf16.gmra.mrb[36].mxu1 %v26145_v16  ;;  %v24174_v16 = vld [vmem:[%s27545_s1 + $0x8b0] sm:$0xff]  }
 0xa48   : > { %21367 = vmatprep.mubr.bf16.mxu1 %v26150_v11  ;;  %21396 = vmatpush3.bf16.msra.mxu1 %v24170_v58  ;;  %v24175_v11 = vld [vmem:[%s27545_s1 + $0x8b8] sm:$0xff]  }
 0xa49   : > { %21397 = vmatprep.subr.bf16.mxu1 %v24171_v36  ;;  %v10809_v58 = vld [vmem:[#allocation2 + $0x171] sm:$0xff] }
 0xa4c   : > { %21398 = vmatpush3.bf16.msra.mxu1 %v24171_v36  ;;  %v10811_v36 = vld [vmem:[#allocation2 + $0x189] sm:$0xff] }
 0xa4d   : > { %21399 = vmatprep.subr.bf16.mxu1 %v24172_v19 }
 0xa4f   : > { %21368 = vmatmul.mubr.bf16.gmra.mrb[40].mxu1 %v26157_v35  ;;  %v24176_v35 = vld [vmem:[%s27545_s1 + $0x8c0] sm:$0xff]  }
 0xa50   : > { %21371 = vmatprep.mubr.bf16.mxu1 %v26162_v41  ;;  %21400 = vmatpush3.bf16.msra.mxu1 %v24172_v19  ;;  %v24335_v41 = vld [vmem:[#allocation2] sm:$0xff]  ;;  %v10808_v19 = vld [vmem:[#allocation2 + $0x169] sm:$0xff] }
 0xa51   : > { %21401 = vmatprep.subr.bf16.mxu1 %v24173_v42 }
 0xa54   : > { %21402 = vmatpush3.bf16.msra.mxu1 %v24173_v42  ;;  %v10827_v42 = vpack.c.bf16 %v10809_v58, %v10808_v19  ;;  %v11595_v58 = vld [vmem:[#allocation2 + $0x1] sm:$0xff] }
 0xa55   : > { %21403 = vmatprep.subr.bf16.mxu1 %v24174_v16 }
 0xa57   : > { %21372 = vmatmul.mubr.bf16.gmra.mrb[44].mxu1 %v26169_v14  ;;  %v26429_v14 = vpack.c.bf16 %v24335_v41, %v24335_v41  ;;  %v10813_v41 = vld [vmem:[#allocation2 + $0x1a1] sm:$0xff] }
 0xa58   : > { %21375 = vmatprep.mubr.bf16.mxu1 %v26171_v20  ;;  %21404 = vmatpush3.bf16.msra.mxu1 %v24174_v16  ;;  %v24184_v20 = vld [vmem:[%s27545_s1 + $0x940] sm:$0xff]  }
 0xa59   : > { %21405 = vmatprep.subr.bf16.mxu1 %v24175_v11  ;;  %21487 = vmatprep.subr.bf16.mxu0 %v24184_v20  ;;  %v10810_v16 = vld [vmem:[#allocation2 + $0x181] sm:$0xff] }
 0xa5a   : > { %21488 = vmatpush3.bf16.msra.mxu0 %v24184_v20 }
 0xa5c   : > { %21406 = vmatpush3.bf16.msra.mxu1 %v24175_v11  ;;  %v10828_v11 = vpack.c.bf16 %v10811_v36, %v10810_v16  ;;  %v11596_v36 = vld [vmem:[#allocation2 + $0x9] sm:$0xff] }
 0xa5d   : > { %21439 = vmatprep.subr.bf16.mxu1 %v24176_v35  ;;  %v11627_v19 = vpack.c.bf16 %v11596_v36, %v11595_v58  ;;  %v24196_v36 = vld [vmem:[%s27545_s1 + $0x920] sm:$0xff]  }
 0xa5f   : > { %21376 = vmatmul.mubr.bf16.gmra.mrb[48].mxu1 %v26175_v52  ;;  %v24185_v52 = vld [vmem:[%s27545_s1 + $0x948] sm:$0xff]   ;;  %21503 = vmatprep.mubr.bf16.mxu0 %v11627_v19 }
 0xa60   : > { %21379 = vmatprep.mubr.bf16.mxu1 %v26177_v25  ;;  %v10785_v25 = vld [vmem:[#allocation2 + $0x51] sm:$0xff]  ;;  %21489 = vmatprep.subr.bf16.mxu0 %v24185_v52 }
 0xa61   : > { %21490 = vmatpush3.bf16.msra.mxu0 %v24185_v52  ;;  %v11088_v52 = vld [vmem:[#allocation2 + $0x32] sm:$0xff] }
 0xa67   : > { %21380 = vmatmul.mubr.bf16.gmra.mrb[52].mxu1 %v26181_v30  ;;  %v10787_v30 = vld [vmem:[#allocation2 + $0x69] sm:$0xff] }
 0xa68   : > { %21383 = vmatprep.mubr.bf16.mxu1 %v26183_v39  ;;  %v24186_v39 = vld [vmem:[%s27545_s1 + $0x950] sm:$0xff]   ;;  %v10816_v55 = vpack.c.bf16 %v10787_v30, %v26312_v61  ;;  %v10797_v61 = vld [vmem:[#allocation2 + $0xe1] sm:$0xff] }
 0xa69   : > { %21491 = vmatprep.subr.bf16.mxu0 %v24186_v39  ;;  %v10821_v46 = vpack.c.bf16 %v10797_v61, %v10796_v15  ;;  %v11107_v61 = vld [vmem:[#allocation2 + $0x112] sm:$0xff]  ;;  %v11109_v15 = vld [vmem:[#allocation2 + $0x12a] sm:$0xff] }
 0xa6a   : > { %21492 = vmatpush3.bf16.msra.mxu0 %v24186_v39  ;;  %v11090_v39 = vld [vmem:[#allocation2 + $0x4a] sm:$0xff]  ;;  %v11130_v62 = vpack.c.bf16 %v11109_v15, %v11108_v28 }
 0xa6b   : > { %21493 = vmatprep.subr.bf16.mxu0 %v24187_v59 }
 0xa6e   : > { %21494 = vmatpush3.bf16.msra.mxu0 %v24187_v59 }
 0xa6f   : > { %21384 = vmatmul.mubr.bf16.gmra.mrb[56].mxu1 %v26187_v26  ;;  %v10784_v26 = vld [vmem:[#allocation2 + $0x49] sm:$0xff]  ;;  %21495 = vmatprep.subr.bf16.mxu0 %v24188_v57 }
 0xa70   : > { %21387 = vmatprep.mubr.bf16.mxu1 %v26298_v31  ;;  %v10815_v48 = vpack.c.bf16 %v10785_v25, %v10784_v26  ;;  %v10795_v31 = vld [vmem:[#allocation2 + $0xc9] sm:$0xff]  ;;  %v11089_v25 = vld [vmem:[#allocation2 + $0x3a] sm:$0xff]  ;;  %v11091_v26 = vld [vmem:[#allocation2 + $0x52] sm:$0xff] }
 0xa71   : > { %v10820_v12 = vpack.c.bf16 %v10795_v31, %v10794_v8  ;;  %v11120_v30 = vpack.c.bf16 %v11089_v25, %v11088_v52  ;;  %v11102_v31 = vld [vmem:[#allocation2 + $0xda] sm:$0xff] }
 0xa72   : > { %21496 = vmatpush3.bf16.msra.mxu0 %v24188_v57  ;;  %v11097_v57 = vld [vmem:[#allocation2 + $0x9a] sm:$0xff] }
 0xa73   : > { %21497 = vmatprep.subr.bf16.mxu0 %v24189_v21  ;;  %v11105_v8 = vld [vmem:[#allocation2 + $0xfa] sm:$0xff] }
 0xa76   : > { %21498 = vmatpush3.bf16.msra.mxu0 %v24189_v21  ;;  %v11101_v21 = vld [vmem:[#allocation2 + $0xca] sm:$0xff] }
 0xa77   : > { %21388 = vmatmul.mubr.bf16.gmra.mrb[60].mxu1 %v26429_v14  ;;  %21499 = vmatprep.subr.bf16.mxu0 %v24190_v47 }
 0xa78   : > { %21407 = vmatprep.mubr.bf16.mxu1 %v26302_v3  ;;  %v24181_v3 = vld [vmem:[%s27545_s1 + $0x8e8] sm:$0xff]  }
 0xa7a   : > { %21500 = vmatpush3.bf16.msra.mxu0 %v24190_v47 }
 0xa7f   : > { %21408 = vmatmul.mubr.bf16.vlgmr.msra.gmra.mrb[32].mxu1 %v10815_v48  ;;  %v11092_v48 = vld [vmem:[#allocation2 + $0x62] sm:$0xff] }
 0xa80   : > { %21411 = vmatprep.mubr.bf16.mxu1 %v10816_v55  ;;  %21440 = vmatpush3.bf16.msra.mxu1 %v24176_v35  ;;  %v10812_v35 = vld [vmem:[#allocation2 + $0x199] sm:$0xff]  ;;  %v11121_v55 = vpack.c.bf16 %v11091_v26, %v11090_v39 }
 0xa81   : > { %21441 = vmatprep.subr.bf16.mxu1 %v24177_v38  ;;  %v10829_v20 = vpack.c.bf16 %v10813_v41, %v10812_v35 }
 0xa84   : > { %21442 = vmatpush3.bf16.msra.mxu1 %v24177_v38  ;;  %v11093_v38 = vld [vmem:[#allocation2 + $0x6a] sm:$0xff] }
 0xa85   : > { %21443 = vmatprep.subr.bf16.mxu1 %v24178_v54  ;;  %v11122_v59 = vpack.c.bf16 %v11093_v38, %v11092_v48 }
 0xa87   : > { %21412 = vmatmul.mubr.bf16.gmra.mrb[36].mxu1 %v10817_v29  ;;  %v11124_v29 = vpack.c.bf16 %v11097_v57, %v11096_v27 }
 0xa88   : > { %21415 = vmatprep.mubr.bf16.mxu1 %v10818_v43  ;;  %21444 = vmatpush3.bf16.msra.mxu1 %v24178_v54  ;;  %v11094_v54 = vld [vmem:[#allocation2 + $0x7a] sm:$0xff]  ;;  %v11100_v43 = vld [vmem:[#allocation2 + $0xc2] sm:$0xff] }
 0xa89   : > { %21445 = vmatprep.subr.bf16.mxu1 %v24179_v37  ;;  %v11123_v60 = vpack.c.bf16 %v11095_v23, %v11094_v54  ;;  %v11126_v13 = vpack.c.bf16 %v11101_v21, %v11100_v43  ;;  %v24193_v21 = vld [vmem:[%s27545_s1 + $0x908] sm:$0xff]  }
 0xa8c   : > { %21446 = vmatpush3.bf16.msra.mxu1 %v24179_v37  ;;  %v11099_v37 = vld [vmem:[#allocation2 + $0xb2] sm:$0xff] }
 0xa8d   : > { %21447 = vmatprep.subr.bf16.mxu1 %v24180_v2 }
 0xa8f   : > { %21416 = vmatmul.mubr.bf16.gmra.mrb[40].mxu1 %v10819_v53  ;;  %v11104_v53 = vld [vmem:[#allocation2 + $0xf2] sm:$0xff] }
 0xa90   : > { %21419 = vmatprep.mubr.bf16.mxu1 %v10820_v12  ;;  %21448 = vmatpush3.bf16.msra.mxu1 %v24180_v2  ;;  %v11125_v2 = vpack.c.bf16 %v11099_v37, %v11098_v17  ;;  %v11128_v12 = vpack.c.bf16 %v11105_v8, %v11104_v53 }
 0xa91   : > { %21449 = vmatprep.subr.bf16.mxu1 %v24181_v3 }
 0xa94   : > { %21450 = vmatpush3.bf16.msra.mxu1 %v24181_v3  ;;  %v11127_v3 = vpack.c.bf16 %v11103_v5, %v11102_v31 }
 0xa95   : > { %21451 = vmatprep.subr.bf16.mxu1 %v24182_v40 }
 0xa97   : > { %21420 = vmatmul.mubr.bf16.gmra.mrb[44].mxu1 %v10821_v46 }
 0xa98   : > { %21423 = vmatprep.mubr.bf16.mxu1 %v10822_v9  ;;  %21452 = vmatpush3.bf16.msra.mxu1 %v24182_v40  ;;  %v11106_v40 = vld [vmem:[#allocation2 + $0x10a] sm:$0xff]  ;;  %v11111_v9 = vld [vmem:[#allocation2 + $0x142] sm:$0xff] }
 0xa99   : > { %21453 = vmatprep.subr.bf16.mxu1 %v24183_v10  ;;  %v11129_v46 = vpack.c.bf16 %v11107_v61, %v11106_v40  ;;  %v24194_v61 = vld [vmem:[%s27545_s1 + $0x910] sm:$0xff]  }
 0xa9c   : > { %21454 = vmatpush3.bf16.msra.mxu1 %v24183_v10  ;;  %v11110_v10 = vld [vmem:[#allocation2 + $0x13a] sm:$0xff] }
 0xa9d   : > { %v11131_v24 = vpack.c.bf16 %v11111_v9, %v11110_v10 }
 0xa9f   : > { %21424 = vmatmul.mubr.bf16.gmra.mrb[48].mxu1 %v10823_v32  ;;  %v11132_v32 = vpack.c.bf16 %v11113_v33, %v11112_v18 }
 0xaa0   : > { %21427 = vmatprep.mubr.bf16.mxu1 %v10824_v45  ;;  %v11115_v45 = vld [vmem:[#allocation2 + $0x172] sm:$0xff] }
 0xaa1   : > { %v11133_v63 = vpack.c.bf16 %v11115_v45, %v11114_v49 }
 0xaa7   : > { %21428 = vmatmul.mubr.bf16.gmra.mrb[52].mxu1 %v10825_v34  ;;  %v11135_v34 = vpack.c.bf16 %v11119_v50, %v11118_v56 }
 0xaa8   : > { %21431 = vmatprep.mubr.bf16.mxu1 %v10826_v51  ;;  %v24191_v51 = vld [vmem:[%s27545_s1 + $0x978] sm:$0xff]  }
 0xaa9   : > { %21501 = vmatprep.subr.bf16.mxu0 %v24191_v51 }
 0xaaa   : > { %21502 = vmatpush3.bf16.msra.mxu0 %v24191_v51 }
 0xaaf   : > { %21432 = vmatmul.mubr.bf16.gmra.mrb[56].mxu1 %v10827_v42  ;;  %v17810_v42 = vld [vmem:[%s27546_s2 + $0x8] sm:$0xff] }
 0xab0   : > { %21435 = vmatprep.mubr.bf16.mxu1 %v10828_v11  ;;  %v26488_v16 = vrot.slane %v17810_v42, %v2984_v1  ;;  %v26492_v11 = vrot.slane %v17810_v42, %v3020_v22 }
 0xab7   : > { %21436 = vmatmul.mubr.bf16.gmra.mrb[60].mxu1 %v10829_v20 }
 0xab8   : > { %21455 = vmatprep.mubr.bf16.mxu1 %v11120_v30 }
 0xabf   : > { %21456 = vmatmul.mubr.bf16.vlgmr.msra.gmra.mrb[32].mxu1 %v11121_v55 }
 0xac0   : > { %21459 = vmatprep.mubr.bf16.mxu1 %v11122_v59 }
 0xac7   : > { %21460 = vmatmul.mubr.bf16.gmra.mrb[36].mxu1 %v11123_v60 }
 0xac8   : > { %21463 = vmatprep.mubr.bf16.mxu1 %v11124_v29 }
 0xacf   : > { %21464 = vmatmul.mubr.bf16.gmra.mrb[40].mxu1 %v11125_v2 }
 0xad0   : > { %21467 = vmatprep.mubr.bf16.mxu1 %v11126_v13 }
 0xad7   : > { %21468 = vmatmul.mubr.bf16.gmra.mrb[44].mxu1 %v11127_v3 }
 0xad8   : > { %21471 = vmatprep.mubr.bf16.mxu1 %v11128_v12 }
 0xadf   : > { %21472 = vmatmul.mubr.bf16.gmra.mrb[48].mxu1 %v11129_v46 }
 0xae0   : > { %21475 = vmatprep.mubr.bf16.mxu1 %v11130_v62 }
 0xae7   : > { %21476 = vmatmul.mubr.bf16.gmra.mrb[52].mxu1 %v11131_v24 }
 0xae8   : > { %21479 = vmatprep.mubr.bf16.mxu1 %v11132_v32  ;;  %v24195_v32 = vld [vmem:[%s27545_s1 + $0x918] sm:$0xff]  }
 0xaef   : > { %21480 = vmatmul.mubr.bf16.gmra.mrb[56].mxu1 %v11133_v63 }
 0xaf0   : > { %21483 = vmatprep.mubr.bf16.mxu1 %v26387_v44  ;;  %v24192_v44 = vld [vmem:[%s27545_s1 + $0x900] sm:$0xff]  }
 0xaf1   : > { %21535 = vmatprep.subr.bf16.mxu0 %v24192_v44 }
 0xaf7   : > { %21484 = vmatmul.mubr.bf16.gmra.mrb[60].mxu1 %v11135_v34 }
 0xb92   : > { %v21457_v35 = vpop.f32.mrb[32].mxu1 }
 0xb93   : > { %v11400_v41 = vmul.f32 %v21457_v35, %v26488_v16  ;;  %v11235_v20 = vpop.f32.mrb[33].mxu1 }
 0xb94   : > { %v11398_v52 = vmul.f32 %v26488_v16, %v11235_v20  ;;  %v21458_v25 = vpop.f32.mrb[34].mxu1 }
 0xb95   : > { %v11436_v30 = vadd.f32 %v26492_v11, %v11400_v41  ;;  %v11401_v39 = vmul.f32 %v21458_v25, %v26488_v16  ;;  %v11238_v26 = vpop.f32.mrb[35].mxu1 }
 0xb96   : > { %v11434_v48 = vadd.f32 %v26492_v11, %v11398_v52  ;;  %v11399_v1 = vmul.f32 %v26488_v16, %v11238_v26 }
 0xb97   : > { %v11468_v38 = vmax.f32 %v11436_v30, 0.0  ;;  %v11437_v22 = vadd.f32 %v26492_v11, %v11401_v39  ;;  %v24197_v39 = vld [vmem:[%s27545_s1 + $0x928] sm:$0xff]  }
 0xb98   : > { %v11466_v55 = vmax.f32 %v11434_v48, 0.0  ;;  %v11435_v59 = vadd.f32 %v26492_v11, %v11399_v1 }
 0xb99   : > { %11500 = vst [vmem:[#allocation2 + $0x31] sm:$0xff] %v11468_v38  ;;  %v11469_v54 = vmax.f32 %v11437_v22, 0.0 }
 0xb9a   : > { %11498 = vst [vmem:[#allocation2 + $0x19] sm:$0xff] %v11466_v55  ;;  %v11467_v23 = vmax.f32 %v11435_v59, 0.0  ;;  %v21461_v27 = vpop.f32.mrb[36].mxu1 }
 0xb9b   : > { %11501 = vst [vmem:[#allocation2 + $0x39] sm:$0xff] %v11469_v54  ;;  %v11404_v57 = vmul.f32 %v21461_v27, %v26488_v16  ;;  %v11251_v60 = vpop.f32.mrb[37].mxu1  ;;  %v11629_v29 = vpack.c.bf16 %v11469_v54, %v11468_v38  ;;  %v24198_v27 = vld [vmem:[%s27545_s1 + $0x930] sm:$0xff]  }
 0xb9c   : > { %11499 = vst [vmem:[#allocation2 + $0x21] sm:$0xff] %v11467_v23  ;;  %v11402_v17 = vmul.f32 %v26488_v16, %v11251_v60  ;;  %v21462_v37 = vpop.f32.mrb[38].mxu1  ;;  %v11628_v43 = vpack.c.bf16 %v11467_v23, %v11466_v55 }
 0xb9d   : > { %v11440_v2 = vadd.f32 %v26492_v11, %v11404_v57  ;;  %v11405_v13 = vmul.f32 %v21462_v37, %v26488_v16  ;;  %v11254_v31 = vpop.f32.mrb[39].mxu1 }
 0xb9e   : > { %v11438_v5 = vadd.f32 %v26492_v11, %v11402_v17  ;;  %v11403_v53 = vmul.f32 %v26488_v16, %v11254_v31  ;;  %21504 = vmatmul.mubr.bf16.vlgmr.msra.gmra.mrb[64].mxu0 %v11628_v43  ;;  %v24199_v31 = vld [vmem:[%s27545_s1 + $0x938] sm:$0xff]  }
 0xb9f   : > { %v11472_v8 = vmax.f32 %v11440_v2, 0.0  ;;  %v11441_v3 = vadd.f32 %v26492_v11, %v11405_v13  ;;  %21507 = vmatprep.mubr.bf16.mxu0 %v11629_v29  ;;  %21536 = vmatpush3.bf16.msra.mxu0 %v24192_v44 }
 0xba0   : > { %v11470_v12 = vmax.f32 %v11438_v5, 0.0  ;;  %v11439_v40 = vadd.f32 %v26492_v11, %v11403_v53  ;;  %21537 = vmatprep.subr.bf16.mxu0 %v24193_v21 }
 0xba1   : > { %11504 = vst [vmem:[#allocation2 + $0x61] sm:$0xff] %v11472_v8  ;;  %v11473_v28 = vmax.f32 %v11441_v3, 0.0 }
 0xba2   : > { %11502 = vst [vmem:[#allocation2 + $0x49] sm:$0xff] %v11470_v12  ;;  %v11471_v15 = vmax.f32 %v11439_v40, 0.0  ;;  %v21465_v46 = vpop.f32.mrb[40].mxu1 }
 0xba3   : > { %11505 = vst [vmem:[#allocation2 + $0x69] sm:$0xff] %v11473_v28  ;;  %v11408_v62 = vmul.f32 %v21465_v46, %v26488_v16  ;;  %v11267_v10 = vpop.f32.mrb[41].mxu1  ;;  %v11631_v9 = vpack.c.bf16 %v11473_v28, %v11472_v8  ;;  %21538 = vmatpush3.bf16.msra.mxu0 %v24193_v21  ;;  %v26558_v46 = vld [vmem:[%s27545_s1 + $0x980] sm:$0xff]  }
 0xba4   : > { %11503 = vst [vmem:[#allocation2 + $0x51] sm:$0xff] %v11471_v15  ;;  %v11406_v18 = vmul.f32 %v26488_v16, %v11267_v10  ;;  %v21466_v33 = vpop.f32.mrb[42].mxu1  ;;  %v11630_v24 = vpack.c.bf16 %v11471_v15, %v11470_v12  ;;  %21539 = vmatprep.subr.bf16.mxu0 %v24194_v61 }
 0xba5   : > { %v11444_v49 = vadd.f32 %v26492_v11, %v11408_v62  ;;  %v11409_v45 = vmul.f32 %v21466_v33, %v26488_v16  ;;  %v11270_v63 = vpop.f32.mrb[43].mxu1 }
 0xba6   : > { %v11442_v56 = vadd.f32 %v26492_v11, %v11406_v18  ;;  %v11407_v50 = vmul.f32 %v26488_v16, %v11270_v63  ;;  %21508 = vmatmul.mubr.bf16.gmra.mrb[68].mxu0 %v11630_v24 }
 0xba7   : > { %v11476_v34 = vmax.f32 %v11444_v49, 0.0  ;;  %v11445_v47 = vadd.f32 %v26492_v11, %v11409_v45  ;;  %21511 = vmatprep.mubr.bf16.mxu0 %v11631_v9  ;;  %21540 = vmatpush3.bf16.msra.mxu0 %v24194_v61 }
 0xba8   : > { %v11474_v51 = vmax.f32 %v11442_v56, 0.0  ;;  %v11443_v58 = vadd.f32 %v26492_v11, %v11407_v50  ;;  %21541 = vmatprep.subr.bf16.mxu0 %v24195_v32 }
 0xba9   : > { %11508 = vst [vmem:[#allocation2 + $0x91] sm:$0xff] %v11476_v34  ;;  %v11477_v19 = vmax.f32 %v11445_v47, 0.0 }
 0xbaa   : > { %11506 = vst [vmem:[#allocation2 + $0x79] sm:$0xff] %v11474_v51  ;;  %v11475_v44 = vmax.f32 %v11443_v58, 0.0  ;;  %v21469_v42 = vpop.f32.mrb[44].mxu1 }
 0xbab   : > { %11509 = vst [vmem:[#allocation2 + $0x99] sm:$0xff] %v11477_v19  ;;  %v11412_v35 = vmul.f32 %v21469_v42, %v26488_v16  ;;  %v11283_v41 = vpop.f32.mrb[45].mxu1  ;;  %v11633_v20 = vpack.c.bf16 %v11477_v19, %v11476_v34  ;;  %21542 = vmatpush3.bf16.msra.mxu0 %v24195_v32 }
 0xbac   : > { %11507 = vst [vmem:[#allocation2 + $0x81] sm:$0xff] %v11475_v44  ;;  %v11410_v52 = vmul.f32 %v26488_v16, %v11283_v41  ;;  %v21470_v25 = vpop.f32.mrb[46].mxu1  ;;  %v11632_v30 = vpack.c.bf16 %v11475_v44, %v11474_v51  ;;  %21543 = vmatprep.subr.bf16.mxu0 %v24196_v36 }
 0xbad   : > { %v11448_v26 = vadd.f32 %v26492_v11, %v11412_v35  ;;  %v11413_v48 = vmul.f32 %v21470_v25, %v26488_v16  ;;  %v11286_v1 = vpop.f32.mrb[47].mxu1 }
 0xbae   : > { %v11446_v38 = vadd.f32 %v26492_v11, %v11410_v52  ;;  %v11411_v22 = vmul.f32 %v26488_v16, %v11286_v1  ;;  %21512 = vmatmul.mubr.bf16.gmra.mrb[72].mxu0 %v11632_v30 }
 0xbaf   : > { %v11480_v55 = vmax.f32 %v11448_v26, 0.0  ;;  %v11449_v59 = vadd.f32 %v26492_v11, %v11413_v48  ;;  %21515 = vmatprep.mubr.bf16.mxu0 %v11633_v20  ;;  %21544 = vmatpush3.bf16.msra.mxu0 %v24196_v36 }
 0xbb0   : > { %v11478_v54 = vmax.f32 %v11446_v38, 0.0  ;;  %v11447_v23 = vadd.f32 %v26492_v11, %v11411_v22  ;;  %21545 = vmatprep.subr.bf16.mxu0 %v24197_v39 }
 0xbb1   : > { %11512 = vst [vmem:[#allocation2 + $0xc1] sm:$0xff] %v11480_v55  ;;  %v11481_v57 = vmax.f32 %v11449_v59, 0.0 }
 0xbb2   : > { %11510 = vst [vmem:[#allocation2 + $0xa9] sm:$0xff] %v11478_v54  ;;  %v11479_v60 = vmax.f32 %v11447_v23, 0.0  ;;  %v21473_v29 = vpop.f32.mrb[48].mxu1 }
 0xbb3   : > { %11513 = vst [vmem:[#allocation2 + $0xc9] sm:$0xff] %v11481_v57  ;;  %v11416_v17 = vmul.f32 %v21473_v29, %v26488_v16  ;;  %v11299_v37 = vpop.f32.mrb[49].mxu1  ;;  %v11635_v43 = vpack.c.bf16 %v11481_v57, %v11480_v55  ;;  %21546 = vmatpush3.bf16.msra.mxu0 %v24197_v39 }
 0xbb4   : > { %11511 = vst [vmem:[#allocation2 + $0xb1] sm:$0xff] %v11479_v60  ;;  %v11414_v21 = vmul.f32 %v26488_v16, %v11299_v37  ;;  %v21474_v2 = vpop.f32.mrb[50].mxu1  ;;  %v11634_v13 = vpack.c.bf16 %v11479_v60, %v11478_v54  ;;  %21547 = vmatprep.subr.bf16.mxu0 %v24198_v27 }
 0xbb5   : > { %v11452_v5 = vadd.f32 %v26492_v11, %v11416_v17  ;;  %v11417_v53 = vmul.f32 %v21474_v2, %v26488_v16  ;;  %v11302_v8 = vpop.f32.mrb[51].mxu1 }
 0xbb6   : > { %v11450_v3 = vadd.f32 %v26492_v11, %v11414_v21  ;;  %v11415_v12 = vmul.f32 %v26488_v16, %v11302_v8  ;;  %21516 = vmatmul.mubr.bf16.gmra.mrb[76].mxu0 %v11634_v13 }
 0xbb7   : > { %v11484_v40 = vmax.f32 %v11452_v5, 0.0  ;;  %v11453_v61 = vadd.f32 %v26492_v11, %v11417_v53  ;;  %21519 = vmatprep.mubr.bf16.mxu0 %v11635_v43  ;;  %21548 = vmatpush3.bf16.msra.mxu0 %v24198_v27 }
 0xbb8   : > { %v11482_v28 = vmax.f32 %v11450_v3, 0.0  ;;  %v11451_v15 = vadd.f32 %v26492_v11, %v11415_v12  ;;  %21549 = vmatprep.subr.bf16.mxu0 %v24199_v31 }
 0xbb9   : > { %11516 = vst [vmem:[#allocation2 + $0xf1] sm:$0xff] %v11484_v40  ;;  %v26560_v62 = vmax.f32 %v11453_v61, 0.0 }
 0xbba   : > { %11514 = vst [vmem:[#allocation2 + $0xd9] sm:$0xff] %v11482_v28  ;;  %v11483_v10 = vmax.f32 %v11451_v15, 0.0  ;;  %v21477_v9 = vpop.f32.mrb[52].mxu1 }
 0xbbb   : > { %11517 = vst [vmem:[#allocation2 + $0xf9] sm:$0xff] %v26560_v62  ;;  %v11420_v18 = vmul.f32 %v21477_v9, %v26488_v16  ;;  %v11315_v33 = vpop.f32.mrb[53].mxu1  ;;  %v11637_v24 = vpack.c.bf16 %v26560_v62, %v11484_v40  ;;  %21550 = vmatpush3.bf16.msra.mxu0 %v24199_v31 }
 0xbbc   : > { %11515 = vst [vmem:[#allocation2 + $0xe1] sm:$0xff] %v11483_v10  ;;  %v11418_v32 = vmul.f32 %v26488_v16, %v11315_v33  ;;  %v21478_v49 = vpop.f32.mrb[54].mxu1  ;;  %v26566_v45 = vpack.c.bf16 %v11483_v10, %v11482_v28  ;;  %21583 = vmatprep.subr.bf16.mxu0 %v26558_v46  ;;  %v11532_v33 = vld [vmem:[#allocation2 + $0x18] sm:$0xff] }
 0xbbd   : > { %v11456_v63 = vadd.f32 %v26492_v11, %v11420_v18  ;;  %v11421_v56 = vmul.f32 %v21478_v49, %v26488_v16  ;;  %v11318_v50 = vpop.f32.mrb[55].mxu1  ;;  %v11535_v18 = vld [vmem:[#allocation2 + $0x38] sm:$0xff] }
 0xbbe   : > { %v11454_v34 = vadd.f32 %v26492_v11, %v11418_v32  ;;  %v11419_v47 = vmul.f32 %v26488_v16, %v11318_v50  ;;  %21520 = vmatmul.mubr.bf16.gmra.mrb[80].mxu0 %v26566_v45  ;;  %v24201_v32 = vld [vmem:[%s27545_s1 + $0x988] sm:$0xff]  }
 0xbbf   : > { %v11488_v51 = vmax.f32 %v11456_v63, 0.0  ;;  %v11457_v58 = vadd.f32 %v26492_v11, %v11421_v56  ;;  %21523 = vmatprep.mubr.bf16.mxu0 %v11637_v24  ;;  %v11537_v63 = vld [vmem:[#allocation2 + $0x50] sm:$0xff]  ;;  %v11539_v56 = vld [vmem:[#allocation2 + $0x68] sm:$0xff] }
 0xbc0   : > { %v11486_v36 = vmax.f32 %v11454_v34, 0.0  ;;  %v11455_v19 = vadd.f32 %v26492_v11, %v11419_v47  ;;  %v11536_v50 = vld [vmem:[#allocation2 + $0x48] sm:$0xff]  ;;  %v11538_v47 = vld [vmem:[#allocation2 + $0x60] sm:$0xff] }
 0xbc1   : > { %11520 = vst [vmem:[#allocation2 + $0x121] sm:$0xff] %v11488_v51  ;;  %v11489_v44 = vmax.f32 %v11457_v58, 0.0  ;;  %v26623_v34 = vpack.c.bf16 %v11537_v63, %v11536_v50  ;;  %v26628_v58 = vpack.c.bf16 %v11539_v56, %v11538_v47  ;;  %v12082_v63 = vld [vmem:[#allocation2 + $0x32] sm:$0xff]  ;;  %v12083_v56 = vld [vmem:[#allocation2 + $0x3a] sm:$0xff]  ;;  %v24209_v47 = vld [vmem:[%s27545_s1 + $0x9c8] sm:$0xff]  }
 0xbc2   : > { %11518 = vst [vmem:[#allocation2 + $0x109] sm:$0xff] %v11486_v36  ;;  %v11487_v42 = vmax.f32 %v11455_v19, 0.0  ;;  %v21481_v35 = vpop.f32.mrb[56].mxu1  ;;  %v11543_v19 = vld [vmem:[#allocation2 + $0x98] sm:$0xff] }
 0xbc3   : > { %11521 = vst [vmem:[#allocation2 + $0x129] sm:$0xff] %v11489_v44  ;;  %v11424_v41 = vmul.f32 %v21481_v35, %v26488_v16  ;;  %v11331_v20 = vpop.f32.mrb[57].mxu1  ;;  %v26577_v52 = vpack.c.bf16 %v11489_v44, %v11488_v51  ;;  %v24203_v51 = vld [vmem:[%s27545_s1 + $0x998] sm:$0xff]   ;;  %v11542_v35 = vld [vmem:[#allocation2 + $0x90] sm:$0xff] }
 0xbc4   : > { %11519 = vst [vmem:[#allocation2 + $0x111] sm:$0xff] %v11487_v42  ;;  %v11422_v25 = vmul.f32 %v26488_v16, %v11331_v20  ;;  %v21482_v30 = vpop.f32.mrb[58].mxu1  ;;  %v26580_v39 = vpack.c.bf16 %v11487_v42, %v11486_v36  ;;  %v11541_v36 = vld [vmem:[#allocation2 + $0x80] sm:$0xff]  ;;  %v11540_v44 = vld [vmem:[#allocation2 + $0x78] sm:$0xff]  ;;  %v26640_v20 = vpack.c.bf16 %v11543_v19, %v11542_v35  ;;  %v12087_v35 = vld [vmem:[#allocation2 + $0x6a] sm:$0xff] }
 0xbc5   : > { %v11460_v26 = vadd.f32 %v26492_v11, %v11424_v41  ;;  %v11425_v48 = vmul.f32 %v21482_v30, %v26488_v16  ;;  %v11334_v1 = vpop.f32.mrb[59].mxu1  ;;  %v26635_v42 = vpack.c.bf16 %v11541_v36, %v11540_v44  ;;  %v24205_v41 = vld [vmem:[%s27545_s1 + $0x9a8] sm:$0xff]   ;;  %v11545_v30 = vld [vmem:[#allocation2 + $0xb0] sm:$0xff] }
 0xbc6   : > { %v11458_v38 = vadd.f32 %v26492_v11, %v11422_v25  ;;  %v11423_v22 = vmul.f32 %v26488_v16, %v11334_v1  ;;  %21524 = vmatmul.mubr.bf16.gmra.mrb[84].mxu0 %v26580_v39  ;;  %v24206_v25 = vld [vmem:[%s27545_s1 + $0x9b0] sm:$0xff]   ;;  %v12086_v44 = vld [vmem:[#allocation2 + $0x62] sm:$0xff] }
 0xbc7   : > { %v11492_v55 = vmax.f32 %v11460_v26, 0.0  ;;  %v11461_v59 = vadd.f32 %v26492_v11, %v11425_v48  ;;  %21527 = vmatprep.mubr.bf16.mxu0 %v26577_v52  ;;  %v11547_v26 = vld [vmem:[#allocation2 + $0xc8] sm:$0xff]  ;;  %v12085_v19 = vld [vmem:[#allocation2 + $0x52] sm:$0xff] }
 0xbc8   : > { %v11490_v54 = vmax.f32 %v11458_v38, 0.0  ;;  %v11459_v23 = vadd.f32 %v26492_v11, %v11423_v22  ;;  %v11544_v48 = vld [vmem:[#allocation2 + $0xa8] sm:$0xff]  ;;  %v11546_v38 = vld [vmem:[#allocation2 + $0xc0] sm:$0xff]  ;;  %v24207_v22 = vld [vmem:[%s27545_s1 + $0x9b8] sm:$0xff]  }
 0xbc9   : > { %11524 = vst [vmem:[#allocation2 + $0x151] sm:$0xff] %v11492_v55  ;;  %v11493_v27 = vmax.f32 %v11461_v59, 0.0  ;;  %v26647_v1 = vpack.c.bf16 %v11545_v30, %v11544_v48  ;;  %v24208_v59 = vld [vmem:[%s27545_s1 + $0x9c0] sm:$0xff]   ;;  %v12084_v36 = vld [vmem:[#allocation2 + $0x4a] sm:$0xff]  ;;  %v26697_v30 = vpack.c.bf16 %v12087_v35, %v12086_v44 }
 0xbca   : > { %11522 = vst [vmem:[#allocation2 + $0x139] sm:$0xff] %v11490_v54  ;;  %v11491_v57 = vmax.f32 %v11459_v23, 0.0  ;;  %v21485_v60 = vpop.f32.mrb[60].mxu1  ;;  %v11551_v23 = vld [vmem:[#allocation2 + $0xf8] sm:$0xff] }
 0xbcb   : > { %11525 = vst [vmem:[#allocation2 + $0x159] sm:$0xff] %v11493_v27  ;;  %v11428_v29 = vmul.f32 %v21485_v60, %v26488_v16  ;;  %v11347_v17 = vpop.f32.mrb[61].mxu1  ;;  %v26591_v37 = vpack.c.bf16 %v11493_v27, %v11492_v55  ;;  %v26652_v55 = vpack.c.bf16 %v11547_v26, %v11546_v38  ;;  %v11548_v27 = vld [vmem:[#allocation2 + $0xd8] sm:$0xff]  ;;  %v11550_v60 = vld [vmem:[#allocation2 + $0xf0] sm:$0xff]  ;;  %v24212_v26 = vld [vmem:[%s27545_s1 + $0x9e0] sm:$0xff]  }
 0xbcc   : > { %11523 = vst [vmem:[#allocation2 + $0x141] sm:$0xff] %v11491_v57  ;;  %v11426_v43 = vmul.f32 %v26488_v16, %v11347_v17  ;;  %v21486_v21 = vpop.f32.mrb[62].mxu1  ;;  %v26594_v2 = vpack.c.bf16 %v11491_v57, %v11490_v54  ;;  %v11549_v54 = vld [vmem:[#allocation2 + $0xe0] sm:$0xff]  ;;  %v11553_v17 = vld [vmem:[#allocation2 + $0x110] sm:$0xff] }
 0xbcd   : > { %v11464_v13 = vadd.f32 %v26492_v11, %v11428_v29  ;;  %v11429_v31 = vmul.f32 %v21486_v21, %v26488_v16  ;;  %v11350_v5 = vpop.f32.mrb[63].mxu1  ;;  %v26659_v57 = vpack.c.bf16 %v11549_v54, %v11548_v27  ;;  %v26661_v29 = vpack.c.bf16 %v11551_v23, %v11550_v60  ;;  %v11552_v21 = vld [vmem:[#allocation2 + $0x108] sm:$0xff]  ;;  %v12088_v48 = vld [vmem:[#allocation2 + $0x7a] sm:$0xff]  ;;  %v24214_v60 = vld [vmem:[%s27545_s1 + $0x9f0] sm:$0xff]  }
 0xbce   : > { %v11462_v53 = vadd.f32 %v26492_v11, %v11426_v43  ;;  %v11427_v8 = vmul.f32 %v26488_v16, %v11350_v5  ;;  %21528 = vmatmul.mubr.bf16.gmra.mrb[88].mxu0 %v26594_v2  ;;  %v11533_v16 = vld [vmem:[#allocation2 + $0x20] sm:$0xff]  ;;  %v11555_v43 = vld [vmem:[#allocation2 + $0x128] sm:$0xff] }
 0xbcf   : > { %v11496_v3 = vmax.f32 %v11464_v13, 0.0  ;;  %v11465_v12 = vadd.f32 %v26492_v11, %v11429_v31  ;;  %21531 = vmatprep.mubr.bf16.mxu0 %v26591_v37  ;;  %v26610_v24 = vpack.c.bf16 %v11533_v16, %v11532_v33  ;;  %v26665_v13 = vpack.c.bf16 %v11553_v17, %v11552_v21  ;;  %v11554_v31 = vld [vmem:[#allocation2 + $0x120] sm:$0xff]  ;;  %v24213_v23 = vld [vmem:[%s27545_s1 + $0x9e8] sm:$0xff]  }
 0xbd0   : > { %v11494_v40 = vmax.f32 %v11462_v53, 0.0  ;;  %v11463_v61 = vadd.f32 %v26492_v11, %v11427_v8  ;;  %v11534_v11 = vld [vmem:[#allocation2 + $0x30] sm:$0xff]  ;;  %v26667_v5 = vpack.c.bf16 %v11555_v43, %v11554_v31  ;;  %v12089_v38 = vld [vmem:[#allocation2 + $0x82] sm:$0xff] }
 0xbd1   : > { %11528 = vst [vmem:[#allocation2 + $0x181] sm:$0xff] %v11496_v3  ;;  %v11497_v28 = vmax.f32 %v11465_v12, 0.0  ;;  %v26615_v49 = vpack.c.bf16 %v11535_v18, %v11534_v11  ;;  %v26704_v54 = vpack.c.bf16 %v12089_v38, %v12088_v48  ;;  %v12092_v17 = vld [vmem:[#allocation2 + $0xaa] sm:$0xff]  ;;  %v12093_v43 = vld [vmem:[#allocation2 + $0xb2] sm:$0xff]  ;;  %v12094_v21 = vld [vmem:[#allocation2 + $0xc2] sm:$0xff] }
 0xbd2   : > { %11526 = vst [vmem:[#allocation2 + $0x169] sm:$0xff] %v11494_v40  ;;  %v11495_v15 = vmax.f32 %v11463_v61, 0.0  ;;  %v11559_v8 = vld [vmem:[#allocation2 + $0x158] sm:$0xff]  ;;  %v12095_v31 = vld [vmem:[#allocation2 + $0xca] sm:$0xff] }
 0xbd3   : > { %11529 = vst [vmem:[#allocation2 + $0x189] sm:$0xff] %v11497_v28  ;;  %v26604_v10 = vpack.c.bf16 %v11497_v28, %v11496_v3  ;;  %v11557_v53 = vld [vmem:[#allocation2 + $0x140] sm:$0xff]  ;;  %v11556_v3 = vld [vmem:[#allocation2 + $0x138] sm:$0xff] }
 0xbd4   : > { %11527 = vst [vmem:[#allocation2 + $0x171] sm:$0xff] %v11495_v15  ;;  %v26606_v9 = vpack.c.bf16 %v11495_v15, %v11494_v40  ;;  %v26671_v12 = vpack.c.bf16 %v11557_v53, %v11556_v3  ;;  %v11558_v40 = vld [vmem:[#allocation2 + $0x150] sm:$0xff]  ;;  %v12078_v28 = vld [vmem:[#allocation2 + $0x2] sm:$0xff]  ;;  %v26716_v53 = vpack.c.bf16 %v12093_v43, %v12092_v17  ;;  %v26721_v3 = vpack.c.bf16 %v12095_v31, %v12094_v21  ;;  %v24223_v31 = vld [vmem:[%s27545_s1 + $0xa38] sm:$0xff]  }
 0xbd5   : > { %v26673_v61 = vpack.c.bf16 %v11559_v8, %v11558_v40  ;;  %v12079_v15 = vld [vmem:[#allocation2 + $0xa] sm:$0xff]  ;;  %v24215_v8 = vld [vmem:[%s27545_s1 + $0x9f8] sm:$0xff]   ;;  %v24216_v40 = vld [vmem:[%s27545_s1 + $0xa00] sm:$0xff]  }
 0xbd6   : > { %21532 = vmatmul.mubr.bf16.gmra.mrb[92].mxu0 %v26606_v9  ;;  %v12110_v33 = vpack.c.bf16 %v12079_v15, %v12078_v28  ;;  %v12096_v28 = vld [vmem:[#allocation2 + $0xda] sm:$0xff]  ;;  %v12097_v15 = vld [vmem:[#allocation2 + $0xe2] sm:$0xff]  ;;  %v12106_v35 = vld [vmem:[#allocation2 + $0x152] sm:$0xff] }
 0xbd7   : > { %21551 = vmatprep.mubr.bf16.mxu0 %v26429_v14  ;;  %v24202_v14 = vld [vmem:[%s27545_s1 + $0x990] sm:$0xff]   ;;  %v12105_v44 = vld [vmem:[#allocation2 + $0x142] sm:$0xff] }
 0xbd8   : > { %v24220_v17 = vld [vmem:[%s27545_s1 + $0xa20] sm:$0xff]   ;;  %v24221_v43 = vld [vmem:[%s27545_s1 + $0xa28] sm:$0xff]   ;;  %v24222_v21 = vld [vmem:[%s27545_s1 + $0xa30] sm:$0xff]  }
 0xbd9   : > { %v11560_v18 = vld [vmem:[#allocation2 + $0x168] sm:$0xff] }
 0xbdb   : > { %v11561_v16 = vld [vmem:[#allocation2 + $0x170] sm:$0xff] }
 0xbdc   : > { %v26677_v11 = vpack.c.bf16 %v11561_v16, %v11560_v18  ;;  %v12098_v16 = vld [vmem:[#allocation2 + $0xf2] sm:$0xff]  ;;  %v12099_v18 = vld [vmem:[#allocation2 + $0xfa] sm:$0xff]  ;;  %v12108_v38 = vld [vmem:[#allocation2 + $0x16a] sm:$0xff] }
 0xbde   : > { %21552 = vmatmul.mubr.bf16.vlgmr.msra.gmra.mrb[64].mxu0 %v26610_v24 }
 0xbdf   : > { %21555 = vmatprep.mubr.bf16.mxu0 %v26615_v49  ;;  %21584 = vmatpush3.bf16.msra.mxu0 %v26558_v46  ;;  %v24204_v46 = vld [vmem:[%s27545_s1 + $0x9a0] sm:$0xff]  }
 0xbe0   : > { %21585 = vmatprep.subr.bf16.mxu0 %v24201_v32 }
 0xbe3   : > { %21586 = vmatpush3.bf16.msra.mxu0 %v24201_v32  ;;  %v12080_v32 = vld [vmem:[#allocation2 + $0x1a] sm:$0xff] }
 0xbe4   : > { %21587 = vmatprep.subr.bf16.mxu0 %v24202_v14 }
 0xbe6   : > { %21556 = vmatmul.mubr.bf16.gmra.mrb[68].mxu0 %v26623_v34 }
 0xbe7   : > { %21559 = vmatprep.mubr.bf16.mxu0 %v26628_v58  ;;  %21588 = vmatpush3.bf16.msra.mxu0 %v24202_v14  ;;  %v12081_v14 = vld [vmem:[#allocation2 + $0x22] sm:$0xff] }
 0xbe8   : > { %21589 = vmatprep.subr.bf16.mxu0 %v24203_v51  ;;  %v26680_v50 = vpack.c.bf16 %v12081_v14, %v12080_v32  ;;  %v26730_v32 = vpack.c.bf16 %v12099_v18, %v12098_v16  ;;  %v12100_v14 = vld [vmem:[#allocation2 + $0x10a] sm:$0xff]  ;;  %v12690_v18 = vld [vmem:[#allocation2 + $0x19] sm:$0xff] }
 0xbeb   : > { %21590 = vmatpush3.bf16.msra.mxu0 %v24203_v51  ;;  %v26685_v51 = vpack.c.bf16 %v12083_v56, %v12082_v63  ;;  %v12101_v63 = vld [vmem:[#allocation2 + $0x112] sm:$0xff]  ;;  %v12102_v56 = vld [vmem:[#allocation2 + $0x122] sm:$0xff] }
 0xbec   : > { %21591 = vmatprep.subr.bf16.mxu0 %v24204_v46 }
 0xbee   : > { %21560 = vmatmul.mubr.bf16.gmra.mrb[72].mxu0 %v26635_v42 }
 0xbef   : > { %21563 = vmatprep.mubr.bf16.mxu0 %v26640_v20  ;;  %21592 = vmatpush3.bf16.msra.mxu0 %v24204_v46  ;;  %v24210_v46 = vld [vmem:[%s27545_s1 + $0x9d0] sm:$0xff]  }
 0xbf0   : > { %21593 = vmatprep.subr.bf16.mxu0 %v24205_v41 }
 0xbf3   : > { %21594 = vmatpush3.bf16.msra.mxu0 %v24205_v41  ;;  %v26692_v41 = vpack.c.bf16 %v12085_v19, %v12084_v36  ;;  %v12104_v19 = vld [vmem:[#allocation2 + $0x13a] sm:$0xff] }
 0xbf4   : > { %21595 = vmatprep.subr.bf16.mxu0 %v24206_v25 }
 0xbf6   : > { %21564 = vmatmul.mubr.bf16.gmra.mrb[76].mxu0 %v26647_v1 }
 0xbf7   : > { %21567 = vmatprep.mubr.bf16.mxu0 %v26652_v55  ;;  %21596 = vmatpush3.bf16.msra.mxu0 %v24206_v25  ;;  %v24211_v25 = vld [vmem:[%s27545_s1 + $0x9d8] sm:$0xff]  }
 0xbf8   : > { %21597 = vmatprep.subr.bf16.mxu0 %v24207_v22 }
 0xbfb   : > { %21598 = vmatpush3.bf16.msra.mxu0 %v24207_v22  ;;  %v12090_v22 = vld [vmem:[#allocation2 + $0x92] sm:$0xff] }
 0xbfc   : > { %21631 = vmatprep.subr.bf16.mxu0 %v24208_v59 }
 0xbfe   : > { %21568 = vmatmul.mubr.bf16.gmra.mrb[80].mxu0 %v26659_v57 }
 0xbff   : > { %21571 = vmatprep.mubr.bf16.mxu0 %v26661_v29 }
 0xc06   : > { %21572 = vmatmul.mubr.bf16.gmra.mrb[84].mxu0 %v26665_v13 }
 0xc07   : > { %21575 = vmatprep.mubr.bf16.mxu0 %v26667_v5 }
 0xc0e   : > { %21576 = vmatmul.mubr.bf16.gmra.mrb[88].mxu0 %v26671_v12 }
 0xc0f   : > { %21579 = vmatprep.mubr.bf16.mxu0 %v26673_v61 }
 0xc16   : > { %21580 = vmatmul.mubr.bf16.gmra.mrb[92].mxu0 %v26677_v11 }
 0xc17   : > { %21599 = vmatprep.mubr.bf16.mxu0 %v12110_v33  ;;  %v26728_v33 = vpack.c.bf16 %v12097_v15, %v12096_v28  ;;  %v12691_v28 = vld [vmem:[#allocation2 + $0x21] sm:$0xff] }
 0xc18   : > { %v12414_v15 = vld [vmem:[#allocation2 + $0x180] sm:$0xff] }
 0xc1e   : > { %21600 = vmatmul.mubr.bf16.vlgmr.msra.gmra.mrb[64].mxu0 %v26680_v50 }
 0xc1f   : > { %21603 = vmatprep.mubr.bf16.mxu0 %v26685_v51  ;;  %21632 = vmatpush3.bf16.msra.mxu0 %v24208_v59  ;;  %v12091_v59 = vld [vmem:[#allocation2 + $0x9a] sm:$0xff] }
 0xc20   : > { %21633 = vmatprep.subr.bf16.mxu0 %v24209_v47  ;;  %v26709_v27 = vpack.c.bf16 %v12091_v59, %v12090_v22  ;;  %v12109_v22 = vld [vmem:[#allocation2 + $0x172] sm:$0xff] }
 0xc21   : > { %v26746_v59 = vpack.c.bf16 %v12109_v22, %v12108_v38  ;;  %v24226_v38 = vld [vmem:[%s27545_s1 + $0xa50] sm:$0xff]  }
 0xc22   : > { %v12697_v22 = vld [vmem:[#allocation2 + $0x69] sm:$0xff] }
 0xc23   : > { %21634 = vmatpush3.bf16.msra.mxu0 %v24209_v47  ;;  %v12103_v47 = vld [vmem:[#allocation2 + $0x12a] sm:$0xff] }
 0xc24   : > { %21635 = vmatprep.subr.bf16.mxu0 %v24210_v46  ;;  %v26736_v36 = vpack.c.bf16 %v12103_v47, %v12102_v56  ;;  %v12695_v56 = vld [vmem:[#allocation2 + $0x51] sm:$0xff] }
 0xc25   : > { %v12692_v47 = vld [vmem:[#allocation2 + $0x31] sm:$0xff] }
 0xc26   : > { %21604 = vmatmul.mubr.bf16.gmra.mrb[68].mxu0 %v26692_v41 }
 0xc27   : > { %21607 = vmatprep.mubr.bf16.mxu0 %v26697_v30  ;;  %21636 = vmatpush3.bf16.msra.mxu0 %v24210_v46  ;;  %v26734_v46 = vpack.c.bf16 %v12101_v63, %v12100_v14  ;;  %v12722_v14 = vpack.c.bf16 %v12691_v28, %v12690_v18  ;;  %v12693_v63 = vld [vmem:[#allocation2 + $0x39] sm:$0xff]  ;;  %v12700_v28 = vld [vmem:[#allocation2 + $0x91] sm:$0xff]  ;;  %v12702_v18 = vld [vmem:[#allocation2 + $0xa9] sm:$0xff] }
 0xc28   : > { %21637 = vmatprep.subr.bf16.mxu0 %v24211_v25 }
 0xc2b   : > { %21638 = vmatpush3.bf16.msra.mxu0 %v24211_v25  ;;  %v12107_v25 = vld [vmem:[#allocation2 + $0x15a] sm:$0xff] }
 0xc2c   : > { %21639 = vmatprep.subr.bf16.mxu0 %v24212_v26  ;;  %v26742_v48 = vpack.c.bf16 %v12107_v25, %v12106_v35  ;;  %v24225_v35 = vld [vmem:[%s27545_s1 + $0xa48] sm:$0xff]  }
 0xc2e   : > { %21608 = vmatmul.mubr.bf16.gmra.mrb[72].mxu0 %v26704_v54 }
 0xc2f   : > { %21611 = vmatprep.mubr.bf16.mxu0 %v26709_v27  ;;  %21640 = vmatpush3.bf16.msra.mxu0 %v24212_v26  ;;  %v26740_v26 = vpack.c.bf16 %v12105_v44, %v12104_v19  ;;  %v26791_v19 = vpack.c.bf16 %v12693_v63, %v12692_v47  ;;  %v12694_v44 = vld [vmem:[#allocation2 + $0x49] sm:$0xff] }
 0xc30   : > { %21641 = vmatprep.subr.bf16.mxu0 %v24213_v23  ;;  %v26796_v25 = vpack.c.bf16 %v12695_v56, %v12694_v44  ;;  %v24230_v56 = vld [vmem:[%s27545_s1 + $0xa70] sm:$0xff]   ;;  %v12704_v44 = vld [vmem:[#allocation2 + $0xc1] sm:$0xff] }
 0xc31   : > { %v12705_v47 = vld [vmem:[#allocation2 + $0xc9] sm:$0xff] }
 0xc33   : > { %21642 = vmatpush3.bf16.msra.mxu0 %v24213_v23  ;;  %v24217_v23 = vld [vmem:[%s27545_s1 + $0xa08] sm:$0xff]  }
 0xc34   : > { %21643 = vmatprep.subr.bf16.mxu0 %v24214_v60 }
 0xc36   : > { %21612 = vmatmul.mubr.bf16.gmra.mrb[76].mxu0 %v26716_v53 }
 0xc37   : > { %21615 = vmatprep.mubr.bf16.mxu0 %v26721_v3  ;;  %21644 = vmatpush3.bf16.msra.mxu0 %v24214_v60  ;;  %v24218_v60 = vld [vmem:[%s27545_s1 + $0xa10] sm:$0xff]  }
 0xc38   : > { %21645 = vmatprep.subr.bf16.mxu0 %v24215_v8 }
 0xc3b   : > { %21646 = vmatpush3.bf16.msra.mxu0 %v24215_v8  ;;  %v24224_v8 = vld [vmem:[%s27545_s1 + $0xa40] sm:$0xff]  }
 0xc3c   : > { %21679 = vmatprep.subr.bf16.mxu0 %v24216_v40 }
 0xc3e   : > { %21616 = vmatmul.mubr.bf16.gmra.mrb[80].mxu0 %v26728_v33 }
 0xc3f   : > { %21619 = vmatprep.mubr.bf16.mxu0 %v26730_v32 }
 0xc46   : > { %21620 = vmatmul.mubr.bf16.gmra.mrb[84].mxu0 %v26734_v46 }
 0xc47   : > { %21623 = vmatprep.mubr.bf16.mxu0 %v26736_v36 }
 0xc4e   : > { %21624 = vmatmul.mubr.bf16.gmra.mrb[88].mxu0 %v26740_v26 }
 0xc4f   : > { %21627 = vmatprep.mubr.bf16.mxu0 %v26742_v48 }
 0xc56   : > { %21628 = vmatmul.mubr.bf16.gmra.mrb[92].mxu0 %v26746_v59 }
 0xc57   : > { %21647 = vmatprep.mubr.bf16.mxu0 %v26610_v24  ;;  %v24219_v24 = vld [vmem:[%s27545_s1 + $0xa18] sm:$0xff]  }
 0xc5e   : > { %21648 = vmatmul.mubr.bf16.vlgmr.msra.gmra.mrb[64].mxu0 %v26615_v49 }
 0xc5f   : > { %21651 = vmatprep.mubr.bf16.mxu0 %v26623_v34  ;;  %21680 = vmatpush3.bf16.msra.mxu0 %v24216_v40  ;;  %v12415_v40 = vld [vmem:[#allocation2 + $0x188] sm:$0xff] }
 0xc60   : > { %21681 = vmatprep.subr.bf16.mxu0 %v24217_v23  ;;  %v26788_v16 = vpack.c.bf16 %v12415_v40, %v12414_v15  ;;  %v12703_v40 = vld [vmem:[#allocation2 + $0xb1] sm:$0xff] }
 0xc61   : > { %v26820_v63 = vpack.c.bf16 %v12703_v40, %v12702_v18  ;;  %v13633_v40 = vld [vmem:[#allocation2 + $0x159] sm:$0xff]  ;;  %v13632_v18 = vld [vmem:[#allocation2 + $0x151] sm:$0xff] }
 0xc63   : > { %21682 = vmatpush3.bf16.msra.mxu0 %v24217_v23  ;;  %v12699_v23 = vld [vmem:[#allocation2 + $0x81] sm:$0xff] }
 0xc64   : > { %21683 = vmatprep.subr.bf16.mxu0 %v24218_v60 }
 0xc66   : > { %21652 = vmatmul.mubr.bf16.gmra.mrb[68].mxu0 %v26628_v58 }
 0xc67   : > { %21655 = vmatprep.mubr.bf16.mxu0 %v26635_v42  ;;  %21684 = vmatpush3.bf16.msra.mxu0 %v24218_v60  ;;  %v12696_v60 = vld [vmem:[#allocation2 + $0x61] sm:$0xff] }
 0xc68   : > { %21685 = vmatprep.subr.bf16.mxu0 %v24219_v24 }
 0xc6b   : > { %21686 = vmatpush3.bf16.msra.mxu0 %v24219_v24  ;;  %v26803_v24 = vpack.c.bf16 %v12697_v22, %v12696_v60  ;;  %v24232_v22 = vld [vmem:[%s27545_s1 + $0xa80] sm:$0xff]  }
 0xc6c   : > { %21687 = vmatprep.subr.bf16.mxu0 %v24220_v17 }
 0xc6e   : > { %21656 = vmatmul.mubr.bf16.gmra.mrb[72].mxu0 %v26640_v20 }
 0xc6f   : > { %21659 = vmatprep.mubr.bf16.mxu0 %v26647_v1  ;;  %21688 = vmatpush3.bf16.msra.mxu0 %v24220_v17  ;;  %v12698_v17 = vld [vmem:[#allocation2 + $0x79] sm:$0xff] }
 0xc70   : > { %21689 = vmatprep.subr.bf16.mxu0 %v24221_v43 }
 0xc73   : > { %21690 = vmatpush3.bf16.msra.mxu0 %v24221_v43  ;;  %v24227_v43 = vld [vmem:[%s27545_s1 + $0xa58] sm:$0xff]  }
 0xc74   : > { %21691 = vmatprep.subr.bf16.mxu0 %v24222_v21 }
 0xc76   : > { %21660 = vmatmul.mubr.bf16.gmra.mrb[76].mxu0 %v26652_v55 }
 0xc77   : > { %21663 = vmatprep.mubr.bf16.mxu0 %v26659_v57  ;;  %21692 = vmatpush3.bf16.msra.mxu0 %v24222_v21  ;;  %v26808_v21 = vpack.c.bf16 %v12699_v23, %v12698_v17  ;;  %v26837_v23 = vld [vmem:[#allocation2 + $0xf1] sm:$0xff]  ;;  %v13626_v17 = vld [vmem:[#allocation2 + $0x109] sm:$0xff] }
 0xc78   : > { %21693 = vmatprep.subr.bf16.mxu0 %v24223_v31  ;;  %v12731_v60 = vpack.c.bf16 %v26560_v62, %v26837_v23  ;;  %v24233_v62 = vld [vmem:[%s27545_s1 + $0xa88] sm:$0xff]  }
 0xc7b   : > { %21694 = vmatpush3.bf16.msra.mxu0 %v24223_v31  ;;  %v24228_v31 = vld [vmem:[%s27545_s1 + $0xa60] sm:$0xff]  }
 0xc7c   : > { %21727 = vmatprep.subr.bf16.mxu0 %v24224_v8 }
 0xc7e   : > { %21664 = vmatmul.mubr.bf16.gmra.mrb[80].mxu0 %v26661_v29 }
 0xc7f   : > { %21667 = vmatprep.mubr.bf16.mxu0 %v26665_v13 }
 0xc86   : > { %21668 = vmatmul.mubr.bf16.gmra.mrb[84].mxu0 %v26667_v5 }
 0xc87   : > { %21671 = vmatprep.mubr.bf16.mxu0 %v26671_v12 }
 0xc8e   : > { %21672 = vmatmul.mubr.bf16.gmra.mrb[88].mxu0 %v26673_v61 }
 0xc8f   : > { %21675 = vmatprep.mubr.bf16.mxu0 %v26677_v11 }
 0xc96   : > { %21676 = vmatmul.mubr.bf16.gmra.mrb[92].mxu0 %v26788_v16 }
 0xc97   : > { %21695 = vmatprep.mubr.bf16.mxu0 %v12722_v14  ;;  %v24229_v14 = vld [vmem:[%s27545_s1 + $0xa68] sm:$0xff]  }
 0xc9e   : > { %21696 = vmatmul.mubr.bf16.vlgmr.msra.gmra.mrb[64].mxu0 %v26791_v19 }
 0xc9f   : > { %21699 = vmatprep.mubr.bf16.mxu0 %v26796_v25  ;;  %21728 = vmatpush3.bf16.msra.mxu0 %v24224_v8  ;;  %v12701_v8 = vld [vmem:[#allocation2 + $0x99] sm:$0xff] }
 0xca0   : > { %21729 = vmatprep.subr.bf16.mxu0 %v24225_v35  ;;  %v26815_v15 = vpack.c.bf16 %v12701_v8, %v12700_v28  ;;  %v13631_v8 = vld [vmem:[#allocation2 + $0x141] sm:$0xff]  ;;  %v13630_v28 = vld [vmem:[#allocation2 + $0x139] sm:$0xff] }
 0xca3   : > { %21730 = vmatpush3.bf16.msra.mxu0 %v24225_v35  ;;  %v26827_v35 = vpack.c.bf16 %v12705_v47, %v12704_v44  ;;  %v13634_v47 = vld [vmem:[#allocation2 + $0x169] sm:$0xff] }
 0xca4   : > { %21731 = vmatprep.subr.bf16.mxu0 %v24226_v38 }
 0xca6   : > { %21700 = vmatmul.mubr.bf16.gmra.mrb[68].mxu0 %v26803_v24 }
 0xca7   : > { %21703 = vmatprep.mubr.bf16.mxu0 %v26808_v21  ;;  %21732 = vmatpush3.bf16.msra.mxu0 %v24226_v38  ;;  %v24231_v38 = vld [vmem:[%s27545_s1 + $0xa78] sm:$0xff]  }
 0xca8   : > { %21733 = vmatprep.subr.bf16.mxu0 %v24227_v43 }
 0xcab   : > { %21734 = vmatpush3.bf16.msra.mxu0 %v24227_v43 }
 0xcac   : > { %21735 = vmatprep.subr.bf16.mxu0 %v24228_v31 }
 0xcae   : > { %21704 = vmatmul.mubr.bf16.gmra.mrb[72].mxu0 %v26815_v15 }
 0xcaf   : > { %21707 = vmatprep.mubr.bf16.mxu0 %v26820_v63  ;;  %21736 = vmatpush3.bf16.msra.mxu0 %v24228_v31 }
 0xcb0   : > { %21737 = vmatprep.subr.bf16.mxu0 %v24229_v14 }
 0xcb3   : > { %21738 = vmatpush3.bf16.msra.mxu0 %v24229_v14  ;;  %v13652_v14 = vpack.c.bf16 %v13633_v40, %v13632_v18  ;;  %v14421_v18 = vld [vmem:[#allocation2 + $0x1] sm:$0xff] }
 0xcb4   : > { %21739 = vmatprep.subr.bf16.mxu0 %v24230_v56 }
 0xcb6   : > { %21708 = vmatmul.mubr.bf16.gmra.mrb[76].mxu0 %v26827_v35 }
 0xcb7   : > { %21711 = vmatprep.mubr.bf16.mxu0 %v26566_v45  ;;  %21740 = vmatpush3.bf16.msra.mxu0 %v24230_v56  ;;  %v24234_v45 = vld [vmem:[%s27545_s1 + $0xa90] sm:$0xff]  }
 0xcb8   : > { %21741 = vmatprep.subr.bf16.mxu0 %v24231_v38  ;;  %v13637_v56 = vld [vmem:[#allocation2 + $0x189] sm:$0xff] }
 0xcbb   : > { %21742 = vmatpush3.bf16.msra.mxu0 %v24231_v38 }
 0xcbc   : > { %21775 = vmatprep.subr.bf16.mxu0 %v24232_v22 }
 0xcbe   : > { %21712 = vmatmul.mubr.bf16.gmra.mrb[80].mxu0 %v12731_v60 }
 0xcbf   : > { %21715 = vmatprep.mubr.bf16.mxu0 %v26580_v39  ;;  %v24236_v39 = vld [vmem:[%s27545_s1 + $0xaa0] sm:$0xff]  }
 0xcc6   : > { %21716 = vmatmul.mubr.bf16.gmra.mrb[84].mxu0 %v26577_v52  ;;  %v24235_v52 = vld [vmem:[%s27545_s1 + $0xa98] sm:$0xff]  }
 0xcc7   : > { %21719 = vmatprep.mubr.bf16.mxu0 %v26594_v2  ;;  %v24238_v2 = vld [vmem:[%s27545_s1 + $0xab0] sm:$0xff]  }
 0xcce   : > { %21720 = vmatmul.mubr.bf16.gmra.mrb[88].mxu0 %v26591_v37  ;;  %v24237_v37 = vld [vmem:[%s27545_s1 + $0xaa8] sm:$0xff]  }
 0xccf   : > { %21723 = vmatprep.mubr.bf16.mxu0 %v26606_v9  ;;  %v24240_v9 = vld [vmem:[%s27545_s1 + $0xac0] sm:$0xff]  }
 0xcd6   : > { %21724 = vmatmul.mubr.bf16.gmra.mrb[92].mxu0 %v26604_v10  ;;  %v24239_v10 = vld [vmem:[%s27545_s1 + $0xab8] sm:$0xff]  }
 0xcd7   : > { %21743 = vmatprep.mubr.bf16.mxu0 %v26680_v50  ;;  %v13026_v50 = vld [vmem:[#allocation2 + $0x182] sm:$0xff] }
 0xcde   : > { %21744 = vmatmul.mubr.bf16.vlgmr.msra.gmra.mrb[64].mxu0 %v26685_v51  ;;  %v13027_v51 = vld [vmem:[#allocation2 + $0x18a] sm:$0xff] }
 0xcdf   : > { %21747 = vmatprep.mubr.bf16.mxu0 %v26692_v41  ;;  %21776 = vmatpush3.bf16.msra.mxu0 %v24232_v22  ;;  %v26886_v41 = vpack.c.bf16 %v13027_v51, %v13026_v50  ;;  %v13638_v22 = vld [vmem:[#allocation2 + $0x199] sm:$0xff] }
 0xce0   : > { %21777 = vmatprep.subr.bf16.mxu0 %v24233_v62  ;;  %v13920_v51 = vld [vmem:[#allocation2 + $0x7a] sm:$0xff] }
 0xce3   : > { %21778 = vmatpush3.bf16.msra.mxu0 %v24233_v62  ;;  %v13914_v62 = vld [vmem:[#allocation2 + $0x32] sm:$0xff] }
 0xce4   : > { %21779 = vmatprep.subr.bf16.mxu0 %v24234_v45 }
 0xce6   : > { %21748 = vmatmul.mubr.bf16.gmra.mrb[68].mxu0 %v26697_v30  ;;  %v24241_v30 = vld [vmem:[%s27545_s1 + $0xac8] sm:$0xff]  }
 0xce7   : > { %21751 = vmatprep.mubr.bf16.mxu0 %v26704_v54  ;;  %21780 = vmatpush3.bf16.msra.mxu0 %v24234_v45  ;;  %v24242_v54 = vld [vmem:[%s27545_s1 + $0xad0] sm:$0xff]   ;;  %v13915_v45 = vld [vmem:[#allocation2 + $0x3a] sm:$0xff] }
 0xce8   : > { %21781 = vmatprep.subr.bf16.mxu0 %v24235_v52 }
 0xceb   : > { %21782 = vmatpush3.bf16.msra.mxu0 %v24235_v52  ;;  %v13946_v52 = vpack.c.bf16 %v13915_v45, %v13914_v62 }
 0xcec   : > { %21783 = vmatprep.subr.bf16.mxu0 %v24236_v39 }
 0xcee   : > { %21752 = vmatmul.mubr.bf16.gmra.mrb[72].mxu0 %v26709_v27  ;;  %v24260_v27 = vld [vmem:[%s27545_s1 + $0xba0] sm:$0xff]  }
 0xcef   : > { %21755 = vmatprep.mubr.bf16.mxu0 %v26716_v53  ;;  %21784 = vmatpush3.bf16.msra.mxu0 %v24236_v39  ;;  %v24251_v53 = vld [vmem:[%s27545_s1 + $0xb18] sm:$0xff]   ;;  %v13916_v39 = vld [vmem:[#allocation2 + $0x4a] sm:$0xff] }
 0xcf0   : > { %21785 = vmatprep.subr.bf16.mxu0 %v24237_v37 }
 0xcf3   : > { %21786 = vmatpush3.bf16.msra.mxu0 %v24237_v37  ;;  %v13917_v37 = vld [vmem:[#allocation2 + $0x52] sm:$0xff] }
 0xcf4   : > { %21787 = vmatprep.subr.bf16.mxu0 %v24238_v2 }
 0xcf6   : > { %21756 = vmatmul.mubr.bf16.gmra.mrb[76].mxu0 %v26721_v3  ;;  %v24261_v3 = vld [vmem:[%s27545_s1 + $0xba8] sm:$0xff]  }
 0xcf7   : > { %21759 = vmatprep.mubr.bf16.mxu0 %v26728_v33  ;;  %21788 = vmatpush3.bf16.msra.mxu0 %v24238_v2  ;;  %v24252_v33 = vld [vmem:[%s27545_s1 + $0xb20] sm:$0xff]  }
 0xcf8   : > { %21789 = vmatprep.subr.bf16.mxu0 %v24239_v10  ;;  %v13918_v2 = vld [vmem:[#allocation2 + $0x62] sm:$0xff] }
 0xcfb   : > { %21790 = vmatpush3.bf16.msra.mxu0 %v24239_v10  ;;  %v13919_v10 = vld [vmem:[#allocation2 + $0x6a] sm:$0xff] }
 0xcfc   : > { %21823 = vmatprep.subr.bf16.mxu0 %v24240_v9  ;;  %v13948_v50 = vpack.c.bf16 %v13919_v10, %v13918_v2 }
 0xcfe   : > { %21760 = vmatmul.mubr.bf16.gmra.mrb[80].mxu0 %v26730_v32  ;;  %v24253_v32 = vld [vmem:[%s27545_s1 + $0xb28] sm:$0xff]  }
 0xcff   : > { %21763 = vmatprep.mubr.bf16.mxu0 %v26734_v46  ;;  %v24254_v46 = vld [vmem:[%s27545_s1 + $0xb30] sm:$0xff]  }
 0xd06   : > { %21764 = vmatmul.mubr.bf16.gmra.mrb[84].mxu0 %v26736_v36  ;;  %v13623_v36 = vld [vmem:[#allocation2 + $0xe1] sm:$0xff] }
 0xd07   : > { %21767 = vmatprep.mubr.bf16.mxu0 %v26740_v26  ;;  %v13625_v26 = vld [vmem:[#allocation2 + $0xf9] sm:$0xff] }
 0xd0e   : > { %21768 = vmatmul.mubr.bf16.gmra.mrb[88].mxu0 %v26742_v48  ;;  %v13622_v48 = vld [vmem:[#allocation2 + $0xd9] sm:$0xff] }
 0xd0f   : > { %21771 = vmatprep.mubr.bf16.mxu0 %v26746_v59  ;;  %v13647_v59 = vpack.c.bf16 %v13623_v36, %v13622_v48  ;;  %v13936_v48 = vld [vmem:[#allocation2 + $0x13a] sm:$0xff] }
 0xd16   : > { %21772 = vmatmul.mubr.bf16.gmra.mrb[92].mxu0 %v26886_v41 }
 0xd17   : > { %21791 = vmatprep.mubr.bf16.mxu0 %v26615_v49  ;;  %v24243_v49 = vld [vmem:[%s27545_s1 + $0xad8] sm:$0xff]  }
 0xd1e   : > { %21792 = vmatmul.mubr.bf16.vlgmr.msra.gmra.mrb[64].mxu0 %v26623_v34  ;;  %v24244_v34 = vld [vmem:[%s27545_s1 + $0xae0] sm:$0xff]  }
 0xd1f   : > { %21795 = vmatprep.mubr.bf16.mxu0 %v26628_v58  ;;  %21824 = vmatpush3.bf16.msra.mxu0 %v24240_v9  ;;  %v24245_v58 = vld [vmem:[%s27545_s1 + $0xae8] sm:$0xff]   ;;  %v13947_v9 = vpack.c.bf16 %v13917_v37, %v13916_v39 }
 0xd20   : > { %21825 = vmatprep.subr.bf16.mxu0 %v24241_v30 }
 0xd23   : > { %21826 = vmatpush3.bf16.msra.mxu0 %v24241_v30  ;;  %v13921_v30 = vld [vmem:[#allocation2 + $0x82] sm:$0xff] }
 0xd24   : > { %21827 = vmatprep.subr.bf16.mxu0 %v24242_v54 }
 0xd26   : > { %21796 = vmatmul.mubr.bf16.gmra.mrb[68].mxu0 %v26635_v42  ;;  %v24246_v42 = vld [vmem:[%s27545_s1 + $0xaf0] sm:$0xff]  }
 0xd27   : > { %21799 = vmatprep.mubr.bf16.mxu0 %v26640_v20  ;;  %21828 = vmatpush3.bf16.msra.mxu0 %v24242_v54  ;;  %v24247_v20 = vld [vmem:[%s27545_s1 + $0xaf8] sm:$0xff]  }
 0xd28   : > { %21829 = vmatprep.subr.bf16.mxu0 %v24243_v49  ;;  %v13922_v54 = vld [vmem:[#allocation2 + $0x92] sm:$0xff] }
 0xd2b   : > { %21830 = vmatpush3.bf16.msra.mxu0 %v24243_v49  ;;  %v13923_v49 = vld [vmem:[#allocation2 + $0x9a] sm:$0xff] }
 0xd2c   : > { %21831 = vmatprep.subr.bf16.mxu0 %v24244_v34 }
 0xd2e   : > { %21800 = vmatmul.mubr.bf16.gmra.mrb[72].mxu0 %v26647_v1  ;;  %v24248_v1 = vld [vmem:[%s27545_s1 + $0xb00] sm:$0xff]  }
 0xd2f   : > { %21803 = vmatprep.mubr.bf16.mxu0 %v26652_v55  ;;  %21832 = vmatpush3.bf16.msra.mxu0 %v24244_v34  ;;  %v24336_v55 = vld [vmem:[#allocation2] sm:$0xff]  ;;  %v13949_v34 = vpack.c.bf16 %v13921_v30, %v13920_v51 }
 0xd30   : > { %21833 = vmatprep.subr.bf16.mxu0 %v24245_v58 }
 0xd33   : > { %21834 = vmatpush3.bf16.msra.mxu0 %v24245_v58  ;;  %v13950_v58 = vpack.c.bf16 %v13923_v49, %v13922_v54 }
 0xd34   : > { %21835 = vmatprep.subr.bf16.mxu0 %v24246_v42 }
 0xd36   : > { %21804 = vmatmul.mubr.bf16.gmra.mrb[76].mxu0 %v26659_v57  ;;  %v26928_v57 = vpack.c.bf16 %v24336_v55, %v24336_v55  ;;  %v13927_v55 = vld [vmem:[#allocation2 + $0xca] sm:$0xff] }
 0xd37   : > { %21807 = vmatprep.mubr.bf16.mxu0 %v26661_v29  ;;  %21836 = vmatpush3.bf16.msra.mxu0 %v24246_v42  ;;  %v24256_v29 = vld [vmem:[%s27545_s1 + $0xb80] sm:$0xff]   ;;  %v13924_v42 = vld [vmem:[#allocation2 + $0xaa] sm:$0xff] }
 0xd38   : > { %21837 = vmatprep.subr.bf16.mxu0 %v24247_v20  ;;  %21919 = vmatprep.subr.bf16.mxu1 %v24256_v29 }
 0xd39   : > { %21920 = vmatpush3.bf16.msra.mxu1 %v24256_v29 }
 0xd3b   : > { %21838 = vmatpush3.bf16.msra.mxu0 %v24247_v20  ;;  %v13925_v20 = vld [vmem:[#allocation2 + $0xb2] sm:$0xff] }
 0xd3c   : > { %21871 = vmatprep.subr.bf16.mxu0 %v24248_v1  ;;  %v13951_v29 = vpack.c.bf16 %v13925_v20, %v13924_v42  ;;  %v24265_v20 = vld [vmem:[%s27545_s1 + $0xb48] sm:$0xff]  }
 0xd3e   : > { %21808 = vmatmul.mubr.bf16.gmra.mrb[80].mxu0 %v26665_v13  ;;  %v24257_v13 = vld [vmem:[%s27545_s1 + $0xb88] sm:$0xff]  }
 0xd3f   : > { %21811 = vmatprep.mubr.bf16.mxu0 %v26667_v5  ;;  %21921 = vmatprep.subr.bf16.mxu1 %v24257_v13  ;;  %v24258_v5 = vld [vmem:[%s27545_s1 + $0xb90] sm:$0xff]  }
 0xd40   : > { %21922 = vmatpush3.bf16.msra.mxu1 %v24257_v13 }
 0xd41   : > { %21923 = vmatprep.subr.bf16.mxu1 %v24258_v5 }
 0xd44   : > { %21924 = vmatpush3.bf16.msra.mxu1 %v24258_v5  ;;  %v13928_v5 = vld [vmem:[#allocation2 + $0xda] sm:$0xff] }
 0xd46   : > { %21812 = vmatmul.mubr.bf16.gmra.mrb[84].mxu0 %v26671_v12  ;;  %v24249_v12 = vld [vmem:[%s27545_s1 + $0xb08] sm:$0xff]  }
 0xd47   : > { %21815 = vmatprep.mubr.bf16.mxu0 %v26673_v61  ;;  %v24259_v61 = vld [vmem:[%s27545_s1 + $0xb98] sm:$0xff]  }
 0xd48   : > { %21925 = vmatprep.subr.bf16.mxu1 %v24259_v61 }
 0xd49   : > { %21926 = vmatpush3.bf16.msra.mxu1 %v24259_v61  ;;  %v13930_v61 = vld [vmem:[#allocation2 + $0xf2] sm:$0xff] }
 0xd4a   : > { %21927 = vmatprep.subr.bf16.mxu1 %v24260_v27 }
 0xd4d   : > { %21928 = vmatpush3.bf16.msra.mxu1 %v24260_v27 }
 0xd4e   : > { %21816 = vmatmul.mubr.bf16.gmra.mrb[88].mxu0 %v26677_v11  ;;  %v24250_v11 = vld [vmem:[%s27545_s1 + $0xb10] sm:$0xff]   ;;  %21929 = vmatprep.subr.bf16.mxu1 %v24261_v3 }
 0xd4f   : > { %21819 = vmatprep.mubr.bf16.mxu0 %v26788_v16  ;;  %v24255_v16 = vld [vmem:[%s27545_s1 + $0xb38] sm:$0xff]  }
 0xd51   : > { %21930 = vmatpush3.bf16.msra.mxu1 %v24261_v3  ;;  %v13932_v3 = vld [vmem:[#allocation2 + $0x10a] sm:$0xff] }
 0xd56   : > { %21820 = vmatmul.mubr.bf16.gmra.mrb[92].mxu0 %v26928_v57 }
 0xd57   : > { %21839 = vmatprep.mubr.bf16.mxu0 %v26791_v19  ;;  %v13648_v19 = vpack.c.bf16 %v13625_v26, %v26837_v23  ;;  %v13639_v23 = vld [vmem:[#allocation2 + $0x1a1] sm:$0xff] }
 0xd58   : > { %v13655_v60 = vpack.c.bf16 %v13639_v23, %v13638_v22 }
 0xd5e   : > { %21840 = vmatmul.mubr.bf16.vlgmr.msra.gmra.mrb[64].mxu0 %v26796_v25  ;;  %v13627_v25 = vld [vmem:[#allocation2 + $0x111] sm:$0xff] }
 0xd5f   : > { %21843 = vmatprep.mubr.bf16.mxu0 %v26803_v24  ;;  %21872 = vmatpush3.bf16.msra.mxu0 %v24248_v1  ;;  %v13629_v24 = vld [vmem:[#allocation2 + $0x129] sm:$0xff]  ;;  %v13649_v43 = vpack.c.bf16 %v13627_v25, %v13626_v17 }
 0xd60   : > { %21873 = vmatprep.subr.bf16.mxu0 %v24249_v12  ;;  %v13926_v1 = vld [vmem:[#allocation2 + $0xc2] sm:$0xff]  ;;  %v13940_v17 = vld [vmem:[#allocation2 + $0x16a] sm:$0xff] }
 0xd61   : > { %v13952_v13 = vpack.c.bf16 %v13927_v55, %v13926_v1 }
 0xd63   : > { %21874 = vmatpush3.bf16.msra.mxu0 %v24249_v12  ;;  %v13929_v12 = vld [vmem:[#allocation2 + $0xe2] sm:$0xff] }
 0xd64   : > { %21875 = vmatprep.subr.bf16.mxu0 %v24250_v11  ;;  %v13953_v27 = vpack.c.bf16 %v13929_v12, %v13928_v5 }
 0xd66   : > { %21844 = vmatmul.mubr.bf16.gmra.mrb[68].mxu0 %v26808_v21  ;;  %v13628_v21 = vld [vmem:[#allocation2 + $0x121] sm:$0xff] }
 0xd67   : > { %21847 = vmatprep.mubr.bf16.mxu0 %v26815_v15  ;;  %21876 = vmatpush3.bf16.msra.mxu0 %v24250_v11  ;;  %v13650_v31 = vpack.c.bf16 %v13629_v24, %v13628_v21  ;;  %v13651_v15 = vpack.c.bf16 %v13631_v8, %v13630_v28  ;;  %v13931_v11 = vld [vmem:[#allocation2 + $0xfa] sm:$0xff]  ;;  %v13945_v8 = vld [vmem:[#allocation2 + $0x1a2] sm:$0xff]  ;;  %v24262_v28 = vld [vmem:[%s27545_s1 + $0xbb0] sm:$0xff]  }
 0xd68   : > { %21877 = vmatprep.subr.bf16.mxu0 %v24251_v53  ;;  %21931 = vmatprep.subr.bf16.mxu1 %v24262_v28 }
 0xd69   : > { %21932 = vmatpush3.bf16.msra.mxu1 %v24262_v28 }
 0xd6b   : > { %21878 = vmatpush3.bf16.msra.mxu0 %v24251_v53  ;;  %v13954_v53 = vpack.c.bf16 %v13931_v11, %v13930_v61 }
 0xd6c   : > { %21879 = vmatprep.subr.bf16.mxu0 %v24252_v33 }
 0xd6e   : > { %21848 = vmatmul.mubr.bf16.gmra.mrb[72].mxu0 %v26820_v63  ;;  %v13635_v63 = vld [vmem:[#allocation2 + $0x171] sm:$0xff] }
 0xd6f   : > { %21851 = vmatprep.mubr.bf16.mxu0 %v26827_v35  ;;  %21880 = vmatpush3.bf16.msra.mxu0 %v24252_v33  ;;  %v13653_v44 = vpack.c.bf16 %v13635_v63, %v13634_v47  ;;  %v13636_v35 = vld [vmem:[#allocation2 + $0x181] sm:$0xff]  ;;  %v13933_v33 = vld [vmem:[#allocation2 + $0x112] sm:$0xff] }
 0xd70   : > { %21881 = vmatprep.subr.bf16.mxu0 %v24253_v32  ;;  %v13654_v38 = vpack.c.bf16 %v13637_v56, %v13636_v35  ;;  %v13955_v36 = vpack.c.bf16 %v13933_v33, %v13932_v3  ;;  %v24337_v56 = vld [vmem:[%s27546_s2 + $0x8] sm:$0xff] }
 0xd71   : > { %v26993_v47 = vrot.slane %v24337_v56, %v5810_v4 }
 0xd73   : > { %21882 = vmatpush3.bf16.msra.mxu0 %v24253_v32  ;;  %v13934_v32 = vld [vmem:[#allocation2 + $0x122] sm:$0xff] }
 0xd74   : > { %21883 = vmatprep.subr.bf16.mxu0 %v24254_v46 }
 0xd76   : > { %21852 = vmatmul.mubr.bf16.gmra.mrb[76].mxu0 %v13647_v59  ;;  %v13937_v59 = vld [vmem:[#allocation2 + $0x142] sm:$0xff] }
 0xd77   : > { %21855 = vmatprep.mubr.bf16.mxu0 %v13648_v19  ;;  %21884 = vmatpush3.bf16.msra.mxu0 %v24254_v46  ;;  %v13935_v46 = vld [vmem:[#allocation2 + $0x12a] sm:$0xff]  ;;  %v13939_v19 = vld [vmem:[#allocation2 + $0x15a] sm:$0xff]  ;;  %v13957_v25 = vpack.c.bf16 %v13937_v59, %v13936_v48 }
 0xd78   : > { %21885 = vmatprep.subr.bf16.mxu0 %v24255_v16  ;;  %v13956_v26 = vpack.c.bf16 %v13935_v46, %v13934_v32 }
 0xd7b   : > { %21886 = vmatpush3.bf16.msra.mxu0 %v24255_v16  ;;  %v13938_v16 = vld [vmem:[#allocation2 + $0x152] sm:$0xff] }
 0xd7c   : > { %v13958_v24 = vpack.c.bf16 %v13939_v19, %v13938_v16  ;;  %v24267_v19 = vld [vmem:[%s27545_s1 + $0xb58] sm:$0xff]  }
 0xd7e   : > { %21856 = vmatmul.mubr.bf16.gmra.mrb[80].mxu0 %v13649_v43  ;;  %v13941_v43 = vld [vmem:[#allocation2 + $0x172] sm:$0xff] }
 0xd7f   : > { %21859 = vmatprep.mubr.bf16.mxu0 %v13650_v31  ;;  %v13959_v21 = vpack.c.bf16 %v13941_v43, %v13940_v17  ;;  %v13944_v31 = vld [vmem:[#allocation2 + $0x19a] sm:$0xff] }
 0xd80   : > { %v13961_v40 = vpack.c.bf16 %v13945_v8, %v13944_v31 }
 0xd86   : > { %21860 = vmatmul.mubr.bf16.gmra.mrb[84].mxu0 %v13651_v15  ;;  %v24263_v15 = vld [vmem:[%s27545_s1 + $0xbb8] sm:$0xff]  }
 0xd87   : > { %21863 = vmatprep.mubr.bf16.mxu0 %v13652_v14  ;;  %21933 = vmatprep.subr.bf16.mxu1 %v24263_v15  ;;  %v14422_v14 = vld [vmem:[#allocation2 + $0x9] sm:$0xff] }
 0xd88   : > { %21934 = vmatpush3.bf16.msra.mxu1 %v24263_v15  ;;  %v14453_v63 = vpack.c.bf16 %v14422_v14, %v14421_v18  ;;  %v24268_v15 = vld [vmem:[%s27545_s1 + $0xb60] sm:$0xff]  }
 0xd8a   : > { %21935 = vmatprep.mubr.bf16.mxu1 %v14453_v63 }
 0xd8e   : > { %21864 = vmatmul.mubr.bf16.gmra.mrb[88].mxu0 %v13653_v44  ;;  %v26997_v44 = vrot.slane %v24337_v56, %v5846_v7 }
 0xd8f   : > { %21867 = vmatprep.mubr.bf16.mxu0 %v13654_v38 }
 0xd96   : > { %21868 = vmatmul.mubr.bf16.gmra.mrb[92].mxu0 %v13655_v60 }
 0xd97   : > { %21887 = vmatprep.mubr.bf16.mxu0 %v13946_v52 }
 0xd9e   : > { %21888 = vmatmul.mubr.bf16.vlgmr.msra.gmra.mrb[64].mxu0 %v13947_v9 }
 0xd9f   : > { %21891 = vmatprep.mubr.bf16.mxu0 %v13948_v50 }
 0xda6   : > { %21892 = vmatmul.mubr.bf16.gmra.mrb[68].mxu0 %v13949_v34 }
 0xda7   : > { %21895 = vmatprep.mubr.bf16.mxu0 %v13950_v58 }
 0xdae   : > { %21896 = vmatmul.mubr.bf16.gmra.mrb[72].mxu0 %v13951_v29 }
 0xdaf   : > { %21899 = vmatprep.mubr.bf16.mxu0 %v13952_v13 }
 0xdb6   : > { %21900 = vmatmul.mubr.bf16.gmra.mrb[76].mxu0 %v13953_v27 }
 0xdb7   : > { %21903 = vmatprep.mubr.bf16.mxu0 %v13954_v53  ;;  %v24266_v53 = vld [vmem:[%s27545_s1 + $0xb50] sm:$0xff]  }
 0xdbe   : > { %21904 = vmatmul.mubr.bf16.gmra.mrb[80].mxu0 %v13955_v36 }
 0xdbf   : > { %21907 = vmatprep.mubr.bf16.mxu0 %v13956_v26 }
 0xdc6   : > { %21908 = vmatmul.mubr.bf16.gmra.mrb[84].mxu0 %v13957_v25 }
 0xdc7   : > { %21911 = vmatprep.mubr.bf16.mxu0 %v13958_v24 }
 0xdce   : > { %21912 = vmatmul.mubr.bf16.gmra.mrb[88].mxu0 %v13959_v21 }
 0xdcf   : > { %21915 = vmatprep.mubr.bf16.mxu0 %v26886_v41  ;;  %v24264_v41 = vld [vmem:[%s27545_s1 + $0xb40] sm:$0xff]  }
 0xdd0   : > { %21967 = vmatprep.subr.bf16.mxu1 %v24264_v41 }
 0xdd6   : > { %21916 = vmatmul.mubr.bf16.gmra.mrb[92].mxu0 %v13961_v40 }
 0xe71   : > { %v21889_v35 = vpop.f32.mrb[64].mxu0 }
 0xe72   : > { %v14226_v38 = vmul.f32 %v21889_v35, %v26993_v47  ;;  %v14061_v22 = vpop.f32.mrb[65].mxu0 }
 0xe73   : > { %v14224_v23 = vmul.f32 %v26993_v47, %v14061_v22  ;;  %v21890_v60 = vpop.f32.mrb[66].mxu0 }
 0xe74   : > { %v14262_v62 = vadd.f32 %v26997_v44, %v14226_v38  ;;  %v14227_v45 = vmul.f32 %v21890_v60, %v26993_v47  ;;  %v14064_v52 = vpop.f32.mrb[67].mxu0  ;;  %v24269_v60 = vld [vmem:[%s27545_s1 + $0xb68] sm:$0xff]  }
 0xe75   : > { %v14260_v39 = vadd.f32 %v26997_v44, %v14224_v23  ;;  %v14225_v4 = vmul.f32 %v26993_v47, %v14064_v52 }
 0xe76   : > { %v14294_v37 = vmax.f32 %v14262_v62, 0.0  ;;  %v14263_v7 = vadd.f32 %v26997_v44, %v14227_v45 }
 0xe77   : > { %v14292_v2 = vmax.f32 %v14260_v39, 0.0  ;;  %v14261_v10 = vadd.f32 %v26997_v44, %v14225_v4 }
 0xe78   : > { %14326 = vst [vmem:[#allocation2 + $0x31] sm:$0xff] %v14294_v37  ;;  %v14295_v9 = vmax.f32 %v14263_v7, 0.0 }
 0xe79   : > { %14324 = vst [vmem:[#allocation2 + $0x19] sm:$0xff] %v14292_v2  ;;  %v14293_v50 = vmax.f32 %v14261_v10, 0.0  ;;  %v21893_v51 = vpop.f32.mrb[68].mxu0 }
 0xe7a   : > { %14327 = vst [vmem:[#allocation2 + $0x39] sm:$0xff] %v14295_v9  ;;  %v14230_v30 = vmul.f32 %v21893_v51, %v26993_v47  ;;  %v14077_v54 = vpop.f32.mrb[69].mxu0  ;;  %v14455_v49 = vpack.c.bf16 %v14295_v9, %v14294_v37  ;;  %v24270_v9 = vld [vmem:[%s27545_s1 + $0xb70] sm:$0xff]  }
 0xe7b   : > { %14325 = vst [vmem:[#allocation2 + $0x21] sm:$0xff] %v14293_v50  ;;  %v14228_v34 = vmul.f32 %v26993_v47, %v14077_v54  ;;  %v21894_v58 = vpop.f32.mrb[70].mxu0  ;;  %v14454_v42 = vpack.c.bf16 %v14293_v50, %v14292_v2 }
 0xe7c   : > { %v14266_v1 = vadd.f32 %v26997_v44, %v14230_v30  ;;  %v14231_v55 = vmul.f32 %v21894_v58, %v26993_v47  ;;  %v14080_v29 = vpop.f32.mrb[71].mxu0 }
 0xe7d   : > { %v14264_v13 = vadd.f32 %v26997_v44, %v14228_v34  ;;  %v14229_v5 = vmul.f32 %v26993_v47, %v14080_v29  ;;  %21936 = vmatmul.mubr.bf16.vlgmr.msra.gmra.mrb[64].mxu1 %v14454_v42 }
 0xe7e   : > { %v14298_v12 = vmax.f32 %v14266_v1, 0.0  ;;  %v14267_v61 = vadd.f32 %v26997_v44, %v14231_v55  ;;  %21939 = vmatprep.mubr.bf16.mxu1 %v14455_v49  ;;  %21968 = vmatpush3.bf16.msra.mxu1 %v24264_v41  ;;  %v24271_v1 = vld [vmem:[%s27545_s1 + $0xb78] sm:$0xff]  }
 0xe7f   : > { %v14296_v11 = vmax.f32 %v14264_v13, 0.0  ;;  %v14265_v27 = vadd.f32 %v26997_v44, %v14229_v5  ;;  %21969 = vmatprep.subr.bf16.mxu1 %v24265_v20 }
 0xe80   : > { %14330 = vst [vmem:[#allocation2 + $0x61] sm:$0xff] %v14298_v12  ;;  %v14299_v3 = vmax.f32 %v14267_v61, 0.0 }
 0xe81   : > { %14328 = vst [vmem:[#allocation2 + $0x49] sm:$0xff] %v14296_v11  ;;  %v14297_v33 = vmax.f32 %v14265_v27, 0.0  ;;  %v21897_v32 = vpop.f32.mrb[72].mxu0 }
 0xe82   : > { %14331 = vst [vmem:[#allocation2 + $0x69] sm:$0xff] %v14299_v3  ;;  %v14234_v46 = vmul.f32 %v21897_v32, %v26993_v47  ;;  %v14093_v36 = vpop.f32.mrb[73].mxu0  ;;  %v14457_v26 = vpack.c.bf16 %v14299_v3, %v14298_v12  ;;  %21970 = vmatpush3.bf16.msra.mxu1 %v24265_v20  ;;  %v27063_v3 = vld [vmem:[%s27545_s1 + $0xbc0] sm:$0xff]  }
 0xe83   : > { %14329 = vst [vmem:[#allocation2 + $0x51] sm:$0xff] %v14297_v33  ;;  %v14232_v48 = vmul.f32 %v26993_v47, %v14093_v36  ;;  %v21898_v59 = vpop.f32.mrb[74].mxu0  ;;  %v14456_v16 = vpack.c.bf16 %v14297_v33, %v14296_v11  ;;  %21971 = vmatprep.subr.bf16.mxu1 %v24266_v53 }
 0xe84   : > { %v14270_v25 = vadd.f32 %v26997_v44, %v14234_v46  ;;  %v14235_v24 = vmul.f32 %v21898_v59, %v26993_v47  ;;  %v14096_v17 = vpop.f32.mrb[75].mxu0 }
 0xe85   : > { %v14268_v43 = vadd.f32 %v26997_v44, %v14232_v48  ;;  %v14233_v21 = vmul.f32 %v26993_v47, %v14096_v17  ;;  %21940 = vmatmul.mubr.bf16.gmra.mrb[68].mxu1 %v14456_v16 }
 0xe86   : > { %v14302_v31 = vmax.f32 %v14270_v25, 0.0  ;;  %v14271_v8 = vadd.f32 %v26997_v44, %v14235_v24  ;;  %21943 = vmatprep.mubr.bf16.mxu1 %v14457_v26  ;;  %21972 = vmatpush3.bf16.msra.mxu1 %v24266_v53 }
 0xe87   : > { %v14300_v40 = vmax.f32 %v14268_v43, 0.0  ;;  %v14269_v28 = vadd.f32 %v26997_v44, %v14233_v21  ;;  %21973 = vmatprep.subr.bf16.mxu1 %v24267_v19 }
 0xe88   : > { %14334 = vst [vmem:[#allocation2 + $0x91] sm:$0xff] %v14302_v31  ;;  %v14303_v18 = vmax.f32 %v14271_v8, 0.0 }
 0xe89   : > { %14332 = vst [vmem:[#allocation2 + $0x79] sm:$0xff] %v14300_v40  ;;  %v14301_v14 = vmax.f32 %v14269_v28, 0.0  ;;  %v21901_v63 = vpop.f32.mrb[76].mxu0 }
 0xe8a   : > { %14335 = vst [vmem:[#allocation2 + $0x99] sm:$0xff] %v14303_v18  ;;  %v14238_v41 = vmul.f32 %v21901_v63, %v26993_v47  ;;  %v14109_v56 = vpop.f32.mrb[77].mxu0  ;;  %v14459_v35 = vpack.c.bf16 %v14303_v18, %v14302_v31  ;;  %21974 = vmatpush3.bf16.msra.mxu1 %v24267_v19 }
 0xe8b   : > { %14333 = vst [vmem:[#allocation2 + $0x81] sm:$0xff] %v14301_v14  ;;  %v14236_v38 = vmul.f32 %v26993_v47, %v14109_v56  ;;  %v21902_v22 = vpop.f32.mrb[78].mxu0  ;;  %v14458_v23 = vpack.c.bf16 %v14301_v14, %v14300_v40  ;;  %21975 = vmatprep.subr.bf16.mxu1 %v24268_v15 }
 0xe8c   : > { %v14274_v62 = vadd.f32 %v26997_v44, %v14238_v41  ;;  %v14239_v45 = vmul.f32 %v21902_v22, %v26993_v47  ;;  %v14112_v52 = vpop.f32.mrb[79].mxu0 }
 0xe8d   : > { %v14272_v39 = vadd.f32 %v26997_v44, %v14236_v38  ;;  %v14237_v4 = vmul.f32 %v26993_v47, %v14112_v52  ;;  %21944 = vmatmul.mubr.bf16.gmra.mrb[72].mxu1 %v14458_v23 }
 0xe8e   : > { %v14306_v37 = vmax.f32 %v14274_v62, 0.0  ;;  %v14275_v7 = vadd.f32 %v26997_v44, %v14239_v45  ;;  %21947 = vmatprep.mubr.bf16.mxu1 %v14459_v35  ;;  %21976 = vmatpush3.bf16.msra.mxu1 %v24268_v15 }
 0xe8f   : > { %v14304_v2 = vmax.f32 %v14272_v39, 0.0  ;;  %v14273_v10 = vadd.f32 %v26997_v44, %v14237_v4  ;;  %21977 = vmatprep.subr.bf16.mxu1 %v24269_v60 }
 0xe90   : > { %14338 = vst [vmem:[#allocation2 + $0xc1] sm:$0xff] %v14306_v37  ;;  %v14307_v50 = vmax.f32 %v14275_v7, 0.0 }
 0xe91   : > { %14336 = vst [vmem:[#allocation2 + $0xa9] sm:$0xff] %v14304_v2  ;;  %v14305_v51 = vmax.f32 %v14273_v10, 0.0  ;;  %v21905_v30 = vpop.f32.mrb[80].mxu0 }
 0xe92   : > { %14339 = vst [vmem:[#allocation2 + $0xc9] sm:$0xff] %v14307_v50  ;;  %v14242_v54 = vmul.f32 %v21905_v30, %v26993_v47  ;;  %v14125_v49 = vpop.f32.mrb[81].mxu0  ;;  %v14461_v34 = vpack.c.bf16 %v14307_v50, %v14306_v37  ;;  %21978 = vmatpush3.bf16.msra.mxu1 %v24269_v60 }
 0xe93   : > { %14337 = vst [vmem:[#allocation2 + $0xb1] sm:$0xff] %v14305_v51  ;;  %v14240_v58 = vmul.f32 %v26993_v47, %v14125_v49  ;;  %v21906_v42 = vpop.f32.mrb[82].mxu0  ;;  %v14460_v20 = vpack.c.bf16 %v14305_v51, %v14304_v2  ;;  %21979 = vmatprep.subr.bf16.mxu1 %v24270_v9 }
 0xe94   : > { %v14278_v55 = vadd.f32 %v26997_v44, %v14242_v54  ;;  %v14243_v29 = vmul.f32 %v21906_v42, %v26993_v47  ;;  %v14128_v13 = vpop.f32.mrb[83].mxu0 }
 0xe95   : > { %v14276_v5 = vadd.f32 %v26997_v44, %v14240_v58  ;;  %v14241_v12 = vmul.f32 %v26993_v47, %v14128_v13  ;;  %21948 = vmatmul.mubr.bf16.gmra.mrb[76].mxu1 %v14460_v20 }
 0xe96   : > { %v14310_v61 = vmax.f32 %v14278_v55, 0.0  ;;  %v14279_v11 = vadd.f32 %v26997_v44, %v14243_v29  ;;  %21951 = vmatprep.mubr.bf16.mxu1 %v14461_v34  ;;  %21980 = vmatpush3.bf16.msra.mxu1 %v24270_v9 }
 0xe97   : > { %v14308_v27 = vmax.f32 %v14276_v5, 0.0  ;;  %v14277_v53 = vadd.f32 %v26997_v44, %v14241_v12  ;;  %21981 = vmatprep.subr.bf16.mxu1 %v24271_v1 }
 0xe98   : > { %14342 = vst [vmem:[#allocation2 + $0xf1] sm:$0xff] %v14310_v61  ;;  %v27065_v33 = vmax.f32 %v14279_v11, 0.0 }
 0xe99   : > { %14340 = vst [vmem:[#allocation2 + $0xd9] sm:$0xff] %v14308_v27  ;;  %v14309_v32 = vmax.f32 %v14277_v53, 0.0  ;;  %v21909_v46 = vpop.f32.mrb[84].mxu0 }
 0xe9a   : > { %14343 = vst [vmem:[#allocation2 + $0xf9] sm:$0xff] %v27065_v33  ;;  %v14246_v36 = vmul.f32 %v21909_v46, %v26993_v47  ;;  %v14141_v26 = vpop.f32.mrb[85].mxu0  ;;  %v14463_v48 = vpack.c.bf16 %v27065_v33, %v14310_v61  ;;  %21982 = vmatpush3.bf16.msra.mxu1 %v24271_v1  ;;  %v14358_v46 = vld [vmem:[#allocation2 + $0x18] sm:$0xff] }
 0xe9b   : > { %14341 = vst [vmem:[#allocation2 + $0xe1] sm:$0xff] %v14309_v32  ;;  %v14244_v59 = vmul.f32 %v26993_v47, %v14141_v26  ;;  %v21910_v16 = vpop.f32.mrb[86].mxu0  ;;  %v27071_v19 = vpack.c.bf16 %v14309_v32, %v14308_v27  ;;  %22015 = vmatprep.subr.bf16.mxu1 %v27063_v3  ;;  %v14361_v32 = vld [vmem:[#allocation2 + $0x38] sm:$0xff]  ;;  %v24273_v26 = vld [vmem:[%s27545_s1 + $0xbc8] sm:$0xff]  }
 0xe9c   : > { %v14282_v25 = vadd.f32 %v26997_v44, %v14246_v36  ;;  %v14247_v24 = vmul.f32 %v21910_v16, %v26993_v47  ;;  %v14144_v17 = vpop.f32.mrb[87].mxu0  ;;  %v14365_v16 = vld [vmem:[#allocation2 + $0x68] sm:$0xff] }
 0xe9d   : > { %v14280_v43 = vadd.f32 %v26997_v44, %v14244_v59  ;;  %v14245_v21 = vmul.f32 %v26993_v47, %v14144_v17  ;;  %21952 = vmatmul.mubr.bf16.gmra.mrb[80].mxu1 %v27071_v19  ;;  %v14363_v59 = vld [vmem:[#allocation2 + $0x50] sm:$0xff]  ;;  %v14364_v17 = vld [vmem:[#allocation2 + $0x60] sm:$0xff] }
 0xe9e   : > { %v14314_v31 = vmax.f32 %v14282_v25, 0.0  ;;  %v14283_v8 = vadd.f32 %v26997_v44, %v14247_v24  ;;  %21955 = vmatprep.mubr.bf16.mxu1 %v14463_v48  ;;  %v14362_v25 = vld [vmem:[#allocation2 + $0x48] sm:$0xff] }
 0xe9f   : > { %v14312_v40 = vmax.f32 %v14280_v43, 0.0  ;;  %v14281_v28 = vadd.f32 %v26997_v44, %v14245_v21  ;;  %v27128_v24 = vpack.c.bf16 %v14363_v59, %v14362_v25  ;;  %v24275_v43 = vld [vmem:[%s27545_s1 + $0xbd8] sm:$0xff]   ;;  %v27133_v21 = vpack.c.bf16 %v14365_v16, %v14364_v17  ;;  %v24281_v16 = vld [vmem:[%s27545_s1 + $0xc08] sm:$0xff]   ;;  %v24282_v17 = vld [vmem:[%s27545_s1 + $0xc10] sm:$0xff]  }
 0xea0   : > { %14346 = vst [vmem:[#allocation2 + $0x121] sm:$0xff] %v14314_v31  ;;  %v14315_v15 = vmax.f32 %v14283_v8, 0.0  ;;  %v14369_v8 = vld [vmem:[#allocation2 + $0x98] sm:$0xff] }
 0xea1   : > { %14344 = vst [vmem:[#allocation2 + $0x109] sm:$0xff] %v14312_v40  ;;  %v14313_v18 = vmax.f32 %v14281_v28, 0.0  ;;  %v21913_v14 = vpop.f32.mrb[88].mxu0 }
 0xea2   : > { %14347 = vst [vmem:[#allocation2 + $0x129] sm:$0xff] %v14315_v15  ;;  %v14250_v63 = vmul.f32 %v21913_v14, %v26993_v47  ;;  %v14157_v41 = vpop.f32.mrb[89].mxu0  ;;  %v27082_v56 = vpack.c.bf16 %v14315_v15, %v14314_v31  ;;  %v14367_v31 = vld [vmem:[#allocation2 + $0x80] sm:$0xff]  ;;  %v14368_v15 = vld [vmem:[#allocation2 + $0x90] sm:$0xff] }
 0xea3   : > { %14345 = vst [vmem:[#allocation2 + $0x111] sm:$0xff] %v14313_v18  ;;  %v14248_v35 = vmul.f32 %v26993_v47, %v14157_v41  ;;  %v21914_v38 = vpop.f32.mrb[90].mxu0  ;;  %v27085_v22 = vpack.c.bf16 %v14313_v18, %v14312_v40  ;;  %v14366_v40 = vld [vmem:[#allocation2 + $0x78] sm:$0xff]  ;;  %v24277_v18 = vld [vmem:[%s27545_s1 + $0xbe8] sm:$0xff]   ;;  %v27145_v14 = vpack.c.bf16 %v14369_v8, %v14368_v15  ;;  %v14371_v41 = vld [vmem:[#allocation2 + $0xb0] sm:$0xff] }
 0xea4   : > { %v14286_v23 = vadd.f32 %v26997_v44, %v14250_v63  ;;  %v14251_v60 = vmul.f32 %v21914_v38, %v26993_v47  ;;  %v14160_v62 = vpop.f32.mrb[91].mxu0  ;;  %v27140_v28 = vpack.c.bf16 %v14367_v31, %v14366_v40  ;;  %v24278_v63 = vld [vmem:[%s27545_s1 + $0xbf0] sm:$0xff]   ;;  %v14370_v38 = vld [vmem:[#allocation2 + $0xa8] sm:$0xff]  ;;  %v24283_v15 = vld [vmem:[%s27545_s1 + $0xc18] sm:$0xff]  }
 0xea5   : > { %v14284_v45 = vadd.f32 %v26997_v44, %v14248_v35  ;;  %v14249_v52 = vmul.f32 %v26993_v47, %v14160_v62  ;;  %21956 = vmatmul.mubr.bf16.gmra.mrb[84].mxu1 %v27085_v22  ;;  %v14373_v35 = vld [vmem:[#allocation2 + $0xc8] sm:$0xff]  ;;  %v24279_v62 = vld [vmem:[%s27545_s1 + $0xbf8] sm:$0xff]  }
 0xea6   : > { %v14318_v39 = vmax.f32 %v14286_v23, 0.0  ;;  %v14287_v4 = vadd.f32 %v26997_v44, %v14251_v60  ;;  %21959 = vmatprep.mubr.bf16.mxu1 %v27082_v56  ;;  %v27152_v23 = vpack.c.bf16 %v14371_v41, %v14370_v38  ;;  %v14372_v60 = vld [vmem:[#allocation2 + $0xc0] sm:$0xff]  ;;  %v14913_v8 = vld [vmem:[#allocation2 + $0x6a] sm:$0xff]  ;;  %v14916_v38 = vld [vmem:[#allocation2 + $0x92] sm:$0xff] }
 0xea7   : > { %v14316_v37 = vmax.f32 %v14284_v45, 0.0  ;;  %v14285_v7 = vadd.f32 %v26997_v44, %v14249_v52  ;;  %v27157_v45 = vpack.c.bf16 %v14373_v35, %v14372_v60  ;;  %v24280_v52 = vld [vmem:[%s27545_s1 + $0xc00] sm:$0xff]  }
 0xea8   : > { %14350 = vst [vmem:[#allocation2 + $0x151] sm:$0xff] %v14318_v39  ;;  %v14319_v2 = vmax.f32 %v14287_v4, 0.0  ;;  %v14377_v4 = vld [vmem:[#allocation2 + $0xf8] sm:$0xff]  ;;  %v14912_v31 = vld [vmem:[#allocation2 + $0x62] sm:$0xff] }
 0xea9   : > { %14348 = vst [vmem:[#allocation2 + $0x139] sm:$0xff] %v14316_v37  ;;  %v14317_v10 = vmax.f32 %v14285_v7, 0.0  ;;  %v21917_v9 = vpop.f32.mrb[92].mxu0  ;;  %v14914_v41 = vld [vmem:[#allocation2 + $0x7a] sm:$0xff]  ;;  %v14915_v35 = vld [vmem:[#allocation2 + $0x82] sm:$0xff] }
 0xeaa   : > { %14351 = vst [vmem:[#allocation2 + $0x159] sm:$0xff] %v14319_v2  ;;  %v14254_v50 = vmul.f32 %v21917_v9, %v26993_v47  ;;  %v14173_v51 = vpop.f32.mrb[93].mxu0  ;;  %v27096_v30 = vpack.c.bf16 %v14319_v2, %v14318_v39  ;;  %v14375_v39 = vld [vmem:[#allocation2 + $0xe0] sm:$0xff]  ;;  %v14376_v2 = vld [vmem:[#allocation2 + $0xf0] sm:$0xff] }
 0xeab   : > { %14349 = vst [vmem:[#allocation2 + $0x141] sm:$0xff] %v14317_v10  ;;  %v14252_v54 = vmul.f32 %v26993_v47, %v14173_v51  ;;  %v21918_v49 = vpop.f32.mrb[94].mxu0  ;;  %v27099_v34 = vpack.c.bf16 %v14317_v10, %v14316_v37  ;;  %v14374_v37 = vld [vmem:[#allocation2 + $0xd8] sm:$0xff]  ;;  %v27166_v10 = vpack.c.bf16 %v14377_v4, %v14376_v2  ;;  %v14379_v9 = vld [vmem:[#allocation2 + $0x110] sm:$0xff]  ;;  %v14378_v51 = vld [vmem:[#allocation2 + $0x108] sm:$0xff] }
 0xeac   : > { %v14290_v58 = vadd.f32 %v26997_v44, %v14254_v50  ;;  %v14255_v42 = vmul.f32 %v21918_v49, %v26993_v47  ;;  %v14176_v20 = vpop.f32.mrb[95].mxu0  ;;  %v27164_v7 = vpack.c.bf16 %v14375_v39, %v14374_v37  ;;  %v14381_v50 = vld [vmem:[#allocation2 + $0x128] sm:$0xff]  ;;  %v14380_v49 = vld [vmem:[#allocation2 + $0x120] sm:$0xff]  ;;  %v24286_v4 = vld [vmem:[%s27545_s1 + $0xc30] sm:$0xff]  }
 0xead   : > { %v14288_v1 = vadd.f32 %v26997_v44, %v14252_v54  ;;  %v14253_v55 = vmul.f32 %v26993_v47, %v14176_v20  ;;  %21960 = vmatmul.mubr.bf16.gmra.mrb[88].mxu1 %v27099_v34  ;;  %v14359_v47 = vld [vmem:[#allocation2 + $0x20] sm:$0xff]  ;;  %v27170_v54 = vpack.c.bf16 %v14379_v9, %v14378_v51  ;;  %v14918_v37 = vld [vmem:[#allocation2 + $0xaa] sm:$0xff]  ;;  %v14919_v2 = vld [vmem:[#allocation2 + $0xb2] sm:$0xff] }
 0xeae   : > { %v14322_v29 = vmax.f32 %v14290_v58, 0.0  ;;  %v14291_v13 = vadd.f32 %v26997_v44, %v14255_v42  ;;  %21963 = vmatprep.mubr.bf16.mxu1 %v27096_v30  ;;  %v27115_v36 = vpack.c.bf16 %v14359_v47, %v14358_v46  ;;  %v27172_v58 = vpack.c.bf16 %v14381_v50, %v14380_v49  ;;  %v14906_v46 = vld [vmem:[#allocation2 + $0x1a] sm:$0xff]  ;;  %v14920_v9 = vld [vmem:[#allocation2 + $0xc2] sm:$0xff]  ;;  %v14921_v50 = vld [vmem:[#allocation2 + $0xca] sm:$0xff] }
 0xeaf   : > { %v14320_v5 = vmax.f32 %v14288_v1, 0.0  ;;  %v14289_v12 = vadd.f32 %v26997_v44, %v14253_v55  ;;  %v14360_v44 = vld [vmem:[#allocation2 + $0x30] sm:$0xff]  ;;  %v14917_v60 = vld [vmem:[#allocation2 + $0x9a] sm:$0xff]  ;;  %v27221_v51 = vpack.c.bf16 %v14919_v2, %v14918_v37 }
 0xeb0   : > { %14354 = vst [vmem:[#allocation2 + $0x181] sm:$0xff] %v14322_v29  ;;  %v14323_v61 = vmax.f32 %v14291_v13, 0.0  ;;  %v27120_v48 = vpack.c.bf16 %v14361_v32, %v14360_v44  ;;  %v14382_v1 = vld [vmem:[#allocation2 + $0x138] sm:$0xff]  ;;  %v14907_v44 = vld [vmem:[#allocation2 + $0x22] sm:$0xff]  ;;  %v27214_v39 = vpack.c.bf16 %v14917_v60, %v14916_v38  ;;  %v24290_v60 = vld [vmem:[%s27545_s1 + $0xc50] sm:$0xff]  }
 0xeb1   : > { %14352 = vst [vmem:[#allocation2 + $0x169] sm:$0xff] %v14320_v5  ;;  %v14321_v11 = vmax.f32 %v14289_v12, 0.0  ;;  %v14385_v20 = vld [vmem:[#allocation2 + $0x158] sm:$0xff]  ;;  %v14905_v12 = vld [vmem:[#allocation2 + $0xa] sm:$0xff]  ;;  %v27185_v59 = vpack.c.bf16 %v14907_v44, %v14906_v46  ;;  %v14928_v44 = vld [vmem:[#allocation2 + $0x122] sm:$0xff] }
 0xeb2   : > { %14355 = vst [vmem:[#allocation2 + $0x189] sm:$0xff] %v14323_v61  ;;  %v27109_v27 = vpack.c.bf16 %v14323_v61, %v14322_v29  ;;  %v14383_v42 = vld [vmem:[#allocation2 + $0x140] sm:$0xff]  ;;  %v14384_v29 = vld [vmem:[#allocation2 + $0x150] sm:$0xff]  ;;  %v24287_v49 = vld [vmem:[%s27545_s1 + $0xc38] sm:$0xff]  }
 0xeb3   : > { %14353 = vst [vmem:[#allocation2 + $0x171] sm:$0xff] %v14321_v11  ;;  %v27111_v53 = vpack.c.bf16 %v14321_v11, %v14320_v5  ;;  %v27176_v55 = vpack.c.bf16 %v14383_v42, %v14382_v1  ;;  %v27178_v13 = vpack.c.bf16 %v14385_v20, %v14384_v29  ;;  %v14904_v5 = vld [vmem:[#allocation2 + $0x2] sm:$0xff]  ;;  %v27226_v42 = vpack.c.bf16 %v14921_v50, %v14920_v9  ;;  %v14922_v1 = vld [vmem:[#allocation2 + $0xda] sm:$0xff]  ;;  %v14927_v46 = vld [vmem:[#allocation2 + $0x112] sm:$0xff] }
 0xeb4   : > { %v14936_v47 = vpack.c.bf16 %v14905_v12, %v14904_v5  ;;  %v24288_v20 = vld [vmem:[%s27545_s1 + $0xc40] sm:$0xff]   ;;  %v14924_v5 = vld [vmem:[#allocation2 + $0xf2] sm:$0xff]  ;;  %v24289_v38 = vld [vmem:[%s27545_s1 + $0xc48] sm:$0xff]  }
 0xeb5   : > { %21964 = vmatmul.mubr.bf16.gmra.mrb[92].mxu1 %v27111_v53  ;;  %v14923_v29 = vld [vmem:[#allocation2 + $0xe2] sm:$0xff]  ;;  %v14925_v12 = vld [vmem:[#allocation2 + $0xfa] sm:$0xff]  ;;  %v24294_v37 = vld [vmem:[%s27545_s1 + $0xc70] sm:$0xff]  }
 0xeb6   : > { %21983 = vmatprep.mubr.bf16.mxu1 %v26928_v57  ;;  %v24274_v57 = vld [vmem:[%s27545_s1 + $0xbd0] sm:$0xff]   ;;  %v24295_v2 = vld [vmem:[%s27545_s1 + $0xc78] sm:$0xff]   ;;  %v24296_v9 = vld [vmem:[%s27545_s1 + $0xc80] sm:$0xff]  }
 0xeb8   : > { %v14386_v11 = vld [vmem:[#allocation2 + $0x168] sm:$0xff] }
 0xeb9   : > { %v15241_v50 = vld [vmem:[#allocation2 + $0x188] sm:$0xff] }
 0xeba   : > { %v14387_v61 = vld [vmem:[#allocation2 + $0x170] sm:$0xff] }
 0xebb   : > { %v27182_v32 = vpack.c.bf16 %v14387_v61, %v14386_v11  ;;  %v27233_v61 = vpack.c.bf16 %v14923_v29, %v14922_v1  ;;  %v27235_v11 = vpack.c.bf16 %v14925_v12, %v14924_v5  ;;  %v15516_v29 = vld [vmem:[#allocation2 + $0x19] sm:$0xff] }
 0xebc   : > { %v15519_v12 = vld [vmem:[#allocation2 + $0x39] sm:$0xff] }
 0xebd   : > { %21984 = vmatmul.mubr.bf16.vlgmr.msra.gmra.mrb[64].mxu1 %v27115_v36 }
 0xebe   : > { %21987 = vmatprep.mubr.bf16.mxu1 %v27120_v48  ;;  %22016 = vmatpush3.bf16.msra.mxu1 %v27063_v3  ;;  %v24276_v3 = vld [vmem:[%s27545_s1 + $0xbe0] sm:$0xff]  }
 0xebf   : > { %22017 = vmatprep.subr.bf16.mxu1 %v24273_v26 }
 0xec2   : > { %22018 = vmatpush3.bf16.msra.mxu1 %v24273_v26  ;;  %v14908_v26 = vld [vmem:[#allocation2 + $0x32] sm:$0xff] }
 0xec3   : > { %22019 = vmatprep.subr.bf16.mxu1 %v24274_v57 }
 0xec5   : > { %21988 = vmatmul.mubr.bf16.gmra.mrb[68].mxu1 %v27128_v24 }
 0xec6   : > { %21991 = vmatprep.mubr.bf16.mxu1 %v27133_v21  ;;  %22020 = vmatpush3.bf16.msra.mxu1 %v24274_v57  ;;  %v14909_v57 = vld [vmem:[#allocation2 + $0x3a] sm:$0xff] }
 0xec7   : > { %22021 = vmatprep.subr.bf16.mxu1 %v24275_v43  ;;  %v27190_v25 = vpack.c.bf16 %v14909_v57, %v14908_v26  ;;  %v14929_v26 = vld [vmem:[#allocation2 + $0x12a] sm:$0xff] }
 0xeca   : > { %22022 = vmatpush3.bf16.msra.mxu1 %v24275_v43  ;;  %v14910_v43 = vld [vmem:[#allocation2 + $0x4a] sm:$0xff] }
 0xecb   : > { %22023 = vmatprep.subr.bf16.mxu1 %v24276_v3 }
 0xecd   : > { %21992 = vmatmul.mubr.bf16.gmra.mrb[72].mxu1 %v27140_v28 }
 0xece   : > { %21995 = vmatprep.mubr.bf16.mxu1 %v27145_v14  ;;  %22024 = vmatpush3.bf16.msra.mxu1 %v24276_v3  ;;  %v14911_v3 = vld [vmem:[#allocation2 + $0x52] sm:$0xff] }
 0xecf   : > { %22025 = vmatprep.subr.bf16.mxu1 %v24277_v18  ;;  %v27197_v40 = vpack.c.bf16 %v14911_v3, %v14910_v43  ;;  %v14931_v43 = vld [vmem:[#allocation2 + $0x142] sm:$0xff]  ;;  %v14932_v3 = vld [vmem:[#allocation2 + $0x152] sm:$0xff] }
 0xed2   : > { %22026 = vmatpush3.bf16.msra.mxu1 %v24277_v18  ;;  %v27202_v18 = vpack.c.bf16 %v14913_v8, %v14912_v31  ;;  %v14933_v31 = vld [vmem:[#allocation2 + $0x15a] sm:$0xff] }
 0xed3   : > { %22027 = vmatprep.subr.bf16.mxu1 %v24278_v63 }
 0xed5   : > { %21996 = vmatmul.mubr.bf16.gmra.mrb[76].mxu1 %v27152_v23 }
 0xed6   : > { %21999 = vmatprep.mubr.bf16.mxu1 %v27157_v45  ;;  %22028 = vmatpush3.bf16.msra.mxu1 %v24278_v63  ;;  %v24284_v63 = vld [vmem:[%s27545_s1 + $0xc20] sm:$0xff]  }
 0xed7   : > { %22029 = vmatprep.subr.bf16.mxu1 %v24279_v62 }
 0xeda   : > { %22030 = vmatpush3.bf16.msra.mxu1 %v24279_v62  ;;  %v27209_v62 = vpack.c.bf16 %v14915_v35, %v14914_v41  ;;  %v14935_v41 = vld [vmem:[#allocation2 + $0x172] sm:$0xff] }
 0xedb   : > { %22063 = vmatprep.subr.bf16.mxu1 %v24280_v52 }
 0xedd   : > { %22000 = vmatmul.mubr.bf16.gmra.mrb[80].mxu1 %v27164_v7 }
 0xede   : > { %22003 = vmatprep.mubr.bf16.mxu1 %v27166_v10 }
 0xee5   : > { %22004 = vmatmul.mubr.bf16.gmra.mrb[84].mxu1 %v27170_v54 }
 0xee6   : > { %22007 = vmatprep.mubr.bf16.mxu1 %v27172_v58 }
 0xeed   : > { %22008 = vmatmul.mubr.bf16.gmra.mrb[88].mxu1 %v27176_v55 }
 0xeee   : > { %22011 = vmatprep.mubr.bf16.mxu1 %v27178_v13 }
 0xef5   : > { %22012 = vmatmul.mubr.bf16.gmra.mrb[92].mxu1 %v27182_v32 }
 0xef6   : > { %22031 = vmatprep.mubr.bf16.mxu1 %v14936_v47  ;;  %v14926_v47 = vld [vmem:[#allocation2 + $0x10a] sm:$0xff] }
 0xef7   : > { %v27239_v57 = vpack.c.bf16 %v14927_v46, %v14926_v47  ;;  %v15521_v47 = vld [vmem:[#allocation2 + $0x51] sm:$0xff] }
 0xef8   : > { %v15518_v46 = vld [vmem:[#allocation2 + $0x31] sm:$0xff] }
 0xefd   : > { %22032 = vmatmul.mubr.bf16.vlgmr.msra.gmra.mrb[64].mxu1 %v27185_v59 }
 0xefe   : > { %22035 = vmatprep.mubr.bf16.mxu1 %v27190_v25  ;;  %22064 = vmatpush3.bf16.msra.mxu1 %v24280_v52  ;;  %v24285_v52 = vld [vmem:[%s27545_s1 + $0xc28] sm:$0xff]  }
 0xeff   : > { %22065 = vmatprep.subr.bf16.mxu1 %v24281_v16 }
 0xf02   : > { %22066 = vmatpush3.bf16.msra.mxu1 %v24281_v16  ;;  %v27241_v16 = vpack.c.bf16 %v14929_v26, %v14928_v44  ;;  %v27296_v44 = vpack.c.bf16 %v15519_v12, %v15518_v46  ;;  %v15520_v26 = vld [vmem:[#allocation2 + $0x49] sm:$0xff] }
 0xf03   : > { %22067 = vmatprep.subr.bf16.mxu1 %v24282_v17  ;;  %v15531_v12 = vld [vmem:[#allocation2 + $0xc9] sm:$0xff] }
 0xf05   : > { %22036 = vmatmul.mubr.bf16.gmra.mrb[68].mxu1 %v27197_v40 }
 0xf06   : > { %22039 = vmatprep.mubr.bf16.mxu1 %v27202_v18  ;;  %22068 = vmatpush3.bf16.msra.mxu1 %v24282_v17  ;;  %v14930_v17 = vld [vmem:[#allocation2 + $0x13a] sm:$0xff] }
 0xf07   : > { %22069 = vmatprep.subr.bf16.mxu1 %v24283_v15  ;;  %v27245_v8 = vpack.c.bf16 %v14931_v43, %v14930_v17  ;;  %v24297_v17 = vld [vmem:[%s27545_s1 + $0xc88] sm:$0xff]   ;;  %v27301_v43 = vpack.c.bf16 %v15521_v47, %v15520_v26  ;;  %v24303_v26 = vld [vmem:[%s27545_s1 + $0xcb8] sm:$0xff]  }
 0xf08   : > { %v15530_v47 = vld [vmem:[#allocation2 + $0xc1] sm:$0xff] }
 0xf09   : > { %v27332_v46 = vpack.c.bf16 %v15531_v12, %v15530_v47  ;;  %v16741_v12 = vld [vmem:[#allocation2 + $0x3a] sm:$0xff] }
 0xf0a   : > { %22070 = vmatpush3.bf16.msra.mxu1 %v24283_v15  ;;  %v27247_v15 = vpack.c.bf16 %v14933_v31, %v14932_v3  ;;  %v24298_v3 = vld [vmem:[%s27545_s1 + $0xc90] sm:$0xff]  }
 0xf0b   : > { %22071 = vmatprep.subr.bf16.mxu1 %v24284_v63  ;;  %v15523_v31 = vld [vmem:[#allocation2 + $0x69] sm:$0xff] }
 0xf0d   : > { %22040 = vmatmul.mubr.bf16.gmra.mrb[72].mxu1 %v27209_v62 }
 0xf0e   : > { %22043 = vmatprep.mubr.bf16.mxu1 %v27214_v39  ;;  %22072 = vmatpush3.bf16.msra.mxu1 %v24284_v63  ;;  %v14934_v63 = vld [vmem:[#allocation2 + $0x16a] sm:$0xff] }
 0xf0f   : > { %22073 = vmatprep.subr.bf16.mxu1 %v24285_v52  ;;  %v27251_v35 = vpack.c.bf16 %v14935_v41, %v14934_v63  ;;  %v15525_v63 = vld [vmem:[#allocation2 + $0x81] sm:$0xff] }
 0xf10   : > { %v15522_v41 = vld [vmem:[#allocation2 + $0x61] sm:$0xff] }
 0xf12   : > { %22074 = vmatpush3.bf16.msra.mxu1 %v24285_v52  ;;  %v24292_v52 = vld [vmem:[%s27545_s1 + $0xc60] sm:$0xff]  }
 0xf13   : > { %22075 = vmatprep.subr.bf16.mxu1 %v24286_v4 }
 0xf15   : > { %22044 = vmatmul.mubr.bf16.gmra.mrb[76].mxu1 %v27221_v51 }
 0xf16   : > { %22047 = vmatprep.mubr.bf16.mxu1 %v27226_v42  ;;  %22076 = vmatpush3.bf16.msra.mxu1 %v24286_v4  ;;  %v24293_v4 = vld [vmem:[%s27545_s1 + $0xc68] sm:$0xff]  }
 0xf17   : > { %22077 = vmatprep.subr.bf16.mxu1 %v24287_v49 }
 0xf1a   : > { %22078 = vmatpush3.bf16.msra.mxu1 %v24287_v49  ;;  %v15517_v49 = vld [vmem:[#allocation2 + $0x21] sm:$0xff] }
 0xf1b   : > { %22111 = vmatprep.subr.bf16.mxu1 %v24288_v20  ;;  %v15548_v5 = vpack.c.bf16 %v15517_v49, %v15516_v29  ;;  %v15528_v49 = vld [vmem:[#allocation2 + $0xa9] sm:$0xff] }
 0xf1d   : > { %22048 = vmatmul.mubr.bf16.gmra.mrb[80].mxu1 %v27233_v61 }
 0xf1e   : > { %22051 = vmatprep.mubr.bf16.mxu1 %v27235_v11 }
 0xf25   : > { %22052 = vmatmul.mubr.bf16.gmra.mrb[84].mxu1 %v27239_v57 }
 0xf26   : > { %22055 = vmatprep.mubr.bf16.mxu1 %v27241_v16 }
 0xf2d   : > { %22056 = vmatmul.mubr.bf16.gmra.mrb[88].mxu1 %v27245_v8 }
 0xf2e   : > { %22059 = vmatprep.mubr.bf16.mxu1 %v27247_v15 }
 0xf35   : > { %22060 = vmatmul.mubr.bf16.gmra.mrb[92].mxu1 %v27251_v35 }
 0xf36   : > { %22079 = vmatprep.mubr.bf16.mxu1 %v27115_v36  ;;  %v24291_v36 = vld [vmem:[%s27545_s1 + $0xc58] sm:$0xff]  }
 0xf3d   : > { %22080 = vmatmul.mubr.bf16.vlgmr.msra.gmra.mrb[64].mxu1 %v27120_v48 }
 0xf3e   : > { %22083 = vmatprep.mubr.bf16.mxu1 %v27128_v24  ;;  %22112 = vmatpush3.bf16.msra.mxu1 %v24288_v20  ;;  %v15240_v20 = vld [vmem:[#allocation2 + $0x180] sm:$0xff] }
 0xf3f   : > { %22113 = vmatprep.subr.bf16.mxu1 %v24289_v38  ;;  %v27293_v1 = vpack.c.bf16 %v15241_v50, %v15240_v20  ;;  %v24301_v20 = vld [vmem:[%s27545_s1 + $0xca8] sm:$0xff]  }
 0xf42   : > { %22114 = vmatpush3.bf16.msra.mxu1 %v24289_v38  ;;  %v27308_v38 = vpack.c.bf16 %v15523_v31, %v15522_v41  ;;  %v16456_v41 = vld [vmem:[#allocation2 + $0x139] sm:$0xff] }
 0xf43   : > { %22115 = vmatprep.subr.bf16.mxu1 %v24290_v60 }
 0xf45   : > { %22084 = vmatmul.mubr.bf16.gmra.mrb[68].mxu1 %v27133_v21 }
 0xf46   : > { %22087 = vmatprep.mubr.bf16.mxu1 %v27140_v28  ;;  %22116 = vmatpush3.bf16.msra.mxu1 %v24290_v60  ;;  %v15524_v60 = vld [vmem:[#allocation2 + $0x79] sm:$0xff] }
 0xf47   : > { %22117 = vmatprep.subr.bf16.mxu1 %v24291_v36 }
 0xf4a   : > { %22118 = vmatpush3.bf16.msra.mxu1 %v24291_v36  ;;  %v24299_v36 = vld [vmem:[%s27545_s1 + $0xc98] sm:$0xff]  }
 0xf4b   : > { %22119 = vmatprep.subr.bf16.mxu1 %v24292_v52 }
 0xf4d   : > { %22088 = vmatmul.mubr.bf16.gmra.mrb[72].mxu1 %v27145_v14 }
 0xf4e   : > { %22091 = vmatprep.mubr.bf16.mxu1 %v27152_v23  ;;  %22120 = vmatpush3.bf16.msra.mxu1 %v24292_v52  ;;  %v27313_v52 = vpack.c.bf16 %v15525_v63, %v15524_v60  ;;  %v16459_v63 = vld [vmem:[#allocation2 + $0x159] sm:$0xff]  ;;  %v16458_v60 = vld [vmem:[#allocation2 + $0x151] sm:$0xff] }
 0xf4f   : > { %22121 = vmatprep.subr.bf16.mxu1 %v24293_v4 }
 0xf52   : > { %22122 = vmatpush3.bf16.msra.mxu1 %v24293_v4  ;;  %v24300_v4 = vld [vmem:[%s27545_s1 + $0xca0] sm:$0xff]  }
 0xf53   : > { %22123 = vmatprep.subr.bf16.mxu1 %v24294_v37 }
 0xf55   : > { %22092 = vmatmul.mubr.bf16.gmra.mrb[76].mxu1 %v27157_v45 }
 0xf56   : > { %22095 = vmatprep.mubr.bf16.mxu1 %v27164_v7  ;;  %22124 = vmatpush3.bf16.msra.mxu1 %v24294_v37  ;;  %v15527_v37 = vld [vmem:[#allocation2 + $0x99] sm:$0xff] }
 0xf57   : > { %22125 = vmatprep.subr.bf16.mxu1 %v24295_v2 }
 0xf5a   : > { %22126 = vmatpush3.bf16.msra.mxu1 %v24295_v2  ;;  %v15529_v2 = vld [vmem:[#allocation2 + $0xb1] sm:$0xff] }
 0xf5b   : > { %22159 = vmatprep.subr.bf16.mxu1 %v24296_v9  ;;  %v27325_v29 = vpack.c.bf16 %v15529_v2, %v15528_v49  ;;  %v16464_v49 = vld [vmem:[#allocation2 + $0x199] sm:$0xff] }
 0xf5d   : > { %22096 = vmatmul.mubr.bf16.gmra.mrb[80].mxu1 %v27166_v10 }
 0xf5e   : > { %22099 = vmatprep.mubr.bf16.mxu1 %v27170_v54 }
 0xf65   : > { %22100 = vmatmul.mubr.bf16.gmra.mrb[84].mxu1 %v27172_v58 }
 0xf66   : > { %22103 = vmatprep.mubr.bf16.mxu1 %v27176_v55 }
 0xf6d   : > { %22104 = vmatmul.mubr.bf16.gmra.mrb[88].mxu1 %v27178_v13 }
 0xf6e   : > { %22107 = vmatprep.mubr.bf16.mxu1 %v27182_v32 }
 0xf75   : > { %22108 = vmatmul.mubr.bf16.gmra.mrb[92].mxu1 %v27293_v1 }
 0xf76   : > { %22127 = vmatprep.mubr.bf16.mxu1 %v15548_v5  ;;  %v24302_v5 = vld [vmem:[%s27545_s1 + $0xcb0] sm:$0xff]  }
 0xf7d   : > { %22128 = vmatmul.mubr.bf16.vlgmr.msra.gmra.mrb[64].mxu1 %v27296_v44 }
 0xf7e   : > { %22131 = vmatprep.mubr.bf16.mxu1 %v27301_v43  ;;  %22160 = vmatpush3.bf16.msra.mxu1 %v24296_v9  ;;  %v15526_v9 = vld [vmem:[#allocation2 + $0x91] sm:$0xff] }
 0xf7f   : > { %22161 = vmatprep.subr.bf16.mxu1 %v24297_v17  ;;  %v27320_v50 = vpack.c.bf16 %v15527_v37, %v15526_v9  ;;  %v16460_v37 = vld [vmem:[#allocation2 + $0x169] sm:$0xff]  ;;  %v16462_v9 = vld [vmem:[#allocation2 + $0x181] sm:$0xff] }
 0xf82   : > { %22162 = vmatpush3.bf16.msra.mxu1 %v24297_v17  ;;  %v24304_v17 = vld [vmem:[%s27545_s1 + $0xcc0] sm:$0xff]  }
 0xf83   : > { %22163 = vmatprep.subr.bf16.mxu1 %v24298_v3 }
 0xf85   : > { %22132 = vmatmul.mubr.bf16.gmra.mrb[68].mxu1 %v27308_v38 }
 0xf86   : > { %22135 = vmatprep.mubr.bf16.mxu1 %v27313_v52  ;;  %22164 = vmatpush3.bf16.msra.mxu1 %v24298_v3  ;;  %v27342_v3 = vld [vmem:[#allocation2 + $0xf1] sm:$0xff] }
 0xf87   : > { %22165 = vmatprep.subr.bf16.mxu1 %v24299_v36  ;;  %v15557_v31 = vpack.c.bf16 %v27065_v33, %v27342_v3  ;;  %v24305_v33 = vld [vmem:[%s27545_s1 + $0xcc8] sm:$0xff]  }
 0xf8a   : > { %22166 = vmatpush3.bf16.msra.mxu1 %v24299_v36  ;;  %v16478_v36 = vpack.c.bf16 %v16459_v63, %v16458_v60 }
 0xf8b   : > { %22167 = vmatprep.subr.bf16.mxu1 %v24300_v4 }
 0xf8d   : > { %22136 = vmatmul.mubr.bf16.gmra.mrb[72].mxu1 %v27320_v50 }
 0xf8e   : > { %22139 = vmatprep.mubr.bf16.mxu1 %v27325_v29  ;;  %22168 = vmatpush3.bf16.msra.mxu1 %v24300_v4  ;;  %v16463_v4 = vld [vmem:[#allocation2 + $0x189] sm:$0xff] }
 0xf8f   : > { %22169 = vmatprep.subr.bf16.mxu1 %v24301_v20 }
 0xf92   : > { %22170 = vmatpush3.bf16.msra.mxu1 %v24301_v20  ;;  %v16465_v20 = vld [vmem:[#allocation2 + $0x1a1] sm:$0xff] }
 0xf93   : > { %22171 = vmatprep.subr.bf16.mxu1 %v24302_v5 }
 0xf95   : > { %22140 = vmatmul.mubr.bf16.gmra.mrb[76].mxu1 %v27332_v46 }
 0xf96   : > { %22143 = vmatprep.mubr.bf16.mxu1 %v27071_v19  ;;  %22172 = vmatpush3.bf16.msra.mxu1 %v24302_v5  ;;  %v24306_v19 = vld [vmem:[%s27545_s1 + $0xcd0] sm:$0xff]  }
 0xf97   : > { %22173 = vmatprep.subr.bf16.mxu1 %v24303_v26  ;;  %v16740_v5 = vld [vmem:[#allocation2 + $0x32] sm:$0xff] }
 0xf98   : > { %v16772_v47 = vpack.c.bf16 %v16741_v12, %v16740_v5 }
 0xf9a   : > { %22174 = vmatpush3.bf16.msra.mxu1 %v24303_v26  ;;  %v16743_v26 = vld [vmem:[#allocation2 + $0x52] sm:$0xff] }
 0xf9b   : > { %22207 = vmatprep.subr.bf16.mxu1 %v24304_v17 }
 0xf9d   : > { %22144 = vmatmul.mubr.bf16.gmra.mrb[80].mxu1 %v15557_v31 }
 0xf9e   : > { %22147 = vmatprep.mubr.bf16.mxu1 %v27085_v22  ;;  %v24308_v22 = vld [vmem:[%s27545_s1 + $0xce0] sm:$0xff]  }
 0xfa5   : > { %22148 = vmatmul.mubr.bf16.gmra.mrb[84].mxu1 %v27082_v56  ;;  %v24307_v56 = vld [vmem:[%s27545_s1 + $0xcd8] sm:$0xff]  }
 0xfa6   : > { %22151 = vmatprep.mubr.bf16.mxu1 %v27099_v34  ;;  %v24310_v34 = vld [vmem:[%s27545_s1 + $0xcf0] sm:$0xff]  }
 0xfad   : > { %22152 = vmatmul.mubr.bf16.gmra.mrb[88].mxu1 %v27096_v30  ;;  %v24309_v30 = vld [vmem:[%s27545_s1 + $0xce8] sm:$0xff]  }
 0xfae   : > { %22155 = vmatprep.mubr.bf16.mxu1 %v27111_v53  ;;  %v24312_v53 = vld [vmem:[%s27545_s1 + $0xd00] sm:$0xff]  }
 0xfb5   : > { %22156 = vmatmul.mubr.bf16.gmra.mrb[92].mxu1 %v27109_v27  ;;  %v24311_v27 = vld [vmem:[%s27545_s1 + $0xcf8] sm:$0xff]  }
 0xfb6   : > { %22175 = vmatprep.mubr.bf16.mxu1 %v27185_v59  ;;  %v15852_v59 = vld [vmem:[#allocation2 + $0x182] sm:$0xff] }
 0xfbd   : > { %22176 = vmatmul.mubr.bf16.vlgmr.msra.gmra.mrb[64].mxu1 %v27190_v25  ;;  %v15853_v25 = vld [vmem:[#allocation2 + $0x18a] sm:$0xff] }
 0xfbe   : > { %22179 = vmatprep.mubr.bf16.mxu1 %v27197_v40  ;;  %22208 = vmatpush3.bf16.msra.mxu1 %v24304_v17  ;;  %v27391_v40 = vpack.c.bf16 %v15853_v25, %v15852_v59  ;;  %v16744_v17 = vld [vmem:[#allocation2 + $0x62] sm:$0xff]  ;;  %v16751_v59 = vld [vmem:[#allocation2 + $0xb2] sm:$0xff] }
 0xfbf   : > { %22209 = vmatprep.subr.bf16.mxu1 %v24305_v33  ;;  %v16752_v25 = vld [vmem:[#allocation2 + $0xc2] sm:$0xff] }
 0xfc2   : > { %22210 = vmatpush3.bf16.msra.mxu1 %v24305_v33 }
 0xfc3   : > { %22211 = vmatprep.subr.bf16.mxu1 %v24306_v19 }
 0xfc5   : > { %22180 = vmatmul.mubr.bf16.gmra.mrb[68].mxu1 %v27202_v18  ;;  %v24313_v18 = vld [vmem:[%s27545_s1 + $0xd08] sm:$0xff]  }
 0xfc6   : > { %22183 = vmatprep.mubr.bf16.mxu1 %v27209_v62  ;;  %22212 = vmatpush3.bf16.msra.mxu1 %v24306_v19  ;;  %v24314_v62 = vld [vmem:[%s27545_s1 + $0xd10] sm:$0xff]   ;;  %v16746_v19 = vld [vmem:[#allocation2 + $0x7a] sm:$0xff] }
 0xfc7   : > { %22213 = vmatprep.subr.bf16.mxu1 %v24307_v56 }
 0xfca   : > { %22214 = vmatpush3.bf16.msra.mxu1 %v24307_v56  ;;  %v16747_v56 = vld [vmem:[#allocation2 + $0x82] sm:$0xff] }
 0xfcb   : > { %22215 = vmatprep.subr.bf16.mxu1 %v24308_v22 }
 0xfcd   : > { %22184 = vmatmul.mubr.bf16.gmra.mrb[72].mxu1 %v27214_v39  ;;  %v16449_v39 = vld [vmem:[#allocation2 + $0xe1] sm:$0xff] }
 0xfce   : > { %22187 = vmatprep.mubr.bf16.mxu1 %v27221_v51  ;;  %22216 = vmatpush3.bf16.msra.mxu1 %v24308_v22  ;;  %v16451_v51 = vld [vmem:[#allocation2 + $0xf9] sm:$0xff] }
 0xfcf   : > { %22217 = vmatprep.subr.bf16.mxu1 %v24309_v30  ;;  %v16748_v22 = vld [vmem:[#allocation2 + $0x92] sm:$0xff] }
 0xfd2   : > { %22218 = vmatpush3.bf16.msra.mxu1 %v24309_v30  ;;  %v16749_v30 = vld [vmem:[#allocation2 + $0x9a] sm:$0xff] }
 0xfd3   : > { %22219 = vmatprep.subr.bf16.mxu1 %v24310_v34 }
 0xfd5   : > { %22188 = vmatmul.mubr.bf16.gmra.mrb[76].mxu1 %v27226_v42  ;;  %v16448_v42 = vld [vmem:[#allocation2 + $0xd9] sm:$0xff] }
 0xfd6   : > { %22191 = vmatprep.mubr.bf16.mxu1 %v27233_v61  ;;  %22220 = vmatpush3.bf16.msra.mxu1 %v24310_v34  ;;  %v16473_v61 = vpack.c.bf16 %v16449_v39, %v16448_v42  ;;  %v16775_v34 = vpack.c.bf16 %v16747_v56, %v16746_v19  ;;  %v16763_v39 = vld [vmem:[#allocation2 + $0x142] sm:$0xff]  ;;  %v16765_v42 = vld [vmem:[#allocation2 + $0x15a] sm:$0xff] }
 0xfd7   : > { %22221 = vmatprep.subr.bf16.mxu1 %v24311_v27 }
 0xfda   : > { %22222 = vmatpush3.bf16.msra.mxu1 %v24311_v27  ;;  %v16776_v27 = vpack.c.bf16 %v16749_v30, %v16748_v22 }
 0xfdb   : > { %22255 = vmatprep.subr.bf16.mxu1 %v24312_v53 }
 0xfdd   : > { %22192 = vmatmul.mubr.bf16.gmra.mrb[80].mxu1 %v27235_v11  ;;  %v24327_v11 = vld [vmem:[%s27545_s1 + $0xd78] sm:$0xff]  }
 0xfde   : > { %22195 = vmatprep.mubr.bf16.mxu1 %v27239_v57  ;;  %v16474_v57 = vpack.c.bf16 %v16451_v51, %v27342_v3  ;;  %v16745_v3 = vld [vmem:[#allocation2 + $0x6a] sm:$0xff]  ;;  %v16764_v51 = vld [vmem:[#allocation2 + $0x152] sm:$0xff] }
 0xfdf   : > { %v16774_v33 = vpack.c.bf16 %v16745_v3, %v16744_v17 }
 0xfe5   : > { %22196 = vmatmul.mubr.bf16.gmra.mrb[84].mxu1 %v27241_v16  ;;  %v16453_v16 = vld [vmem:[#allocation2 + $0x111] sm:$0xff] }
 0xfe6   : > { %22199 = vmatprep.mubr.bf16.mxu1 %v27245_v8  ;;  %v16455_v8 = vld [vmem:[#allocation2 + $0x129] sm:$0xff] }
 0xfed   : > { %22200 = vmatmul.mubr.bf16.gmra.mrb[88].mxu1 %v27247_v15  ;;  %v16452_v15 = vld [vmem:[#allocation2 + $0x109] sm:$0xff] }
 0xfee   : > { %22203 = vmatprep.mubr.bf16.mxu1 %v27251_v35  ;;  %v16475_v35 = vpack.c.bf16 %v16453_v16, %v16452_v15  ;;  %v16767_v16 = vld [vmem:[#allocation2 + $0x172] sm:$0xff]  ;;  %v16770_v15 = vld [vmem:[#allocation2 + $0x19a] sm:$0xff] }
 0xff5   : > { %22204 = vmatmul.mubr.bf16.gmra.mrb[92].mxu1 %v27391_v40 }
 0xff6   : > { %22223 = vmatprep.mubr.bf16.mxu1 %v27120_v48  ;;  %v24315_v48 = vld [vmem:[%s27545_s1 + $0xd18] sm:$0xff]  }
 0xffd   : > { %22224 = vmatmul.mubr.bf16.vlgmr.msra.gmra.mrb[64].mxu1 %v27128_v24  ;;  %v24316_v24 = vld [vmem:[%s27545_s1 + $0xd20] sm:$0xff]  }
 0xffe   : > { %22227 = vmatprep.mubr.bf16.mxu1 %v27133_v21  ;;  %22256 = vmatpush3.bf16.msra.mxu1 %v24312_v53  ;;  %v24317_v21 = vld [vmem:[%s27545_s1 + $0xd28] sm:$0xff]  }
 0xfff   : > { %22257 = vmatprep.subr.bf16.mxu1 %v24313_v18  ;;  %v16750_v53 = vld [vmem:[#allocation2 + $0xaa] sm:$0xff] }
0x1002   : > { %22258 = vmatpush3.bf16.msra.mxu1 %v24313_v18  ;;  %v16753_v18 = vld [vmem:[#allocation2 + $0xca] sm:$0xff] }
0x1003   : > { %22259 = vmatprep.subr.bf16.mxu1 %v24314_v62 }
0x1005   : > { %22228 = vmatmul.mubr.bf16.gmra.mrb[68].mxu1 %v27140_v28  ;;  %v24318_v28 = vld [vmem:[%s27545_s1 + $0xd30] sm:$0xff]  }
0x1006   : > { %22231 = vmatprep.mubr.bf16.mxu1 %v27145_v14  ;;  %22260 = vmatpush3.bf16.msra.mxu1 %v24314_v62  ;;  %v24319_v14 = vld [vmem:[%s27545_s1 + $0xd38] sm:$0xff]   ;;  %v16777_v62 = vpack.c.bf16 %v16751_v59, %v16750_v53 }
0x1007   : > { %22261 = vmatprep.subr.bf16.mxu1 %v24315_v48 }
0x100a   : > { %22262 = vmatpush3.bf16.msra.mxu1 %v24315_v48  ;;  %v16778_v48 = vpack.c.bf16 %v16753_v18, %v16752_v25 }
0x100b   : > { %22263 = vmatprep.subr.bf16.mxu1 %v24316_v24 }
0x100d   : > { %22232 = vmatmul.mubr.bf16.gmra.mrb[72].mxu1 %v27152_v23  ;;  %v24320_v23 = vld [vmem:[%s27545_s1 + $0xd40] sm:$0xff]  }
0x100e   : > { %22235 = vmatprep.mubr.bf16.mxu1 %v27157_v45  ;;  %22264 = vmatpush3.bf16.msra.mxu1 %v24316_v24  ;;  %v24338_v45 = vld [vmem:[#allocation2] sm:$0xff] }
0x100f   : > { %22265 = vmatprep.subr.bf16.mxu1 %v24317_v21  ;;  %v16754_v24 = vld [vmem:[#allocation2 + $0xda] sm:$0xff] }
0x1012   : > { %22266 = vmatpush3.bf16.msra.mxu1 %v24317_v21  ;;  %v16755_v21 = vld [vmem:[#allocation2 + $0xe2] sm:$0xff] }
0x1013   : > { %22267 = vmatprep.subr.bf16.mxu1 %v24318_v28 }
0x1015   : > { %22236 = vmatmul.mubr.bf16.gmra.mrb[76].mxu1 %v27164_v7  ;;  %v16175_v7 = vpack.c.bf16 %v24338_v45, %v24338_v45 }
0x1016   : > { %22239 = vmatprep.mubr.bf16.mxu1 %v27166_v10  ;;  %22268 = vmatpush3.bf16.msra.mxu1 %v24318_v28  ;;  %v24321_v10 = vld [vmem:[%s27545_s1 + $0xd48] sm:$0xff]   ;;  %v16756_v28 = vld [vmem:[#allocation2 + $0xf2] sm:$0xff] }
0x1017   : > { %22269 = vmatprep.subr.bf16.mxu1 %v24319_v14 }
0x101a   : > { %22270 = vmatpush3.bf16.msra.mxu1 %v24319_v14  ;;  %v16757_v14 = vld [vmem:[#allocation2 + $0xfa] sm:$0xff] }
0x101b   : > { %22303 = vmatprep.subr.bf16.mxu1 %v24320_v23  ;;  %v16780_v45 = vpack.c.bf16 %v16757_v14, %v16756_v28 }
0x101d   : > { %22240 = vmatmul.mubr.bf16.gmra.mrb[80].mxu1 %v27170_v54  ;;  %v24322_v54 = vld [vmem:[%s27545_s1 + $0xd50] sm:$0xff]  }
0x101e   : > { %22243 = vmatprep.mubr.bf16.mxu1 %v27172_v58  ;;  %v24323_v58 = vld [vmem:[%s27545_s1 + $0xd58] sm:$0xff]  }
0x1025   : > { %22244 = vmatmul.mubr.bf16.gmra.mrb[84].mxu1 %v27176_v55  ;;  %v24324_v55 = vld [vmem:[%s27545_s1 + $0xd60] sm:$0xff]  }
0x1026   : > { %22247 = vmatprep.mubr.bf16.mxu1 %v27178_v13  ;;  %v24325_v13 = vld [vmem:[%s27545_s1 + $0xd68] sm:$0xff]  }
0x102d   : > { %22248 = vmatmul.mubr.bf16.gmra.mrb[88].mxu1 %v27182_v32  ;;  %v24326_v32 = vld [vmem:[%s27545_s1 + $0xd70] sm:$0xff]  }
0x102e   : > { %22251 = vmatprep.mubr.bf16.mxu1 %v27293_v1  ;;  %v16454_v1 = vld [vmem:[#allocation2 + $0x121] sm:$0xff] }
0x1035   : > { %22252 = vmatmul.mubr.bf16.gmra.mrb[92].mxu1 %v16175_v7  ;;  %v16758_v7 = vld [vmem:[#allocation2 + $0x10a] sm:$0xff] }
0x1036   : > { %22271 = vmatprep.mubr.bf16.mxu1 %v27296_v44  ;;  %v16476_v44 = vpack.c.bf16 %v16455_v8, %v16454_v1 }
0x103d   : > { %22272 = vmatmul.mubr.bf16.vlgmr.msra.gmra.mrb[64].mxu1 %v27301_v43  ;;  %v16457_v43 = vld [vmem:[#allocation2 + $0x141] sm:$0xff] }
0x103e   : > { %22275 = vmatprep.mubr.bf16.mxu1 %v27308_v38  ;;  %22304 = vmatpush3.bf16.msra.mxu1 %v24320_v23  ;;  %v16477_v38 = vpack.c.bf16 %v16457_v43, %v16456_v41  ;;  %v16779_v23 = vpack.c.bf16 %v16755_v21, %v16754_v24 }
0x103f   : > { %22305 = vmatprep.subr.bf16.mxu1 %v24321_v10 }
0x1042   : > { %22306 = vmatpush3.bf16.msra.mxu1 %v24321_v10  ;;  %v16759_v10 = vld [vmem:[#allocation2 + $0x112] sm:$0xff] }
0x1043   : > { %22307 = vmatprep.subr.bf16.mxu1 %v24322_v54 }
0x1045   : > { %22276 = vmatmul.mubr.bf16.gmra.mrb[68].mxu1 %v27313_v52  ;;  %v16461_v52 = vld [vmem:[#allocation2 + $0x171] sm:$0xff] }
0x1046   : > { %22279 = vmatprep.mubr.bf16.mxu1 %v27320_v50  ;;  %22308 = vmatpush3.bf16.msra.mxu1 %v24322_v54  ;;  %v16479_v2 = vpack.c.bf16 %v16461_v52, %v16460_v37  ;;  %v16480_v50 = vpack.c.bf16 %v16463_v4, %v16462_v9  ;;  %v16760_v54 = vld [vmem:[#allocation2 + $0x122] sm:$0xff] }
0x1047   : > { %22309 = vmatprep.subr.bf16.mxu1 %v24323_v58 }
0x104a   : > { %22310 = vmatpush3.bf16.msra.mxu1 %v24323_v58  ;;  %v16761_v58 = vld [vmem:[#allocation2 + $0x12a] sm:$0xff] }
0x104b   : > { %22311 = vmatprep.subr.bf16.mxu1 %v24324_v55 }
0x104d   : > { %22280 = vmatmul.mubr.bf16.gmra.mrb[72].mxu1 %v27325_v29  ;;  %v16481_v29 = vpack.c.bf16 %v16465_v20, %v16464_v49 }
0x104e   : > { %22283 = vmatprep.mubr.bf16.mxu1 %v27332_v46  ;;  %22312 = vmatpush3.bf16.msra.mxu1 %v24324_v55  ;;  %v16742_v46 = vld [vmem:[#allocation2 + $0x4a] sm:$0xff]  ;;  %v16781_v55 = vpack.c.bf16 %v16759_v10, %v16758_v7 }
0x104f   : > { %22313 = vmatprep.subr.bf16.mxu1 %v24325_v13  ;;  %v16773_v31 = vpack.c.bf16 %v16743_v26, %v16742_v46 }
0x1052   : > { %22314 = vmatpush3.bf16.msra.mxu1 %v24325_v13  ;;  %v16782_v13 = vpack.c.bf16 %v16761_v58, %v16760_v54 }
0x1053   : > { %22315 = vmatprep.subr.bf16.mxu1 %v24326_v32 }
0x1055   : > { %22284 = vmatmul.mubr.bf16.gmra.mrb[76].mxu1 %v16473_v61 }
0x1056   : > { %22287 = vmatprep.mubr.bf16.mxu1 %v16474_v57  ;;  %22316 = vmatpush3.bf16.msra.mxu1 %v24326_v32  ;;  %v16762_v32 = vld [vmem:[#allocation2 + $0x13a] sm:$0xff]  ;;  %v16766_v57 = vld [vmem:[#allocation2 + $0x16a] sm:$0xff] }
0x1057   : > { %22317 = vmatprep.subr.bf16.mxu1 %v24327_v11  ;;  %v16783_v61 = vpack.c.bf16 %v16763_v39, %v16762_v32  ;;  %v16785_v8 = vpack.c.bf16 %v16767_v16, %v16766_v57 }
0x105a   : > { %22318 = vmatpush3.bf16.msra.mxu1 %v24327_v11  ;;  %v16784_v11 = vpack.c.bf16 %v16765_v42, %v16764_v51 }
0x105d   : > { %22288 = vmatmul.mubr.bf16.gmra.mrb[80].mxu1 %v16475_v35  ;;  %v16771_v35 = vld [vmem:[#allocation2 + $0x1a2] sm:$0xff] }
0x105e   : > { %22291 = vmatprep.mubr.bf16.mxu1 %v16476_v44  ;;  %v16787_v1 = vpack.c.bf16 %v16771_v35, %v16770_v15  ;;  %v24339_v44 = vld [vmem:[%s27546_s2 + $0x8] sm:$0xff] }
0x105f   : > { %v27468_v43 = vrot.slane %v24339_v44, %v8636_v6 }
0x1065   : > { %22292 = vmatmul.mubr.bf16.gmra.mrb[84].mxu1 %v16477_v38 }
0x1066   : > { %22295 = vmatprep.mubr.bf16.mxu1 %v16478_v36 }
0x106d   : > { %22296 = vmatmul.mubr.bf16.gmra.mrb[88].mxu1 %v16479_v2 }
0x106e   : > { %22299 = vmatprep.mubr.bf16.mxu1 %v16480_v50 }
0x1075   : > { %22300 = vmatmul.mubr.bf16.gmra.mrb[92].mxu1 %v16481_v29 }
0x1076   : > { %22319 = vmatprep.mubr.bf16.mxu1 %v16772_v47 }
0x107d   : > { %22320 = vmatmul.mubr.bf16.vlgmr.msra.gmra.mrb[64].mxu1 %v16773_v31 }
0x107e   : > { %22323 = vmatprep.mubr.bf16.mxu1 %v16774_v33 }
0x1085   : > { %22324 = vmatmul.mubr.bf16.gmra.mrb[68].mxu1 %v16775_v34 }
0x1086   : > { %22327 = vmatprep.mubr.bf16.mxu1 %v16776_v27 }
0x108d   : > { %22328 = vmatmul.mubr.bf16.gmra.mrb[72].mxu1 %v16777_v62 }
0x108e   : > { %22331 = vmatprep.mubr.bf16.mxu1 %v16778_v48 }
0x1095   : > { %22332 = vmatmul.mubr.bf16.gmra.mrb[76].mxu1 %v16779_v23 }
0x1096   : > { %22335 = vmatprep.mubr.bf16.mxu1 %v16780_v45 }
0x109d   : > { %22336 = vmatmul.mubr.bf16.gmra.mrb[80].mxu1 %v16781_v55 }
0x109e   : > { %22339 = vmatprep.mubr.bf16.mxu1 %v16782_v13 }
0x10a5   : > { %22340 = vmatmul.mubr.bf16.gmra.mrb[84].mxu1 %v16783_v61 }
0x10a6   : > { %22343 = vmatprep.mubr.bf16.mxu1 %v16784_v11 }
0x10ad   : > { %22344 = vmatmul.mubr.bf16.gmra.mrb[88].mxu1 %v16785_v8 }
0x10ae   : > { %22347 = vmatprep.mubr.bf16.mxu1 %v27391_v40 }
0x10b5   : > { %22348 = vmatmul.mubr.bf16.gmra.mrb[92].mxu1 %v16787_v1 }
0x1150   : > { %v22321_v40 = vpop.f32.mrb[64].mxu1 }
0x1151   : > { %v17052_v63 = vadd.f32 %v22321_v40, %v27468_v43  ;;  %v16887_v41 = vpop.f32.mrb[65].mxu1 }
0x1152   : > { %v17050_v38 = vadd.f32 %v27468_v43, %v16887_v41  ;;  %v22322_v0 = vpop.f32.mrb[66].mxu1 }
0x1153   : > { %17084 = vst [vmem:[%s27475_s6 + $0x10] sm:$0xff] %v17052_v63  ;;  %v17053_v6 = vadd.f32 %v22322_v0, %v27468_v43  ;;  %v16890_v60 = vpop.f32.mrb[67].mxu1 }
0x1154   : > { %17082 = vst [vmem:[%s27475_s6] sm:$0xff] %v17050_v38  ;;  %v17051_v36 = vadd.f32 %v27468_v43, %v16890_v60 }
0x1155   : > { %17085 = vst [vmem:[%s27475_s6 + $0x18] sm:$0xff] %v17053_v6 }
0x1156   : > { %17083 = vst [vmem:[%s27475_s6 + $0x8] sm:$0xff] %v17051_v36 }
0x1158   : > { %v22325_v52 = vpop.f32.mrb[68].mxu1 }
0x1159   : > { %v17056_v4 = vadd.f32 %v22325_v52, %v27468_v43  ;;  %v16903_v37 = vpop.f32.mrb[69].mxu1 }
0x115a   : > { %v17054_v2 = vadd.f32 %v27468_v43, %v16903_v37  ;;  %v22326_v9 = vpop.f32.mrb[70].mxu1 }
0x115b   : > { %17088 = vst [vmem:[%s27475_s6 + $0x30] sm:$0xff] %v17056_v4  ;;  %v17057_v50 = vadd.f32 %v22326_v9, %v27468_v43  ;;  %v16906_v49 = vpop.f32.mrb[71].mxu1 }
0x115c   : > { %17086 = vst [vmem:[%s27475_s6 + $0x20] sm:$0xff] %v17054_v2  ;;  %v17055_v20 = vadd.f32 %v27468_v43, %v16906_v49 }
0x115d   : > { %17089 = vst [vmem:[%s27475_s6 + $0x38] sm:$0xff] %v17057_v50 }
0x115e   : > { %17087 = vst [vmem:[%s27475_s6 + $0x28] sm:$0xff] %v17055_v20 }
0x1160   : > { %v22329_v29 = vpop.f32.mrb[72].mxu1 }
0x1161   : > { %v17060_v5 = vadd.f32 %v22329_v29, %v27468_v43  ;;  %v16919_v12 = vpop.f32.mrb[73].mxu1 }
0x1162   : > { %v17058_v47 = vadd.f32 %v27468_v43, %v16919_v12  ;;  %v22330_v46 = vpop.f32.mrb[74].mxu1 }
0x1163   : > { %17092 = vst [vmem:[%s27475_s6 + $0x50] sm:$0xff] %v17060_v5  ;;  %v17061_v26 = vadd.f32 %v22330_v46, %v27468_v43  ;;  %v16922_v17 = vpop.f32.mrb[75].mxu1 }
0x1164   : > { %17090 = vst [vmem:[%s27475_s6 + $0x40] sm:$0xff] %v17058_v47  ;;  %v17059_v3 = vadd.f32 %v27468_v43, %v16922_v17 }
0x1165   : > { %17093 = vst [vmem:[%s27475_s6 + $0x58] sm:$0xff] %v17061_v26 }
0x1166   : > { %17091 = vst [vmem:[%s27475_s6 + $0x48] sm:$0xff] %v17059_v3 }
0x1168   : > { %v22333_v31 = vpop.f32.mrb[76].mxu1 }
0x1169   : > { %v17064_v33 = vadd.f32 %v22333_v31, %v27468_v43  ;;  %v16935_v19 = vpop.f32.mrb[77].mxu1 }
0x116a   : > { %v17062_v56 = vadd.f32 %v27468_v43, %v16935_v19  ;;  %v22334_v22 = vpop.f32.mrb[78].mxu1 }
0x116b   : > { %17096 = vst [vmem:[%s27475_s6 + $0x70] sm:$0xff] %v17064_v33  ;;  %v17065_v30 = vadd.f32 %v22334_v22, %v27468_v43  ;;  %v16938_v34 = vpop.f32.mrb[79].mxu1 }
0x116c   : > { %17094 = vst [vmem:[%s27475_s6 + $0x60] sm:$0xff] %v17062_v56  ;;  %v17063_v27 = vadd.f32 %v27468_v43, %v16938_v34 }
0x116d   : > { %17097 = vst [vmem:[%s27475_s6 + $0x78] sm:$0xff] %v17065_v30 }
0x116e   : > { %17095 = vst [vmem:[%s27475_s6 + $0x68] sm:$0xff] %v17063_v27 }
0x1170   : > { %v22337_v53 = vpop.f32.mrb[80].mxu1 }
0x1171   : > { %v17068_v59 = vadd.f32 %v22337_v53, %v27468_v43  ;;  %v16951_v25 = vpop.f32.mrb[81].mxu1 }
0x1172   : > { %v17066_v18 = vadd.f32 %v27468_v43, %v16951_v25  ;;  %v22338_v62 = vpop.f32.mrb[82].mxu1 }
0x1173   : > { %17100 = vst [vmem:[%s27475_s6 + $0x90] sm:$0xff] %v17068_v59  ;;  %v17069_v48 = vadd.f32 %v22338_v62, %v27468_v43  ;;  %v16954_v24 = vpop.f32.mrb[83].mxu1 }
0x1174   : > { %17098 = vst [vmem:[%s27475_s6 + $0x80] sm:$0xff] %v17066_v18  ;;  %v17067_v21 = vadd.f32 %v27468_v43, %v16954_v24 }
0x1175   : > { %17101 = vst [vmem:[%s27475_s6 + $0x98] sm:$0xff] %v17069_v48 }
0x1176   : > { %17099 = vst [vmem:[%s27475_s6 + $0x88] sm:$0xff] %v17067_v21 }
0x1178   : > { %v22341_v28 = vpop.f32.mrb[84].mxu1 }
0x1179   : > { %v17072_v14 = vadd.f32 %v22341_v28, %v27468_v43  ;;  %v16967_v23 = vpop.f32.mrb[85].mxu1 }
0x117a   : > { %v17070_v45 = vadd.f32 %v27468_v43, %v16967_v23  ;;  %v22342_v7 = vpop.f32.mrb[86].mxu1 }
0x117b   : > { %17104 = vst [vmem:[%s27475_s6 + $0xb0] sm:$0xff] %v17072_v14  ;;  %v17073_v10 = vadd.f32 %v22342_v7, %v27468_v43  ;;  %v16970_v54 = vpop.f32.mrb[87].mxu1 }
0x117c   : > { %17102 = vst [vmem:[%s27475_s6 + $0xa0] sm:$0xff] %v17070_v45  ;;  %v17071_v58 = vadd.f32 %v27468_v43, %v16970_v54 }
0x117d   : > { %17105 = vst [vmem:[%s27475_s6 + $0xb8] sm:$0xff] %v17073_v10 }
0x117e   : > { %17103 = vst [vmem:[%s27475_s6 + $0xa8] sm:$0xff] %v17071_v58 }
0x1180   : > { %v22345_v55 = vpop.f32.mrb[88].mxu1 }
0x1181   : > { %v17076_v13 = vadd.f32 %v22345_v55, %v27468_v43  ;;  %v16983_v32 = vpop.f32.mrb[89].mxu1 }
0x1182   : > { %v17074_v39 = vadd.f32 %v27468_v43, %v16983_v32  ;;  %v22346_v51 = vpop.f32.mrb[90].mxu1 }
0x1183   : > { %17108 = vst [vmem:[%s27475_s6 + $0xd0] sm:$0xff] %v17076_v13  ;;  %v17077_v42 = vadd.f32 %v22346_v51, %v27468_v43  ;;  %v16986_v61 = vpop.f32.mrb[91].mxu1 }
0x1184   : > { %17106 = vst [vmem:[%s27475_s6 + $0xc0] sm:$0xff] %v17074_v39  ;;  %v17075_v11 = vadd.f32 %v27468_v43, %v16986_v61 }
0x1185   : > { %17109 = vst [vmem:[%s27475_s6 + $0xd8] sm:$0xff] %v17077_v42 }
0x1186   : > { %17107 = vst [vmem:[%s27475_s6 + $0xc8] sm:$0xff] %v17075_v11 }
0x1188   : > { %v22349_v57 = vpop.f32.mrb[92].mxu1 }
0x1189   : > { %v17080_v16 = vadd.f32 %v22349_v57, %v27468_v43  ;;  %v16999_v8 = vpop.f32.mrb[93].mxu1 }
0x118a   : > { %v17078_v15 = vadd.f32 %v27468_v43, %v16999_v8  ;;  %v22350_v35 = vpop.f32.mrb[94].mxu1 }
0x118b   : > { %17112 = vst [vmem:[%s27475_s6 + $0xf0] sm:$0xff] %v17080_v16  ;;  %v17081_v1 = vadd.f32 %v22350_v35, %v27468_v43  ;;  %v17002_v44 = vpop.f32.mrb[95].mxu1 }
0x118c   : > { %17110 = vst [vmem:[%s27475_s6 + $0xe0] sm:$0xff] %v17078_v15  ;;  %v17079_v40 = vadd.f32 %v27468_v43, %v17002_v44 }
0x118d   : > { %17113 = vst [vmem:[%s27475_s6 + $0xf8] sm:$0xff] %v17081_v1 }
0x118e   : > { %17111 = vst [vmem:[%s27475_s6 + $0xe8] sm:$0xff] %v17079_v40 }
0x118f PF: > { %s13_s12 = sadd.s32 1, %s24346_s12  }
0x1190   : > { %p10_p4 = scmp.ge.s32.totalorder %s13_s12, 4  }
0x1192   :  { %12 = sbr.rel (!%p10_p4) target bundleno = 1 (0x1), region = 118 }

</bundles_post_ra>
